<compile_context>
chip_gen: v5e
topology: v5e:2x2
jax: 0.10.0
libtpu: 0.0.40
codegen_flags: <defaults>
</compile_context>

<pallas_src>
import functools

import jax
import jax.numpy as jnp
from jax import lax
from jax.experimental import pallas as pl
from jax.experimental.pallas import tpu as pltpu


# ------------------------------ small helpers --------------------------------

def _round_up(x, m):
    return ((x + m - 1) // m) * m


def _vmem_capacity_bytes():
    try:
        return int(pltpu.get_tpu_info().vmem_capacity_bytes)
    except Exception:
        return 64 * 1024 * 1024            # v7x per-TensorCore VMEM (most conservative)


def _pick_tn(N, K, Cout, target=512):
    """Position (lane) tile for the matmul kernels: VMEM-aware, >=128, <=target."""
    budget = _vmem_capacity_bytes() // 8   # headroom for double buffering + epilogue
    tn = target
    while tn > 128 and 2 * tn * (2 * K + 8 * Cout + 16) > budget:
        tn //= 2
    return max(128, min(tn, _round_up(N, 128)))


def _pick_attn_tile(N, C, target=512):
    budget = _vmem_capacity_bytes() // 8
    t = target
    while t > 128 and (6 * C * t + 4 * t * t + 8 * (C + 2) * t) > budget:
        t //= 2
    return max(128, min(t, _round_up(N, 128)))


def to_flat(x):
    """(B, C, D, H, W) -> (C, B*D*H*W)  ("flipped" layout: features x positions)."""
    C = x.shape[1]
    return x.transpose(1, 0, 2, 3, 4).reshape(C, -1)


def from_flat(f, shape5d):
    B, C, D, H, W = shape5d
    return f.reshape(C, B, D, H, W).transpose(1, 0, 2, 3, 4)


# ----------------------------- Pallas kernels --------------------------------

def _mm_bn_kernel(w_ref, p_ref, s_ref, b_ref, o_ref, *, relu):
    # (Cout, K) @ (K, TN) -> (Cout, TN) lane-dense, fused BN scale/bias (+ ReLU)
    acc = jnp.dot(w_ref[...], p_ref[...], preferred_element_type=jnp.float32)
    acc = acc * s_ref[...] + b_ref[...]
    if relu:
        acc = jnp.maximum(acc, 0.0)
    o_ref[...] = acc


def _mm_bn_res_kernel(w_ref, p_ref, s_ref, b_ref, r_ref, o_ref, *, relu):
    # same as above + fused residual add (transpose-conv + redir + add + ReLU)
    acc = jnp.dot(w_ref[...], p_ref[...], preferred_element_type=jnp.float32)
    acc = acc * s_ref[...] + b_ref[...] + r_ref[...]
    if relu:
        acc = jnp.maximum(acc, 0.0)
    o_ref[...] = acc


def _mm2_bn_kernel(w1_ref, p_ref, s1_ref, b1_ref, w2_ref, s2_ref, b2_ref, o_ref):
    # fused pair of 1x1x1 conv+BN+ReLU projections on the in-VMEM tile
    t = jnp.dot(w1_ref[...], p_ref[...], preferred_element_type=jnp.float32)
    t = jnp.maximum(t * s1_ref[...] + b1_ref[...], 0.0)
    acc = jnp.dot(w2_ref[...], t.astype(w2_ref.dtype),
                  preferred_element_type=jnp.float32)
    acc = jnp.maximum(acc * s2_ref[...] + b2_ref[...], 0.0)
    o_ref[...] = acc


def _sem_pool_kernel(p_ref, f_ref, o_ref):
    # per-disparity-class softmax over spatial positions + weighted feature pooling
    logits = p_ref[0]                                        # (D, HW)
    logits = logits - jnp.max(logits, axis=-1, keepdims=True)
    e = jnp.exp(logits)
    w = e * pl.reciprocal(jnp.sum(e, axis=-1, keepdims=True), approx=True)
    f = f_ref[0]                                             # (D, HW, C)
    # broadcast multiply + reduce (VPU/XLU) instead of D separate M=1 MXU dots
    o_ref[0] = jnp.sum(w[:, :, None] * f, axis=1)            # (D, C)


def _attn_kernel(q_ref, k_ref, v_ref, o_ref, m_sc, l_sc, acc_sc,
                 *, scale, n_valid, tk):
    # flipped-layout flash attention: q/k/v tiles are (C, T*); online softmax over kv.
    ki = pl.program_id(2)

    @pl.when(ki == 0)
    def _():
        m_sc[...] = jnp.full(m_sc.shape, -1e30, m_sc.dtype)
        l_sc[...] = jnp.zeros(l_sc.shape, l_sc.dtype)
        acc_sc[...] = jnp.zeros(acc_sc.shape, acc_sc.dtype)

    q = q_ref[0]                                             # (C, TQ) bf16
    k = k_ref[0]                                             # (C, TK) bf16
    v = v_ref[0]                                             # (C, TK) bf16
    # sT[j, i] = k_j . q_i  (scores transposed: kv on sublanes, q on lanes)
    sT = lax.dot_general(k, q, (((0,), (0,)), ((), ())),
                         preferred_element_type=jnp.float32) * scale   # (TK, TQ)
    kv_pos = ki * tk + lax.broadcasted_iota(jnp.int32, (tk, 1), 0)
    valid = kv_pos < n_valid
    sT = jnp.where(valid, sT, -1e30)

    m_prev = m_sc[...]                                       # (1, TQ)
    m_new = jnp.maximum(m_prev, jnp.max(sT, axis=0, keepdims=True))
    alpha = jnp.exp(m_prev - m_new)
    p = jnp.exp(sT - m_new)
    p = jnp.where(valid, p, 0.0)
    l_sc[...] = alpha * l_sc[...] + jnp.sum(p, axis=0, keepdims=True)
    acc_sc[...] = alpha * acc_sc[...] + jnp.dot(
        v, p.astype(jnp.bfloat16), preferred_element_type=jnp.float32)  # (C, TQ)
    m_sc[...] = m_new

    @pl.when(ki == pl.num_programs(2) - 1)
    def _():
        o_ref[0] = acc_sc[...] * pl.reciprocal(l_sc[...], approx=True)


# ----------------------------- kernel wrappers --------------------------------

def pallas_matmul_bn(w2d, p, scale, bias, relu, residual=None):
    """w2d: (Cout, K), p: (K, N) -> (Cout, N) with fused BN (+residual) (+ReLU)."""
    Cout, K = w2d.shape
    N = p.shape[1]
    TN = _pick_tn(N, K, Cout)
    Npad = _round_up(N, TN)
    p = jnp.pad(p.astype(jnp.bfloat16), ((0, 0), (0, Npad - N)))
    w = w2d.astype(jnp.bfloat16)
    s = scale.reshape(Cout, 1).astype(jnp.float32)
    b = bias.reshape(Cout, 1).astype(jnp.float32)

    in_specs = [
        pl.BlockSpec((Cout, K), lambda i: (0, 0)),
        pl.BlockSpec((K, TN), lambda i: (0, i)),
        pl.BlockSpec((Cout, 1), lambda i: (0, 0)),
        pl.BlockSpec((Cout, 1), lambda i: (0, 0)),
    ]
    args = [w, p, s, b]
    if residual is None:
        kern = functools.partial(_mm_bn_kernel, relu=relu)
    else:
        r = jnp.pad(residual.astype(jnp.float32), ((0, 0), (0, Npad - N)))
        in_specs.append(pl.BlockSpec((Cout, TN), lambda i: (0, i)))
        args.append(r)
        kern = functools.partial(_mm_bn_res_kernel, relu=relu)

    out = pl.pallas_call(
        kern,
        out_shape=jax.ShapeDtypeStruct((Cout, Npad), jnp.float32),
        grid=(Npad // TN,),
        in_specs=in_specs,
        out_specs=pl.BlockSpec((Cout, TN), lambda i: (0, i)),
        compiler_params=pltpu.CompilerParams(dimension_semantics=("parallel",)),
    )(*args)
    return out[:, :N]


def pallas_proj2(p_flat, prm1, prm2):
    """Fused (1x1x1 conv+BN+ReLU) -> (1x1x1 conv+BN+ReLU) on a flat (Cin, N) slab."""
    C1, Cin = prm1["w"].shape[0], prm1["w"].shape[1]
    C2 = prm2["w"].shape[0]
    N = p_flat.shape[1]
    TN = _pick_tn(N, Cin + C1, max(C1, C2))
    Npad = _round_up(N, TN)
    p = jnp.pad(p_flat.astype(jnp.bfloat16), ((0, 0), (0, Npad - N)))
    w1 = prm1["w"].reshape(C1, Cin).astype(jnp.bfloat16)
    w2 = prm2["w"].reshape(C2, C1).astype(jnp.bfloat16)
    s1 = prm1["scale"].reshape(C1, 1).astype(jnp.float32)
    b1 = prm1["bias"].reshape(C1, 1).astype(jnp.float32)
    s2 = prm2["scale"].reshape(C2, 1).astype(jnp.float32)
    b2 = prm2["bias"].reshape(C2, 1).astype(jnp.float32)
    out = pl.pallas_call(
        _mm2_bn_kernel,
        out_shape=jax.ShapeDtypeStruct((C2, Npad), jnp.float32),
        grid=(Npad // TN,),
        in_specs=[
            pl.BlockSpec((C1, Cin), lambda i: (0, 0)),
            pl.BlockSpec((Cin, TN), lambda i: (0, i)),
            pl.BlockSpec((C1, 1), lambda i: (0, 0)),
            pl.BlockSpec((C1, 1), lambda i: (0, 0)),
            pl.BlockSpec((C2, C1), lambda i: (0, 0)),
            pl.BlockSpec((C2, 1), lambda i: (0, 0)),
            pl.BlockSpec((C2, 1), lambda i: (0, 0)),
        ],
        out_specs=pl.BlockSpec((C2, TN), lambda i: (0, i)),
        compiler_params=pltpu.CompilerParams(dimension_semantics=("parallel",)),
    )(w1, p, s1, b1, w2, s2, b2)
    return out[:, :N]


def pallas_sem_pool(preds_r, feats_r):
    """preds_r: (B, D, HW), feats_r: (B, D, HW, C) -> class features (B, D, C)."""
    B, D, HW = preds_r.shape
    C = feats_r.shape[-1]
    return pl.pallas_call(
        _sem_pool_kernel,
        out_shape=jax.ShapeDtypeStruct((B, D, C), jnp.float32),
        grid=(B,),
        in_specs=[pl.BlockSpec((1, D, HW), lambda b: (b, 0, 0)),
                  pl.BlockSpec((1, D, HW, C), lambda b: (b, 0, 0, 0))],
        out_specs=pl.BlockSpec((1, D, C), lambda b: (b, 0, 0)),
        compiler_params=pltpu.CompilerParams(dimension_semantics=("parallel",)),
    )(preds_r, feats_r)


def pallas_slc_attention(qT, kT, vT):
    """qT/kT/vT: (B, C, N) flipped layout -> out (B, C, N) = (softmax(qK^T/sqrt(C)) V)^T."""
    B, C, N = qT.shape
    scale = float(C) ** -0.5
    T = _pick_attn_tile(N, C)
    Npad = _round_up(N, T)
    pad = ((0, 0), (0, 0), (0, Npad - N))
    q = jnp.pad(qT.astype(jnp.bfloat16), pad)
    k = jnp.pad(kT.astype(jnp.bfloat16), pad)
    v = jnp.pad(vT.astype(jnp.bfloat16), pad)
    nt = Npad // T
    out = pl.pallas_call(
        functools.partial(_attn_kernel, scale=scale, n_valid=N, tk=T),
        out_shape=jax.ShapeDtypeStruct((B, C, Npad), jnp.float32),
        grid=(B, nt, nt),
        in_specs=[pl.BlockSpec((1, C, T), lambda b, qi, ki: (b, 0, qi)),
                  pl.BlockSpec((1, C, T), lambda b, qi, ki: (b, 0, ki)),
                  pl.BlockSpec((1, C, T), lambda b, qi, ki: (b, 0, ki))],
        out_specs=pl.BlockSpec((1, C, T), lambda b, qi, ki: (b, 0, qi)),
        scratch_shapes=[pltpu.VMEM((1, T), jnp.float32),     # running max
                        pltpu.VMEM((1, T), jnp.float32),     # running denom
                        pltpu.VMEM((C, T), jnp.float32)],    # output accumulator
        compiler_params=pltpu.CompilerParams(
            dimension_semantics=("parallel", "parallel", "arbitrary")),
    )(q, k, v)
    return out[:, :, :N]


# ----------------------------- conv glue (im2col) ----------------------------
# TODO(synk): fusing the 27-tap gather into the matmul grid (no HBM patch tensor)
# would cut patch traffic ~27x further; kept as XLA glue (in bf16) for robustness.

def extract_patches_kn(x, k, stride, pad):
    """NCDHW -> im2col patches (Cin*k^3, B*Do*Ho*Wo) in bf16 (flipped, lane-dense RHS)."""
    B, C, D, H, W = x.shape
    x = x.astype(jnp.bfloat16)
    if pad:
        x = jnp.pad(x, ((0, 0), (0, 0), (pad, pad), (pad, pad), (pad, pad)))
    Do = (D + 2 * pad - k) // stride + 1
    Ho = (H + 2 * pad - k) // stride + 1
    Wo = (W + 2 * pad - k) // stride + 1
    if k == 1:
        xs = x[:, :, ::stride, ::stride, ::stride]
        p = xs.transpose(1, 0, 2, 3, 4).reshape(C, B * Do * Ho * Wo)
        return p, (B, Do, Ho, Wo)
    pieces = []
    for kd in range(k):
        for kh in range(k):
            for kw in range(k):
                pieces.append(x[:, :,
                                kd:kd + stride * Do:stride,
                                kh:kh + stride * Ho:stride,
                                kw:kw + stride * Wo:stride])
    p = jnp.stack(pieces, axis=2)                        # (B, C, k^3, Do, Ho, Wo)
    p = p.transpose(1, 2, 0, 3, 4, 5).reshape(C * k ** 3, B * Do * Ho * Wo)
    return p, (B, Do, Ho, Wo)


def conv3d_bn(x, w, scale, bias, stride, pad, relu, residual_flat=None):
    """3-D conv (PyTorch weight layout (Cout,Cin,k,k,k)) + folded BN + ReLU/residual."""
    Cout, k = w.shape[0], w.shape[2]
    patches, (B, Do, Ho, Wo) = extract_patches_kn(x, k, stride, pad)
    y = pallas_matmul_bn(w.reshape(Cout, -1), patches, scale, bias, relu,
                         residual=residual_flat)          # (Cout, B*Do*Ho*Wo)
    return from_flat(y, (B, Cout, Do, Ho, Wo))


def avgpool3d_k3s2p1(x):
    # nn.AvgPool3d((3,3,3), stride=2, padding=1), count_include_pad=True -> /27 always.
    # Shifted-slice VPU adds (no dense matmul / im2col materialization).
    B, C, D, H, W = x.shape
    xp = jnp.pad(x, ((0, 0), (0, 0), (1, 1), (1, 1), (1, 1)))
    Do = (D + 2 - 3) // 2 + 1
    Ho = (H + 2 - 3) // 2 + 1
    Wo = (W + 2 - 3) // 2 + 1
    acc = jnp.zeros((B, C, Do, Ho, Wo), jnp.float32)
    for kd in range(3):
        for kh in range(3):
            for kw in range(3):
                acc = acc + xp[:, :,
                               kd:kd + 2 * Do:2,
                               kh:kh + 2 * Ho:2,
                               kw:kw + 2 * Wo:2]
    return acc / 27.0


def conv_transpose3d_bn(x, wt, scale, bias, stride, pad, outpad, relu,
                        residual_flat=None):
    # ConvTranspose3d as stride-1 conv over the zero-dilated, padded input.
    # TODO(synk): sub-pixel (stride-parity) decomposition would avoid ~8x zero work.
    B, Cin, D, H, W = x.shape
    k = wt.shape[2]
    xd = jnp.zeros((B, Cin, (D - 1) * stride + 1, (H - 1) * stride + 1,
                    (W - 1) * stride + 1), x.dtype)
    xd = xd.at[:, :, ::stride, ::stride, ::stride].set(x)
    lo = k - 1 - pad
    hi = k - 1 - pad + outpad
    xd = jnp.pad(xd, ((0, 0), (0, 0), (lo, hi), (lo, hi), (lo, hi)))
    w = jnp.flip(wt, axis=(2, 3, 4)).transpose(1, 0, 2, 3, 4)   # -> (Cout,Cin,k,k,k)
    return conv3d_bn(xd, w, scale, bias, stride=1, pad=0, relu=relu,
                     residual_flat=residual_flat)


def upsample_trilinear_x2(x):
    # F.interpolate(scale_factor=(2,2,2), mode='trilinear', align_corners=False):
    # separable -> three 1-D lerps (XLA glue).
    def lerp_axis(t, axis):
        n = t.shape[axis]
        o = jnp.arange(2 * n, dtype=jnp.float32)
        src = jnp.maximum((o + 0.5) / 2.0 - 0.5, 0.0)
        i0 = jnp.clip(jnp.floor(src).astype(jnp.int32), 0, n - 1)
        i1 = jnp.clip(i0 + 1, 0, n - 1)
        lam = src - i0.astype(jnp.float32)
        t0 = jnp.take(t, i0, axis=axis)
        t1 = jnp.take(t, i1, axis=axis)
        shape = [1] * t.ndim
        shape[axis] = 2 * n
        lam = lam.reshape(shape)
        return t0 * (1.0 - lam) + t1 * lam

    for ax in (2, 3, 4):
        x = lerp_axis(x, ax)
    return x


# ------------------------------ model blocks ---------------------------------

def slc_net(x, preds, p):
    # TODO(synk): the original SemanticLevelContext source was not provided; this is a
    # documented 3-D adaptation of ISNet's SLC (same math as the validated previous
    # kernel): per-disparity-class soft pooling, q/k/v 1x1x1 projections, scaled-dot
    # attention, out-projection, concat-input bottleneck.
    B, C, D, H, W = x.shape
    HW = H * W
    N = D * HW

    preds_r = preds.reshape(B, D, HW)
    feats_r = x.transpose(0, 2, 3, 4, 1).reshape(B, D, HW, C)
    cls_feat = pallas_sem_pool(preds_r, feats_r)                     # (B, D, C)

    # class features broadcast over their disparity slice, kept in flat (C, B*N) layout
    feats_sl_flat = jnp.broadcast_to(
        cls_feat.transpose(2, 0, 1)[:, :, :, None], (C, B, D, HW)).reshape(C, B * N)
    x_flat = to_flat(x)

    q_flat = pallas_proj2(x_flat, p["q1"], p["q2"])                  # (C, B*N)
    k_flat = pallas_proj2(feats_sl_flat, p["k1"], p["k2"])
    v_flat = pallas_matmul_bn(p["v"]["w"].reshape(C, C), feats_sl_flat,
                              p["v"]["scale"], p["v"]["bias"], relu=True)

    def to_bcn(f):
        return f.reshape(C, B, N).transpose(1, 0, 2)                 # (B, C, N)

    ctx = pallas_slc_attention(to_bcn(q_flat), to_bcn(k_flat), to_bcn(v_flat))
    ctx_flat = ctx.transpose(1, 0, 2).reshape(C, B * N)
    ctx_flat = pallas_matmul_bn(p["out"]["w"].reshape(C, C), ctx_flat,
                                p["out"]["scale"], p["out"]["bias"], relu=True)
    ctx5 = from_flat(ctx_flat, (B, C, D, H, W))

    cat = jnp.concatenate([ctx5, x], axis=1)
    bn = p["bottleneck"]
    return conv3d_bn(cat, bn["w"], bn["scale"], bn["bias"], 1, 1, True)


def multi_aggregation(x5d, x_flat, p):
    c1 = conv3d_bn(x5d, p["conv1"]["w"], p["conv1"]["scale"], p["conv1"]["bias"],
                   2, 1, True)
    c2 = conv3d_bn(c1, p["conv2"]["w"], p["conv2"]["scale"], p["conv2"]["bias"],
                   1, 1, True)
    Cr = p["redir"]["w"].shape[0]
    rd_flat = pallas_matmul_bn(p["redir"]["w"].reshape(Cr, -1), x_flat,
                               p["redir"]["scale"], p["redir"]["bias"], relu=False)
    # redir + add + ReLU fused into the transpose-conv matmul epilogue
    return conv_transpose3d_bn(c2, p["conv3"]["w"], p["conv3"]["scale"],
                               p["conv3"]["bias"], stride=2, pad=1, outpad=1,
                               relu=True, residual_flat=rd_flat)


def cva_forward(cost_volume, params, downsample=True):
    x = cost_volume
    B = x.shape[0]
    if downsample:
        feats = avgpool3d_k3s2p1(x)
        feats = conv3d_bn(feats, params["ds"]["w"], params["ds"]["scale"],
                          params["ds"]["bias"], 1, 1, True)
    else:
        feats = x
    c = conv3d_bn(feats, params["cls1"]["w"], params["cls1"]["scale"],
                  params["cls1"]["bias"], 1, 1, True)
    prob5 = conv3d_bn(c, params["cls2"]["w"], params["cls2"]["scale"],
                      params["cls2"]["bias"], 1, 1, False)
    prob = prob5[:, 0]                                   # .squeeze(1)

    aug = slc_net(feats, prob, params["slc"])
    if downsample:
        aug = upsample_trilinear_x2(aug)

    cat = jnp.concatenate([aug, x], axis=1)
    _, _, D, H, W = cat.shape
    cat_flat = to_flat(cat)
    Cf = params["fuse"]["w"].shape[0]
    fused_flat = pallas_matmul_bn(params["fuse"]["w"].reshape(Cf, -1), cat_flat,
                                  params["fuse"]["scale"], params["fuse"]["bias"],
                                  relu=False)
    fused_5d = from_flat(fused_flat, (B, Cf, D, H, W))

    aug_out = multi_aggregation(fused_5d, fused_flat, params["agg"])
    return prob[:, None], aug_out          # (prob_volume.unsqueeze(1), augmented_cost)


# --------------------------- deterministic params ----------------------------

def _bn_fold(keys, cout):
    gamma = 1.0 + 0.1 * jax.random.normal(keys[0], (cout,), dtype=jnp.float32)
    beta = 0.1 * jax.random.normal(keys[1], (cout,), dtype=jnp.float32)
    mean = 0.1 * jax.random.normal(keys[2], (cout,), dtype=jnp.float32)
    var = 0.5 + jax.random.uniform(keys[3], (cout,), dtype=jnp.float32)
    scale = gamma / jnp.sqrt(var + 1e-5)
    return scale, beta - mean * scale


def init_convbn(key, cin, cout, k, with_bn=True):
    ks = jax.random.split(key, 5)
    w = 0.05 * jax.random.normal(ks[0], (cout, cin, k, k, k), jnp.float32)
    if not with_bn:
        return {"w": w, "scale": jnp.ones((cout,), jnp.float32),
                "bias": jnp.zeros((cout,), jnp.float32)}
    scale, bias = _bn_fold(ks[1:], cout)
    return {"w": w, "scale": scale, "bias": bias}


def init_convtbn(key, cin, cout, k):
    ks = jax.random.split(key, 5)
    w = 0.05 * jax.random.normal(ks[0], (cin, cout, k, k, k), jnp.float32)  # ConvT layout
    scale, bias = _bn_fold(ks[1:], cout)
    return {"w": w, "scale": scale, "bias": bias}


def init_params(key, channel=32):
    keys = iter(jax.random.split(key, 32))
    C = channel
    return {
        "ds": init_convbn(next(keys), C, C, 3),
        "cls1": init_convbn(next(keys), C, C, 3),
        "cls2": init_convbn(next(keys), C, 1, 3, with_bn=False),
        "slc": {
            "q1": init_convbn(next(keys), C, C, 1),
            "q2": init_convbn(next(keys), C, C, 1),
            "k1": init_convbn(next(keys), C, C, 1),
            "k2": init_convbn(next(keys), C, C, 1),
            "v": init_convbn(next(keys), C, C, 1),
            "out": init_convbn(next(keys), C, C, 1),
            "bottleneck": init_convbn(next(keys), 2 * C, C, 3),
        },
        "fuse": init_convbn(next(keys), 2 * C, C, 1),
        "agg": {
            "conv1": init_convbn(next(keys), C, 2 * C, 3),
            "conv2": init_convbn(next(keys), 2 * C, 2 * C, 3),
            "conv3": init_convtbn(next(keys), 2 * C, C, 3),
            "redir": init_convbn(next(keys), C, C, 1),
        },
    }


# ------------------------------------ main ------------------------------------

if __name__ == "__main__":
    key = jax.random.PRNGKey(0)
    kx, kp = jax.random.split(key)
    # cost_volume: (B, C=32, D, H, W); channel is fixed at 32 by the module's
    # hard-coded downsample/fuse layers.
    cost_volume = jax.random.normal(kx, (1, 32, 8, 8, 8), jnp.float32)
    params = init_params(kp, channel=32)

    fwd = jax.jit(functools.partial(cva_forward, downsample=True))
    prob_volume, augmented_cost = fwd(cost_volume, params)
    jax.block_until_ready((prob_volume, augmented_cost))

    assert prob_volume.shape == (1, 1, 4, 4, 4), prob_volume.shape
    assert augmented_cost.shape == (1, 32, 8, 8, 8), augmented_cost.shape
    assert bool(jnp.isfinite(prob_volume).all())
    assert bool(jnp.isfinite(augmented_cost).all())
    print("KERNEL_OK")
</pallas_src>

<mosaic_0001>
module attributes {stable_mosaic.version = 11 : i64} {
  func.func @_mm_bn_kernel(%arg0: i32, %arg1: memref<32x864xbf16, #tpu.memory_space<vmem>>, %arg2: memref<864x128xbf16, #tpu.memory_space<vmem>>, %arg3: memref<32x1xf32, #tpu.memory_space<vmem>>, %arg4: memref<32x1xf32, #tpu.memory_space<vmem>>, %arg5: memref<32x128xf32, #tpu.memory_space<vmem>>) attributes {dimension_semantics = [#tpu.dimension_semantics<parallel>], iteration_bounds = array<i64: 1>, scalar_prefetch = 0 : i64, scratch_operands = 0 : i64, tpu.core_type = #tpu.core_type<tc>, window_params = [{pipeline_mode = #tpu.pipeline_mode<synchronous>, transform_indices = @transform_0, window_bounds = array<i64: 32, 864>}, {transform_indices = @transform_1, window_bounds = array<i64: 864, 128>}, {pipeline_mode = #tpu.pipeline_mode<synchronous>, transform_indices = @transform_2, window_bounds = array<i64: 32, 1>}, {pipeline_mode = #tpu.pipeline_mode<synchronous>, transform_indices = @transform_3, window_bounds = array<i64: 32, 1>}, {transform_indices = @transform_4, window_bounds = array<i64: 32, 128>}]} {
    %c0 = arith.constant 0 : index
    %c0_0 = arith.constant 0 : index
    %0 = vector.load %arg1[%c0, %c0_0] : memref<32x864xbf16, #tpu.memory_space<vmem>>, vector<32x864xbf16>
    %c0_1 = arith.constant 0 : index
    %c0_2 = arith.constant 0 : index
    %1 = vector.load %arg2[%c0_1, %c0_2] : memref<864x128xbf16, #tpu.memory_space<vmem>>, vector<864x128xbf16>
    %cst = arith.constant dense<0.000000e+00> : vector<32x128xf32>
    %2 = tpu.matmul %0, %1, %cst {dimension_numbers = #tpu.dot_dimension_numbers<[1], [0], [0], [1], [0, 0, 1, 1], [], []>} : vector<32x864xbf16>, vector<864x128xbf16>, vector<32x128xf32> -> vector<32x128xf32>
    %c0_3 = arith.constant 0 : index
    %c0_4 = arith.constant 0 : index
    %3 = vector.load %arg3[%c0_3, %c0_4] : memref<32x1xf32, #tpu.memory_space<vmem>>, vector<32x1xf32>
    %4 = vector.broadcast %3 : vector<32x1xf32> to vector<32x128xf32>
    %5 = arith.mulf %2, %4 : vector<32x128xf32>
    %c0_5 = arith.constant 0 : index
    %c0_6 = arith.constant 0 : index
    %6 = vector.load %arg4[%c0_5, %c0_6] : memref<32x1xf32, #tpu.memory_space<vmem>>, vector<32x1xf32>
    %7 = vector.broadcast %6 : vector<32x1xf32> to vector<32x128xf32>
    %8 = arith.addf %5, %7 : vector<32x128xf32>
    %cst_7 = arith.constant 0.000000e+00 : f32
    %9 = vector.broadcast %cst_7 : f32 to vector<32x128xf32>
    %10 = arith.maximumf %8, %9 : vector<32x128xf32>
    %c0_8 = arith.constant 0 : index
    %c0_9 = arith.constant 0 : index
    %11 = vector.load %arg5[%c0_8, %c0_9] : memref<32x128xf32, #tpu.memory_space<vmem>>, vector<32x128xf32>
    tpu.vector_store %arg5[%c0_8, %c0_9], %10 {strides = array<i32>} : memref<32x128xf32, #tpu.memory_space<vmem>>, vector<32x128xf32>,
    return
  }
  func.func @transform_0(%arg0: i32) -> (i32, i32) {
    %c0_i32 = arith.constant 0 : i32
    %c0_i32_0 = arith.constant 0 : i32
    %c0_i32_1 = arith.constant 0 : i32
    return %c0_i32, %c0_i32_0 : i32, i32
  }
  func.func @transform_1(%arg0: i32) -> (i32, i32) {
    %c0_i32 = arith.constant 0 : i32
    %c0_i32_0 = arith.constant 0 : i32
    return %c0_i32, %arg0 : i32, i32
  }
  func.func @transform_2(%arg0: i32) -> (i32, i32) {
    %c0_i32 = arith.constant 0 : i32
    %c0_i32_0 = arith.constant 0 : i32
    %c0_i32_1 = arith.constant 0 : i32
    return %c0_i32, %c0_i32_0 : i32, i32
  }
  func.func @transform_3(%arg0: i32) -> (i32, i32) {
    %c0_i32 = arith.constant 0 : i32
    %c0_i32_0 = arith.constant 0 : i32
    %c0_i32_1 = arith.constant 0 : i32
    return %c0_i32, %c0_i32_0 : i32, i32
  }
  func.func @transform_4(%arg0: i32) -> (i32, i32) {
    %c0_i32 = arith.constant 0 : i32
    %c0_i32_0 = arith.constant 0 : i32
    return %c0_i32, %arg0 : i32, i32
  }
}

module attributes {stable_mosaic.version = 11 : i64} {
  func.func @_mm_bn_kernel(%arg0: i32, %arg1: memref<1x864xbf16, #tpu.memory_space<vmem>>, %arg2: memref<864x128xbf16, #tpu.memory_space<vmem>>, %arg3: memref<1x1xf32, #tpu.memory_space<vmem>>, %arg4: memref<1x1xf32, #tpu.memory_space<vmem>>, %arg5: memref<1x128xf32, #tpu.memory_space<vmem>>) attributes {dimension_semantics = [#tpu.dimension_semantics<parallel>], iteration_bounds = array<i64: 1>, scalar_prefetch = 0 : i64, scratch_operands = 0 : i64, tpu.core_type = #tpu.core_type<tc>, window_params = [{pipeline_mode = #tpu.pipeline_mode<synchronous>, transform_indices = @transform_0, window_bounds = array<i64: 1, 864>}, {transform_indices = @transform_1, window_bounds = array<i64: 864, 128>}, {pipeline_mode = #tpu.pipeline_mode<synchronous>, transform_indices = @transform_2, window_bounds = array<i64: 1, 1>}, {pipeline_mode = #tpu.pipeline_mode<synchronous>, transform_indices = @transform_3, window_bounds = array<i64: 1, 1>}, {transform_indices = @transform_4, window_bounds = array<i64: 1, 128>}]} {
    %c0 = arith.constant 0 : index
    %c0_0 = arith.constant 0 : index
    %0 = vector.load %arg1[%c0, %c0_0] : memref<1x864xbf16, #tpu.memory_space<vmem>>, vector<1x864xbf16>
    %c0_1 = arith.constant 0 : index
    %c0_2 = arith.constant 0 : index
    %1 = vector.load %arg2[%c0_1, %c0_2] : memref<864x128xbf16, #tpu.memory_space<vmem>>, vector<864x128xbf16>
    %cst = arith.constant dense<0.000000e+00> : vector<1x128xf32>
    %2 = tpu.matmul %0, %1, %cst {dimension_numbers = #tpu.dot_dimension_numbers<[1], [0], [0], [1], [0, 0, 1, 1], [], []>} : vector<1x864xbf16>, vector<864x128xbf16>, vector<1x128xf32> -> vector<1x128xf32>
    %c0_3 = arith.constant 0 : index
    %c0_4 = arith.constant 0 : index
    %3 = vector.load %arg3[%c0_3, %c0_4] : memref<1x1xf32, #tpu.memory_space<vmem>>, vector<1x1xf32>
    %4 = vector.broadcast %3 : vector<1x1xf32> to vector<1x128xf32>
    %5 = arith.mulf %2, %4 : vector<1x128xf32>
    %c0_5 = arith.constant 0 : index
    %c0_6 = arith.constant 0 : index
    %6 = vector.load %arg4[%c0_5, %c0_6] : memref<1x1xf32, #tpu.memory_space<vmem>>, vector<1x1xf32>
    %7 = vector.broadcast %6 : vector<1x1xf32> to vector<1x128xf32>
    %8 = arith.addf %5, %7 : vector<1x128xf32>
    %c0_7 = arith.constant 0 : index
    %c0_8 = arith.constant 0 : index
    %9 = vector.load %arg5[%c0_7, %c0_8] : memref<1x128xf32, #tpu.memory_space<vmem>>, vector<1x128xf32>
    tpu.vector_store %arg5[%c0_7, %c0_8], %8 {strides = array<i32>} : memref<1x128xf32, #tpu.memory_space<vmem>>, vector<1x128xf32>,
    return
  }
  func.func @transform_0(%arg0: i32) -> (i32, i32) {
    %c0_i32 = arith.constant 0 : i32
    %c0_i32_0 = arith.constant 0 : i32
    %c0_i32_1 = arith.constant 0 : i32
    return %c0_i32, %c0_i32_0 : i32, i32
  }
  func.func @transform_1(%arg0: i32) -> (i32, i32) {
    %c0_i32 = arith.constant 0 : i32
    %c0_i32_0 = arith.constant 0 : i32
    return %c0_i32, %arg0 : i32, i32
  }
  func.func @transform_2(%arg0: i32) -> (i32, i32) {
    %c0_i32 = arith.constant 0 : i32
    %c0_i32_0 = arith.constant 0 : i32
    %c0_i32_1 = arith.constant 0 : i32
    return %c0_i32, %c0_i32_0 : i32, i32
  }
  func.func @transform_3(%arg0: i32) -> (i32, i32) {
    %c0_i32 = arith.constant 0 : i32
    %c0_i32_0 = arith.constant 0 : i32
    %c0_i32_1 = arith.constant 0 : i32
    return %c0_i32, %c0_i32_0 : i32, i32
  }
  func.func @transform_4(%arg0: i32) -> (i32, i32) {
    %c0_i32 = arith.constant 0 : i32
    %c0_i32_0 = arith.constant 0 : i32
    return %c0_i32, %arg0 : i32, i32
  }
}

module attributes {stable_mosaic.version = 11 : i64} {
  func.func @_sem_pool_kernel(%arg0: i32, %arg1: memref<1x4x16xf32, #tpu.memory_space<vmem>>, %arg2: memref<1x4x16x32xf32, #tpu.memory_space<vmem>>, %arg3: memref<1x4x32xf32, #tpu.memory_space<vmem>>) attributes {dimension_semantics = [#tpu.dimension_semantics<parallel>], iteration_bounds = array<i64: 1>, scalar_prefetch = 0 : i64, scratch_operands = 0 : i64, tpu.core_type = #tpu.core_type<tc>, window_params = [{transform_indices = @transform_0, window_bounds = array<i64: 1, 4, 16>}, {transform_indices = @transform_1, window_bounds = array<i64: 1, 4, 16, 32>}, {transform_indices = @transform_2, window_bounds = array<i64: 1, 4, 32>}]} {
    %c0 = arith.constant 0 : index
    %c0_0 = arith.constant 0 : index
    %c0_1 = arith.constant 0 : index
    %0 = vector.load %arg1[%c0, %c0_0, %c0_1] : memref<1x4x16xf32, #tpu.memory_space<vmem>>, vector<1x4x16xf32>
    %1 = vector.shape_cast %0 : vector<1x4x16xf32> to vector<4x16xf32>
    %cst = arith.constant dense<0xFF800000> : vector<4xf32>
    %2 = vector.multi_reduction <maximumf>, %1, %cst [1] : vector<4x16xf32> to vector<4xf32>
    %3 = vector.shape_cast %2 : vector<4xf32> to vector<4x1xf32>
    %4 = vector.broadcast %3 : vector<4x1xf32> to vector<4x16xf32>
    %5 = arith.subf %1, %4 : vector<4x16xf32>
    %6 = math.exp %5 : vector<4x16xf32>
    %cst_2 = arith.constant dense<0.000000e+00> : vector<4xf32>
    %7 = vector.multi_reduction <add>, %6, %cst_2 [1] : vector<4x16xf32> to vector<4xf32>
    %8 = vector.shape_cast %7 : vector<4xf32> to vector<4x1xf32>
    %9 = tpu.reciprocal %8 {approx = true} : vector<4x1xf32> -> vector<4x1xf32>
    %10 = vector.broadcast %9 : vector<4x1xf32> to vector<4x16xf32>
    %11 = arith.mulf %6, %10 : vector<4x16xf32>
    %c0_3 = arith.constant 0 : index
    %c0_4 = arith.constant 0 : index
    %c0_5 = arith.constant 0 : index
    %c0_6 = arith.constant 0 : index
    %12 = vector.load %arg2[%c0_3, %c0_4, %c0_5, %c0_6] : memref<1x4x16x32xf32, #tpu.memory_space<vmem>>, vector<1x4x16x32xf32>
    %13 = vector.shape_cast %12 : vector<1x4x16x32xf32> to vector<4x16x32xf32>
    %14 = vector.shape_cast %11 : vector<4x16xf32> to vector<4x16x1xf32>
    %15 = vector.broadcast %14 : vector<4x16x1xf32> to vector<4x16x32xf32>
    %16 = arith.mulf %15, %13 : vector<4x16x32xf32>
    %cst_7 = arith.constant dense<0.000000e+00> : vector<4x32xf32>
    %17 = vector.multi_reduction <add>, %16, %cst_7 [1] : vector<4x16x32xf32> to vector<4x32xf32>
    %c0_8 = arith.constant 0 : index
    %c0_9 = arith.constant 0 : index
    %c0_10 = arith.constant 0 : index
    %18 = vector.load %arg3[%c0_8, %c0_9, %c0_10] : memref<1x4x32xf32, #tpu.memory_space<vmem>>, vector<1x4x32xf32>
    %19 = vector.shape_cast %18 : vector<1x4x32xf32> to vector<4x32xf32>
    %20 = vector.shape_cast %17 : vector<4x32xf32> to vector<1x4x32xf32>
    tpu.vector_store %arg3[%c0_8, %c0_9, %c0_10], %20 {strides = array<i32>} : memref<1x4x32xf32, #tpu.memory_space<vmem>>, vector<1x4x32xf32>,
    return
  }
  func.func @transform_0(%arg0: i32) -> (i32, i32, i32) {
    %c0_i32 = arith.constant 0 : i32
    %c0_i32_0 = arith.constant 0 : i32
    %c0_i32_1 = arith.constant 0 : i32
    return %arg0, %c0_i32, %c0_i32_0 : i32, i32, i32
  }
  func.func @transform_1(%arg0: i32) -> (i32, i32, i32, i32) {
    %c0_i32 = arith.constant 0 : i32
    %c0_i32_0 = arith.constant 0 : i32
    %c0_i32_1 = arith.constant 0 : i32
    %c0_i32_2 = arith.constant 0 : i32
    return %arg0, %c0_i32, %c0_i32_0, %c0_i32_1 : i32, i32, i32, i32
  }
  func.func @transform_2(%arg0: i32) -> (i32, i32, i32) {
    %c0_i32 = arith.constant 0 : i32
    %c0_i32_0 = arith.constant 0 : i32
    %c0_i32_1 = arith.constant 0 : i32
    return %arg0, %c0_i32, %c0_i32_0 : i32, i32, i32
  }
}

module attributes {stable_mosaic.version = 11 : i64} {
  func.func @_mm2_bn_kernel(%arg0: i32, %arg1: memref<32x32xbf16, #tpu.memory_space<vmem>>, %arg2: memref<32x128xbf16, #tpu.memory_space<vmem>>, %arg3: memref<32x1xf32, #tpu.memory_space<vmem>>, %arg4: memref<32x1xf32, #tpu.memory_space<vmem>>, %arg5: memref<32x32xbf16, #tpu.memory_space<vmem>>, %arg6: memref<32x1xf32, #tpu.memory_space<vmem>>, %arg7: memref<32x1xf32, #tpu.memory_space<vmem>>, %arg8: memref<32x128xf32, #tpu.memory_space<vmem>>) attributes {dimension_semantics = [#tpu.dimension_semantics<parallel>], iteration_bounds = array<i64: 1>, scalar_prefetch = 0 : i64, scratch_operands = 0 : i64, tpu.core_type = #tpu.core_type<tc>, window_params = [{pipeline_mode = #tpu.pipeline_mode<synchronous>, transform_indices = @transform_0, window_bounds = array<i64: 32, 32>}, {transform_indices = @transform_1, window_bounds = array<i64: 32, 128>}, {pipeline_mode = #tpu.pipeline_mode<synchronous>, transform_indices = @transform_2, window_bounds = array<i64: 32, 1>}, {pipeline_mode = #tpu.pipeline_mode<synchronous>, transform_indices = @transform_3, window_bounds = array<i64: 32, 1>}, {pipeline_mode = #tpu.pipeline_mode<synchronous>, transform_indices = @transform_4, window_bounds = array<i64: 32, 32>}, {pipeline_mode = #tpu.pipeline_mode<synchronous>, transform_indices = @transform_5, window_bounds = array<i64: 32, 1>}, {pipeline_mode = #tpu.pipeline_mode<synchronous>, transform_indices = @transform_6, window_bounds = array<i64: 32, 1>}, {transform_indices = @transform_7, window_bounds = array<i64: 32, 128>}]} {
    %c0 = arith.constant 0 : index
    %c0_0 = arith.constant 0 : index
    %0 = vector.load %arg1[%c0, %c0_0] : memref<32x32xbf16, #tpu.memory_space<vmem>>, vector<32x32xbf16>
    %c0_1 = arith.constant 0 : index
    %c0_2 = arith.constant 0 : index
    %1 = vector.load %arg2[%c0_1, %c0_2] : memref<32x128xbf16, #tpu.memory_space<vmem>>, vector<32x128xbf16>
    %cst = arith.constant dense<0.000000e+00> : vector<32x128xf32>
    %2 = tpu.matmul %0, %1, %cst {dimension_numbers = #tpu.dot_dimension_numbers<[1], [0], [0], [1], [0, 0, 1, 1], [], []>} : vector<32x32xbf16>, vector<32x128xbf16>, vector<32x128xf32> -> vector<32x128xf32>
    %c0_3 = arith.constant 0 : index
    %c0_4 = arith.constant 0 : index
    %3 = vector.load %arg3[%c0_3, %c0_4] : memref<32x1xf32, #tpu.memory_space<vmem>>, vector<32x1xf32>
    %4 = vector.broadcast %3 : vector<32x1xf32> to vector<32x128xf32>
    %5 = arith.mulf %2, %4 : vector<32x128xf32>
    %c0_5 = arith.constant 0 : index
    %c0_6 = arith.constant 0 : index
    %6 = vector.load %arg4[%c0_5, %c0_6] : memref<32x1xf32, #tpu.memory_space<vmem>>, vector<32x1xf32>
    %7 = vector.broadcast %6 : vector<32x1xf32> to vector<32x128xf32>
    %8 = arith.addf %5, %7 : vector<32x128xf32>
    %cst_7 = arith.constant 0.000000e+00 : f32
    %9 = vector.broadcast %cst_7 : f32 to vector<32x128xf32>
    %10 = arith.maximumf %8, %9 : vector<32x128xf32>
    %c0_8 = arith.constant 0 : index
    %c0_9 = arith.constant 0 : index
    %11 = vector.load %arg5[%c0_8, %c0_9] : memref<32x32xbf16, #tpu.memory_space<vmem>>, vector<32x32xbf16>
    %12 = arith.truncf %10 : vector<32x128xf32> to vector<32x128xbf16>
    %cst_10 = arith.constant dense<0.000000e+00> : vector<32x128xf32>
    %13 = tpu.matmul %11, %12, %cst_10 {dimension_numbers = #tpu.dot_dimension_numbers<[1], [0], [0], [1], [0, 0, 1, 1], [], []>} : vector<32x32xbf16>, vector<32x128xbf16>, vector<32x128xf32> -> vector<32x128xf32>
    %c0_11 = arith.constant 0 : index
    %c0_12 = arith.constant 0 : index
    %14 = vector.load %arg6[%c0_11, %c0_12] : memref<32x1xf32, #tpu.memory_space<vmem>>, vector<32x1xf32>
    %15 = vector.broadcast %14 : vector<32x1xf32> to vector<32x128xf32>
    %16 = arith.mulf %13, %15 : vector<32x128xf32>
    %c0_13 = arith.constant 0 : index
    %c0_14 = arith.constant 0 : index
    %17 = vector.load %arg7[%c0_13, %c0_14] : memref<32x1xf32, #tpu.memory_space<vmem>>, vector<32x1xf32>
    %18 = vector.broadcast %17 : vector<32x1xf32> to vector<32x128xf32>
    %19 = arith.addf %16, %18 : vector<32x128xf32>
    %cst_15 = arith.constant 0.000000e+00 : f32
    %20 = vector.broadcast %cst_15 : f32 to vector<32x128xf32>
    %21 = arith.maximumf %19, %20 : vector<32x128xf32>
    %c0_16 = arith.constant 0 : index
    %c0_17 = arith.constant 0 : index
    %22 = vector.load %arg8[%c0_16, %c0_17] : memref<32x128xf32, #tpu.memory_space<vmem>>, vector<32x128xf32>
    tpu.vector_store %arg8[%c0_16, %c0_17], %21 {strides = array<i32>} : memref<32x128xf32, #tpu.memory_space<vmem>>, vector<32x128xf32>,
    return
  }
  func.func @transform_0(%arg0: i32) -> (i32, i32) {
    %c0_i32 = arith.constant 0 : i32
    %c0_i32_0 = arith.constant 0 : i32
    %c0_i32_1 = arith.constant 0 : i32
    return %c0_i32, %c0_i32_0 : i32, i32
  }
  func.func @transform_1(%arg0: i32) -> (i32, i32) {
    %c0_i32 = arith.constant 0 : i32
    %c0_i32_0 = arith.constant 0 : i32
    return %c0_i32, %arg0 : i32, i32
  }
  func.func @transform_2(%arg0: i32) -> (i32, i32) {
    %c0_i32 = arith.constant 0 : i32
    %c0_i32_0 = arith.constant 0 : i32
    %c0_i32_1 = arith.constant 0 : i32
    return %c0_i32, %c0_i32_0 : i32, i32
  }
  func.func @transform_3(%arg0: i32) -> (i32, i32) {
    %c0_i32 = arith.constant 0 : i32
    %c0_i32_0 = arith.constant 0 : i32
    %c0_i32_1 = arith.constant 0 : i32
    return %c0_i32, %c0_i32_0 : i32, i32
  }
  func.func @transform_4(%arg0: i32) -> (i32, i32) {
    %c0_i32 = arith.constant 0 : i32
    %c0_i32_0 = arith.constant 0 : i32
    %c0_i32_1 = arith.constant 0 : i32
    return %c0_i32, %c0_i32_0 : i32, i32
  }
  func.func @transform_5(%arg0: i32) -> (i32, i32) {
    %c0_i32 = arith.constant 0 : i32
    %c0_i32_0 = arith.constant 0 : i32
    %c0_i32_1 = arith.constant 0 : i32
    return %c0_i32, %c0_i32_0 : i32, i32
  }
  func.func @transform_6(%arg0: i32) -> (i32, i32) {
    %c0_i32 = arith.constant 0 : i32
    %c0_i32_0 = arith.constant 0 : i32
    %c0_i32_1 = arith.constant 0 : i32
    return %c0_i32, %c0_i32_0 : i32, i32
  }
  func.func @transform_7(%arg0: i32) -> (i32, i32) {
    %c0_i32 = arith.constant 0 : i32
    %c0_i32_0 = arith.constant 0 : i32
    return %c0_i32, %arg0 : i32, i32
  }
}

module attributes {stable_mosaic.version = 11 : i64} {
  func.func @_mm_bn_kernel(%arg0: i32, %arg1: memref<32x32xbf16, #tpu.memory_space<vmem>>, %arg2: memref<32x128xbf16, #tpu.memory_space<vmem>>, %arg3: memref<32x1xf32, #tpu.memory_space<vmem>>, %arg4: memref<32x1xf32, #tpu.memory_space<vmem>>, %arg5: memref<32x128xf32, #tpu.memory_space<vmem>>) attributes {dimension_semantics = [#tpu.dimension_semantics<parallel>], iteration_bounds = array<i64: 1>, scalar_prefetch = 0 : i64, scratch_operands = 0 : i64, tpu.core_type = #tpu.core_type<tc>, window_params = [{pipeline_mode = #tpu.pipeline_mode<synchronous>, transform_indices = @transform_0, window_bounds = array<i64: 32, 32>}, {transform_indices = @transform_1, window_bounds = array<i64: 32, 128>}, {pipeline_mode = #tpu.pipeline_mode<synchronous>, transform_indices = @transform_2, window_bounds = array<i64: 32, 1>}, {pipeline_mode = #tpu.pipeline_mode<synchronous>, transform_indices = @transform_3, window_bounds = array<i64: 32, 1>}, {transform_indices = @transform_4, window_bounds = array<i64: 32, 128>}]} {
    %c0 = arith.constant 0 : index
    %c0_0 = arith.constant 0 : index
    %0 = vector.load %arg1[%c0, %c0_0] : memref<32x32xbf16, #tpu.memory_space<vmem>>, vector<32x32xbf16>
    %c0_1 = arith.constant 0 : index
    %c0_2 = arith.constant 0 : index
    %1 = vector.load %arg2[%c0_1, %c0_2] : memref<32x128xbf16, #tpu.memory_space<vmem>>, vector<32x128xbf16>
    %cst = arith.constant dense<0.000000e+00> : vector<32x128xf32>
    %2 = tpu.matmul %0, %1, %cst {dimension_numbers = #tpu.dot_dimension_numbers<[1], [0], [0], [1], [0, 0, 1, 1], [], []>} : vector<32x32xbf16>, vector<32x128xbf16>, vector<32x128xf32> -> vector<32x128xf32>
    %c0_3 = arith.constant 0 : index
    %c0_4 = arith.constant 0 : index
    %3 = vector.load %arg3[%c0_3, %c0_4] : memref<32x1xf32, #tpu.memory_space<vmem>>, vector<32x1xf32>
    %4 = vector.broadcast %3 : vector<32x1xf32> to vector<32x128xf32>
    %5 = arith.mulf %2, %4 : vector<32x128xf32>
    %c0_5 = arith.constant 0 : index
    %c0_6 = arith.constant 0 : index
    %6 = vector.load %arg4[%c0_5, %c0_6] : memref<32x1xf32, #tpu.memory_space<vmem>>, vector<32x1xf32>
    %7 = vector.broadcast %6 : vector<32x1xf32> to vector<32x128xf32>
    %8 = arith.addf %5, %7 : vector<32x128xf32>
    %cst_7 = arith.constant 0.000000e+00 : f32
    %9 = vector.broadcast %cst_7 : f32 to vector<32x128xf32>
    %10 = arith.maximumf %8, %9 : vector<32x128xf32>
    %c0_8 = arith.constant 0 : index
    %c0_9 = arith.constant 0 : index
    %11 = vector.load %arg5[%c0_8, %c0_9] : memref<32x128xf32, #tpu.memory_space<vmem>>, vector<32x128xf32>
    tpu.vector_store %arg5[%c0_8, %c0_9], %10 {strides = array<i32>} : memref<32x128xf32, #tpu.memory_space<vmem>>, vector<32x128xf32>,
    return
  }
  func.func @transform_0(%arg0: i32) -> (i32, i32) {
    %c0_i32 = arith.constant 0 : i32
    %c0_i32_0 = arith.constant 0 : i32
    %c0_i32_1 = arith.constant 0 : i32
    return %c0_i32, %c0_i32_0 : i32, i32
  }
  func.func @transform_1(%arg0: i32) -> (i32, i32) {
    %c0_i32 = arith.constant 0 : i32
    %c0_i32_0 = arith.constant 0 : i32
    return %c0_i32, %arg0 : i32, i32
  }
  func.func @transform_2(%arg0: i32) -> (i32, i32) {
    %c0_i32 = arith.constant 0 : i32
    %c0_i32_0 = arith.constant 0 : i32
    %c0_i32_1 = arith.constant 0 : i32
    return %c0_i32, %c0_i32_0 : i32, i32
  }
  func.func @transform_3(%arg0: i32) -> (i32, i32) {
    %c0_i32 = arith.constant 0 : i32
    %c0_i32_0 = arith.constant 0 : i32
    %c0_i32_1 = arith.constant 0 : i32
    return %c0_i32, %c0_i32_0 : i32, i32
  }
  func.func @transform_4(%arg0: i32) -> (i32, i32) {
    %c0_i32 = arith.constant 0 : i32
    %c0_i32_0 = arith.constant 0 : i32
    return %c0_i32, %arg0 : i32, i32
  }
}

module attributes {stable_mosaic.version = 11 : i64} {
  func.func @_attn_kernel(%arg0: i32, %arg1: i32, %arg2: i32, %arg3: memref<1x32x128xbf16, #tpu.memory_space<vmem>>, %arg4: memref<1x32x128xbf16, #tpu.memory_space<vmem>>, %arg5: memref<1x32x128xbf16, #tpu.memory_space<vmem>>, %arg6: memref<1x32x128xf32, #tpu.memory_space<vmem>>, %arg7: memref<1x128xf32, #tpu.memory_space<vmem>>, %arg8: memref<1x128xf32, #tpu.memory_space<vmem>>, %arg9: memref<32x128xf32, #tpu.memory_space<vmem>>) attributes {dimension_semantics = [#tpu.dimension_semantics<parallel>, #tpu.dimension_semantics<parallel>, #tpu.dimension_semantics<arbitrary>], iteration_bounds = array<i64: 1, 1, 1>, scalar_prefetch = 0 : i64, scratch_operands = 3 : i64, tpu.core_type = #tpu.core_type<tc>, window_params = [{transform_indices = @transform_0, window_bounds = array<i64: 1, 32, 128>}, {transform_indices = @transform_1, window_bounds = array<i64: 1, 32, 128>}, {transform_indices = @transform_2, window_bounds = array<i64: 1, 32, 128>}, {transform_indices = @transform_3, window_bounds = array<i64: 1, 32, 128>}]} {
    %c0_i32 = arith.constant 0 : i32
    %0 = arith.cmpi eq, %arg2, %c0_i32 : i32
    %1 = arith.extui %0 : i1 to i32
    %c0_i32_0 = arith.constant 0 : i32
    %2 = arith.cmpi ne, %1, %c0_i32_0 : i32
    scf.if %2 {
      %cst_29 = arith.constant -1.000000e+30 : f32
      %52 = vector.broadcast %cst_29 : f32 to vector<1x128xf32>
      %c0_30 = arith.constant 0 : index
      %c0_31 = arith.constant 0 : index
      %53 = vector.load %arg7[%c0_30, %c0_31] : memref<1x128xf32, #tpu.memory_space<vmem>>, vector<1x128xf32>
      tpu.vector_store %arg7[%c0_30, %c0_31], %52 {strides = array<i32>} : memref<1x128xf32, #tpu.memory_space<vmem>>, vector<1x128xf32>,
      %cst_32 = arith.constant 0.000000e+00 : f32
      %54 = vector.broadcast %cst_32 : f32 to vector<1x128xf32>
      %c0_33 = arith.constant 0 : index
      %c0_34 = arith.constant 0 : index
      %55 = vector.load %arg8[%c0_33, %c0_34] : memref<1x128xf32, #tpu.memory_space<vmem>>, vector<1x128xf32>
      tpu.vector_store %arg8[%c0_33, %c0_34], %54 {strides = array<i32>} : memref<1x128xf32, #tpu.memory_space<vmem>>, vector<1x128xf32>,
      %cst_35 = arith.constant 0.000000e+00 : f32
      %56 = vector.broadcast %cst_35 : f32 to vector<32x128xf32>
      %c0_36 = arith.constant 0 : index
      %c0_37 = arith.constant 0 : index
      %57 = vector.load %arg9[%c0_36, %c0_37] : memref<32x128xf32, #tpu.memory_space<vmem>>, vector<32x128xf32>
      tpu.vector_store %arg9[%c0_36, %c0_37], %56 {strides = array<i32>} : memref<32x128xf32, #tpu.memory_space<vmem>>, vector<32x128xf32>,
    } else {
    }
    %c0 = arith.constant 0 : index
    %c0_1 = arith.constant 0 : index
    %c0_2 = arith.constant 0 : index
    %3 = vector.load %arg3[%c0, %c0_1, %c0_2] : memref<1x32x128xbf16, #tpu.memory_space<vmem>>, vector<1x32x128xbf16>
    %4 = vector.shape_cast %3 : vector<1x32x128xbf16> to vector<32x128xbf16>
    %c0_3 = arith.constant 0 : index
    %c0_4 = arith.constant 0 : index
    %c0_5 = arith.constant 0 : index
    %5 = vector.load %arg4[%c0_3, %c0_4, %c0_5] : memref<1x32x128xbf16, #tpu.memory_space<vmem>>, vector<1x32x128xbf16>
    %6 = vector.shape_cast %5 : vector<1x32x128xbf16> to vector<32x128xbf16>
    %c0_6 = arith.constant 0 : index
    %c0_7 = arith.constant 0 : index
    %c0_8 = arith.constant 0 : index
    %7 = vector.load %arg5[%c0_6, %c0_7, %c0_8] : memref<1x32x128xbf16, #tpu.memory_space<vmem>>, vector<1x32x128xbf16>
    %8 = vector.shape_cast %7 : vector<1x32x128xbf16> to vector<32x128xbf16>
    %cst = arith.constant dense<0.000000e+00> : vector<128x128xf32>
    %9 = tpu.matmul %6, %4, %cst {dimension_numbers = #tpu.dot_dimension_numbers<[0], [0], [1], [1], [0, 1, 1, 1], [], []>} : vector<32x128xbf16>, vector<32x128xbf16>, vector<128x128xf32> -> vector<128x128xf32>
    %cst_9 = arith.constant 0.176776692 : f32
    %10 = vector.broadcast %cst_9 : f32 to vector<128x128xf32>
    %11 = arith.mulf %9, %10 : vector<128x128xf32>
    %c128_i32 = arith.constant 128 : i32
    %12 = arith.muli %arg2, %c128_i32 : i32
    %13 = tpu.iota {dimensions = array<i32: 0>} : vector<128x1xi32>
    %14 = vector.broadcast %12 : i32 to vector<128x1xi32>
    %15 = arith.addi %14, %13 : vector<128x1xi32>
    %c64_i32 = arith.constant 64 : i32
    %16 = vector.broadcast %c64_i32 : i32 to vector<128x1xi32>
    %17 = arith.cmpi slt, %15, %16 : vector<128x1xi32>
    %cst_10 = arith.constant -1.000000e+30 : f32
    %18 = vector.shape_cast %17 : vector<128x1xi1> to vector<128x1xi1>
    %19 = vector.broadcast %18 : vector<128x1xi1> to vector<128x128xi1>
    %20 = vector.broadcast %cst_10 : f32 to vector<128x128xf32>
    %21 = arith.select %19, %11, %20 : vector<128x128xi1>, vector<128x128xf32>
    %c0_11 = arith.constant 0 : index
    %c0_12 = arith.constant 0 : index
    %22 = vector.load %arg7[%c0_11, %c0_12] : memref<1x128xf32, #tpu.memory_space<vmem>>, vector<1x128xf32>
    %cst_13 = arith.constant dense<0xFF800000> : vector<128xf32>
    %23 = vector.multi_reduction <maximumf>, %21, %cst_13 [0] : vector<128x128xf32> to vector<128xf32>
    %24 = vector.shape_cast %23 : vector<128xf32> to vector<1x128xf32>
    %25 = arith.maximumf %22, %24 : vector<1x128xf32>
    %26 = arith.subf %22, %25 : vector<1x128xf32>
    %27 = math.exp %26 : vector<1x128xf32>
    %28 = vector.broadcast %25 : vector<1x128xf32> to vector<128x128xf32>
    %29 = arith.subf %21, %28 : vector<128x128xf32>
    %30 = math.exp %29 : vector<128x128xf32>
    %cst_14 = arith.constant 0.000000e+00 : f32
    %31 = vector.shape_cast %17 : vector<128x1xi1> to vector<128x1xi1>
    %32 = vector.broadcast %31 : vector<128x1xi1> to vector<128x128xi1>
    %33 = vector.broadcast %cst_14 : f32 to vector<128x128xf32>
    %34 = arith.select %32, %30, %33 : vector<128x128xi1>, vector<128x128xf32>
    %c0_15 = arith.constant 0 : index
    %c0_16 = arith.constant 0 : index
    %35 = vector.load %arg8[%c0_15, %c0_16] : memref<1x128xf32, #tpu.memory_space<vmem>>, vector<1x128xf32>
    %36 = arith.mulf %27, %35 : vector<1x128xf32>
    %cst_17 = arith.constant dense<0.000000e+00> : vector<128xf32>
    %37 = vector.multi_reduction <add>, %34, %cst_17 [0] : vector<128x128xf32> to vector<128xf32>
    %38 = vector.shape_cast %37 : vector<128xf32> to vector<1x128xf32>
    %39 = arith.addf %36, %38 : vector<1x128xf32>
    %c0_18 = arith.constant 0 : index
    %c0_19 = arith.constant 0 : index
    %40 = vector.load %arg8[%c0_18, %c0_19] : memref<1x128xf32, #tpu.memory_space<vmem>>, vector<1x128xf32>
    tpu.vector_store %arg8[%c0_18, %c0_19], %39 {strides = array<i32>} : memref<1x128xf32, #tpu.memory_space<vmem>>, vector<1x128xf32>,
    %c0_20 = arith.constant 0 : index
    %c0_21 = arith.constant 0 : index
    %41 = vector.load %arg9[%c0_20, %c0_21] : memref<32x128xf32, #tpu.memory_space<vmem>>, vector<32x128xf32>
    %42 = vector.broadcast %27 : vector<1x128xf32> to vector<32x128xf32>
    %43 = arith.mulf %42, %41 : vector<32x128xf32>
    %44 = arith.truncf %34 : vector<128x128xf32> to vector<128x128xbf16>
    %cst_22 = arith.constant dense<0.000000e+00> : vector<32x128xf32>
    %45 = tpu.matmul %8, %44, %cst_22 {dimension_numbers = #tpu.dot_dimension_numbers<[1], [0], [0], [1], [0, 0, 1, 1], [], []>} : vector<32x128xbf16>, vector<128x128xbf16>, vector<32x128xf32> -> vector<32x128xf32>
    %46 = arith.addf %43, %45 : vector<32x128xf32>
    %c0_23 = arith.constant 0 : index
    %c0_24 = arith.constant 0 : index
    %47 = vector.load %arg9[%c0_23, %c0_24] : memref<32x128xf32, #tpu.memory_space<vmem>>, vector<32x128xf32>
    tpu.vector_store %arg9[%c0_23, %c0_24], %46 {strides = array<i32>} : memref<32x128xf32, #tpu.memory_space<vmem>>, vector<32x128xf32>,
    %c0_25 = arith.constant 0 : index
    %c0_26 = arith.constant 0 : index
    %48 = vector.load %arg7[%c0_25, %c0_26] : memref<1x128xf32, #tpu.memory_space<vmem>>, vector<1x128xf32>
    tpu.vector_store %arg7[%c0_25, %c0_26], %25 {strides = array<i32>} : memref<1x128xf32, #tpu.memory_space<vmem>>, vector<1x128xf32>,
    %c0_i32_27 = arith.constant 0 : i32
    %49 = arith.cmpi eq, %arg2, %c0_i32_27 : i32
    %50 = arith.extui %49 : i1 to i32
    %c0_i32_28 = arith.constant 0 : i32
    %51 = arith.cmpi ne, %50, %c0_i32_28 : i32
    scf.if %51 {
      %c0_29 = arith.constant 0 : index
      %c0_30 = arith.constant 0 : index
      %52 = vector.load %arg9[%c0_29, %c0_30] : memref<32x128xf32, #tpu.memory_space<vmem>>, vector<32x128xf32>
      %c0_31 = arith.constant 0 : index
      %c0_32 = arith.constant 0 : index
      %53 = vector.load %arg8[%c0_31, %c0_32] : memref<1x128xf32, #tpu.memory_space<vmem>>, vector<1x128xf32>
      %54 = tpu.reciprocal %53 {approx = true} : vector<1x128xf32> -> vector<1x128xf32>
      %55 = vector.broadcast %54 : vector<1x128xf32> to vector<32x128xf32>
      %56 = arith.mulf %52, %55 : vector<32x128xf32>
      %c0_33 = arith.constant 0 : index
      %c0_34 = arith.constant 0 : index
      %c0_35 = arith.constant 0 : index
      %57 = vector.load %arg6[%c0_33, %c0_34, %c0_35] : memref<1x32x128xf32, #tpu.memory_space<vmem>>, vector<1x32x128xf32>
      %58 = vector.shape_cast %57 : vector<1x32x128xf32> to vector<32x128xf32>
      %59 = vector.shape_cast %56 : vector<32x128xf32> to vector<1x32x128xf32>
      tpu.vector_store %arg6[%c0_33, %c0_34, %c0_35], %59 {strides = array<i32>} : memref<1x32x128xf32, #tpu.memory_space<vmem>>, vector<1x32x128xf32>,
    } else {
    }
    return
  }
  func.func @transform_0(%arg0: i32, %arg1: i32, %arg2: i32) -> (i32, i32, i32) {
    %c0_i32 = arith.constant 0 : i32
    %c0_i32_0 = arith.constant 0 : i32
    return %arg0, %c0_i32, %arg1 : i32, i32, i32
  }
  func.func @transform_1(%arg0: i32, %arg1: i32, %arg2: i32) -> (i32, i32, i32) {
    %c0_i32 = arith.constant 0 : i32
    %c0_i32_0 = arith.constant 0 : i32
    return %arg0, %c0_i32, %arg2 : i32, i32, i32
  }
  func.func @transform_2(%arg0: i32, %arg1: i32, %arg2: i32) -> (i32, i32, i32) {
    %c0_i32 = arith.constant 0 : i32
    %c0_i32_0 = arith.constant 0 : i32
    return %arg0, %c0_i32, %arg2 : i32, i32, i32
  }
  func.func @transform_3(%arg0: i32, %arg1: i32, %arg2: i32) -> (i32, i32, i32) {
    %c0_i32 = arith.constant 0 : i32
    %c0_i32_0 = arith.constant 0 : i32
    return %arg0, %c0_i32, %arg1 : i32, i32, i32
  }
}

module attributes {stable_mosaic.version = 11 : i64} {
  func.func @_mm_bn_kernel(%arg0: i32, %arg1: memref<32x1728xbf16, #tpu.memory_space<vmem>>, %arg2: memref<1728x128xbf16, #tpu.memory_space<vmem>>, %arg3: memref<32x1xf32, #tpu.memory_space<vmem>>, %arg4: memref<32x1xf32, #tpu.memory_space<vmem>>, %arg5: memref<32x128xf32, #tpu.memory_space<vmem>>) attributes {dimension_semantics = [#tpu.dimension_semantics<parallel>], iteration_bounds = array<i64: 1>, scalar_prefetch = 0 : i64, scratch_operands = 0 : i64, tpu.core_type = #tpu.core_type<tc>, window_params = [{pipeline_mode = #tpu.pipeline_mode<synchronous>, transform_indices = @transform_0, window_bounds = array<i64: 32, 1728>}, {transform_indices = @transform_1, window_bounds = array<i64: 1728, 128>}, {pipeline_mode = #tpu.pipeline_mode<synchronous>, transform_indices = @transform_2, window_bounds = array<i64: 32, 1>}, {pipeline_mode = #tpu.pipeline_mode<synchronous>, transform_indices = @transform_3, window_bounds = array<i64: 32, 1>}, {transform_indices = @transform_4, window_bounds = array<i64: 32, 128>}]} {
    %c0 = arith.constant 0 : index
    %c0_0 = arith.constant 0 : index
    %0 = vector.load %arg1[%c0, %c0_0] : memref<32x1728xbf16, #tpu.memory_space<vmem>>, vector<32x1728xbf16>
    %c0_1 = arith.constant 0 : index
    %c0_2 = arith.constant 0 : index
    %1 = vector.load %arg2[%c0_1, %c0_2] : memref<1728x128xbf16, #tpu.memory_space<vmem>>, vector<1728x128xbf16>
    %cst = arith.constant dense<0.000000e+00> : vector<32x128xf32>
    %2 = tpu.matmul %0, %1, %cst {dimension_numbers = #tpu.dot_dimension_numbers<[1], [0], [0], [1], [0, 0, 1, 1], [], []>} : vector<32x1728xbf16>, vector<1728x128xbf16>, vector<32x128xf32> -> vector<32x128xf32>
    %c0_3 = arith.constant 0 : index
    %c0_4 = arith.constant 0 : index
    %3 = vector.load %arg3[%c0_3, %c0_4] : memref<32x1xf32, #tpu.memory_space<vmem>>, vector<32x1xf32>
    %4 = vector.broadcast %3 : vector<32x1xf32> to vector<32x128xf32>
    %5 = arith.mulf %2, %4 : vector<32x128xf32>
    %c0_5 = arith.constant 0 : index
    %c0_6 = arith.constant 0 : index
    %6 = vector.load %arg4[%c0_5, %c0_6] : memref<32x1xf32, #tpu.memory_space<vmem>>, vector<32x1xf32>
    %7 = vector.broadcast %6 : vector<32x1xf32> to vector<32x128xf32>
    %8 = arith.addf %5, %7 : vector<32x128xf32>
    %cst_7 = arith.constant 0.000000e+00 : f32
    %9 = vector.broadcast %cst_7 : f32 to vector<32x128xf32>
    %10 = arith.maximumf %8, %9 : vector<32x128xf32>
    %c0_8 = arith.constant 0 : index
    %c0_9 = arith.constant 0 : index
    %11 = vector.load %arg5[%c0_8, %c0_9] : memref<32x128xf32, #tpu.memory_space<vmem>>, vector<32x128xf32>
    tpu.vector_store %arg5[%c0_8, %c0_9], %10 {strides = array<i32>} : memref<32x128xf32, #tpu.memory_space<vmem>>, vector<32x128xf32>,
    return
  }
  func.func @transform_0(%arg0: i32) -> (i32, i32) {
    %c0_i32 = arith.constant 0 : i32
    %c0_i32_0 = arith.constant 0 : i32
    %c0_i32_1 = arith.constant 0 : i32
    return %c0_i32, %c0_i32_0 : i32, i32
  }
  func.func @transform_1(%arg0: i32) -> (i32, i32) {
    %c0_i32 = arith.constant 0 : i32
    %c0_i32_0 = arith.constant 0 : i32
    return %c0_i32, %arg0 : i32, i32
  }
  func.func @transform_2(%arg0: i32) -> (i32, i32) {
    %c0_i32 = arith.constant 0 : i32
    %c0_i32_0 = arith.constant 0 : i32
    %c0_i32_1 = arith.constant 0 : i32
    return %c0_i32, %c0_i32_0 : i32, i32
  }
  func.func @transform_3(%arg0: i32) -> (i32, i32) {
    %c0_i32 = arith.constant 0 : i32
    %c0_i32_0 = arith.constant 0 : i32
    %c0_i32_1 = arith.constant 0 : i32
    return %c0_i32, %c0_i32_0 : i32, i32
  }
  func.func @transform_4(%arg0: i32) -> (i32, i32) {
    %c0_i32 = arith.constant 0 : i32
    %c0_i32_0 = arith.constant 0 : i32
    return %c0_i32, %arg0 : i32, i32
  }
}

module attributes {stable_mosaic.version = 11 : i64} {
  func.func @_mm_bn_kernel(%arg0: i32, %arg1: memref<32x64xbf16, #tpu.memory_space<vmem>>, %arg2: memref<64x512xbf16, #tpu.memory_space<vmem>>, %arg3: memref<32x1xf32, #tpu.memory_space<vmem>>, %arg4: memref<32x1xf32, #tpu.memory_space<vmem>>, %arg5: memref<32x512xf32, #tpu.memory_space<vmem>>) attributes {dimension_semantics = [#tpu.dimension_semantics<parallel>], iteration_bounds = array<i64: 1>, scalar_prefetch = 0 : i64, scratch_operands = 0 : i64, tpu.core_type = #tpu.core_type<tc>, window_params = [{pipeline_mode = #tpu.pipeline_mode<synchronous>, transform_indices = @transform_0, window_bounds = array<i64: 32, 64>}, {transform_indices = @transform_1, window_bounds = array<i64: 64, 512>}, {pipeline_mode = #tpu.pipeline_mode<synchronous>, transform_indices = @transform_2, window_bounds = array<i64: 32, 1>}, {pipeline_mode = #tpu.pipeline_mode<synchronous>, transform_indices = @transform_3, window_bounds = array<i64: 32, 1>}, {transform_indices = @transform_4, window_bounds = array<i64: 32, 512>}]} {
    %c0 = arith.constant 0 : index
    %c0_0 = arith.constant 0 : index
    %0 = vector.load %arg1[%c0, %c0_0] : memref<32x64xbf16, #tpu.memory_space<vmem>>, vector<32x64xbf16>
    %c0_1 = arith.constant 0 : index
    %c0_2 = arith.constant 0 : index
    %1 = vector.load %arg2[%c0_1, %c0_2] : memref<64x512xbf16, #tpu.memory_space<vmem>>, vector<64x512xbf16>
    %cst = arith.constant dense<0.000000e+00> : vector<32x512xf32>
    %2 = tpu.matmul %0, %1, %cst {dimension_numbers = #tpu.dot_dimension_numbers<[1], [0], [0], [1], [0, 0, 1, 1], [], []>} : vector<32x64xbf16>, vector<64x512xbf16>, vector<32x512xf32> -> vector<32x512xf32>
    %c0_3 = arith.constant 0 : index
    %c0_4 = arith.constant 0 : index
    %3 = vector.load %arg3[%c0_3, %c0_4] : memref<32x1xf32, #tpu.memory_space<vmem>>, vector<32x1xf32>
    %4 = vector.broadcast %3 : vector<32x1xf32> to vector<32x512xf32>
    %5 = arith.mulf %2, %4 : vector<32x512xf32>
    %c0_5 = arith.constant 0 : index
    %c0_6 = arith.constant 0 : index
    %6 = vector.load %arg4[%c0_5, %c0_6] : memref<32x1xf32, #tpu.memory_space<vmem>>, vector<32x1xf32>
    %7 = vector.broadcast %6 : vector<32x1xf32> to vector<32x512xf32>
    %8 = arith.addf %5, %7 : vector<32x512xf32>
    %c0_7 = arith.constant 0 : index
    %c0_8 = arith.constant 0 : index
    %9 = vector.load %arg5[%c0_7, %c0_8] : memref<32x512xf32, #tpu.memory_space<vmem>>, vector<32x512xf32>
    tpu.vector_store %arg5[%c0_7, %c0_8], %8 {strides = array<i32>} : memref<32x512xf32, #tpu.memory_space<vmem>>, vector<32x512xf32>,
    return
  }
  func.func @transform_0(%arg0: i32) -> (i32, i32) {
    %c0_i32 = arith.constant 0 : i32
    %c0_i32_0 = arith.constant 0 : i32
    %c0_i32_1 = arith.constant 0 : i32
    return %c0_i32, %c0_i32_0 : i32, i32
  }
  func.func @transform_1(%arg0: i32) -> (i32, i32) {
    %c0_i32 = arith.constant 0 : i32
    %c0_i32_0 = arith.constant 0 : i32
    return %c0_i32, %arg0 : i32, i32
  }
  func.func @transform_2(%arg0: i32) -> (i32, i32) {
    %c0_i32 = arith.constant 0 : i32
    %c0_i32_0 = arith.constant 0 : i32
    %c0_i32_1 = arith.constant 0 : i32
    return %c0_i32, %c0_i32_0 : i32, i32
  }
  func.func @transform_3(%arg0: i32) -> (i32, i32) {
    %c0_i32 = arith.constant 0 : i32
    %c0_i32_0 = arith.constant 0 : i32
    %c0_i32_1 = arith.constant 0 : i32
    return %c0_i32, %c0_i32_0 : i32, i32
  }
  func.func @transform_4(%arg0: i32) -> (i32, i32) {
    %c0_i32 = arith.constant 0 : i32
    %c0_i32_0 = arith.constant 0 : i32
    return %c0_i32, %arg0 : i32, i32
  }
}

module attributes {stable_mosaic.version = 11 : i64} {
  func.func @_mm_bn_kernel(%arg0: i32, %arg1: memref<64x864xbf16, #tpu.memory_space<vmem>>, %arg2: memref<864x128xbf16, #tpu.memory_space<vmem>>, %arg3: memref<64x1xf32, #tpu.memory_space<vmem>>, %arg4: memref<64x1xf32, #tpu.memory_space<vmem>>, %arg5: memref<64x128xf32, #tpu.memory_space<vmem>>) attributes {dimension_semantics = [#tpu.dimension_semantics<parallel>], iteration_bounds = array<i64: 1>, scalar_prefetch = 0 : i64, scratch_operands = 0 : i64, tpu.core_type = #tpu.core_type<tc>, window_params = [{pipeline_mode = #tpu.pipeline_mode<synchronous>, transform_indices = @transform_0, window_bounds = array<i64: 64, 864>}, {transform_indices = @transform_1, window_bounds = array<i64: 864, 128>}, {pipeline_mode = #tpu.pipeline_mode<synchronous>, transform_indices = @transform_2, window_bounds = array<i64: 64, 1>}, {pipeline_mode = #tpu.pipeline_mode<synchronous>, transform_indices = @transform_3, window_bounds = array<i64: 64, 1>}, {transform_indices = @transform_4, window_bounds = array<i64: 64, 128>}]} {
    %c0 = arith.constant 0 : index
    %c0_0 = arith.constant 0 : index
    %0 = vector.load %arg1[%c0, %c0_0] : memref<64x864xbf16, #tpu.memory_space<vmem>>, vector<64x864xbf16>
    %c0_1 = arith.constant 0 : index
    %c0_2 = arith.constant 0 : index
    %1 = vector.load %arg2[%c0_1, %c0_2] : memref<864x128xbf16, #tpu.memory_space<vmem>>, vector<864x128xbf16>
    %cst = arith.constant dense<0.000000e+00> : vector<64x128xf32>
    %2 = tpu.matmul %0, %1, %cst {dimension_numbers = #tpu.dot_dimension_numbers<[1], [0], [0], [1], [0, 0, 1, 1], [], []>} : vector<64x864xbf16>, vector<864x128xbf16>, vector<64x128xf32> -> vector<64x128xf32>
    %c0_3 = arith.constant 0 : index
    %c0_4 = arith.constant 0 : index
    %3 = vector.load %arg3[%c0_3, %c0_4] : memref<64x1xf32, #tpu.memory_space<vmem>>, vector<64x1xf32>
    %4 = vector.broadcast %3 : vector<64x1xf32> to vector<64x128xf32>
    %5 = arith.mulf %2, %4 : vector<64x128xf32>
    %c0_5 = arith.constant 0 : index
    %c0_6 = arith.constant 0 : index
    %6 = vector.load %arg4[%c0_5, %c0_6] : memref<64x1xf32, #tpu.memory_space<vmem>>, vector<64x1xf32>
    %7 = vector.broadcast %6 : vector<64x1xf32> to vector<64x128xf32>
    %8 = arith.addf %5, %7 : vector<64x128xf32>
    %cst_7 = arith.constant 0.000000e+00 : f32
    %9 = vector.broadcast %cst_7 : f32 to vector<64x128xf32>
    %10 = arith.maximumf %8, %9 : vector<64x128xf32>
    %c0_8 = arith.constant 0 : index
    %c0_9 = arith.constant 0 : index
    %11 = vector.load %arg5[%c0_8, %c0_9] : memref<64x128xf32, #tpu.memory_space<vmem>>, vector<64x128xf32>
    tpu.vector_store %arg5[%c0_8, %c0_9], %10 {strides = array<i32>} : memref<64x128xf32, #tpu.memory_space<vmem>>, vector<64x128xf32>,
    return
  }
  func.func @transform_0(%arg0: i32) -> (i32, i32) {
    %c0_i32 = arith.constant 0 : i32
    %c0_i32_0 = arith.constant 0 : i32
    %c0_i32_1 = arith.constant 0 : i32
    return %c0_i32, %c0_i32_0 : i32, i32
  }
  func.func @transform_1(%arg0: i32) -> (i32, i32) {
    %c0_i32 = arith.constant 0 : i32
    %c0_i32_0 = arith.constant 0 : i32
    return %c0_i32, %arg0 : i32, i32
  }
  func.func @transform_2(%arg0: i32) -> (i32, i32) {
    %c0_i32 = arith.constant 0 : i32
    %c0_i32_0 = arith.constant 0 : i32
    %c0_i32_1 = arith.constant 0 : i32
    return %c0_i32, %c0_i32_0 : i32, i32
  }
  func.func @transform_3(%arg0: i32) -> (i32, i32) {
    %c0_i32 = arith.constant 0 : i32
    %c0_i32_0 = arith.constant 0 : i32
    %c0_i32_1 = arith.constant 0 : i32
    return %c0_i32, %c0_i32_0 : i32, i32
  }
  func.func @transform_4(%arg0: i32) -> (i32, i32) {
    %c0_i32 = arith.constant 0 : i32
    %c0_i32_0 = arith.constant 0 : i32
    return %c0_i32, %arg0 : i32, i32
  }
}

module attributes {stable_mosaic.version = 11 : i64} {
  func.func @_mm_bn_kernel(%arg0: i32, %arg1: memref<64x1728xbf16, #tpu.memory_space<vmem>>, %arg2: memref<1728x128xbf16, #tpu.memory_space<vmem>>, %arg3: memref<64x1xf32, #tpu.memory_space<vmem>>, %arg4: memref<64x1xf32, #tpu.memory_space<vmem>>, %arg5: memref<64x128xf32, #tpu.memory_space<vmem>>) attributes {dimension_semantics = [#tpu.dimension_semantics<parallel>], iteration_bounds = array<i64: 1>, scalar_prefetch = 0 : i64, scratch_operands = 0 : i64, tpu.core_type = #tpu.core_type<tc>, window_params = [{pipeline_mode = #tpu.pipeline_mode<synchronous>, transform_indices = @transform_0, window_bounds = array<i64: 64, 1728>}, {transform_indices = @transform_1, window_bounds = array<i64: 1728, 128>}, {pipeline_mode = #tpu.pipeline_mode<synchronous>, transform_indices = @transform_2, window_bounds = array<i64: 64, 1>}, {pipeline_mode = #tpu.pipeline_mode<synchronous>, transform_indices = @transform_3, window_bounds = array<i64: 64, 1>}, {transform_indices = @transform_4, window_bounds = array<i64: 64, 128>}]} {
    %c0 = arith.constant 0 : index
    %c0_0 = arith.constant 0 : index
    %0 = vector.load %arg1[%c0, %c0_0] : memref<64x1728xbf16, #tpu.memory_space<vmem>>, vector<64x1728xbf16>
    %c0_1 = arith.constant 0 : index
    %c0_2 = arith.constant 0 : index
    %1 = vector.load %arg2[%c0_1, %c0_2] : memref<1728x128xbf16, #tpu.memory_space<vmem>>, vector<1728x128xbf16>
    %cst = arith.constant dense<0.000000e+00> : vector<64x128xf32>
    %2 = tpu.matmul %0, %1, %cst {dimension_numbers = #tpu.dot_dimension_numbers<[1], [0], [0], [1], [0, 0, 1, 1], [], []>} : vector<64x1728xbf16>, vector<1728x128xbf16>, vector<64x128xf32> -> vector<64x128xf32>
    %c0_3 = arith.constant 0 : index
    %c0_4 = arith.constant 0 : index
    %3 = vector.load %arg3[%c0_3, %c0_4] : memref<64x1xf32, #tpu.memory_space<vmem>>, vector<64x1xf32>
    %4 = vector.broadcast %3 : vector<64x1xf32> to vector<64x128xf32>
    %5 = arith.mulf %2, %4 : vector<64x128xf32>
    %c0_5 = arith.constant 0 : index
    %c0_6 = arith.constant 0 : index
    %6 = vector.load %arg4[%c0_5, %c0_6] : memref<64x1xf32, #tpu.memory_space<vmem>>, vector<64x1xf32>
    %7 = vector.broadcast %6 : vector<64x1xf32> to vector<64x128xf32>
    %8 = arith.addf %5, %7 : vector<64x128xf32>
    %cst_7 = arith.constant 0.000000e+00 : f32
    %9 = vector.broadcast %cst_7 : f32 to vector<64x128xf32>
    %10 = arith.maximumf %8, %9 : vector<64x128xf32>
    %c0_8 = arith.constant 0 : index
    %c0_9 = arith.constant 0 : index
    %11 = vector.load %arg5[%c0_8, %c0_9] : memref<64x128xf32, #tpu.memory_space<vmem>>, vector<64x128xf32>
    tpu.vector_store %arg5[%c0_8, %c0_9], %10 {strides = array<i32>} : memref<64x128xf32, #tpu.memory_space<vmem>>, vector<64x128xf32>,
    return
  }
  func.func @transform_0(%arg0: i32) -> (i32, i32) {
    %c0_i32 = arith.constant 0 : i32
    %c0_i32_0 = arith.constant 0 : i32
    %c0_i32_1 = arith.constant 0 : i32
    return %c0_i32, %c0_i32_0 : i32, i32
  }
  func.func @transform_1(%arg0: i32) -> (i32, i32) {
    %c0_i32 = arith.constant 0 : i32
    %c0_i32_0 = arith.constant 0 : i32
    return %c0_i32, %arg0 : i32, i32
  }
  func.func @transform_2(%arg0: i32) -> (i32, i32) {
    %c0_i32 = arith.constant 0 : i32
    %c0_i32_0 = arith.constant 0 : i32
    %c0_i32_1 = arith.constant 0 : i32
    return %c0_i32, %c0_i32_0 : i32, i32
  }
  func.func @transform_3(%arg0: i32) -> (i32, i32) {
    %c0_i32 = arith.constant 0 : i32
    %c0_i32_0 = arith.constant 0 : i32
    %c0_i32_1 = arith.constant 0 : i32
    return %c0_i32, %c0_i32_0 : i32, i32
  }
  func.func @transform_4(%arg0: i32) -> (i32, i32) {
    %c0_i32 = arith.constant 0 : i32
    %c0_i32_0 = arith.constant 0 : i32
    return %c0_i32, %arg0 : i32, i32
  }
}

module attributes {stable_mosaic.version = 11 : i64} {
  func.func @_mm_bn_kernel(%arg0: i32, %arg1: memref<32x32xbf16, #tpu.memory_space<vmem>>, %arg2: memref<32x512xbf16, #tpu.memory_space<vmem>>, %arg3: memref<32x1xf32, #tpu.memory_space<vmem>>, %arg4: memref<32x1xf32, #tpu.memory_space<vmem>>, %arg5: memref<32x512xf32, #tpu.memory_space<vmem>>) attributes {dimension_semantics = [#tpu.dimension_semantics<parallel>], iteration_bounds = array<i64: 1>, scalar_prefetch = 0 : i64, scratch_operands = 0 : i64, tpu.core_type = #tpu.core_type<tc>, window_params = [{pipeline_mode = #tpu.pipeline_mode<synchronous>, transform_indices = @transform_0, window_bounds = array<i64: 32, 32>}, {transform_indices = @transform_1, window_bounds = array<i64: 32, 512>}, {pipeline_mode = #tpu.pipeline_mode<synchronous>, transform_indices = @transform_2, window_bounds = array<i64: 32, 1>}, {pipeline_mode = #tpu.pipeline_mode<synchronous>, transform_indices = @transform_3, window_bounds = array<i64: 32, 1>}, {transform_indices = @transform_4, window_bounds = array<i64: 32, 512>}]} {
    %c0 = arith.constant 0 : index
    %c0_0 = arith.constant 0 : index
    %0 = vector.load %arg1[%c0, %c0_0] : memref<32x32xbf16, #tpu.memory_space<vmem>>, vector<32x32xbf16>
    %c0_1 = arith.constant 0 : index
    %c0_2 = arith.constant 0 : index
    %1 = vector.load %arg2[%c0_1, %c0_2] : memref<32x512xbf16, #tpu.memory_space<vmem>>, vector<32x512xbf16>
    %cst = arith.constant dense<0.000000e+00> : vector<32x512xf32>
    %2 = tpu.matmul %0, %1, %cst {dimension_numbers = #tpu.dot_dimension_numbers<[1], [0], [0], [1], [0, 0, 1, 1], [], []>} : vector<32x32xbf16>, vector<32x512xbf16>, vector<32x512xf32> -> vector<32x512xf32>
    %c0_3 = arith.constant 0 : index
    %c0_4 = arith.constant 0 : index
    %3 = vector.load %arg3[%c0_3, %c0_4] : memref<32x1xf32, #tpu.memory_space<vmem>>, vector<32x1xf32>
    %4 = vector.broadcast %3 : vector<32x1xf32> to vector<32x512xf32>
    %5 = arith.mulf %2, %4 : vector<32x512xf32>
    %c0_5 = arith.constant 0 : index
    %c0_6 = arith.constant 0 : index
    %6 = vector.load %arg4[%c0_5, %c0_6] : memref<32x1xf32, #tpu.memory_space<vmem>>, vector<32x1xf32>
    %7 = vector.broadcast %6 : vector<32x1xf32> to vector<32x512xf32>
    %8 = arith.addf %5, %7 : vector<32x512xf32>
    %c0_7 = arith.constant 0 : index
    %c0_8 = arith.constant 0 : index
    %9 = vector.load %arg5[%c0_7, %c0_8] : memref<32x512xf32, #tpu.memory_space<vmem>>, vector<32x512xf32>
    tpu.vector_store %arg5[%c0_7, %c0_8], %8 {strides = array<i32>} : memref<32x512xf32, #tpu.memory_space<vmem>>, vector<32x512xf32>,
    return
  }
  func.func @transform_0(%arg0: i32) -> (i32, i32) {
    %c0_i32 = arith.constant 0 : i32
    %c0_i32_0 = arith.constant 0 : i32
    %c0_i32_1 = arith.constant 0 : i32
    return %c0_i32, %c0_i32_0 : i32, i32
  }
  func.func @transform_1(%arg0: i32) -> (i32, i32) {
    %c0_i32 = arith.constant 0 : i32
    %c0_i32_0 = arith.constant 0 : i32
    return %c0_i32, %arg0 : i32, i32
  }
  func.func @transform_2(%arg0: i32) -> (i32, i32) {
    %c0_i32 = arith.constant 0 : i32
    %c0_i32_0 = arith.constant 0 : i32
    %c0_i32_1 = arith.constant 0 : i32
    return %c0_i32, %c0_i32_0 : i32, i32
  }
  func.func @transform_3(%arg0: i32) -> (i32, i32) {
    %c0_i32 = arith.constant 0 : i32
    %c0_i32_0 = arith.constant 0 : i32
    %c0_i32_1 = arith.constant 0 : i32
    return %c0_i32, %c0_i32_0 : i32, i32
  }
  func.func @transform_4(%arg0: i32) -> (i32, i32) {
    %c0_i32 = arith.constant 0 : i32
    %c0_i32_0 = arith.constant 0 : i32
    return %c0_i32, %arg0 : i32, i32
  }
}

module attributes {stable_mosaic.version = 11 : i64} {
  func.func @_mm_bn_res_kernel(%arg0: i32, %arg1: memref<32x1728xbf16, #tpu.memory_space<vmem>>, %arg2: memref<1728x512xbf16, #tpu.memory_space<vmem>>, %arg3: memref<32x1xf32, #tpu.memory_space<vmem>>, %arg4: memref<32x1xf32, #tpu.memory_space<vmem>>, %arg5: memref<32x512xf32, #tpu.memory_space<vmem>>, %arg6: memref<32x512xf32, #tpu.memory_space<vmem>>) attributes {dimension_semantics = [#tpu.dimension_semantics<parallel>], iteration_bounds = array<i64: 1>, scalar_prefetch = 0 : i64, scratch_operands = 0 : i64, tpu.core_type = #tpu.core_type<tc>, window_params = [{pipeline_mode = #tpu.pipeline_mode<synchronous>, transform_indices = @transform_0, window_bounds = array<i64: 32, 1728>}, {transform_indices = @transform_1, window_bounds = array<i64: 1728, 512>}, {pipeline_mode = #tpu.pipeline_mode<synchronous>, transform_indices = @transform_2, window_bounds = array<i64: 32, 1>}, {pipeline_mode = #tpu.pipeline_mode<synchronous>, transform_indices = @transform_3, window_bounds = array<i64: 32, 1>}, {transform_indices = @transform_4, window_bounds = array<i64: 32, 512>}, {transform_indices = @transform_5, window_bounds = array<i64: 32, 512>}]} {
    %c0 = arith.constant 0 : index
    %c0_0 = arith.constant 0 : index
    %0 = vector.load %arg1[%c0, %c0_0] : memref<32x1728xbf16, #tpu.memory_space<vmem>>, vector<32x1728xbf16>
    %c0_1 = arith.constant 0 : index
    %c0_2 = arith.constant 0 : index
    %1 = vector.load %arg2[%c0_1, %c0_2] : memref<1728x512xbf16, #tpu.memory_space<vmem>>, vector<1728x512xbf16>
    %cst = arith.constant dense<0.000000e+00> : vector<32x512xf32>
    %2 = tpu.matmul %0, %1, %cst {dimension_numbers = #tpu.dot_dimension_numbers<[1], [0], [0], [1], [0, 0, 1, 1], [], []>} : vector<32x1728xbf16>, vector<1728x512xbf16>, vector<32x512xf32> -> vector<32x512xf32>
    %c0_3 = arith.constant 0 : index
    %c0_4 = arith.constant 0 : index
    %3 = vector.load %arg3[%c0_3, %c0_4] : memref<32x1xf32, #tpu.memory_space<vmem>>, vector<32x1xf32>
    %4 = vector.broadcast %3 : vector<32x1xf32> to vector<32x512xf32>
    %5 = arith.mulf %2, %4 : vector<32x512xf32>
    %c0_5 = arith.constant 0 : index
    %c0_6 = arith.constant 0 : index
    %6 = vector.load %arg4[%c0_5, %c0_6] : memref<32x1xf32, #tpu.memory_space<vmem>>, vector<32x1xf32>
    %7 = vector.broadcast %6 : vector<32x1xf32> to vector<32x512xf32>
    %8 = arith.addf %5, %7 : vector<32x512xf32>
    %c0_7 = arith.constant 0 : index
    %c0_8 = arith.constant 0 : index
    %9 = vector.load %arg5[%c0_7, %c0_8] : memref<32x512xf32, #tpu.memory_space<vmem>>, vector<32x512xf32>
    %10 = arith.addf %8, %9 : vector<32x512xf32>
    %cst_9 = arith.constant 0.000000e+00 : f32
    %11 = vector.broadcast %cst_9 : f32 to vector<32x512xf32>
    %12 = arith.maximumf %10, %11 : vector<32x512xf32>
    %c0_10 = arith.constant 0 : index
    %c0_11 = arith.constant 0 : index
    %13 = vector.load %arg6[%c0_10, %c0_11] : memref<32x512xf32, #tpu.memory_space<vmem>>, vector<32x512xf32>
    tpu.vector_store %arg6[%c0_10, %c0_11], %12 {strides = array<i32>} : memref<32x512xf32, #tpu.memory_space<vmem>>, vector<32x512xf32>,
    return
  }
  func.func @transform_0(%arg0: i32) -> (i32, i32) {
    %c0_i32 = arith.constant 0 : i32
    %c0_i32_0 = arith.constant 0 : i32
    %c0_i32_1 = arith.constant 0 : i32
    return %c0_i32, %c0_i32_0 : i32, i32
  }
  func.func @transform_1(%arg0: i32) -> (i32, i32) {
    %c0_i32 = arith.constant 0 : i32
    %c0_i32_0 = arith.constant 0 : i32
    return %c0_i32, %arg0 : i32, i32
  }
  func.func @transform_2(%arg0: i32) -> (i32, i32) {
    %c0_i32 = arith.constant 0 : i32
    %c0_i32_0 = arith.constant 0 : i32
    %c0_i32_1 = arith.constant 0 : i32
    return %c0_i32, %c0_i32_0 : i32, i32
  }
  func.func @transform_3(%arg0: i32) -> (i32, i32) {
    %c0_i32 = arith.constant 0 : i32
    %c0_i32_0 = arith.constant 0 : i32
    %c0_i32_1 = arith.constant 0 : i32
    return %c0_i32, %c0_i32_0 : i32, i32
  }
  func.func @transform_4(%arg0: i32) -> (i32, i32) {
    %c0_i32 = arith.constant 0 : i32
    %c0_i32_0 = arith.constant 0 : i32
    return %c0_i32, %arg0 : i32, i32
  }
  func.func @transform_5(%arg0: i32) -> (i32, i32) {
    %c0_i32 = arith.constant 0 : i32
    %c0_i32_0 = arith.constant 0 : i32
    return %c0_i32, %arg0 : i32, i32
  }
}

</mosaic_0001>

<bundles_post_ra>
// kernel: cva_forward.15
= control target key start
LH: loop header
LB: loop body
LE: loop exit
PB: predicated region body
PF: predicated region fallthrough
CT: control target
= control target key end

     0   :  { %v1098_v54 = vmov 0   ;;  %vm536_vm0 = vcmask 785408   ;;  %s1406_s1 = inlined_call_operand.vmem [shape: bf16[864,128], index: 1, kind: input, shape index: {}]   ;;  %s1407_s0 = inlined_call_operand.vmem [shape: bf16[32,864], index: 0, kind: input, shape index: {}]   ;;  %s1408_s2 = inlined_call_operand.vmem [shape: f32[32,1], index: 2, kind: input, shape index: {}]   ;;  %s1409_s3 = inlined_call_operand.vmem [shape: f32[32,1], index: 3, kind: input, shape index: {}]   ;;  %s1410_s4 = inlined_call_operand.vmem [shape: f32[32,128], index: 4, kind: output, shape index: {}]  }
   0x1   :  { %v1039_v0 = vld [vmem:[%s1406_s1 + $0x38] sm:$0xff]  ;;  %v1038_v4 = vld [vmem:[%s1406_s1 + $0x30] sm:$0xff]  ;;  %v1037_v8 = vld [vmem:[%s1406_s1 + $0x28] sm:$0xff]  ;;  %1096 = vset.pattern.permute.xlu1 %v1098_v54  ;;  %1095 = vset.pattern.permute.xlu0 %v1098_v54 }
   0x2   :  { %v1047_v1 = vld [vmem:[%s1406_s1 + $0x78] sm:$0xff]  ;;  %543 = vmatpush.bf16.msra.mxu0 %v1039_v0  ;;  %v1046_v5 = vld [vmem:[%s1406_s1 + $0x70] sm:$0xff]  ;;  %v1045_v9 = vld [vmem:[%s1406_s1 + $0x68] sm:$0xff]  ;;  %1097 = vset.pattern.permute.xlu2 %v1098_v54 }
   0x3   :  { %v1055_v2 = vld [vmem:[%s1406_s1 + $0xb8] sm:$0xff]  ;;  %562 = vmatpush.bf16.msra.mxu1 %v1047_v1  ;;  %v1054_v6 = vld [vmem:[%s1406_s1 + $0xb0] sm:$0xff]  ;;  %v1053_v10 = vld [vmem:[%s1406_s1 + $0xa8] sm:$0xff] }
   0x4   :  { %v1063_v3 = vld [vmem:[%s1406_s1 + $0xf8] sm:$0xff]  ;;  %581 = vmatpush.bf16.msra.mxu2 %v1055_v2  ;;  %v1062_v7 = vld [vmem:[%s1406_s1 + $0xf0] sm:$0xff]  ;;  %v1061_v11 = vld [vmem:[%s1406_s1 + $0xe8] sm:$0xff] }
   0x5   :  { %600 = vmatpush.bf16.msra.mxu3 %v1063_v3  ;;  %v1036_v12 = vld [vmem:[%s1406_s1 + $0x20] sm:$0xff]  ;;  %v1035_v16 = vld [vmem:[%s1406_s1 + $0x18] sm:$0xff]  ;;  %v1034_v20 = vld [vmem:[%s1406_s1 + $0x10] sm:$0xff] }
   0x6   :  { %544 = vmatpush.bf16.msra.mxu0 %v1038_v4  ;;  %v1044_v13 = vld [vmem:[%s1406_s1 + $0x60] sm:$0xff]  ;;  %v1043_v17 = vld [vmem:[%s1406_s1 + $0x58] sm:$0xff]  ;;  %v1042_v21 = vld [vmem:[%s1406_s1 + $0x50] sm:$0xff] }
   0x7   :  { %563 = vmatpush.bf16.msra.mxu1 %v1046_v5  ;;  %v1052_v14 = vld [vmem:[%s1406_s1 + $0xa0] sm:$0xff]  ;;  %v1051_v18 = vld [vmem:[%s1406_s1 + $0x98] sm:$0xff]  ;;  %v1050_v22 = vld [vmem:[%s1406_s1 + $0x90] sm:$0xff] }
   0x8   :  { %582 = vmatpush.bf16.msra.mxu2 %v1054_v6  ;;  %v1060_v15 = vld [vmem:[%s1406_s1 + $0xe0] sm:$0xff]  ;;  %v1059_v19 = vld [vmem:[%s1406_s1 + $0xd8] sm:$0xff]  ;;  %v1058_v23 = vld [vmem:[%s1406_s1 + $0xd0] sm:$0xff] }
   0x9   :  { %601 = vmatpush.bf16.msra.mxu3 %v1062_v7  ;;  %v1033_v24 = vld [vmem:[%s1406_s1 + $0x8] sm:$0xff]  ;;  %v1032_v28 = vld [vmem:[%s1406_s1] sm:$0xff]  ;;  %v1021_v33 = vld [vmem:[%s1407_s0 + $0x18] sm:$0xf0] }
   0xa   :  { %545 = vmatpush.bf16.msra.mxu0 %v1037_v8  ;;  %v1041_v25 = vld [vmem:[%s1406_s1 + $0x48] sm:$0xff]  ;;  %v1040_v29 = vld [vmem:[%s1406_s1 + $0x40] sm:$0xff]  ;;  %v1071_v41 = vld [vmem:[%s1406_s1 + $0x138] sm:$0xff] }
   0xb   :  { %564 = vmatpush.bf16.msra.mxu1 %v1045_v9  ;;  %v1049_v26 = vld [vmem:[%s1406_s1 + $0x88] sm:$0xff]  ;;  %v1048_v30 = vld [vmem:[%s1406_s1 + $0x80] sm:$0xff]  ;;  %v1079_v46 = vld [vmem:[%s1406_s1 + $0x178] sm:$0xff] }
   0xc   :  { %583 = vmatpush.bf16.msra.mxu2 %v1053_v10  ;;  %v1057_v27 = vld [vmem:[%s1406_s1 + $0xc8] sm:$0xff]  ;;  %v1056_v31 = vld [vmem:[%s1406_s1 + $0xc0] sm:$0xff]  ;;  %v1070_v47 = vld [vmem:[%s1406_s1 + $0x130] sm:$0xff] }
   0xd   :  { %602 = vmatpush.bf16.msra.mxu3 %v1061_v11  ;;  %v746_v32 = vld [vmem:[%s1407_s0] sm:$0xf]  ;;  %v1018_v34 = vld [vmem:[%s1407_s0 + $0x4] sm:$0xf]  ;;  %v754_v36 = vld [vmem:[%s1407_s0 + $0x8] sm:$0xf] }
   0xe   :  { %546 = vmatpush.bf16.msra.mxu0 %v1036_v12  ;;  %v748_v35 = vld [vmem:[%s1407_s0 + $0x1c] sm:$0xf0]  ;;  %v1022_v37 = vld [vmem:[%s1407_s0 + $0x20] sm:$0xf0]  ;;  %v1019_v38 = vld [vmem:[%s1407_s0 + $0xc] sm:$0xf]  ;;  %v747_v42 = vor.u32 %v1021_v33, %v746_v32 }
   0xf   :  { %565 = vmatpush.bf16.msra.mxu1 %v1044_v13  ;;  %v756_v39 = vld [vmem:[%s1407_s0 + $0x24] sm:$0xf0]  ;;  %v751_v43 = vor.u32 %v1018_v34, %v748_v35  ;;  %v755_v44 = vor.u32 %v1022_v37, %v754_v36  ;;  %v1084_v48 = vld [vmem:[%s1406_s1 + $0x1a0] sm:$0xff]  ;;  %v1078_v49 = vld [vmem:[%s1406_s1 + $0x170] sm:$0xff] }
  0x10   :  { %584 = vmatpush.bf16.msra.mxu2 %v1052_v14  ;;  %v1085_v40 = vld [vmem:[%s1406_s1 + $0x1a8] sm:$0xff]  ;;  %v759_v45 = vor.u32 %v1019_v38, %v756_v39  ;;  %v678_v50 = vld [vmem:[%s1408_s2 + $0x10] sm:$0xff]  ;;  %v676_v51 = vld [vmem:[%s1408_s2] sm:$0xff] }
  0x11   :  { %603 = vmatpush.bf16.msra.mxu3 %v1060_v15  ;;  %v1069_v52 = vld [vmem:[%s1406_s1 + $0x128] sm:$0xff]  ;;  %v1083_v53 = vld [vmem:[%s1406_s1 + $0x198] sm:$0xff]  ;;  %692 = vperm.xlu1 %1096, %v678_v50   ;;  %v1068_v56 = vld [vmem:[%s1406_s1 + $0x120] sm:$0xff] }
  0x12   :  { %547 = vmatpush.bf16.msra.mxu0 %v1035_v16  ;;  %682 = vperm.xlu0 %1095, %v676_v51   ;;  %v1077_v55 = vld [vmem:[%s1406_s1 + $0x168] sm:$0xff]  ;;  %v1082_v57 = vld [vmem:[%s1406_s1 + $0x190] sm:$0xff]  ;;  %v1076_v58 = vld [vmem:[%s1406_s1 + $0x160] sm:$0xff] }
  0x13   :  { %566 = vmatpush.bf16.msra.mxu1 %v1043_v17  ;;  %v774_v59 = vld [vmem:[%s1407_s0 + $0x38] sm:$0xf]  ;;  %v1028_v60 = vld [vmem:[%s1407_s0 + $0x50] sm:$0xf0]  ;;  %v1025_v61 = vld [vmem:[%s1407_s0 + $0x3c] sm:$0xf] }
  0x14   :  { %585 = vmatpush.bf16.msra.mxu2 %v1051_v18  ;;  %v776_v62 = vld [vmem:[%s1407_s0 + $0x54] sm:$0xf0]  ;;  %v782_v63 = vld [vmem:[%s1407_s0 + $0x40] sm:$0xf]  ;;  %v1029_v0 = vld [vmem:[%s1407_s0 + $0x58] sm:$0xf0]  ;;  %v775_v5 = vor.u32 %v1028_v60, %v774_v59 }
  0x15   :  { %604 = vmatpush.bf16.msra.mxu3 %v1059_v19  ;;  %v1026_v1 = vld [vmem:[%s1407_s0 + $0x44] sm:$0xf]  ;;  %v784_v2 = vld [vmem:[%s1407_s0 + $0x5c] sm:$0xf0]  ;;  %v1067_v3 = vld [vmem:[%s1406_s1 + $0x118] sm:$0xff]  ;;  %v779_v6 = vor.u32 %v1025_v61, %v776_v62  ;;  %v783_v7 = vor.u32 %v1029_v0, %v782_v63 }
  0x16   :  { %548 = vmatpush.bf16.msra.mxu0 %v1034_v20  ;;  %v1081_v4 = vld [vmem:[%s1406_s1 + $0x188] sm:$0xff]  ;;  %v787_v8 = vor.u32 %v1026_v1, %v784_v2  ;;  %v1075_v9 = vld [vmem:[%s1406_s1 + $0x158] sm:$0xff]  ;;  %v1066_v10 = vld [vmem:[%s1406_s1 + $0x110] sm:$0xff] }
  0x17   :  { %567 = vmatpush.bf16.msra.mxu1 %v1042_v21  ;;  %v1080_v11 = vld [vmem:[%s1406_s1 + $0x180] sm:$0xff]  ;;  %v1074_v12 = vld [vmem:[%s1406_s1 + $0x150] sm:$0xff]  ;;  %v679_v13 = vld [vmem:[%s1408_s2 + $0x18] sm:$0xff] }
  0x18   :  { %586 = vmatpush.bf16.msra.mxu2 %v1050_v22  ;;  %v677_v14 = vld [vmem:[%s1408_s2 + $0x8] sm:$0xff]  ;;  %v704_v16 = vld [vmem:[%s1409_s3] sm:$0xff]  ;;  %v762_v20 = vld [vmem:[%s1407_s0 + $0x10] sm:$0xf] }
  0x19   :  { %605 = vmatpush.bf16.msra.mxu3 %v1058_v23  ;;  %v1065_v15 = vld [vmem:[%s1406_s1 + $0x108] sm:$0xff]  ;;  %697 = vperm.xlu1 %1096, %v679_v13   ;;  %v1064_v18 = vld [vmem:[%s1406_s1 + $0x100] sm:$0xff]  ;;  %v798_v37 = vld [vmem:[%s1407_s0 + $0x50] sm:$0xf] }
  0x1a   :  { %549 = vmatpush.bf16.msra.mxu0 %v1033_v24  ;;  %687 = vperm.xlu0 %1095, %v677_v14   ;;  %v1073_v17 = vld [vmem:[%s1406_s1 + $0x148] sm:$0xff]  ;;  %v1072_v19 = vld [vmem:[%s1406_s1 + $0x140] sm:$0xff]  ;;  %v707_v24 = vld [vmem:[%s1409_s3 + $0x18] sm:$0xff] }
  0x1b   :  { %568 = vmatpush.bf16.msra.mxu1 %v1041_v25  ;;  %710 = vperm.xlu2 %1097, %v704_v16   ;;  %v1023_v21 = vld [vmem:[%s1407_s0 + $0x28] sm:$0xf0]  ;;  %v790_v22 = vld [vmem:[%s1407_s0 + $0x48] sm:$0xf]  ;;  %v1030_v23 = vld [vmem:[%s1407_s0 + $0x60] sm:$0xf0] }
  0x1c   :  { %587 = vmatpush.bf16.msra.mxu2 %v1049_v26  ;;  %v706_v25 = vld [vmem:[%s1409_s3 + $0x10] sm:$0xff]  ;;  %v791_v32 = vor.u32 %v1030_v23, %v790_v22  ;;  %v1027_v35 = vld [vmem:[%s1407_s0 + $0x4c] sm:$0xf]  ;;  %v792_v36 = vld [vmem:[%s1407_s0 + $0x64] sm:$0xf0] }
  0x1d   :  { %606 = vmatpush.bf16.msra.mxu3 %v1057_v27  ;;  %v1020_v26 = vld [vmem:[%s1407_s0 + $0x14] sm:$0xf]  ;;  %v764_v27 = vld [vmem:[%s1407_s0 + $0x2c] sm:$0xf0]  ;;  %v1031_v38 = vld [vmem:[%s1407_s0 + $0x68] sm:$0xf0]  ;;  %v795_v39 = vor.u32 %v1027_v35, %v792_v36 }
  0x1e   :  { %550 = vmatpush.bf16.msra.mxu0 %v1032_v28  ;;  %v705_v28 = vld [vmem:[%s1409_s3 + $0x8] sm:$0xff]  ;;  %v767_v33 = vor.u32 %v1020_v26, %v764_v27 }
  0x1f   :  { %569 = vmatpush.bf16.msra.mxu1 %v1040_v29  ;;  %v770_v29 = vld [vmem:[%s1407_s0 + $0x18] sm:$0xf] }
  0x20   :  { %588 = vmatpush.bf16.msra.mxu2 %v1048_v30  ;;  %v1024_v30 = vld [vmem:[%s1407_s0 + $0x30] sm:$0xf0] }
  0x21   :  { %607 = vmatpush.bf16.msra.mxu3 %v1056_v31  ;;  %551 = vmatmul.bf16.vlgmr.msra.gmra.mxu0 %v747_v42  ;;  %v763_v31 = vor.u32 %v1023_v21, %v762_v20  ;;  %v771_v34 = vor.u32 %v1024_v30, %v770_v29 }
  0x22   :  { %619 = vmatpush.bf16.msrb.mxu0 %v1071_v41  ;;  %570 = vmatmul.bf16.vlgmr.msra.gmra.mxu1 %v751_v43 }
  0x23   :  { %589 = vmatmul.bf16.vlgmr.msra.gmra.mxu2 %v755_v44  ;;  %638 = vmatpush.bf16.msrb.mxu1 %v1079_v46 }
  0x24   :  { %659 = vmatpush.bf16.msrb.mxu2 %v1085_v40  ;;  %608 = vmatmul.bf16.vlgmr.msra.gmra.mxu3 %v759_v45  ;;  %v799_v40 = vor.u32 %v1031_v38, %v798_v37 }
  0x25   :  { %1086 = vmatpush.bf16.msrb.mxu3 %v1071_v41  ;;  %725 = vperm.xlu1 %1096, %v707_v24  }
  0x26   :  { %620 = vmatpush.bf16.msrb.mxu0 %v1070_v47  ;;  %720 = vperm.xlu0 %1095, %v706_v25  }
  0x27   :  { %639 = vmatpush.bf16.msrb.mxu1 %v1078_v49  ;;  %715 = vperm.xlu2 %1097, %v705_v28  }
  0x28   :  { %660 = vmatpush.bf16.msrb.mxu2 %v1084_v48 }
  0x29   :  { %1087 = vmatpush.bf16.msrb.mxu3 %v1070_v47 }
  0x2a   :  { %621 = vmatpush.bf16.msrb.mxu0 %v1069_v52 }
  0x2b   :  { %640 = vmatpush.bf16.msrb.mxu1 %v1077_v55 }
  0x2c   :  { %661 = vmatpush.bf16.msrb.mxu2 %v1083_v53 }
  0x2d   :  { %1088 = vmatpush.bf16.msrb.mxu3 %v1069_v52 }
  0x2e   :  { %622 = vmatpush.bf16.msrb.mxu0 %v1068_v56 }
  0x2f   :  { %641 = vmatpush.bf16.msrb.mxu1 %v1076_v58 }
  0x30   :  { %662 = vmatpush.bf16.msrb.mxu2 %v1082_v57 }
  0x31   :  { %1089 = vmatpush.bf16.msrb.mxu3 %v1068_v56  ;;  %556 = vmatmul.bf16.gmra.mxu0 %v775_v5 }
  0x32   :  { %623 = vmatpush.bf16.msrb.mxu0 %v1067_v3  ;;  %575 = vmatmul.bf16.gmra.mxu1 %v779_v6 }
  0x33   :  { %594 = vmatmul.bf16.gmra.mxu2 %v783_v7  ;;  %642 = vmatpush.bf16.msrb.mxu1 %v1075_v9 }
  0x34   :  { %663 = vmatpush.bf16.msrb.mxu2 %v1081_v4  ;;  %613 = vmatmul.bf16.gmra.mxu3 %v787_v8 }
  0x35   :  { %1090 = vmatpush.bf16.msrb.mxu3 %v1067_v3 }
  0x36   :  { %624 = vmatpush.bf16.msrb.mxu0 %v1066_v10 }
  0x37   :  { %643 = vmatpush.bf16.msrb.mxu1 %v1074_v12 }
  0x38   :  { %664 = vmatpush.bf16.msrb.mxu2 %v1080_v11 }
  0x39   :  { %1091 = vmatpush.bf16.msrb.mxu3 %v1066_v10 }
  0x3a   :  { %625 = vmatpush.bf16.msrb.mxu0 %v1065_v15 }
  0x3b   :  { %644 = vmatpush.bf16.msrb.mxu1 %v1073_v17 }
  0x3d   :  { %1092 = vmatpush.bf16.msrb.mxu3 %v1065_v15 }
  0x3e   :  { %626 = vmatpush.bf16.msrb.mxu0 %v1064_v18 }
  0x3f   :  { %645 = vmatpush.bf16.msrb.mxu1 %v1072_v19 }
  0x41   :  { %1093 = vmatpush.bf16.msrb.mxu3 %v1064_v18  ;;  %627 = vmatmul.bf16.vlgmr.msrb.gmra.mxu0 %v763_v31 }
  0x42   :  { %646 = vmatmul.bf16.vlgmr.msrb.gmra.mxu1 %v767_v33 }
  0x43   :  { %1016 = vmatmul.msk.bf16.vlgmr.msrb.gmra.mxu2 %vm536_vm0, %v771_v34 }
  0x44   :  { %632 = vmatmul.bf16.vlgmr.msrb.gmra.mxu3 %v791_v32 }
  0x52   :  { %651 = vmatmul.bf16.gmra.mxu1 %v795_v39 }
  0x53   :  { %1017 = vmatmul.msk.bf16.gmra.mxu2 %vm536_vm0, %v799_v40 }
  0x75   :  { %v711_v3 = vpop.permute.xlu2 %710 }
  0x81   :  { %v716_v22 = vpop.permute.xlu2 %715 }
  0x83   :  { %v693_v14 = vpop.permute.xlu1 %692 }
  0x84   :  { %v683_v2 = vpop.permute.xlu0 %682 }
  0x8b   :  { %v698_v33 = vpop.permute.xlu1 %697 }
  0x8c   :  { %v688_v19 = vpop.permute.xlu0 %687 }
  0x98   :  { %v721_v37 = vpop.permute.xlu0 %720 }
  0x9e   :  { %v552_v41 = vpop.f32.mrf.mxu0 }
  0x9f   :  { %v571_v42 = vpop.f32.mrf.mxu1 }
  0xa0   :  { %v572_v54 = vadd.f32 %v571_v42, %v552_v41 }
  0xa6   :  { %v590_v43 = vpop.f32.mrf.mxu2  ;;  %v554_v45 = vpop.f32.mrf.mxu0 }
  0xa7   :  { %v609_v44 = vpop.f32.mrf.mxu3  ;;  %v573_v46 = vpop.f32.mrf.mxu1  ;;  %v591_v56 = vadd.f32 %v590_v43, %v572_v54 }
  0xa8   :  { %v574_v61 = vadd.f32 %v573_v46, %v554_v45  ;;  %v726_v46 = vpop.permute.xlu1 %725 }
  0xa9   :  { %v610_v59 = vadd.f32 %v609_v44, %v591_v56 }
  0xae   :  { %v592_v47 = vpop.f32.mrf.mxu2  ;;  %v557_v48 = vpop.f32.mrf.mxu0 }
  0xaf   :  { %v576_v49 = vpop.f32.mrf.mxu1  ;;  %v611_v50 = vpop.f32.mrf.mxu3  ;;  %v593_v63 = vadd.f32 %v592_v47, %v574_v61 }
  0xb0   :  { %v577_v9 = vadd.f32 %v576_v49, %v557_v48 }
  0xb1   :  { %v612_v6 = vadd.f32 %v611_v50, %v593_v63 }
  0xb6   :  { %v595_v51 = vpop.f32.mrf.mxu2  ;;  %v559_v52 = vpop.f32.mrf.mxu0 }
  0xb7   :  { %v578_v53 = vpop.f32.mrf.mxu1  ;;  %v614_v55 = vpop.f32.mrf.mxu3  ;;  %v596_v13 = vadd.f32 %v595_v51, %v577_v9 }
  0xb8   :  { %v579_v25 = vadd.f32 %v578_v53, %v559_v52 }
  0xb9   :  { %v615_v23 = vadd.f32 %v614_v55, %v596_v13 }
  0xbe   :  { %v597_v57 = vpop.f32.mrf.mxu2  ;;  %v628_v58 = vpop.f32.mrf.mxu0 }
  0xbf   :  { %v647_v60 = vpop.f32.mrf.mxu1  ;;  %v629_v62 = vadd.f32 %v628_v58, %v610_v59  ;;  %v616_v0 = vpop.f32.mrf.mxu3  ;;  %v598_v28 = vadd.f32 %v597_v57, %v579_v25 }
  0xc1   :  { %v648_v1 = vadd.f32 %v647_v60, %v629_v62  ;;  %v617_v35 = vadd.f32 %v616_v0, %v598_v28 }
  0xc6   :  { %v666_v4 = vpop.f32.mrf.mxu2  ;;  %v630_v5 = vpop.f32.mrf.mxu0 }
  0xc7   :  { %v667_v7 = vadd.f32 %v666_v4, %v648_v1  ;;  %v649_v8 = vpop.f32.mrf.mxu1  ;;  %v631_v10 = vadd.f32 %v630_v5, %v612_v6  ;;  %v633_v17 = vpop.f32.mrf.mxu3 }
  0xc8   :  { %v634_v26 = vadd.f32 %v633_v17, %v615_v23 }
  0xc9   :  { %v700_v11 = vmul.f32 %v683_v2, %v667_v7  ;;  %v650_v15 = vadd.f32 %v649_v8, %v631_v10 }
  0xcb   :  { %v728_v12 = vadd.f32 %v711_v3, %v700_v11 }
  0xcd   :  { %v732_v16 = vmax.f32 %v728_v12, 0.0 }
  0xce   :  { %v668_v18 = vpop.f32.mrf.mxu2 }
  0xcf   :  { %736 = vst [vmem:[%s1410_s4] sm:$0xff] %v732_v16  ;;  %v669_v20 = vadd.f32 %v668_v18, %v650_v15  ;;  %v652_v21 = vpop.f32.mrf.mxu1  ;;  %v635_v34 = vpop.f32.mrf.mxu3 }
  0xd0   :  { %v653_v29 = vadd.f32 %v652_v21, %v634_v26  ;;  %v636_v39 = vadd.f32 %v635_v34, %v617_v35 }
  0xd1   :  { %v701_v24 = vmul.f32 %v688_v19, %v669_v20 }
  0xd3   :  { %v729_v27 = vadd.f32 %v716_v22, %v701_v24 }
  0xd5   :  { %v733_v30 = vmax.f32 %v729_v27, 0.0 }
  0xd6   :  { %v671_v31 = vpop.f32.mrf.mxu2 }
  0xd7   :  { %737 = vst [vmem:[%s1410_s4 + $0x8] sm:$0xff] %v733_v30  ;;  %v672_v32 = vadd.f32 %v671_v31, %v653_v29  ;;  %v654_v38 = vpop.f32.mrf.mxu1 }
  0xd8   :  { %v655_v42 = vadd.f32 %v654_v38, %v636_v39 }
  0xd9   :  { %v702_v36 = vmul.f32 %v693_v14, %v672_v32 }
  0xdb   :  { %v730_v40 = vadd.f32 %v721_v37, %v702_v36 }
  0xdd   :  { %v734_v41 = vmax.f32 %v730_v40, 0.0 }
  0xde   :  { %v673_v43 = vpop.f32.mrf.mxu2 }
  0xdf   :  { %738 = vst [vmem:[%s1410_s4 + $0x10] sm:$0xff] %v734_v41  ;;  %v674_v44 = vadd.f32 %v673_v43, %v655_v42 }
  0xe1   :  { %v703_v45 = vmul.f32 %v698_v33, %v674_v44 }
  0xe3   :  { %v731_v47 = vadd.f32 %v726_v46, %v703_v45 }
  0xe5   :  { %v735_v48 = vmax.f32 %v731_v47, 0.0 }
  0xe7   :  { %739 = vst [vmem:[%s1410_s4 + $0x18] sm:$0xff] %v735_v48 }

// kernel: cva_forward.18
= control target key start
LH: loop header
LB: loop body
LE: loop exit
PB: predicated region body
PF: predicated region fallthrough
CT: control target
= control target key end

     0   :  { %vm12_vm0 = vcmask 125952   ;;  %v33_v7 = vlaneseq  ;;  %vm92_vm1 = vcmask 261120   ;;  %vm133_vm2 = vcmask 1041409   ;;  %s210_s0 = inlined_call_operand.vmem [shape: f32[1,4,16], index: 0, kind: input, shape index: {}]   ;;  %s211_s1 = inlined_call_operand.vmem [shape: f32[1,4,16,32], index: 1, kind: input, shape index: {}]   ;;  %s212_s2 = inlined_call_operand.vmem [shape: f32[1,4,32], index: 2, kind: output, shape index: {}]  }
   0x1   :  { %v11_v0 = vld [vmem:[%s210_s0] sm:$0xf]  ;;  %v27_v19 = vld [vmem:[%s211_s1 + $0x18] sm:$0xff]  ;;  %v26_v22 = vld [vmem:[%s211_s1 + $0x10] sm:$0xff]  ;;  %vm135_vm3 = vcmask 1042434   ;;  %vm137_vm4 = vcmask 1043459  }
   0x2   :  { %v13_v1 = vsel %vm12_vm0, %v11_v0, -inf  ;;  %v34_v8 = vshrl.u32 %v33_v7, 7  ;;  %v24_v21 = vld [vmem:[%s211_s1] sm:$0xff]  ;;  %v25_v23 = vld [vmem:[%s211_s1 + $0x8] sm:$0xff]  ;;  %v30_v45 = vld [vmem:[%s211_s1 + $0x30] sm:$0xff]  ;;  %vm140_vm5 = vcmask 257024  }
   0x3   :  { %14 = vmax.xlane.f32.xlu0 %v13_v1  ;;  %v28_v32 = vld [vmem:[%s211_s1 + $0x20] sm:$0xff]  ;;  %v29_v37 = vld [vmem:[%s211_s1 + $0x28] sm:$0xff]  ;;  %v31_v51 = vld [vmem:[%s211_s1 + $0x38] sm:$0xff] }
   0x4   :  { %150 = vset.pattern.permute.xlu0 %v34_v8  ;;  %148 = vset.pattern.permute.xlu2 %v34_v8  ;;  %v41_v15 = vadd.s32 8, %v34_v8 }
   0x5   :  { %146 = vset.pattern.permute.xlu1 %v34_v8 }
  0x76   :  { %v15_v2 = vpop.xlane.xlu0 %14 }
  0x77   :  { %v16_v3 = vsub.f32 %v11_v0, %v15_v2 }
  0x79   :  { %v17_v4 = vmul.f32 1.442695, %v16_v3 }
  0x7b   :  { %153 = vpow2.f32 %v17_v4 }
  0x81   :  { %v154_v5 = vpop.eup %153 }
  0x82   :  { %v19_v6 = vsel %vm12_vm0, %v154_v5, 0.0 }
  0x83   :  { %20 = vadd.xlane.f32.xlu0 %v19_v6 }
  0xf6   :  { %v21_v9 = vpop.xlane.xlu0 %20 }
  0xf7   :  { %155 = vrcp.f32 %v21_v9 }
  0xfd   :  { %v156_v10 = vpop.eup %155 }
  0xfe   :  { %v23_v11 = vmul.f32 %v156_v10, %v154_v5 }
 0x100   :  { %v58_v12 = vperm.slane %v23_v11, 2  ;;  %v45_v13 = vperm.slane %v23_v11, 1  ;;  %v32_v14 = vperm.slane %v23_v11, 0  ;;  %v71_v16 = vperm.slane %v23_v11, 3 }
 0x102   :  { %63 = vperm.xlu0 %150, %v58_v12   ;;  %50 = vperm.xlu2 %148, %v45_v13  }
 0x103   :  { %37 = vperm.xlu1 %146, %v32_v14  }
 0x10a   :  { %149 = vset.pattern.permute.xlu2 %v41_v15  ;;  %152 = vset.pattern.permute.xlu0 %v41_v15 }
 0x10b   :  { %147 = vset.pattern.permute.xlu1 %v41_v15 }
 0x112   :  { %56 = vperm.xlu2 %149, %v45_v13  }
 0x113   :  { %43 = vperm.xlu1 %147, %v32_v14  }
 0x11a   :  { %151 = vset.pattern.permute.xlu2 %v34_v8 }
 0x11b   :  { %69 = vperm.xlu1 %147, %v58_v12  }
 0x122   :  { %76 = vperm.xlu2 %151, %v71_v16  }
 0x123   :  { %82 = vperm.xlu1 %147, %v71_v16  }
 0x15c   :  { %v51_v17 = vpop.permute.xlu2 %50 }
 0x15d   :  { %v86_v27 = vmul.f32 %v51_v17, %v26_v22 }
 0x15f   :  { %v102_v35 = vsel %vm92_vm1, %v86_v27, 0.0 }
 0x16c   :  { %v57_v20 = vpop.permute.xlu2 %56 }
 0x16d   :  { %v87_v24 = vmul.f32 %v57_v20, %v27_v19 }
 0x16f   :  { %v103_v29 = vsel %vm92_vm1, %v87_v24, 0.0 }
 0x170   :  { %v104_v36 = vadd.f32 %v103_v29, %v102_v35 }
 0x172   :  { %v105_v42 = vrot.slane %v104_v36, 4 }
 0x174   :  { %v64_v33 = vpop.permute.xlu0 %63  ;;  %v106_v49 = vadd.f32 %v105_v42, %v104_v36 }
 0x175   :  { %v38_v18 = vpop.permute.xlu1 %37  ;;  %v88_v38 = vmul.f32 %v64_v33, %v28_v32 }
 0x176   :  { %v84_v25 = vmul.f32 %v38_v18, %v24_v21  ;;  %v107_v57 = vrot.slane %v106_v49, 2 }
 0x177   :  { %v111_v43 = vsel %vm92_vm1, %v88_v38, 0.0 }
 0x178   :  { %v93_v30 = vsel %vm92_vm1, %v84_v25, 0.0  ;;  %v108_v0 = vadd.f32 %v107_v57, %v106_v49 }
 0x17a   :  { %v109_v5 = vrot.slane %v108_v0, 1 }
 0x17c   :  { %v77_v46 = vpop.permute.xlu2 %76  ;;  %v110_v10 = vadd.f32 %v109_v5, %v108_v0 }
 0x17d   :  { %v90_v52 = vmul.f32 %v77_v46, %v30_v45 }
 0x17f   :  { %v120_v59 = vsel %vm92_vm1, %v90_v52, 0.0 }
 0x185   :  { %v44_v26 = vpop.permute.xlu1 %43 }
 0x186   :  { %v85_v28 = vmul.f32 %v44_v26, %v25_v23 }
 0x188   :  { %v94_v31 = vsel %vm92_vm1, %v85_v28, 0.0 }
 0x189   :  { %v95_v34 = vadd.f32 %v94_v31, %v93_v30 }
 0x18b   :  { %v96_v39 = vrot.slane %v95_v34, 4 }
 0x18d   :  { %v70_v40 = vpop.permute.xlu1 %69  ;;  %v97_v47 = vadd.f32 %v96_v39, %v95_v34 }
 0x18e   :  { %v89_v41 = vmul.f32 %v70_v40, %v29_v37 }
 0x18f   :  { %v98_v53 = vrot.slane %v97_v47, 2 }
 0x190   :  { %v112_v44 = vsel %vm92_vm1, %v89_v41, 0.0 }
 0x191   :  { %v113_v48 = vadd.f32 %v112_v44, %v111_v43  ;;  %v99_v61 = vadd.f32 %v98_v53, %v97_v47 }
 0x193   :  { %v114_v50 = vrot.slane %v113_v48, 4  ;;  %v100_v2 = vrot.slane %v99_v61, 1 }
 0x195   :  { %v115_v54 = vadd.f32 %v114_v50, %v113_v48  ;;  %v83_v55 = vpop.permute.xlu1 %82  ;;  %v101_v7 = vadd.f32 %v100_v2, %v99_v61 }
 0x196   :  { %v91_v56 = vmul.f32 %v83_v55, %v31_v51 }
 0x197   :  { %v116_v58 = vrot.slane %v115_v54, 2  ;;  %v134_v12 = vsel %vm133_vm2, %v110_v10, %v101_v7 }
 0x198   :  { %v121_v60 = vsel %vm92_vm1, %v91_v56, 0.0 }
 0x199   :  { %v122_v62 = vadd.f32 %v121_v60, %v120_v59  ;;  %v117_v63 = vadd.f32 %v116_v58, %v115_v54 }
 0x19b   :  { %v123_v1 = vrot.slane %v122_v62, 4  ;;  %v118_v4 = vrot.slane %v117_v63, 1 }
 0x19d   :  { %v124_v3 = vadd.f32 %v123_v1, %v122_v62  ;;  %v119_v9 = vadd.f32 %v118_v4, %v117_v63 }
 0x19f   :  { %v125_v6 = vrot.slane %v124_v3, 2  ;;  %v136_v14 = vsel %vm135_vm3, %v119_v9, %v134_v12 }
 0x1a1   :  { %v126_v8 = vadd.f32 %v125_v6, %v124_v3 }
 0x1a3   :  { %v127_v11 = vrot.slane %v126_v8, 1 }
 0x1a5   :  { %v128_v13 = vadd.f32 %v127_v11, %v126_v8 }
 0x1a7   :  { %v138_v15 = vsel %vm137_vm4, %v128_v13, %v136_v14 }
 0x1a8   :  { %141 = vst.msk [vmem:[%s212_s2] sm:$0xf] %vm140_vm5, %v138_v15 }

// kernel: cva_forward.17
= control target key start
LH: loop header
LB: loop body
LE: loop exit
PB: predicated region body
PF: predicated region fallthrough
CT: control target
= control target key end

     0   :  { %v858_v36 = vmov 0   ;;  %vm470_vm0 = vcmask 785408   ;;  %s1058_s1 = inlined_call_operand.vmem [shape: bf16[864,128], index: 1, kind: input, shape index: {}]   ;;  %s1059_s0 = inlined_call_operand.vmem [shape: bf16[1,864], index: 0, kind: input, shape index: {}]   ;;  %s1060_s2 = inlined_call_operand.<no memory space> [shape: f32[1,1], index: 2, kind: input, shape index: {}]   ;;  %s1061_s3 = inlined_call_operand.<no memory space> [shape: f32[1,1], index: 3, kind: input, shape index: {}]   ;;  %s1062_s4 = inlined_call_operand.vmem [shape: f32[1,128], index: 4, kind: output, shape index: {}]  }
   0x1   :  { %v809_v0 = vld [vmem:[%s1058_s1 + $0x38] sm:$0xff]  ;;  %v808_v3 = vld [vmem:[%s1058_s1 + $0x30] sm:$0xff]  ;;  %v807_v8 = vld [vmem:[%s1058_s1 + $0x28] sm:$0xff]  ;;  %v9_v28 = vstv %s1060_s2  ;;  %857 = vset.pattern.permute.xlu0 %v858_v36 }
   0x2   :  { %v817_v1 = vld [vmem:[%s1058_s1 + $0x78] sm:$0xff]  ;;  %473 = vmatpush.bf16.msra.mxu0 %v809_v0  ;;  %v816_v4 = vld [vmem:[%s1058_s1 + $0x70] sm:$0xff]  ;;  %v815_v9 = vld [vmem:[%s1058_s1 + $0x68] sm:$0xff]  ;;  %10 = vst [vmem:[#allocation2] sm:$0x1] %v9_v28  ;;  %v11_v42 = vstv %s1061_s3 }
   0x3   :  { %v825_v2 = vld [vmem:[%s1058_s1 + $0xb8] sm:$0xff]  ;;  %486 = vmatpush.bf16.msra.mxu1 %v817_v1  ;;  %v824_v5 = vld [vmem:[%s1058_s1 + $0xb0] sm:$0xff]  ;;  %v823_v10 = vld [vmem:[%s1058_s1 + $0xa8] sm:$0xff]  ;;  %12 = vst [vmem:[#allocation3] sm:$0x1] %v11_v42 }
   0x4   :  { %499 = vmatpush.bf16.msra.mxu2 %v825_v2  ;;  %v833_v6 = vld [vmem:[%s1058_s1 + $0xf8] sm:$0xff]  ;;  %v832_v7 = vld [vmem:[%s1058_s1 + $0xf0] sm:$0xff]  ;;  %v831_v11 = vld [vmem:[%s1058_s1 + $0xe8] sm:$0xff] }
   0x5   :  { %512 = vmatpush.bf16.msra.mxu3 %v833_v6  ;;  %v806_v12 = vld [vmem:[%s1058_s1 + $0x20] sm:$0xff]  ;;  %v805_v17 = vld [vmem:[%s1058_s1 + $0x18] sm:$0xff]  ;;  %v804_v21 = vld [vmem:[%s1058_s1 + $0x10] sm:$0xff] }
   0x6   :  { %474 = vmatpush.bf16.msra.mxu0 %v808_v3  ;;  %v814_v13 = vld [vmem:[%s1058_s1 + $0x60] sm:$0xff]  ;;  %v813_v18 = vld [vmem:[%s1058_s1 + $0x58] sm:$0xff]  ;;  %v812_v22 = vld [vmem:[%s1058_s1 + $0x50] sm:$0xff] }
   0x7   :  { %487 = vmatpush.bf16.msra.mxu1 %v816_v4  ;;  %v822_v14 = vld [vmem:[%s1058_s1 + $0xa0] sm:$0xff]  ;;  %v821_v19 = vld [vmem:[%s1058_s1 + $0x98] sm:$0xff]  ;;  %v820_v23 = vld [vmem:[%s1058_s1 + $0x90] sm:$0xff] }
   0x8   :  { %500 = vmatpush.bf16.msra.mxu2 %v824_v5  ;;  %v22_v15 = vld [vmem:[%s1059_s0] sm:$0x7f]  ;;  %v829_v20 = vld [vmem:[%s1058_s1 + $0xd8] sm:$0xff]  ;;  %v828_v24 = vld [vmem:[%s1058_s1 + $0xd0] sm:$0xff] }
   0x9   :  { %513 = vmatpush.bf16.msra.mxu3 %v832_v7  ;;  %132 = vst [vmem:[#allocation1] ss:$9 sm:$0xff] %v22_v15  ;;  %v830_v16 = vld [vmem:[%s1058_s1 + $0xe0] sm:$0xff]  ;;  %v803_v25 = vld [vmem:[%s1058_s1 + $0x8] sm:$0xff]  ;;  %v841_v33 = vld [vmem:[%s1058_s1 + $0x138] sm:$0xff] }
   0xa   :  { %475 = vmatpush.bf16.msra.mxu0 %v807_v8  ;;  %v811_v26 = vld [vmem:[%s1058_s1 + $0x48] sm:$0xff]  ;;  %v802_v30 = vld [vmem:[%s1058_s1] sm:$0xff]  ;;  %v849_v34 = vld [vmem:[%s1058_s1 + $0x178] sm:$0xff] }
   0xb   :  { %488 = vmatpush.bf16.msra.mxu1 %v815_v9  ;;  %v819_v27 = vld [vmem:[%s1058_s1 + $0x88] sm:$0xff]  ;;  %v810_v31 = vld [vmem:[%s1058_s1 + $0x40] sm:$0xff]  ;;  %v840_v41 = vld [vmem:[%s1058_s1 + $0x130] sm:$0xff] }
   0xc   :  { %501 = vmatpush.bf16.msra.mxu2 %v823_v10  ;;  %v827_v29 = vld [vmem:[%s1058_s1 + $0xc8] sm:$0xff]  ;;  %v818_v32 = vld [vmem:[%s1058_s1 + $0x80] sm:$0xff]  ;;  %v848_v43 = vld [vmem:[%s1058_s1 + $0x170] sm:$0xff] }
   0xd   :  { %514 = vmatpush.bf16.msra.mxu3 %v831_v11  ;;  %v855_v35 = vld [vmem:[%s1058_s1 + $0x1a8] sm:$0xff]  ;;  %v826_v39 = vld [vmem:[%s1058_s1 + $0xc0] sm:$0xff]  ;;  %v853_v49 = vld [vmem:[%s1058_s1 + $0x198] sm:$0xff] }
   0xe   :  { %476 = vmatpush.bf16.msra.mxu0 %v806_v12  ;;  %v854_v44 = vld [vmem:[%s1058_s1 + $0x1a0] sm:$0xff]  ;;  %v564_v45 = vld [vmem:[#allocation2] sm:$0x1]  ;;  %v852_v52 = vld [vmem:[%s1058_s1 + $0x190] sm:$0xff] }
   0xf   :  { %489 = vmatpush.bf16.msra.mxu1 %v814_v13  ;;  %v839_v47 = vld [vmem:[%s1058_s1 + $0x128] sm:$0xff]  ;;  %567 = vperm.xlu0 %857, %v564_v45   ;;  %v838_v50 = vld [vmem:[%s1058_s1 + $0x120] sm:$0xff]  ;;  %v837_v54 = vld [vmem:[%s1058_s1 + $0x118] sm:$0xff] }
  0x10   :  { %502 = vmatpush.bf16.msra.mxu2 %v822_v14  ;;  %v133_v37 = vld [vmem:[#allocation1] sm:$0xff]  ;;  %v134_v38 = vld [vmem:[#allocation1 + $0x9] sm:$0xff]  ;;  %v135_v40 = vld [vmem:[#allocation1 + $0x12] sm:$0xff] }
  0x11   :  { %515 = vmatpush.bf16.msra.mxu3 %v830_v16  ;;  %v136_v46 = vld [vmem:[#allocation1 + $0x1b] sm:$0xff]  ;;  %v847_v48 = vld [vmem:[%s1058_s1 + $0x168] sm:$0xff]  ;;  %v836_v57 = vld [vmem:[%s1058_s1 + $0x110] sm:$0xff] }
  0x12   :  { %477 = vmatpush.bf16.msra.mxu0 %v805_v17  ;;  %v846_v51 = vld [vmem:[%s1058_s1 + $0x160] sm:$0xff]  ;;  %v572_v53 = vld [vmem:[#allocation3] sm:$0x1]  ;;  %v845_v55 = vld [vmem:[%s1058_s1 + $0x158] sm:$0xff] }
  0x13   :  { %490 = vmatpush.bf16.msra.mxu1 %v813_v18  ;;  %v851_v56 = vld [vmem:[%s1058_s1 + $0x188] sm:$0xff]  ;;  %v844_v58 = vld [vmem:[%s1058_s1 + $0x150] sm:$0xff]  ;;  %v850_v59 = vld [vmem:[%s1058_s1 + $0x180] sm:$0xff] }
  0x14   :  { %503 = vmatpush.bf16.msra.mxu2 %v821_v19  ;;  %v835_v60 = vld [vmem:[%s1058_s1 + $0x108] sm:$0xff]  ;;  %v139_v61 = vld [vmem:[#allocation1 + $0x36] sm:$0xff]  ;;  %v834_v63 = vld [vmem:[%s1058_s1 + $0x100] sm:$0xff] }
  0x15   :  { %516 = vmatpush.bf16.msra.mxu3 %v829_v20  ;;  %v843_v62 = vld [vmem:[%s1058_s1 + $0x148] sm:$0xff]  ;;  %v842_v0 = vld [vmem:[%s1058_s1 + $0x140] sm:$0xff] }
  0x16   :  { %478 = vmatpush.bf16.msra.mxu0 %v804_v21  ;;  %v137_v1 = vld [vmem:[#allocation1 + $0x24] sm:$0xff]  ;;  %v138_v2 = vld [vmem:[#allocation1 + $0x2d] sm:$0xff] }
  0x17   :  { %491 = vmatpush.bf16.msra.mxu1 %v812_v22  ;;  %575 = vperm.xlu0 %857, %v572_v53  }
  0x18   :  { %504 = vmatpush.bf16.msra.mxu2 %v820_v23 }
  0x19   :  { %517 = vmatpush.bf16.msra.mxu3 %v828_v24 }
  0x1a   :  { %479 = vmatpush.bf16.msra.mxu0 %v803_v25 }
  0x1b   :  { %492 = vmatpush.bf16.msra.mxu1 %v811_v26 }
  0x1c   :  { %505 = vmatpush.bf16.msra.mxu2 %v819_v27 }
  0x1d   :  { %518 = vmatpush.bf16.msra.mxu3 %v827_v29 }
  0x1e   :  { %480 = vmatpush.bf16.msra.mxu0 %v802_v30 }
  0x1f   :  { %493 = vmatpush.bf16.msra.mxu1 %v810_v31 }
  0x20   :  { %506 = vmatpush.bf16.msra.mxu2 %v818_v32 }
  0x21   :  { %481 = vmatmul.bf16.vlgmr.msra.gmra.mxu0 %v133_v37  ;;  %519 = vmatpush.bf16.msra.mxu3 %v826_v39 }
  0x22   :  { %525 = vmatpush.bf16.msrb.mxu0 %v841_v33  ;;  %494 = vmatmul.bf16.vlgmr.msra.gmra.mxu1 %v134_v38 }
  0x23   :  { %538 = vmatpush.bf16.msrb.mxu1 %v849_v34  ;;  %507 = vmatmul.bf16.vlgmr.msra.gmra.mxu2 %v135_v40 }
  0x24   :  { %553 = vmatpush.bf16.msrb.mxu2 %v855_v35  ;;  %520 = vmatmul.bf16.vlgmr.msra.gmra.mxu3 %v136_v46 }
  0x26   :  { %526 = vmatpush.bf16.msrb.mxu0 %v840_v41 }
  0x27   :  { %539 = vmatpush.bf16.msrb.mxu1 %v848_v43 }
  0x28   :  { %554 = vmatpush.bf16.msrb.mxu2 %v854_v44 }
  0x2a   :  { %527 = vmatpush.bf16.msrb.mxu0 %v839_v47 }
  0x2b   :  { %540 = vmatpush.bf16.msrb.mxu1 %v847_v48 }
  0x2c   :  { %555 = vmatpush.bf16.msrb.mxu2 %v853_v49 }
  0x2e   :  { %528 = vmatpush.bf16.msrb.mxu0 %v838_v50 }
  0x2f   :  { %541 = vmatpush.bf16.msrb.mxu1 %v846_v51 }
  0x30   :  { %556 = vmatpush.bf16.msrb.mxu2 %v852_v52 }
  0x32   :  { %529 = vmatpush.bf16.msrb.mxu0 %v837_v54 }
  0x33   :  { %542 = vmatpush.bf16.msrb.mxu1 %v845_v55 }
  0x34   :  { %557 = vmatpush.bf16.msrb.mxu2 %v851_v56 }
  0x36   :  { %530 = vmatpush.bf16.msrb.mxu0 %v836_v57 }
  0x37   :  { %543 = vmatpush.bf16.msrb.mxu1 %v844_v58 }
  0x38   :  { %558 = vmatpush.bf16.msrb.mxu2 %v850_v59 }
  0x3a   :  { %531 = vmatpush.bf16.msrb.mxu0 %v835_v60 }
  0x3b   :  { %801 = vmatmul.msk.bf16.vlgmr.msrb.gmra.mxu2 %vm470_vm0, %v139_v61  ;;  %544 = vmatpush.bf16.msrb.mxu1 %v843_v62 }
  0x3e   :  { %532 = vmatpush.bf16.msrb.mxu0 %v834_v63 }
  0x3f   :  { %545 = vmatpush.bf16.msrb.mxu1 %v842_v0 }
  0x41   :  { %533 = vmatmul.bf16.vlgmr.msrb.gmra.mxu0 %v137_v1 }
  0x42   :  { %546 = vmatmul.bf16.vlgmr.msrb.gmra.mxu1 %v138_v2 }
  0x81   :  { %v568_v12 = vpop.permute.xlu0 %567 }
  0x82   :  { %v570_v21 = vperm.slane %v568_v12, 0 }
  0x89   :  { %v576_v20 = vpop.permute.xlu0 %575 }
  0x8a   :  { %v578_v23 = vperm.slane %v576_v20, 0 }
  0x9e   :  { %v482_v3 = vpop.f32.mrf.mxu0 }
  0x9f   :  { %v495_v4 = vpop.f32.mrf.mxu1 }
  0xa0   :  { %v496_v11 = vadd.f32 %v495_v4, %v482_v3 }
  0xa6   :  { %v508_v5 = vpop.f32.mrf.mxu2  ;;  %v484_v6 = vpop.f32.mrf.mxu0 }
  0xa7   :  { %v497_v7 = vpop.f32.mrf.mxu1  ;;  %v521_v8 = vpop.f32.mrf.mxu3  ;;  %v509_v13 = vadd.f32 %v508_v5, %v496_v11 }
  0xa9   :  { %v522_v14 = vadd.f32 %v521_v8, %v509_v13 }
  0xae   :  { %v510_v9 = vpop.f32.mrf.mxu2 }
  0xaf   :  { %v523_v10 = vpop.f32.mrf.mxu3 }
  0xbe   :  { %v560_v15 = vpop.f32.mrf.mxu2  ;;  %v534_v16 = vpop.f32.mrf.mxu0 }
  0xbf   :  { %v535_v17 = vadd.f32 %v534_v16, %v522_v14  ;;  %v547_v18 = vpop.f32.mrf.mxu1 }
  0xc1   :  { %v548_v19 = vadd.f32 %v547_v18, %v535_v17 }
  0xc3   :  { %v561_v22 = vadd.f32 %v560_v15, %v548_v19 }
  0xc5   :  { %v571_v24 = vmul.f32 %v570_v21, %v561_v22 }
  0xc6   :  { %v562_v25 = vpop.f32.mrf.mxu2  ;;  %v536_v26 = vpop.f32.mrf.mxu0 }
  0xc7   :  { %v579_v27 = vadd.f32 %v578_v23, %v571_v24  ;;  %v549_v28 = vpop.f32.mrf.mxu1 }
  0xc9   :  { %580 = vst [vmem:[%s1062_s4] sm:$0x1] %v579_v27 }

// kernel: cva_forward.20
= control target key start
LH: loop header
LB: loop body
LE: loop exit
PB: predicated region body
PF: predicated region fallthrough
CT: control target
= control target key end

     0   :  { %v294_v0 = vmov 0   ;;  %vm57_vm0 = vcmask 261120   ;;  %s417_s3 = inlined_call_operand.vmem [shape: f32[32,1], index: 3, kind: input, shape index: {}]   ;;  %s418_s2 = inlined_call_operand.vmem [shape: f32[32,1], index: 2, kind: input, shape index: {}]   ;;  %s419_s1 = inlined_call_operand.vmem [shape: bf16[32,128], index: 1, kind: input, shape index: {}]   ;;  %s420_s0 = inlined_call_operand.vmem [shape: bf16[32,32], index: 0, kind: input, shape index: {}]   ;;  %s421_s5 = inlined_call_operand.vmem [shape: f32[32,1], index: 5, kind: input, shape index: {}]   ;;  %s422_s6 = inlined_call_operand.vmem [shape: f32[32,1], index: 6, kind: input, shape index: {}]   ;;  %s423_s4 = inlined_call_operand.vmem [shape: bf16[32,32], index: 4, kind: input, shape index: {}]   ;;  %s424_s7 = inlined_call_operand.vmem [shape: f32[32,128], index: 7, kind: output, shape index: {}]  }
   0x1   :  { %292 = vset.pattern.permute.xlu1 %v294_v0  ;;  %291 = vset.pattern.permute.xlu0 %v294_v0  ;;  %v113_v1 = vld [vmem:[%s417_s3 + $0x10] sm:$0xff]  ;;  %v283_v3 = vld [vmem:[%s419_s1 + $0x8] sm:$0xff]  ;;  %v282_v4 = vld [vmem:[%s419_s1] sm:$0xff] }
   0x2   :  { %v85_v2 = vld [vmem:[%s418_s2 + $0x10] sm:$0xff]  ;;  %127 = vperm.xlu1 %292, %v113_v1   ;;  %70 = vmatpush.bf16.msra.mxu0 %v283_v3  ;;  %v83_v5 = vld [vmem:[%s418_s2] sm:$0xff]  ;;  %v114_v6 = vld [vmem:[%s417_s3 + $0x18] sm:$0xff] }
   0x3   :  { %99 = vperm.xlu0 %291, %v85_v2   ;;  %286 = vmatpush.bf16.msra.mxu2 %v283_v3  ;;  %v86_v7 = vld [vmem:[%s418_s2 + $0x18] sm:$0xff]  ;;  %v280_v8 = vld [vmem:[%s420_s0] sm:$0xff]  ;;  %v281_v9 = vld [vmem:[%s420_s0 + $0x8] sm:$0xff] }
   0x4   :  { %293 = vset.pattern.permute.xlu2 %v294_v0  ;;  %v84_v10 = vld [vmem:[%s418_s2 + $0x8] sm:$0xff]  ;;  %v111_v12 = vld [vmem:[%s417_s3] sm:$0xff]  ;;  %v186_v14 = vld [vmem:[%s421_s5 + $0x10] sm:$0xff] }
   0x5   :  { %89 = vperm.xlu2 %293, %v83_v5   ;;  %v112_v11 = vld [vmem:[%s417_s3 + $0x8] sm:$0xff]  ;;  %v184_v13 = vld [vmem:[%s421_s5] sm:$0xff]  ;;  %v187_v16 = vld [vmem:[%s421_s5 + $0x18] sm:$0xff] }
   0x6   :  { %71 = vmatpush.bf16.msra.mxu0 %v282_v4  ;;  %v185_v15 = vld [vmem:[%s421_s5 + $0x8] sm:$0xff]  ;;  %v212_v18 = vld [vmem:[%s422_s6] sm:$0xff]  ;;  %v214_v19 = vld [vmem:[%s422_s6 + $0x10] sm:$0xff] }
   0x7   :  { %287 = vmatpush.bf16.msra.mxu2 %v282_v4  ;;  %v213_v17 = vld [vmem:[%s422_s6 + $0x8] sm:$0xff]  ;;  %v215_v20 = vld [vmem:[%s422_s6 + $0x18] sm:$0xff]  ;;  %v284_v47 = vld [vmem:[%s423_s4] sm:$0xff] }
   0x8   :  { %v285_v48 = vld [vmem:[%s423_s4 + $0x8] sm:$0xff] }
   0x9   :  { %268 = vmatmul.msk.bf16.vlgmr.msra.gmra.mxu0 %vm57_vm0, %v280_v8 }
   0xa   :  { %132 = vperm.xlu1 %292, %v114_v6   ;;  %269 = vmatmul.msk.bf16.vlgmr.msra.gmra.mxu2 %vm57_vm0, %v281_v9 }
   0xb   :  { %104 = vperm.xlu0 %291, %v86_v7  }
   0xd   :  { %94 = vperm.xlu2 %293, %v84_v10  }
  0x12   :  { %122 = vperm.xlu1 %292, %v112_v11  }
  0x13   :  { %117 = vperm.xlu0 %291, %v111_v12  }
  0x15   :  { %190 = vperm.xlu2 %293, %v184_v13  }
  0x1a   :  { %200 = vperm.xlu1 %292, %v186_v14  }
  0x1b   :  { %195 = vperm.xlu0 %291, %v185_v15  }
  0x1d   :  { %205 = vperm.xlu2 %293, %v187_v16  }
  0x22   :  { %223 = vperm.xlu1 %292, %v213_v17  }
  0x23   :  { %218 = vperm.xlu0 %291, %v212_v18  }
  0x25   :  { %228 = vperm.xlu2 %293, %v214_v19  }
  0x2b   :  { %233 = vperm.xlu0 %291, %v215_v20  }
  0x5f   :  { %v90_v24 = vpop.permute.xlu2 %89 }
  0x67   :  { %v95_v30 = vpop.permute.xlu2 %94 }
  0x6f   :  { %v191_v49 = vpop.permute.xlu2 %190 }
  0x74   :  { %v128_v21 = vpop.permute.xlu1 %127 }
  0x75   :  { %v100_v22 = vpop.permute.xlu0 %99 }
  0x77   :  { %v206_v51 = vpop.permute.xlu2 %205 }
  0x7c   :  { %v133_v25 = vpop.permute.xlu1 %132 }
  0x7d   :  { %v105_v27 = vpop.permute.xlu0 %104 }
  0x7f   :  { %v229_v60 = vpop.permute.xlu2 %228 }
  0x84   :  { %v123_v36 = vpop.permute.xlu1 %122 }
  0x85   :  { %v118_v39 = vpop.permute.xlu0 %117 }
  0x86   :  { %v73_v23 = vpop.f32.mrf.mxu0 }
  0x87   :  { %v107_v33 = vmul.f32 %v90_v24, %v73_v23 }
  0x89   :  { %v135_v40 = vadd.f32 %v118_v39, %v107_v33 }
  0x8b   :  { %v139_v45 = vmax.f32 %v135_v40, 0.0 }
  0x8c   :  { %v201_v52 = vpop.permute.xlu1 %200 }
  0x8d   :  { %v78_v26 = vpop.f32.mrf.mxu2  ;;  %v196_v50 = vpop.permute.xlu0 %195 }
  0x8e   :  { %v75_v28 = vpop.f32.mrf.mxu0  ;;  %v109_v29 = vmul.f32 %v100_v22, %v78_v26 }
  0x8f   :  { %v108_v31 = vmul.f32 %v95_v30, %v75_v28 }
  0x90   :  { %v137_v34 = vadd.f32 %v128_v21, %v109_v29 }
  0x91   :  { %v136_v37 = vadd.f32 %v123_v36, %v108_v31 }
  0x92   :  { %v141_v41 = vmax.f32 %v137_v34, 0.0 }
  0x93   :  { %v140_v43 = vmax.f32 %v136_v37, 0.0 }
  0x94   :  { %v224_v0 = vpop.permute.xlu1 %223 }
  0x95   :  { %v80_v32 = vpop.f32.mrf.mxu2  ;;  %v147_v46 = vpack.c.bf16 %v140_v43, %v139_v45  ;;  %v219_v55 = vpop.permute.xlu0 %218 }
  0x96   :  { %v110_v35 = vmul.f32 %v105_v27, %v80_v32 }
  0x98   :  { %v138_v38 = vadd.f32 %v133_v25, %v110_v35 }
  0x9a   :  { %v142_v42 = vmax.f32 %v138_v38, 0.0 }
  0x9c   :  { %v148_v44 = vpack.c.bf16 %v142_v42, %v141_v41 }
  0x9d   :  { %v234_v6 = vpop.permute.xlu0 %233 }
  0x9e   :  { %171 = vmatpush.bf16.msra.mxu1 %v148_v44  ;;  %288 = vmatpush.bf16.msra.mxu3 %v148_v44 }
  0xa2   :  { %172 = vmatpush.bf16.msra.mxu1 %v147_v46  ;;  %289 = vmatpush.bf16.msra.mxu3 %v147_v46 }
  0xa5   :  { %278 = vmatmul.msk.bf16.vlgmr.msra.gmra.mxu1 %vm57_vm0, %v284_v47  ;;  %279 = vmatmul.msk.bf16.vlgmr.msra.gmra.mxu3 %vm57_vm0, %v285_v48 }
 0x122   :  { %v174_v53 = vpop.f32.mrf.mxu1 }
 0x123   :  { %v208_v54 = vmul.f32 %v191_v49, %v174_v53 }
 0x125   :  { %v236_v56 = vadd.f32 %v219_v55, %v208_v54 }
 0x127   :  { %v240_v57 = vmax.f32 %v236_v56, 0.0 }
 0x128   :  { %v179_v58 = vpop.f32.mrf.mxu3 }
 0x129   :  { %244 = vst [vmem:[%s424_s7] sm:$0xff] %v240_v57  ;;  %v210_v59 = vmul.f32 %v201_v52, %v179_v58 }
 0x12a   :  { %v176_v61 = vpop.f32.mrf.mxu1 }
 0x12b   :  { %v238_v62 = vadd.f32 %v229_v60, %v210_v59  ;;  %v209_v63 = vmul.f32 %v196_v50, %v176_v61 }
 0x12d   :  { %v242_v1 = vmax.f32 %v238_v62, 0.0  ;;  %v237_v2 = vadd.f32 %v224_v0, %v209_v63 }
 0x12f   :  { %246 = vst [vmem:[%s424_s7 + $0x10] sm:$0xff] %v242_v1  ;;  %v241_v3 = vmax.f32 %v237_v2, 0.0 }
 0x130   :  { %v181_v4 = vpop.f32.mrf.mxu3 }
 0x131   :  { %245 = vst [vmem:[%s424_s7 + $0x8] sm:$0xff] %v241_v3  ;;  %v211_v5 = vmul.f32 %v206_v51, %v181_v4 }
 0x133   :  { %v239_v7 = vadd.f32 %v234_v6, %v211_v5 }
 0x135   :  { %v243_v8 = vmax.f32 %v239_v7, 0.0 }
 0x137   :  { %247 = vst [vmem:[%s424_s7 + $0x18] sm:$0xff] %v243_v8 }

// kernel: cva_forward.21
= control target key start
LH: loop header
LB: loop body
LE: loop exit
PB: predicated region body
PF: predicated region fallthrough
CT: control target
= control target key end

     0   :  { %v170_v0 = vmov 0   ;;  %vm48_vm0 = vcmask 261120   ;;  %s244_s2 = inlined_call_operand.vmem [shape: f32[32,1], index: 2, kind: input, shape index: {}]   ;;  %s245_s1 = inlined_call_operand.vmem [shape: bf16[32,128], index: 1, kind: input, shape index: {}]   ;;  %s246_s3 = inlined_call_operand.vmem [shape: f32[32,1], index: 3, kind: input, shape index: {}]   ;;  %s247_s0 = inlined_call_operand.vmem [shape: bf16[32,32], index: 0, kind: input, shape index: {}]   ;;  %s248_s4 = inlined_call_operand.vmem [shape: f32[32,128], index: 4, kind: output, shape index: {}]  }
   0x1   :  { %168 = vset.pattern.permute.xlu1 %v170_v0  ;;  %167 = vset.pattern.permute.xlu0 %v170_v0  ;;  %v76_v1 = vld [vmem:[%s244_s2 + $0x10] sm:$0xff]  ;;  %v74_v2 = vld [vmem:[%s244_s2] sm:$0xff]  ;;  %v163_v3 = vld [vmem:[%s245_s1 + $0x8] sm:$0xff] }
   0x2   :  { %90 = vperm.xlu1 %168, %v76_v1   ;;  %80 = vperm.xlu0 %167, %v74_v2   ;;  %v162_v4 = vld [vmem:[%s245_s1] sm:$0xff]  ;;  %v77_v6 = vld [vmem:[%s244_s2 + $0x18] sm:$0xff]  ;;  %v75_v7 = vld [vmem:[%s244_s2 + $0x8] sm:$0xff] }
   0x3   :  { %61 = vmatpush.bf16.msra.mxu0 %v163_v3  ;;  %164 = vmatpush.bf16.msra.mxu1 %v163_v3  ;;  %v102_v5 = vld [vmem:[%s246_s3] sm:$0xff]  ;;  %v161_v9 = vld [vmem:[%s247_s0 + $0x8] sm:$0xff]  ;;  %v105_v11 = vld [vmem:[%s246_s3 + $0x18] sm:$0xff] }
   0x4   :  { %169 = vset.pattern.permute.xlu2 %v170_v0  ;;  %v160_v8 = vld [vmem:[%s247_s0] sm:$0xff]  ;;  %v103_v10 = vld [vmem:[%s246_s3 + $0x8] sm:$0xff]  ;;  %v104_v12 = vld [vmem:[%s246_s3 + $0x10] sm:$0xff] }
   0x5   :  { %108 = vperm.xlu2 %169, %v102_v5  }
   0x7   :  { %62 = vmatpush.bf16.msra.mxu0 %v162_v4  ;;  %165 = vmatpush.bf16.msra.mxu1 %v162_v4 }
   0xa   :  { %95 = vperm.xlu1 %168, %v77_v6   ;;  %85 = vperm.xlu0 %167, %v75_v7  }
   0xb   :  { %158 = vmatmul.msk.bf16.vlgmr.msra.gmra.mxu0 %vm48_vm0, %v160_v8  ;;  %159 = vmatmul.msk.bf16.vlgmr.msra.gmra.mxu1 %vm48_vm0, %v161_v9 }
   0xd   :  { %113 = vperm.xlu2 %169, %v103_v10  }
  0x12   :  { %123 = vperm.xlu1 %168, %v105_v11   ;;  %118 = vperm.xlu0 %167, %v104_v12  }
  0x5f   :  { %v109_v17 = vpop.permute.xlu2 %108 }
  0x67   :  { %v114_v32 = vpop.permute.xlu2 %113 }
  0x74   :  { %v81_v13 = vpop.permute.xlu0 %80  ;;  %v91_v14 = vpop.permute.xlu1 %90 }
  0x7c   :  { %v86_v15 = vpop.permute.xlu0 %85  ;;  %v96_v16 = vpop.permute.xlu1 %95 }
  0x84   :  { %v119_v22 = vpop.permute.xlu0 %118  ;;  %v124_v31 = vpop.permute.xlu1 %123 }
  0x88   :  { %v64_v18 = vpop.f32.mrf.mxu0  ;;  %v69_v19 = vpop.f32.mrf.mxu1 }
  0x89   :  { %v98_v20 = vmul.f32 %v81_v13, %v64_v18  ;;  %v100_v21 = vmul.f32 %v91_v14, %v69_v19 }
  0x8b   :  { %v126_v23 = vadd.f32 %v109_v17, %v98_v20  ;;  %v128_v24 = vadd.f32 %v119_v22, %v100_v21 }
  0x8d   :  { %v130_v25 = vmax.f32 %v126_v23, 0.0  ;;  %v132_v26 = vmax.f32 %v128_v24, 0.0 }
  0x8f   :  { %134 = vst [vmem:[%s248_s4] sm:$0xff] %v130_v25 }
  0x90   :  { %136 = vst [vmem:[%s248_s4 + $0x10] sm:$0xff] %v132_v26  ;;  %v66_v27 = vpop.f32.mrf.mxu0  ;;  %v71_v28 = vpop.f32.mrf.mxu1 }
  0x91   :  { %v99_v29 = vmul.f32 %v86_v15, %v66_v27  ;;  %v101_v30 = vmul.f32 %v96_v16, %v71_v28 }
  0x93   :  { %v127_v33 = vadd.f32 %v114_v32, %v99_v29  ;;  %v129_v34 = vadd.f32 %v124_v31, %v101_v30 }
  0x95   :  { %v131_v35 = vmax.f32 %v127_v33, 0.0  ;;  %v133_v36 = vmax.f32 %v129_v34, 0.0 }
  0x97   :  { %135 = vst [vmem:[%s248_s4 + $0x8] sm:$0xff] %v131_v35 }
  0x98   :  { %137 = vst [vmem:[%s248_s4 + $0x18] sm:$0xff] %v133_v36 }

// kernel: cva_forward.22
= control target key start
LH: loop header
LB: loop body
LE: loop exit
PB: predicated region body
PF: predicated region fallthrough
CT: control target
= control target key end

     0   :  { %vm77_vm0 = vcmask 261120   ;;  %v532_v11 = vmov -1e+30   ;;  %v533_v36 = vmov 0.0   ;;  %s592_s1 = inlined_call_operand.vmem [shape: bf16[1,32,128], index: 1, kind: input, shape index: {}]   ;;  %s593_s0 = inlined_call_operand.vmem [shape: bf16[1,32,128], index: 0, kind: input, shape index: {}]   ;;  %s594_s2 = inlined_call_operand.vmem [shape: bf16[1,32,128], index: 2, kind: input, shape index: {}]   ;;  %s595_s3 = inlined_call_operand.vmem [shape: f32[1,32,128], index: 3, kind: output, shape index: {}]  }
   0x1   :  { %v501_v0 = vld [vmem:[%s592_s1] sm:$0xff]  ;;  %v500_v1 = vld [vmem:[%s593_s0 + $0x8] sm:$0xff]  ;;  %19 = vst [vmem:[#allocation2] sm:$0x1] %v532_v11 }
   0x2   :  { %49 = vxpose.xlu0.c.b16.start [1/2] (short) %v501_v0, 128  ;;  %108 = vmatpush.bf16.msra.mxu0 %v500_v1  ;;  %v499_v2 = vld [vmem:[%s593_s0] sm:$0xff]  ;;  %v502_v3 = vld [vmem:[%s592_s1 + $0x8] sm:$0xff]  ;;  %20 = vst [vmem:[#allocation3] sm:$0x1] %v533_v36 }
   0x3   :  { %505 = vmatpush.bf16.msra.mxu2 %v500_v1  ;;  %506 = vmatpush.bf16.msra.mxu3 %v500_v1 }
   0x6   :  { %109 = vmatpush.bf16.msra.mxu0 %v499_v2 }
   0x7   :  { %507 = vmatpush.bf16.msra.mxu2 %v499_v2  ;;  %508 = vmatpush.bf16.msra.mxu3 %v499_v2 }
   0x8   :  { %v266_v49 = vld [vmem:[#allocation2] sm:$0x1] }
  0x12   :  { %50 = vxpose.xlu0.c.b16.end [2/2] (short) %v502_v3, 128 }
  0xae   :  { %v57_v4 = vpop.trf.xlu0 }
  0xaf   :  { %483 = vmatmul.msk.bf16.vlgmr.msra.gmra.mxu0 %vm77_vm0, %v57_v4 }
  0xbe   :  { %v58_v5 = vpop.trf.xlu0 }
  0xbf   :  { %484 = vmatmul.msk.bf16.gmra.mxu0 %vm77_vm0, %v58_v5 }
  0xce   :  { %v59_v6 = vpop.trf.xlu0 }
  0xcf   :  { %485 = vmatmul.msk.bf16.gmra.mxu0 %vm77_vm0, %v59_v6 }
  0xde   :  { %v60_v7 = vpop.trf.xlu0 }
  0xdf   :  { %486 = vmatmul.msk.bf16.vlgmr.msra.gmra.mxu2 %vm77_vm0, %v60_v7 }
  0xee   :  { %v61_v15 = vpop.trf.xlu0 }
  0xef   :  { %487 = vmatmul.msk.bf16.gmra.mxu2 %vm77_vm0, %v61_v15 }
  0xfe   :  { %v62_v35 = vpop.trf.xlu0 }
  0xff   :  { %488 = vmatmul.msk.bf16.gmra.mxu2 %vm77_vm0, %v62_v35  ;;  %v504_v35 = vld [vmem:[%s594_s2 + $0x8] sm:$0xff] }
 0x10e   :  { %v63_v45 = vpop.trf.xlu0 }
 0x10f   :  { %489 = vmatmul.msk.bf16.vlgmr.msra.gmra.mxu3 %vm77_vm0, %v63_v45 }
 0x11e   :  { %v64_v5 = vpop.trf.xlu0 }
 0x11f   :  { %490 = vmatmul.msk.bf16.gmra.mxu3 %vm77_vm0, %v64_v5 }
 0x12c   :  { %v111_v8 = vpop.f32.mrf.mxu0 }
 0x12d   :  { %v151_v21 = vmul.f32 0.17677669, %v111_v8 }
 0x134   :  { %v113_v9 = vpop.f32.mrf.mxu0 }
 0x135   :  { %v152_v18 = vmul.f32 0.17677669, %v113_v9 }
 0x13c   :  { %v116_v10 = vpop.f32.mrf.mxu0 }
 0x13d   :  { %v153_v22 = vmul.f32 0.17677669, %v116_v10 }
 0x144   :  { %v118_v12 = vpop.f32.mrf.mxu0 }
 0x145   :  { %v154_v27 = vmul.f32 0.17677669, %v118_v12 }
 0x14c   :  { %v121_v13 = vpop.f32.mrf.mxu0 }
 0x14d   :  { %v155_v19 = vmul.f32 0.17677669, %v121_v13 }
 0x14f   :  { %v267_v24 = vmax.f32 %v151_v21, %v155_v19 }
 0x151   :  { %v271_v30 = vmax.f32 %v267_v24, -1e+30 }
 0x153   :  { %v275_v37 = vmax.f32 %v271_v30, -1e+30 }
 0x154   :  { %v123_v14 = vpop.f32.mrf.mxu0 }
 0x155   :  { %v156_v17 = vmul.f32 0.17677669, %v123_v14 }
 0x157   :  { %v268_v23 = vmax.f32 %v152_v18, %v156_v17 }
 0x159   :  { %v272_v28 = vmax.f32 %v268_v23, -1e+30 }
 0x15b   :  { %v276_v33 = vmax.f32 %v272_v28, -1e+30 }
 0x15d   :  { %v279_v40 = vmax.f32 %v275_v37, %v276_v33  ;;  %v359_v33 = vld [vmem:[#allocation3] sm:$0x1] }
 0x162   :  { %v126_v16 = vpop.f32.mrf.mxu2 }
 0x163   :  { %v157_v20 = vmul.f32 0.17677669, %v126_v16 }
 0x165   :  { %v269_v25 = vmax.f32 %v153_v22, %v157_v20 }
 0x167   :  { %v273_v31 = vmax.f32 %v269_v25, -1e+30 }
 0x169   :  { %v277_v38 = vmax.f32 %v273_v31, -1e+30 }
 0x16a   :  { %v128_v26 = vpop.f32.mrf.mxu2 }
 0x16b   :  { %v158_v29 = vmul.f32 0.17677669, %v128_v26 }
 0x16d   :  { %v270_v32 = vmax.f32 %v154_v27, %v158_v29 }
 0x16f   :  { %v274_v34 = vmax.f32 %v270_v32, -1e+30 }
 0x171   :  { %v278_v39 = vmax.f32 %v274_v34, -1e+30 }
 0x173   :  { %v280_v41 = vmax.f32 %v277_v38, %v278_v39  ;;  %v131_v39 = vpop.f32.mrf.mxu2 }
 0x175   :  { %v281_v42 = vmax.f32 %v279_v40, %v280_v41 }
 0x177   :  { %v282_v43 = vrot.slane %v281_v42, 4 }
 0x179   :  { %v283_v44 = vmax.f32 %v281_v42, %v282_v43 }
 0x17b   :  { %v284_v46 = vrot.slane %v283_v44, 2  ;;  %v133_v40 = vpop.f32.mrf.mxu2 }
 0x17d   :  { %v285_v47 = vmax.f32 %v283_v44, %v284_v46 }
 0x17f   :  { %v286_v48 = vrot.slane %v285_v47, 1 }
 0x181   :  { %v287_v50 = vmax.f32 %v285_v47, %v286_v48 }
 0x183   :  { %v288_v51 = vmax.f32 %v266_v49, %v287_v50  ;;  %v136_v41 = vpop.f32.mrf.mxu2 }
 0x185   :  { %v293_v52 = vperm.slane %v288_v51, 0  ;;  %442 = vst [vmem:[#allocation2] sm:$0x1] %v288_v51  ;;  %v289_v23 = vsub.f32 %v266_v49, %v288_v51 }
 0x187   :  { %v302_v53 = vsub.f32 %v158_v29, %v293_v52  ;;  %v301_v54 = vsub.f32 %v157_v20, %v293_v52  ;;  %v299_v55 = vsub.f32 %v155_v19, %v293_v52  ;;  %v300_v56 = vsub.f32 %v156_v17, %v293_v52 }
 0x188   :  { %v297_v57 = vsub.f32 %v153_v22, %v293_v52  ;;  %v298_v58 = vsub.f32 %v154_v27, %v293_v52  ;;  %v295_v62 = vsub.f32 %v151_v21, %v293_v52  ;;  %v296_v0 = vsub.f32 %v152_v18, %v293_v52  ;;  %v503_v22 = vld [vmem:[%s594_s2] sm:$0xff] }
 0x189   :  { %v325_v59 = vmul.f32 1.442695, %v302_v53  ;;  %v323_v60 = vmul.f32 1.442695, %v301_v54  ;;  %v319_v61 = vmul.f32 1.442695, %v299_v55 }
 0x18a   :  { %v321_v63 = vmul.f32 1.442695, %v300_v56  ;;  %v315_v1 = vmul.f32 1.442695, %v297_v57  ;;  %v317_v2 = vmul.f32 1.442695, %v298_v58 }
 0x18b   :  { %512 = vpow2.f32 %v325_v59  ;;  %v311_v3 = vmul.f32 1.442695, %v295_v62  ;;  %v313_v4 = vmul.f32 1.442695, %v296_v0  ;;  %v290_v26 = vmul.f32 1.442695, %v289_v23  ;;  %v138_v42 = vpop.f32.mrf.mxu2 }
 0x18c   :  { %514 = vpow2.f32 %v323_v60 }
 0x18d   :  { %516 = vpow2.f32 %v319_v61 }
 0x18e   :  { %518 = vpow2.f32 %v321_v63 }
 0x18f   :  { %520 = vpow2.f32 %v315_v1 }
 0x190   :  { %522 = vpow2.f32 %v317_v2 }
 0x191   :  { %v513_v6 = vpop.eup %512  ;;  %524 = vpow2.f32 %v311_v3 }
 0x192   :  { %v515_v7 = vpop.eup %514  ;;  %526 = vpow2.f32 %v313_v4  ;;  %v141_v43 = vpop.f32.mrf.mxu3 }
 0x193   :  { %v517_v8 = vpop.eup %516  ;;  %v398_v9 = vpack.c.bf16 %v513_v6, %v515_v7  ;;  %528 = vpow2.f32 %v290_v26 }
 0x194   :  { %v519_v10 = vpop.eup %518 }
 0x195   :  { %v521_v11 = vpop.eup %520  ;;  %419 = vmatpush.bf16.msra.mxu1 %v398_v9  ;;  %v397_v14 = vpack.c.bf16 %v519_v10, %v517_v8 }
 0x196   :  { %v523_v12 = vpop.eup %522 }
 0x197   :  { %v525_v13 = vpop.eup %524  ;;  %v396_v17 = vpack.c.bf16 %v523_v12, %v521_v11 }
 0x198   :  { %v527_v15 = vpop.eup %526 }
 0x199   :  { %420 = vmatpush.bf16.msra.mxu1 %v397_v14  ;;  %v361_v16 = vadd.f32 %v527_v15, %v525_v13  ;;  %v395_v21 = vpack.c.bf16 %v527_v15, %v525_v13  ;;  %v529_v32 = vpop.eup %528 }
 0x19a   :  { %v360_v37 = vmul.f32 %v529_v32, %v359_v33  ;;  %v143_v44 = vpop.f32.mrf.mxu3  ;;  %v389_v47 = vperm.slane %v529_v32, 0 }
 0x19b   :  { %v362_v18 = vadd.f32 %v521_v11, %v361_v16 }
 0x19c   :  { %v391_v50 = vmul.f32 0.0, %v389_v47 }
 0x19d   :  { %421 = vmatpush.bf16.msra.mxu1 %v396_v17  ;;  %v363_v19 = vadd.f32 %v523_v12, %v362_v18 }
 0x19f   :  { %v364_v20 = vadd.f32 %v517_v8, %v363_v19 }
 0x1a1   :  { %v365_v24 = vadd.f32 %v519_v10, %v364_v20  ;;  %422 = vmatpush.bf16.msra.mxu1 %v395_v21 }
 0x1a2   :  { %v146_v45 = vpop.f32.mrf.mxu3 }
 0x1a3   :  { %v366_v25 = vadd.f32 %v515_v7, %v365_v24 }
 0x1a4   :  { %423 = vmatmul.bf16.vlgmr.msra.gmra.mxu1 %v503_v22 }
 0x1a5   :  { %v367_v27 = vadd.f32 %v513_v6, %v366_v25 }
 0x1a7   :  { %v376_v28 = vrot.slane %v367_v27, 4 }
 0x1a9   :  { %v377_v29 = vadd.f32 %v376_v28, %v367_v27 }
 0x1aa   :  { %v148_v48 = vpop.f32.mrf.mxu3 }
 0x1ab   :  { %v378_v30 = vrot.slane %v377_v29, 2 }
 0x1ad   :  { %v379_v31 = vadd.f32 %v378_v30, %v377_v29 }
 0x1af   :  { %v380_v34 = vrot.slane %v379_v31, 1 }
 0x1b1   :  { %v381_v36 = vadd.f32 %v380_v34, %v379_v31 }
 0x1b3   :  { %v382_v38 = vadd.f32 %v381_v36, %v360_v37 }
 0x1b4   :  { %428 = vmatmul.bf16.gmra.mxu1 %v504_v35 }
 0x1b5   :  { %383 = vst [vmem:[#allocation3] sm:$0x1] %v382_v38 }
 0x1bc   :  { %v450_v46 = vld [vmem:[#allocation3] sm:$0x1] }
 0x1bd   :  { %530 = vrcp.f32 %v450_v46 }
 0x1c3   :  { %v531_v49 = vpop.eup %530 }
 0x1c4   :  { %v453_v53 = vperm.slane %v531_v49, 0 }
 0x221   :  { %v424_v51 = vpop.f32.mrf.mxu1 }
 0x222   :  { %v434_v52 = vadd.f32 %v424_v51, %v391_v50 }
 0x224   :  { %v455_v54 = vmul.f32 %v453_v53, %v434_v52 }
 0x226   :  { %459 = vst [vmem:[%s595_s3] sm:$0xff] %v455_v54 }
 0x229   :  { %v426_v55 = vpop.f32.mrf.mxu1 }
 0x22a   :  { %v435_v56 = vadd.f32 %v426_v55, %v391_v50 }
 0x22c   :  { %v456_v57 = vmul.f32 %v453_v53, %v435_v56 }
 0x22e   :  { %460 = vst [vmem:[%s595_s3 + $0x8] sm:$0xff] %v456_v57 }
 0x231   :  { %v429_v58 = vpop.f32.mrf.mxu1 }
 0x232   :  { %v436_v59 = vadd.f32 %v429_v58, %v391_v50 }
 0x234   :  { %v457_v60 = vmul.f32 %v453_v53, %v436_v59 }
 0x236   :  { %461 = vst [vmem:[%s595_s3 + $0x10] sm:$0xff] %v457_v60 }
 0x239   :  { %v431_v61 = vpop.f32.mrf.mxu1 }
 0x23a   :  { %v437_v62 = vadd.f32 %v431_v61, %v391_v50 }
 0x23c   :  { %v458_v63 = vmul.f32 %v453_v53, %v437_v62 }
 0x23e   :  { %462 = vst [vmem:[%s595_s3 + $0x18] sm:$0xff] %v458_v63 }

// kernel: cva_forward.24
= control target key start
LH: loop header
LB: loop body
LE: loop exit
PB: predicated region body
PF: predicated region fallthrough
CT: control target
= control target key end

     0   :  { %vm1048_vm0 = vcmask 523264   ;;  %s2641_s1 = inlined_call_operand.vmem [shape: bf16[1728,128], index: 1, kind: input, shape index: {}]   ;;  %s2642_s0 = inlined_call_operand.vmem [shape: bf16[32,1728], index: 0, kind: input, shape index: {}]   ;;  %s2643_s2 = inlined_call_operand.vmem [shape: f32[32,1], index: 2, kind: input, shape index: {}]   ;;  %s2644_s3 = inlined_call_operand.vmem [shape: f32[32,1], index: 3, kind: input, shape index: {}]   ;;  %s2645_s4 = inlined_call_operand.vmem [shape: f32[32,128], index: 4, kind: output, shape index: {}]  }
   0x1   :  { %v1970_v0 = vld [vmem:[%s2641_s1 + $0x38] sm:$0xff]  ;;  %v1969_v4 = vld [vmem:[%s2641_s1 + $0x30] sm:$0xff]  ;;  %v1968_v8 = vld [vmem:[%s2641_s1 + $0x28] sm:$0xff] }
   0x2   :  { %v1978_v1 = vld [vmem:[%s2641_s1 + $0x78] sm:$0xff]  ;;  %1055 = vmatpush.bf16.msra.mxu0 %v1970_v0  ;;  %v1977_v5 = vld [vmem:[%s2641_s1 + $0x70] sm:$0xff]  ;;  %v1976_v9 = vld [vmem:[%s2641_s1 + $0x68] sm:$0xff] }
   0x3   :  { %v1986_v2 = vld [vmem:[%s2641_s1 + $0xb8] sm:$0xff]  ;;  %1074 = vmatpush.bf16.msra.mxu1 %v1978_v1  ;;  %v1985_v6 = vld [vmem:[%s2641_s1 + $0xb0] sm:$0xff]  ;;  %v1984_v10 = vld [vmem:[%s2641_s1 + $0xa8] sm:$0xff] }
   0x4   :  { %v1994_v3 = vld [vmem:[%s2641_s1 + $0xf8] sm:$0xff]  ;;  %1093 = vmatpush.bf16.msra.mxu2 %v1986_v2  ;;  %v1993_v7 = vld [vmem:[%s2641_s1 + $0xf0] sm:$0xff]  ;;  %v1992_v11 = vld [vmem:[%s2641_s1 + $0xe8] sm:$0xff] }
   0x5   :  { %1112 = vmatpush.bf16.msra.mxu3 %v1994_v3  ;;  %v1967_v12 = vld [vmem:[%s2641_s1 + $0x20] sm:$0xff]  ;;  %v1966_v16 = vld [vmem:[%s2641_s1 + $0x18] sm:$0xff]  ;;  %v1965_v20 = vld [vmem:[%s2641_s1 + $0x10] sm:$0xff] }
   0x6   :  { %1056 = vmatpush.bf16.msra.mxu0 %v1969_v4  ;;  %v1975_v13 = vld [vmem:[%s2641_s1 + $0x60] sm:$0xff]  ;;  %v1974_v17 = vld [vmem:[%s2641_s1 + $0x58] sm:$0xff]  ;;  %v1973_v21 = vld [vmem:[%s2641_s1 + $0x50] sm:$0xff] }
   0x7   :  { %1075 = vmatpush.bf16.msra.mxu1 %v1977_v5  ;;  %v1983_v14 = vld [vmem:[%s2641_s1 + $0xa0] sm:$0xff]  ;;  %v1982_v18 = vld [vmem:[%s2641_s1 + $0x98] sm:$0xff]  ;;  %v1981_v22 = vld [vmem:[%s2641_s1 + $0x90] sm:$0xff] }
   0x8   :  { %1094 = vmatpush.bf16.msra.mxu2 %v1985_v6  ;;  %v1991_v15 = vld [vmem:[%s2641_s1 + $0xe0] sm:$0xff]  ;;  %v1990_v19 = vld [vmem:[%s2641_s1 + $0xd8] sm:$0xff]  ;;  %v1989_v23 = vld [vmem:[%s2641_s1 + $0xd0] sm:$0xff] }
   0x9   :  { %1113 = vmatpush.bf16.msra.mxu3 %v1993_v7  ;;  %v1964_v24 = vld [vmem:[%s2641_s1 + $0x8] sm:$0xff]  ;;  %v1963_v28 = vld [vmem:[%s2641_s1] sm:$0xff]  ;;  %v1942_v33 = vld [vmem:[%s2642_s0 + $0x34] sm:$0xf0] }
   0xa   :  { %1057 = vmatpush.bf16.msra.mxu0 %v1968_v8  ;;  %v1972_v25 = vld [vmem:[%s2641_s1 + $0x48] sm:$0xff]  ;;  %v1971_v29 = vld [vmem:[%s2641_s1 + $0x40] sm:$0xff]  ;;  %v1393_v35 = vld [vmem:[%s2642_s0 + $0x38] sm:$0xf0] }
   0xb   :  { %1076 = vmatpush.bf16.msra.mxu1 %v1976_v9  ;;  %v1980_v26 = vld [vmem:[%s2641_s1 + $0x88] sm:$0xff]  ;;  %v1979_v30 = vld [vmem:[%s2641_s1 + $0x80] sm:$0xff]  ;;  %v2018_v40 = vld [vmem:[%s2641_s1 + $0x1b8] sm:$0xff] }
   0xc   :  { %1095 = vmatpush.bf16.msra.mxu2 %v1984_v10  ;;  %v1988_v27 = vld [vmem:[%s2641_s1 + $0xc8] sm:$0xff]  ;;  %v1987_v31 = vld [vmem:[%s2641_s1 + $0xc0] sm:$0xff]  ;;  %v2002_v41 = vld [vmem:[%s2641_s1 + $0x138] sm:$0xff] }
   0xd   :  { %1114 = vmatpush.bf16.msra.mxu3 %v1992_v11  ;;  %v1391_v32 = vld [vmem:[%s2642_s0] sm:$0xf]  ;;  %v1935_v34 = vld [vmem:[%s2642_s0 + $0x4] sm:$0xf]  ;;  %v1399_v36 = vld [vmem:[%s2642_s0 + $0x8] sm:$0xf] }
   0xe   :  { %1058 = vmatpush.bf16.msra.mxu0 %v1967_v12  ;;  %v1943_v37 = vld [vmem:[%s2642_s0 + $0x3c] sm:$0xf0]  ;;  %v1936_v38 = vld [vmem:[%s2642_s0 + $0xc] sm:$0xf]  ;;  %v1401_v39 = vld [vmem:[%s2642_s0 + $0x40] sm:$0xf0]  ;;  %v1392_v42 = vor.u32 %v1942_v33, %v1391_v32  ;;  %v1396_v43 = vor.u32 %v1935_v34, %v1393_v35 }
   0xf   :  { %1077 = vmatpush.bf16.msra.mxu1 %v1975_v13  ;;  %v1400_v44 = vor.u32 %v1943_v37, %v1399_v36  ;;  %v1404_v45 = vor.u32 %v1936_v38, %v1401_v39  ;;  %v2010_v46 = vld [vmem:[%s2641_s1 + $0x178] sm:$0xff]  ;;  %v2017_v48 = vld [vmem:[%s2641_s1 + $0x1b0] sm:$0xff]  ;;  %v2016_v52 = vld [vmem:[%s2641_s1 + $0x1a8] sm:$0xff] }
  0x10   :  { %1096 = vmatpush.bf16.msra.mxu2 %v1983_v14  ;;  %v2026_v47 = vld [vmem:[%s2641_s1 + $0x1f8] sm:$0xff]  ;;  %v2001_v49 = vld [vmem:[%s2641_s1 + $0x130] sm:$0xff]  ;;  %v2000_v53 = vld [vmem:[%s2641_s1 + $0x128] sm:$0xff] }
  0x11   :  { %1115 = vmatpush.bf16.msra.mxu3 %v1991_v15  ;;  %v2009_v50 = vld [vmem:[%s2641_s1 + $0x170] sm:$0xff]  ;;  %v2008_v54 = vld [vmem:[%s2641_s1 + $0x168] sm:$0xff]  ;;  %v2015_v56 = vld [vmem:[%s2641_s1 + $0x1a0] sm:$0xff] }
  0x12   :  { %1059 = vmatpush.bf16.msra.mxu0 %v1966_v16  ;;  %v2025_v51 = vld [vmem:[%s2641_s1 + $0x1f0] sm:$0xff]  ;;  %v2024_v55 = vld [vmem:[%s2641_s1 + $0x1e8] sm:$0xff]  ;;  %v1999_v57 = vld [vmem:[%s2641_s1 + $0x120] sm:$0xff] }
  0x13   :  { %1078 = vmatpush.bf16.msra.mxu1 %v1974_v17  ;;  %v2007_v58 = vld [vmem:[%s2641_s1 + $0x160] sm:$0xff]  ;;  %v1447_v60 = vld [vmem:[%s2642_s0 + $0x70] sm:$0xf]  ;;  %v1956_v61 = vld [vmem:[%s2642_s0 + $0xa4] sm:$0xf0] }
  0x14   :  { %1097 = vmatpush.bf16.msra.mxu2 %v1982_v18  ;;  %v2023_v59 = vld [vmem:[%s2641_s1 + $0x1e0] sm:$0xff]  ;;  %v1949_v62 = vld [vmem:[%s2642_s0 + $0x74] sm:$0xf]  ;;  %v1449_v63 = vld [vmem:[%s2642_s0 + $0xa8] sm:$0xf0]  ;;  %v1448_v6 = vor.u32 %v1956_v61, %v1447_v60 }
  0x15   :  { %1116 = vmatpush.bf16.msra.mxu3 %v1990_v19  ;;  %v1455_v0 = vld [vmem:[%s2642_s0 + $0x78] sm:$0xf]  ;;  %v1957_v1 = vld [vmem:[%s2642_s0 + $0xac] sm:$0xf0]  ;;  %v1950_v2 = vld [vmem:[%s2642_s0 + $0x7c] sm:$0xf]  ;;  %v1452_v7 = vor.u32 %v1949_v62, %v1449_v63 }
  0x16   :  { %1060 = vmatpush.bf16.msra.mxu0 %v1965_v20  ;;  %v1457_v3 = vld [vmem:[%s2642_s0 + $0xb0] sm:$0xf0]  ;;  %v2014_v4 = vld [vmem:[%s2641_s1 + $0x198] sm:$0xff]  ;;  %v1456_v8 = vor.u32 %v1957_v1, %v1455_v0  ;;  %v2012_v16 = vld [vmem:[%s2641_s1 + $0x188] sm:$0xff] }
  0x17   :  { %1079 = vmatpush.bf16.msra.mxu1 %v1973_v21  ;;  %v1998_v5 = vld [vmem:[%s2641_s1 + $0x118] sm:$0xff]  ;;  %v1460_v9 = vor.u32 %v1950_v2, %v1457_v3  ;;  %v2013_v12 = vld [vmem:[%s2641_s1 + $0x190] sm:$0xff]  ;;  %v1996_v17 = vld [vmem:[%s2641_s1 + $0x108] sm:$0xff] }
  0x18   :  { %1098 = vmatpush.bf16.msra.mxu2 %v1981_v22  ;;  %v2006_v10 = vld [vmem:[%s2641_s1 + $0x158] sm:$0xff]  ;;  %v1997_v13 = vld [vmem:[%s2641_s1 + $0x110] sm:$0xff]  ;;  %v2004_v18 = vld [vmem:[%s2641_s1 + $0x148] sm:$0xff] }
  0x19   :  { %1117 = vmatpush.bf16.msra.mxu3 %v1989_v23  ;;  %v2022_v11 = vld [vmem:[%s2641_s1 + $0x1d8] sm:$0xff]  ;;  %v2005_v14 = vld [vmem:[%s2641_s1 + $0x150] sm:$0xff]  ;;  %v2020_v19 = vld [vmem:[%s2641_s1 + $0x1c8] sm:$0xff] }
  0x1a   :  { %1061 = vmatpush.bf16.msra.mxu0 %v1964_v24  ;;  %v2021_v15 = vld [vmem:[%s2641_s1 + $0x1d0] sm:$0xff]  ;;  %v2011_v20 = vld [vmem:[%s2641_s1 + $0x180] sm:$0xff]  ;;  %v1938_v32 = vld [vmem:[%s2642_s0 + $0x1c] sm:$0xf] }
  0x1b   :  { %1080 = vmatpush.bf16.msra.mxu1 %v1972_v25  ;;  %v1995_v21 = vld [vmem:[%s2641_s1 + $0x100] sm:$0xff]  ;;  %v1407_v24 = vld [vmem:[%s2642_s0 + $0x10] sm:$0xf]  ;;  %v2050_v25 = vld [vmem:[%s2641_s1 + $0x2b8] sm:$0xff] }
  0x1c   :  { %1099 = vmatpush.bf16.msra.mxu2 %v1980_v26  ;;  %v2003_v22 = vld [vmem:[%s2641_s1 + $0x140] sm:$0xff]  ;;  %v2034_v26 = vld [vmem:[%s2641_s1 + $0x238] sm:$0xff]  ;;  %v1417_v33 = vld [vmem:[%s2642_s0 + $0x50] sm:$0xf0] }
  0x1d   :  { %1118 = vmatpush.bf16.msra.mxu3 %v1988_v27  ;;  %v2019_v23 = vld [vmem:[%s2641_s1 + $0x1c0] sm:$0xff]  ;;  %v1944_v27 = vld [vmem:[%s2642_s0 + $0x44] sm:$0xf0]  ;;  %v2042_v34 = vld [vmem:[%s2641_s1 + $0x278] sm:$0xff] }
  0x1e   :  { %1062 = vmatpush.bf16.msra.mxu0 %v1963_v28  ;;  %v1937_v28 = vld [vmem:[%s2642_s0 + $0x14] sm:$0xf]  ;;  %v2058_v35 = vld [vmem:[%s2641_s1 + $0x2f8] sm:$0xff]  ;;  %v1408_v36 = vor.u32 %v1944_v27, %v1407_v24  ;;  %v1473_v61 = vld [vmem:[%s2642_s0 + $0xc0] sm:$0xf0] }
  0x1f   :  { %1081 = vmatpush.bf16.msra.mxu1 %v1971_v29  ;;  %v1409_v29 = vld [vmem:[%s2642_s0 + $0x48] sm:$0xf0]  ;;  %v2049_v37 = vld [vmem:[%s2641_s1 + $0x2b0] sm:$0xff]  ;;  %v2030_v60 = vld [vmem:[%s2641_s1 + $0x218] sm:$0xff] }
  0x20   :  { %1100 = vmatpush.bf16.msra.mxu2 %v1979_v30  ;;  %v1415_v30 = vld [vmem:[%s2642_s0 + $0x18] sm:$0xf]  ;;  %v1412_v38 = vor.u32 %v1937_v28, %v1409_v29  ;;  %v2045_v1 = vld [vmem:[%s2641_s1 + $0x290] sm:$0xff]  ;;  %v1947_v24 = vld [vmem:[%s2642_s0 + $0x5c] sm:$0xf0] }
  0x21   :  { %1119 = vmatpush.bf16.msra.mxu3 %v1987_v31  ;;  %1063 = vmatmul.bf16.vlgmr.msra.gmra.mxu0 %v1392_v42  ;;  %v1945_v31 = vld [vmem:[%s2642_s0 + $0x4c] sm:$0xf0]  ;;  %v2038_v62 = vld [vmem:[%s2641_s1 + $0x258] sm:$0xff] }
  0x22   :  { %1131 = vmatpush.bf16.msrb.mxu0 %v2002_v41  ;;  %1082 = vmatmul.bf16.vlgmr.msra.gmra.mxu1 %v1396_v43  ;;  %v1416_v39 = vor.u32 %v1945_v31, %v1415_v30  ;;  %v2033_v41 = vld [vmem:[%s2641_s1 + $0x230] sm:$0xff]  ;;  %v2054_v63 = vld [vmem:[%s2641_s1 + $0x2d8] sm:$0xff]  ;;  %v1321_v30 = vld [vmem:[%s2643_s2] sm:$0xff] }
  0x23   :  { %1101 = vmatmul.bf16.vlgmr.msra.gmra.mxu2 %v1400_v44  ;;  %1150 = vmatpush.bf16.msrb.mxu1 %v2010_v46  ;;  %v2041_v42 = vld [vmem:[%s2641_s1 + $0x270] sm:$0xff]  ;;  %v2048_v44 = vld [vmem:[%s2641_s1 + $0x2a8] sm:$0xff] }
  0x24   :  { %1169 = vmatpush.bf16.msrb.mxu2 %v2018_v40  ;;  %1120 = vmatmul.bf16.vlgmr.msra.gmra.mxu3 %v1404_v45  ;;  %v1420_v40 = vor.u32 %v1938_v32, %v1417_v33  ;;  %v2057_v43 = vld [vmem:[%s2641_s1 + $0x2f0] sm:$0xff]  ;;  %v2032_v45 = vld [vmem:[%s2641_s1 + $0x228] sm:$0xff] }
  0x25   :  { %1188 = vmatpush.bf16.msrb.mxu3 %v2026_v47  ;;  %v2040_v46 = vld [vmem:[%s2641_s1 + $0x268] sm:$0xff]  ;;  %v2069_v28 = vld [vmem:[%s2641_s1 + $0x350] sm:$0xff] }
  0x26   :  { %1132 = vmatpush.bf16.msrb.mxu0 %v2001_v49  ;;  %v2056_v47 = vld [vmem:[%s2641_s1 + $0x2e8] sm:$0xff]  ;;  %v2031_v49 = vld [vmem:[%s2641_s1 + $0x220] sm:$0xff]  ;;  %v1323_v29 = vld [vmem:[%s2643_s2 + $0x10] sm:$0xff] }
  0x27   :  { %1151 = vmatpush.bf16.msrb.mxu1 %v2009_v50  ;;  %v2039_v50 = vld [vmem:[%s2641_s1 + $0x260] sm:$0xff] }
  0x28   :  { %1170 = vmatpush.bf16.msrb.mxu2 %v2017_v48  ;;  %v2047_v48 = vld [vmem:[%s2641_s1 + $0x2a0] sm:$0xff] }
  0x29   :  { %1189 = vmatpush.bf16.msrb.mxu3 %v2025_v51  ;;  %v2055_v51 = vld [vmem:[%s2641_s1 + $0x2e0] sm:$0xff] }
  0x2a   :  { %1133 = vmatpush.bf16.msrb.mxu0 %v2000_v53  ;;  %v1958_v53 = vld [vmem:[%s2642_s0 + $0xb4] sm:$0xf0] }
  0x2b   :  { %1152 = vmatpush.bf16.msrb.mxu1 %v2008_v54  ;;  %v2046_v54 = vld [vmem:[%s2641_s1 + $0x298] sm:$0xff] }
  0x2c   :  { %1171 = vmatpush.bf16.msrb.mxu2 %v2016_v52  ;;  %v1463_v52 = vld [vmem:[%s2642_s0 + $0x80] sm:$0xf] }
  0x2d   :  { %1190 = vmatpush.bf16.msrb.mxu3 %v2024_v55  ;;  %v1951_v55 = vld [vmem:[%s2642_s0 + $0x84] sm:$0xf]  ;;  %v1464_v0 = vor.u32 %v1958_v53, %v1463_v52 }
  0x2e   :  { %1134 = vmatpush.bf16.msrb.mxu0 %v1999_v57  ;;  %v1471_v57 = vld [vmem:[%s2642_s0 + $0x88] sm:$0xf] }
  0x2f   :  { %1153 = vmatpush.bf16.msrb.mxu1 %v2007_v58  ;;  %v1959_v58 = vld [vmem:[%s2642_s0 + $0xbc] sm:$0xf0] }
  0x30   :  { %1172 = vmatpush.bf16.msrb.mxu2 %v2015_v56  ;;  %v1465_v56 = vld [vmem:[%s2642_s0 + $0xb8] sm:$0xf0]  ;;  %v1472_v3 = vor.u32 %v1959_v58, %v1471_v57  ;;  %v1351_v57 = vld [vmem:[%s2644_s3 + $0x10] sm:$0xff]  ;;  %v2059_v58 = vld [vmem:[%s2641_s1 + $0x300] sm:$0xff] }
  0x31   :  { %1191 = vmatpush.bf16.msrb.mxu3 %v2023_v59  ;;  %1068 = vmatmul.bf16.gmra.mxu0 %v1448_v6  ;;  %v1952_v59 = vld [vmem:[%s2642_s0 + $0x8c] sm:$0xf]  ;;  %v1468_v2 = vor.u32 %v1951_v55, %v1465_v56  ;;  %v2037_v6 = vld [vmem:[%s2641_s1 + $0x250] sm:$0xff] }
  0x32   :  { %1135 = vmatpush.bf16.msrb.mxu0 %v1998_v5  ;;  %1087 = vmatmul.bf16.gmra.mxu1 %v1452_v7  ;;  %v2029_v5 = vld [vmem:[%s2641_s1 + $0x210] sm:$0xff]  ;;  %v2060_v56 = vld [vmem:[%s2641_s1 + $0x308] sm:$0xff] }
  0x33   :  { %1106 = vmatmul.bf16.gmra.mxu2 %v1456_v8  ;;  %1154 = vmatpush.bf16.msrb.mxu1 %v2006_v10  ;;  %v2053_v7 = vld [vmem:[%s2641_s1 + $0x2d0] sm:$0xff]  ;;  %v2044_v8 = vld [vmem:[%s2641_s1 + $0x288] sm:$0xff] }
  0x34   :  { %1173 = vmatpush.bf16.msrb.mxu2 %v2014_v4  ;;  %1125 = vmatmul.bf16.gmra.mxu3 %v1460_v9  ;;  %v1476_v4 = vor.u32 %v1952_v59, %v1473_v61  ;;  %v2028_v9 = vld [vmem:[%s2641_s1 + $0x208] sm:$0xff]  ;;  %v1439_v59 = vld [vmem:[%s2642_s0 + $0x30] sm:$0xf]  ;;  %v1495_v61 = vld [vmem:[%s2642_s0 + $0xa0] sm:$0xf] }
  0x35   :  { %1192 = vmatpush.bf16.msrb.mxu3 %v2022_v11  ;;  %v2036_v10 = vld [vmem:[%s2641_s1 + $0x248] sm:$0xff] }
  0x36   :  { %1136 = vmatpush.bf16.msrb.mxu0 %v1997_v13  ;;  %v2052_v11 = vld [vmem:[%s2641_s1 + $0x2c8] sm:$0xff]  ;;  %v2066_v13 = vld [vmem:[%s2641_s1 + $0x338] sm:$0xff] }
  0x37   :  { %1155 = vmatpush.bf16.msrb.mxu1 %v2005_v14  ;;  %v2027_v14 = vld [vmem:[%s2641_s1 + $0x200] sm:$0xff] }
  0x38   :  { %1174 = vmatpush.bf16.msrb.mxu2 %v2013_v12  ;;  %v2043_v12 = vld [vmem:[%s2641_s1 + $0x280] sm:$0xff] }
  0x39   :  { %1193 = vmatpush.bf16.msrb.mxu3 %v2021_v15  ;;  %v2035_v15 = vld [vmem:[%s2641_s1 + $0x240] sm:$0xff] }
  0x3a   :  { %1137 = vmatpush.bf16.msrb.mxu0 %v1996_v17  ;;  %v1423_v17 = vld [vmem:[%s2642_s0 + $0x20] sm:$0xf] }
  0x3b   :  { %1156 = vmatpush.bf16.msrb.mxu1 %v2004_v18  ;;  %v2070_v18 = vld [vmem:[%s2641_s1 + $0x358] sm:$0xff] }
  0x3c   :  { %1175 = vmatpush.bf16.msrb.mxu2 %v2012_v16  ;;  %v2051_v16 = vld [vmem:[%s2641_s1 + $0x2c0] sm:$0xff] }
  0x3d   :  { %1194 = vmatpush.bf16.msrb.mxu3 %v2020_v19  ;;  %v1946_v19 = vld [vmem:[%s2642_s0 + $0x54] sm:$0xf0] }
  0x3e   :  { %1138 = vmatpush.bf16.msrb.mxu0 %v1995_v21  ;;  %v2065_v21 = vld [vmem:[%s2641_s1 + $0x330] sm:$0xff]  ;;  %v1424_v27 = vor.u32 %v1946_v19, %v1423_v17 }
  0x3f   :  { %1157 = vmatpush.bf16.msrb.mxu1 %v2003_v22  ;;  %v1425_v22 = vld [vmem:[%s2642_s0 + $0x58] sm:$0xf0] }
  0x40   :  { %1176 = vmatpush.bf16.msrb.mxu2 %v2011_v20  ;;  %v1939_v20 = vld [vmem:[%s2642_s0 + $0x24] sm:$0xf] }
  0x41   :  { %1195 = vmatpush.bf16.msrb.mxu3 %v2019_v23  ;;  %1139 = vmatmul.bf16.vlgmr.msrb.gmra.mxu0 %v1408_v36  ;;  %v1431_v23 = vld [vmem:[%s2642_s0 + $0x28] sm:$0xf]  ;;  %v1428_v31 = vor.u32 %v1939_v20, %v1425_v22 }
  0x42   :  { %1207 = vmatpush.bf16.msra.mxu0 %v2034_v26  ;;  %1158 = vmatmul.bf16.vlgmr.msrb.gmra.mxu1 %v1412_v38  ;;  %v1433_v26 = vld [vmem:[%s2642_s0 + $0x60] sm:$0xf0]  ;;  %v1432_v32 = vor.u32 %v1947_v24, %v1431_v23  ;;  %v2068_v36 = vld [vmem:[%s2641_s1 + $0x348] sm:$0xff] }
  0x43   :  { %1226 = vmatpush.bf16.msra.mxu1 %v2042_v34  ;;  %1177 = vmatmul.bf16.vlgmr.msrb.gmra.mxu2 %v1416_v39  ;;  %v2087_v34 = vmov 0   ;;  %v2067_v38 = vld [vmem:[%s2641_s1 + $0x340] sm:$0xff]  ;;  %v1324_v39 = vld [vmem:[%s2643_s2 + $0x18] sm:$0xff] }
  0x44   :  { %1245 = vmatpush.bf16.msra.mxu2 %v2050_v25  ;;  %1196 = vmatmul.bf16.vlgmr.msrb.gmra.mxu3 %v1420_v40  ;;  %v1940_v25 = vld [vmem:[%s2642_s0 + $0x2c] sm:$0xf] }
  0x45   :  { %1264 = vmatpush.bf16.msra.mxu3 %v2058_v35  ;;  %v1436_v33 = vor.u32 %v1940_v25, %v1433_v26  ;;  %2085 = vset.pattern.permute.xlu1 %v2087_v34  ;;  %v2064_v35 = vld [vmem:[%s2641_s1 + $0x328] sm:$0xff] }
  0x46   :  { %1208 = vmatpush.bf16.msra.mxu0 %v2033_v41  ;;  %2084 = vset.pattern.permute.xlu0 %v2087_v34  ;;  %v1322_v40 = vld [vmem:[%s2643_s2 + $0x8] sm:$0xff]  ;;  %v2062_v41 = vld [vmem:[%s2641_s1 + $0x318] sm:$0xff] }
  0x47   :  { %1227 = vmatpush.bf16.msra.mxu1 %v2041_v42  ;;  %1337 = vperm.xlu1 %2085, %v1323_v29   ;;  %v1479_v42 = vld [vmem:[%s2642_s0 + $0x90] sm:$0xf] }
  0x48   :  { %1246 = vmatpush.bf16.msra.mxu2 %v2049_v37  ;;  %1327 = vperm.xlu0 %2084, %v1321_v30   ;;  %v2063_v37 = vld [vmem:[%s2641_s1 + $0x320] sm:$0xff] }
  0x49   :  { %1265 = vmatpush.bf16.msra.mxu3 %v2057_v43  ;;  %2086 = vset.pattern.permute.xlu2 %v2087_v34  ;;  %v1960_v43 = vld [vmem:[%s2642_s0 + $0xc4] sm:$0xf0] }
  0x4a   :  { %1209 = vmatpush.bf16.msra.mxu0 %v2032_v45  ;;  %v1481_v45 = vld [vmem:[%s2642_s0 + $0xc8] sm:$0xf0] }
  0x4b   :  { %1228 = vmatpush.bf16.msra.mxu1 %v2040_v46  ;;  %v1487_v46 = vld [vmem:[%s2642_s0 + $0x98] sm:$0xf] }
  0x4c   :  { %1247 = vmatpush.bf16.msra.mxu2 %v2048_v44  ;;  %v1953_v44 = vld [vmem:[%s2642_s0 + $0x94] sm:$0xf] }
  0x4d   :  { %1266 = vmatpush.bf16.msra.mxu3 %v2056_v47  ;;  %v1961_v47 = vld [vmem:[%s2642_s0 + $0xcc] sm:$0xf0]  ;;  %v1484_v52 = vor.u32 %v1953_v44, %v1481_v45 }
  0x4e   :  { %1210 = vmatpush.bf16.msra.mxu0 %v2031_v49  ;;  %v1489_v49 = vld [vmem:[%s2642_s0 + $0xd0] sm:$0xf0]  ;;  %v1488_v53 = vor.u32 %v1961_v47, %v1487_v46 }
  0x4f   :  { %1229 = vmatpush.bf16.msra.mxu1 %v2039_v50  ;;  %1342 = vperm.xlu1 %2085, %v1324_v39   ;;  %v2061_v50 = vld [vmem:[%s2641_s1 + $0x310] sm:$0xff] }
  0x50   :  { %1248 = vmatpush.bf16.msra.mxu2 %v2047_v48  ;;  %1332 = vperm.xlu0 %2084, %v1322_v40   ;;  %v1954_v48 = vld [vmem:[%s2642_s0 + $0x9c] sm:$0xf] }
  0x51   :  { %1267 = vmatpush.bf16.msra.mxu3 %v2055_v51  ;;  %1144 = vmatmul.bf16.gmra.mxu0 %v1464_v0  ;;  %v1480_v51 = vor.u32 %v1960_v43, %v1479_v42  ;;  %v1492_v55 = vor.u32 %v1954_v48, %v1489_v49  ;;  %v1441_v0 = vld [vmem:[%s2642_s0 + $0x68] sm:$0xf0] }
  0x52   :  { %1211 = vmatpush.bf16.msra.mxu0 %v2030_v60  ;;  %1163 = vmatmul.bf16.gmra.mxu1 %v1468_v2  ;;  %v1948_v60 = vld [vmem:[%s2642_s0 + $0x64] sm:$0xf0]  ;;  %v1497_v2 = vld [vmem:[%s2642_s0 + $0xd8] sm:$0xf0] }
  0x53   :  { %1230 = vmatpush.bf16.msra.mxu1 %v2038_v62  ;;  %1182 = vmatmul.bf16.gmra.mxu2 %v1472_v3  ;;  %v1962_v62 = vld [vmem:[%s2642_s0 + $0xd4] sm:$0xf0]  ;;  %v1440_v3 = vor.u32 %v1948_v60, %v1439_v59 }
  0x54   :  { %1249 = vmatpush.bf16.msra.mxu2 %v2046_v54  ;;  %1201 = vmatmul.bf16.gmra.mxu3 %v1476_v4  ;;  %v1352_v54 = vld [vmem:[%s2644_s3 + $0x18] sm:$0xff]  ;;  %v1496_v4 = vor.u32 %v1962_v62, %v1495_v61 }
  0x55   :  { %1268 = vmatpush.bf16.msra.mxu3 %v2054_v63  ;;  %v1941_v63 = vld [vmem:[%s2642_s0 + $0x34] sm:$0xf] }
  0x56   :  { %1212 = vmatpush.bf16.msra.mxu0 %v2029_v5  ;;  %v1444_v5 = vor.u32 %v1941_v63, %v1441_v0 }
  0x57   :  { %1231 = vmatpush.bf16.msra.mxu1 %v2037_v6  ;;  %1370 = vperm.xlu1 %2085, %v1352_v54  }
  0x58   :  { %1250 = vmatpush.bf16.msra.mxu2 %v2045_v1  ;;  %1365 = vperm.xlu0 %2084, %v1351_v57   ;;  %v1955_v1 = vld [vmem:[%s2642_s0 + $0xa4] sm:$0xf] }
  0x59   :  { %1269 = vmatpush.bf16.msra.mxu3 %v2053_v7  ;;  %v1500_v6 = vor.u32 %v1955_v1, %v1497_v2  ;;  %v1349_v7 = vld [vmem:[%s2644_s3] sm:$0xff] }
  0x5a   :  { %1213 = vmatpush.bf16.msra.mxu0 %v2028_v9  ;;  %1355 = vperm.xlu2 %2086, %v1349_v7  }
  0x5b   :  { %1232 = vmatpush.bf16.msra.mxu1 %v2036_v10 }
  0x5c   :  { %1251 = vmatpush.bf16.msra.mxu2 %v2044_v8  ;;  %v1350_v8 = vld [vmem:[%s2644_s3 + $0x8] sm:$0xff] }
  0x5d   :  { %1270 = vmatpush.bf16.msra.mxu3 %v2052_v11 }
  0x5e   :  { %1214 = vmatpush.bf16.msra.mxu0 %v2027_v14 }
  0x5f   :  { %1233 = vmatpush.bf16.msra.mxu1 %v2035_v15 }
  0x60   :  { %1252 = vmatpush.bf16.msra.mxu2 %v2043_v12 }
  0x61   :  { %1271 = vmatpush.bf16.msra.mxu3 %v2051_v16  ;;  %1215 = vmatmul.bf16.vlgmr.msra.gmra.mxu0 %v1424_v27 }
  0x62   :  { %1283 = vmatpush.bf16.msrb.mxu0 %v2066_v13  ;;  %1234 = vmatmul.bf16.vlgmr.msra.gmra.mxu1 %v1428_v31 }
  0x63   :  { %1306 = vmatpush.bf16.msrb.mxu1 %v2070_v18  ;;  %1253 = vmatmul.bf16.vlgmr.msra.gmra.mxu2 %v1432_v32 }
  0x64   :  { %2071 = vmatpush.bf16.msrb.mxu2 %v2066_v13  ;;  %1272 = vmatmul.bf16.vlgmr.msra.gmra.mxu3 %v1436_v33 }
  0x65   :  { %2079 = vmatpush.bf16.msrb.mxu3 %v2070_v18  ;;  %1360 = vperm.xlu2 %2086, %v1350_v8  }
  0x66   :  { %1284 = vmatpush.bf16.msrb.mxu0 %v2065_v21 }
  0x67   :  { %1307 = vmatpush.bf16.msrb.mxu1 %v2069_v28 }
  0x68   :  { %2072 = vmatpush.bf16.msrb.mxu2 %v2065_v21 }
  0x69   :  { %2080 = vmatpush.bf16.msrb.mxu3 %v2069_v28 }
  0x6a   :  { %1285 = vmatpush.bf16.msrb.mxu0 %v2064_v35 }
  0x6b   :  { %1308 = vmatpush.bf16.msrb.mxu1 %v2068_v36 }
  0x6c   :  { %2073 = vmatpush.bf16.msrb.mxu2 %v2064_v35 }
  0x6d   :  { %2081 = vmatpush.bf16.msrb.mxu3 %v2068_v36 }
  0x6e   :  { %1286 = vmatpush.bf16.msrb.mxu0 %v2063_v37 }
  0x6f   :  { %1309 = vmatpush.bf16.msrb.mxu1 %v2067_v38 }
  0x70   :  { %2074 = vmatpush.bf16.msrb.mxu2 %v2063_v37 }
  0x71   :  { %2082 = vmatpush.bf16.msrb.mxu3 %v2067_v38  ;;  %1220 = vmatmul.bf16.gmra.mxu0 %v1480_v51 }
  0x72   :  { %1287 = vmatpush.bf16.msrb.mxu0 %v2062_v41  ;;  %1239 = vmatmul.bf16.gmra.mxu1 %v1484_v52 }
  0x73   :  { %1258 = vmatmul.bf16.gmra.mxu2 %v1488_v53 }
  0x74   :  { %2075 = vmatpush.bf16.msrb.mxu2 %v2062_v41  ;;  %1277 = vmatmul.bf16.gmra.mxu3 %v1492_v55 }
  0x76   :  { %1288 = vmatpush.bf16.msrb.mxu0 %v2061_v50 }
  0x78   :  { %2076 = vmatpush.bf16.msrb.mxu2 %v2061_v50 }
  0x7a   :  { %1289 = vmatpush.bf16.msrb.mxu0 %v2060_v56 }
  0x7c   :  { %2077 = vmatpush.bf16.msrb.mxu2 %v2060_v56 }
  0x7e   :  { %1290 = vmatpush.bf16.msrb.mxu0 %v2059_v58 }
  0x80   :  { %2078 = vmatpush.bf16.msrb.mxu2 %v2059_v58 }
  0x81   :  { %1291 = vmatmul.bf16.vlgmr.msrb.gmra.mxu0 %v1440_v3 }
  0x82   :  { %1933 = vmatmul.msk.bf16.vlgmr.msrb.gmra.mxu1 %vm1048_vm0, %v1444_v5 }
  0x83   :  { %1296 = vmatmul.bf16.vlgmr.msrb.gmra.mxu2 %v1496_v4 }
  0x84   :  { %1934 = vmatmul.msk.bf16.vlgmr.msrb.gmra.mxu3 %vm1048_vm0, %v1500_v6 }
  0x9e   :  { %v1064_v9 = vpop.f32.mrf.mxu0 }
  0x9f   :  { %v1083_v10 = vpop.f32.mrf.mxu1 }
  0xa0   :  { %v1084_v11 = vadd.f32 %v1083_v10, %v1064_v9 }
  0xa6   :  { %v1102_v12 = vpop.f32.mrf.mxu2  ;;  %v1066_v15 = vpop.f32.mrf.mxu0 }
  0xa7   :  { %v1121_v13 = vpop.f32.mrf.mxu3  ;;  %v1103_v14 = vadd.f32 %v1102_v12, %v1084_v11  ;;  %v1085_v16 = vpop.f32.mrf.mxu1 }
  0xa8   :  { %v1086_v17 = vadd.f32 %v1085_v16, %v1066_v15 }
  0xa9   :  { %v1122_v18 = vadd.f32 %v1121_v13, %v1103_v14 }
  0xae   :  { %v1104_v19 = vpop.f32.mrf.mxu2  ;;  %v1069_v22 = vpop.f32.mrf.mxu0 }
  0xaf   :  { %v1123_v20 = vpop.f32.mrf.mxu3  ;;  %v1105_v21 = vadd.f32 %v1104_v19, %v1086_v17  ;;  %v1088_v23 = vpop.f32.mrf.mxu1 }
  0xb0   :  { %v1089_v49 = vadd.f32 %v1088_v23, %v1069_v22 }
  0xb1   :  { %v1124_v24 = vadd.f32 %v1123_v20, %v1105_v21 }
  0xb6   :  { %v1107_v25 = vpop.f32.mrf.mxu2  ;;  %v1071_v27 = vpop.f32.mrf.mxu0 }
  0xb7   :  { %v1126_v26 = vpop.f32.mrf.mxu3  ;;  %v1090_v28 = vpop.f32.mrf.mxu1  ;;  %v1108_v55 = vadd.f32 %v1107_v25, %v1089_v49 }
  0xb8   :  { %v1091_v60 = vadd.f32 %v1090_v28, %v1071_v27 }
  0xb9   :  { %v1127_v57 = vadd.f32 %v1126_v26, %v1108_v55 }
  0xba   :  { %v1328_v15 = vpop.permute.xlu0 %1327 }
  0xbe   :  { %v1109_v29 = vpop.f32.mrf.mxu2  ;;  %v1140_v31 = vpop.f32.mrf.mxu0 }
  0xbf   :  { %v1128_v30 = vpop.f32.mrf.mxu3  ;;  %v1159_v32 = vpop.f32.mrf.mxu1  ;;  %v1141_v53 = vadd.f32 %v1140_v31, %v1122_v18  ;;  %v1110_v2 = vadd.f32 %v1109_v29, %v1091_v60 }
  0xc1   :  { %v1160_v56 = vadd.f32 %v1159_v32, %v1141_v53  ;;  %v1129_v7 = vadd.f32 %v1128_v30, %v1110_v2  ;;  %v1338_v30 = vpop.permute.xlu1 %1337 }
  0xc6   :  { %v1178_v33 = vpop.f32.mrf.mxu2  ;;  %v1142_v35 = vpop.f32.mrf.mxu0 }
  0xc7   :  { %v1197_v34 = vpop.f32.mrf.mxu3  ;;  %v1161_v36 = vpop.f32.mrf.mxu1  ;;  %v1179_v58 = vadd.f32 %v1178_v33, %v1160_v56  ;;  %v1143_v0 = vadd.f32 %v1142_v35, %v1124_v24 }
  0xc9   :  { %v1198_v3 = vadd.f32 %v1197_v34, %v1179_v58  ;;  %v1162_v5 = vadd.f32 %v1161_v36, %v1143_v0  ;;  %v1333_v36 = vpop.permute.xlu0 %1332 }
  0xce   :  { %v1180_v37 = vpop.f32.mrf.mxu2  ;;  %v1145_v39 = vpop.f32.mrf.mxu0 }
  0xcf   :  { %v1199_v38 = vpop.f32.mrf.mxu3  ;;  %v1164_v40 = vpop.f32.mrf.mxu1  ;;  %v1146_v61 = vadd.f32 %v1145_v39, %v1127_v57  ;;  %v1181_v9 = vadd.f32 %v1180_v37, %v1162_v5 }
  0xd0   :  { %v1356_v39 = vpop.permute.xlu2 %1355 }
  0xd1   :  { %v1165_v4 = vadd.f32 %v1164_v40, %v1146_v61  ;;  %v1200_v18 = vadd.f32 %v1199_v38, %v1181_v9  ;;  %v1366_v57 = vpop.permute.xlu0 %1365 }
  0xd6   :  { %v1183_v41 = vpop.f32.mrf.mxu2  ;;  %v1147_v43 = vpop.f32.mrf.mxu0 }
  0xd7   :  { %v1202_v42 = vpop.f32.mrf.mxu3  ;;  %v1166_v44 = vpop.f32.mrf.mxu1  ;;  %v1184_v8 = vadd.f32 %v1183_v41, %v1165_v4  ;;  %v1148_v11 = vadd.f32 %v1147_v43, %v1129_v7 }
  0xd8   :  { %v1361_v61 = vpop.permute.xlu2 %1360 }
  0xd9   :  { %v1203_v17 = vadd.f32 %v1202_v42, %v1184_v8  ;;  %v1167_v20 = vadd.f32 %v1166_v44, %v1148_v11 }
  0xde   :  { %v1185_v45 = vpop.f32.mrf.mxu2  ;;  %v1216_v47 = vpop.f32.mrf.mxu0 }
  0xdf   :  { %v1204_v46 = vpop.f32.mrf.mxu3  ;;  %v1235_v48 = vpop.f32.mrf.mxu1  ;;  %v1217_v6 = vadd.f32 %v1216_v47, %v1198_v3  ;;  %v1186_v23 = vadd.f32 %v1185_v45, %v1167_v20 }
  0xe1   :  { %v1236_v14 = vadd.f32 %v1235_v48, %v1217_v6  ;;  %v1205_v33 = vadd.f32 %v1204_v46, %v1186_v23 }
  0xe6   :  { %v1254_v50 = vpop.f32.mrf.mxu2  ;;  %v1218_v52 = vpop.f32.mrf.mxu0 }
  0xe7   :  { %v1273_v51 = vpop.f32.mrf.mxu3  ;;  %v1237_v54 = vpop.f32.mrf.mxu1  ;;  %v1255_v19 = vadd.f32 %v1254_v50, %v1236_v14  ;;  %v1219_v22 = vadd.f32 %v1218_v52, %v1200_v18 }
  0xe9   :  { %v1274_v24 = vadd.f32 %v1273_v51, %v1255_v19  ;;  %v1238_v29 = vadd.f32 %v1237_v54, %v1219_v22  ;;  %v1343_v54 = vpop.permute.xlu1 %1342 }
  0xee   :  { %v1256_v59 = vpop.f32.mrf.mxu2  ;;  %v1221_v63 = vpop.f32.mrf.mxu0 }
  0xef   :  { %v1275_v62 = vpop.f32.mrf.mxu3  ;;  %v1240_v1 = vpop.f32.mrf.mxu1  ;;  %v1222_v21 = vadd.f32 %v1221_v63, %v1203_v17  ;;  %v1257_v35 = vadd.f32 %v1256_v59, %v1238_v29 }
  0xf1   :  { %v1241_v26 = vadd.f32 %v1240_v1, %v1222_v21  ;;  %v1276_v42 = vadd.f32 %v1275_v62, %v1257_v35  ;;  %v1371_v6 = vpop.permute.xlu1 %1370 }
  0xf6   :  { %v1259_v10 = vpop.f32.mrf.mxu2  ;;  %v1223_v13 = vpop.f32.mrf.mxu0 }
  0xf7   :  { %v1278_v12 = vpop.f32.mrf.mxu3  ;;  %v1242_v16 = vpop.f32.mrf.mxu1  ;;  %v1260_v34 = vadd.f32 %v1259_v10, %v1241_v26  ;;  %v1224_v38 = vadd.f32 %v1223_v13, %v1205_v33 }
  0xf9   :  { %v1279_v41 = vadd.f32 %v1278_v12, %v1260_v34  ;;  %v1243_v45 = vadd.f32 %v1242_v16, %v1224_v38 }
  0xfe   :  { %v1261_v25 = vpop.f32.mrf.mxu2  ;;  %v1292_v28 = vpop.f32.mrf.mxu0 }
  0xff   :  { %v1280_v27 = vpop.f32.mrf.mxu3  ;;  %v1293_v31 = vadd.f32 %v1292_v28, %v1274_v24  ;;  %v1311_v32 = vpop.f32.mrf.mxu1  ;;  %v1262_v52 = vadd.f32 %v1261_v25, %v1243_v45 }
 0x101   :  { %v1312_v37 = vadd.f32 %v1311_v32, %v1293_v31  ;;  %v1281_v59 = vadd.f32 %v1280_v27, %v1262_v52 }
 0x103   :  { %v1345_v40 = vmul.f32 %v1328_v15, %v1312_v37 }
 0x105   :  { %v1373_v43 = vadd.f32 %v1356_v39, %v1345_v40 }
 0x106   :  { %v1297_v44 = vpop.f32.mrf.mxu2  ;;  %v1294_v49 = vpop.f32.mrf.mxu0 }
 0x107   :  { %v1298_v47 = vadd.f32 %v1297_v44, %v1279_v41  ;;  %v1316_v48 = vpop.f32.mrf.mxu3  ;;  %v1377_v50 = vmax.f32 %v1373_v43, 0.0  ;;  %v1295_v51 = vadd.f32 %v1294_v49, %v1276_v42  ;;  %v1313_v46 = vpop.f32.mrf.mxu1 }
 0x109   :  { %v1317_v53 = vadd.f32 %v1316_v48, %v1298_v47  ;;  %1381 = vst [vmem:[%s2645_s4] sm:$0xff] %v1377_v50  ;;  %v1314_v55 = vadd.f32 %v1313_v46, %v1295_v51 }
 0x10b   :  { %v1347_v56 = vmul.f32 %v1338_v30, %v1317_v53  ;;  %v1346_v58 = vmul.f32 %v1333_v36, %v1314_v55 }
 0x10d   :  { %v1375_v60 = vadd.f32 %v1366_v57, %v1347_v56  ;;  %v1374_v62 = vadd.f32 %v1361_v61, %v1346_v58 }
 0x10e   :  { %v1299_v63 = vpop.f32.mrf.mxu2 }
 0x10f   :  { %v1379_v0 = vmax.f32 %v1375_v60, 0.0  ;;  %v1300_v1 = vadd.f32 %v1299_v63, %v1281_v59  ;;  %v1378_v2 = vmax.f32 %v1374_v62, 0.0  ;;  %v1318_v3 = vpop.f32.mrf.mxu3 }
 0x111   :  { %1383 = vst [vmem:[%s2645_s4 + $0x10] sm:$0xff] %v1379_v0  ;;  %v1319_v4 = vadd.f32 %v1318_v3, %v1300_v1 }
 0x112   :  { %1382 = vst [vmem:[%s2645_s4 + $0x8] sm:$0xff] %v1378_v2 }
 0x113   :  { %v1348_v5 = vmul.f32 %v1343_v54, %v1319_v4 }
 0x115   :  { %v1376_v7 = vadd.f32 %v1371_v6, %v1348_v5 }
 0x117   :  { %v1380_v8 = vmax.f32 %v1376_v7, 0.0 }
 0x119   :  { %1384 = vst [vmem:[%s2645_s4 + $0x18] sm:$0xff] %v1380_v8 }

// kernel: cva_forward.25
= control target key start
LH: loop header
LB: loop body
LE: loop exit
PB: predicated region body
PF: predicated region fallthrough
CT: control target
= control target key end

     0   :  { %v413_v3 = vmov 0   ;;  %vm128_vm0 = vcmask 523264   ;;  %s621_s1 = inlined_call_operand.vmem [shape: bf16[64,512], index: 1, kind: input, shape index: {}]   ;;  %s622_s2 = inlined_call_operand.vmem [shape: f32[32,1], index: 2, kind: input, shape index: {}]   ;;  %s623_s0 = inlined_call_operand.vmem [shape: bf16[32,64], index: 0, kind: input, shape index: {}]   ;;  %s624_s3 = inlined_call_operand.vmem [shape: f32[32,1], index: 3, kind: input, shape index: {}]   ;;  %s625_s4 = inlined_call_operand.vmem [shape: f32[32,512], index: 4, kind: output, shape index: {}]  }
   0x1   :  { %v369_v0 = vld [vmem:[%s621_s1 + $0x60] sm:$0xf]  ;;  %v407_v1 = vld [vmem:[%s621_s1 + $0x6c] sm:$0xf0]  ;;  %v405_v2 = vld [vmem:[%s621_s1 + $0x64] sm:$0xf]  ;;  %411 = vset.pattern.permute.xlu1 %v413_v3  ;;  %410 = vset.pattern.permute.xlu0 %v413_v3 }
   0x2   :  { %v370_v4 = vor.u32 %v407_v1, %v369_v0  ;;  %v371_v5 = vld [vmem:[%s621_s1 + $0x70] sm:$0xf0]  ;;  %v377_v6 = vld [vmem:[%s621_s1 + $0x68] sm:$0xf]  ;;  %v408_v7 = vld [vmem:[%s621_s1 + $0x74] sm:$0xf0]  ;;  %412 = vset.pattern.permute.xlu2 %v413_v3 }
   0x3   :  { %v374_v8 = vor.u32 %v405_v2, %v371_v5  ;;  %v378_v9 = vor.u32 %v408_v7, %v377_v6  ;;  %v406_v10 = vld [vmem:[%s621_s1 + $0x6c] sm:$0xf]  ;;  %v379_v11 = vld [vmem:[%s621_s1 + $0x78] sm:$0xf0]  ;;  %v353_v12 = vld [vmem:[%s621_s1 + $0x40] sm:$0xf] }
   0x4   :  { %139 = vmatpush.bf16.msra.mxu0 %v370_v4  ;;  %v382_v13 = vor.u32 %v406_v10, %v379_v11  ;;  %v403_v14 = vld [vmem:[%s621_s1 + $0x4c] sm:$0xf0]  ;;  %v401_v15 = vld [vmem:[%s621_s1 + $0x44] sm:$0xf]  ;;  %v355_v16 = vld [vmem:[%s621_s1 + $0x50] sm:$0xf0] }
   0x5   :  { %158 = vmatpush.bf16.msra.mxu1 %v374_v8  ;;  %177 = vmatpush.bf16.msra.mxu2 %v378_v9  ;;  %v354_v17 = vor.u32 %v403_v14, %v353_v12  ;;  %v358_v18 = vor.u32 %v401_v15, %v355_v16  ;;  %v361_v19 = vld [vmem:[%s621_s1 + $0x48] sm:$0xf]  ;;  %v404_v20 = vld [vmem:[%s621_s1 + $0x54] sm:$0xf0]  ;;  %v402_v21 = vld [vmem:[%s621_s1 + $0x4c] sm:$0xf] }
   0x6   :  { %196 = vmatpush.bf16.msra.mxu3 %v382_v13  ;;  %v362_v22 = vor.u32 %v404_v20, %v361_v19  ;;  %v363_v23 = vld [vmem:[%s621_s1 + $0x58] sm:$0xf0]  ;;  %v337_v24 = vld [vmem:[%s621_s1 + $0x20] sm:$0xf]  ;;  %v399_v25 = vld [vmem:[%s621_s1 + $0x2c] sm:$0xf0] }
   0x7   :  { %v366_v26 = vor.u32 %v402_v21, %v363_v23  ;;  %v397_v27 = vld [vmem:[%s621_s1 + $0x24] sm:$0xf]  ;;  %v339_v28 = vld [vmem:[%s621_s1 + $0x30] sm:$0xf0]  ;;  %v345_v29 = vld [vmem:[%s621_s1 + $0x28] sm:$0xf]  ;;  %v338_v30 = vor.u32 %v399_v25, %v337_v24 }
   0x8   :  { %140 = vmatpush.bf16.msra.mxu0 %v354_v17  ;;  %v400_v31 = vld [vmem:[%s621_s1 + $0x34] sm:$0xf0]  ;;  %v398_v32 = vld [vmem:[%s621_s1 + $0x2c] sm:$0xf]  ;;  %v347_v33 = vld [vmem:[%s621_s1 + $0x38] sm:$0xf0]  ;;  %v342_v34 = vor.u32 %v397_v27, %v339_v28 }
   0x9   :  { %159 = vmatpush.bf16.msra.mxu1 %v358_v18  ;;  %178 = vmatpush.bf16.msra.mxu2 %v362_v22  ;;  %v346_v35 = vor.u32 %v400_v31, %v345_v29  ;;  %v321_v36 = vld [vmem:[%s621_s1] sm:$0xf]  ;;  %v395_v37 = vld [vmem:[%s621_s1 + $0xc] sm:$0xf0]  ;;  %v393_v38 = vld [vmem:[%s621_s1 + $0x4] sm:$0xf]  ;;  %v350_v39 = vor.u32 %v398_v32, %v347_v33 }
   0xa   :  { %197 = vmatpush.bf16.msra.mxu3 %v366_v26  ;;  %v323_v40 = vld [vmem:[%s621_s1 + $0x10] sm:$0xf0]  ;;  %v329_v41 = vld [vmem:[%s621_s1 + $0x8] sm:$0xf]  ;;  %v396_v42 = vld [vmem:[%s621_s1 + $0x14] sm:$0xf0]  ;;  %v322_v45 = vor.u32 %v395_v37, %v321_v36 }
   0xb   :  { %v394_v43 = vld [vmem:[%s621_s1 + $0xc] sm:$0xf]  ;;  %v331_v44 = vld [vmem:[%s621_s1 + $0x18] sm:$0xf0]  ;;  %v213_v46 = vld [vmem:[%s622_s2 + $0x10] sm:$0xff]  ;;  %v326_v48 = vor.u32 %v393_v38, %v323_v40  ;;  %v330_v49 = vor.u32 %v396_v42, %v329_v41 }
   0xc   :  { %141 = vmatpush.bf16.msra.mxu0 %v338_v30  ;;  %v211_v47 = vld [vmem:[%s622_s2] sm:$0xff]  ;;  %v334_v50 = vor.u32 %v394_v43, %v331_v44  ;;  %227 = vperm.xlu1 %411, %v213_v46   ;;  %v214_v53 = vld [vmem:[%s622_s2 + $0x18] sm:$0xff]  ;;  %v212_v54 = vld [vmem:[%s622_s2 + $0x8] sm:$0xff] }
   0xd   :  { %160 = vmatpush.bf16.msra.mxu1 %v342_v34  ;;  %179 = vmatpush.bf16.msra.mxu2 %v346_v35  ;;  %v251_v51 = vld [vmem:[%s624_s3] sm:$0xff]  ;;  %v252_v55 = vld [vmem:[%s624_s3 + $0x8] sm:$0xff]  ;;  %v254_v56 = vld [vmem:[%s624_s3 + $0x18] sm:$0xff] }
   0xe   :  { %198 = vmatpush.bf16.msra.mxu3 %v350_v39  ;;  %v391_v52 = vld [vmem:[%s623_s0] sm:$0xff]  ;;  %217 = vperm.xlu0 %410, %v211_v47   ;;  %v253_v57 = vld [vmem:[%s624_s3 + $0x10] sm:$0xff]  ;;  %v392_v58 = vld [vmem:[%s623_s0 + $0x8] sm:$0xff] }
   0xf   :  { %257 = vperm.xlu2 %412, %v251_v51  }
  0x10   :  { %142 = vmatpush.bf16.msra.mxu0 %v322_v45 }
  0x11   :  { %161 = vmatpush.bf16.msra.mxu1 %v326_v48  ;;  %180 = vmatpush.bf16.msra.mxu2 %v330_v49 }
  0x12   :  { %199 = vmatpush.bf16.msra.mxu3 %v334_v50 }
  0x13   :  { %383 = vmatmul.msk.bf16.vlgmr.msra.gmra.mxu0 %vm128_vm0, %v391_v52 }
  0x14   :  { %385 = vmatmul.msk.bf16.vlgmr.msra.gmra.mxu1 %vm128_vm0, %v391_v52  ;;  %387 = vmatmul.msk.bf16.vlgmr.msra.gmra.mxu2 %vm128_vm0, %v391_v52 }
  0x15   :  { %389 = vmatmul.msk.bf16.vlgmr.msra.gmra.mxu3 %vm128_vm0, %v391_v52  ;;  %232 = vperm.xlu1 %411, %v214_v53  }
  0x16   :  { %222 = vperm.xlu0 %410, %v212_v54  }
  0x17   :  { %262 = vperm.xlu2 %412, %v252_v55  }
  0x1d   :  { %272 = vperm.xlu1 %411, %v254_v56  }
  0x1e   :  { %267 = vperm.xlu0 %410, %v253_v57  }
  0x23   :  { %384 = vmatmul.msk.bf16.gmra.mxu0 %vm128_vm0, %v392_v58 }
  0x24   :  { %386 = vmatmul.msk.bf16.gmra.mxu1 %vm128_vm0, %v392_v58  ;;  %388 = vmatmul.msk.bf16.gmra.mxu2 %vm128_vm0, %v392_v58 }
  0x25   :  { %390 = vmatmul.msk.bf16.gmra.mxu3 %vm128_vm0, %v392_v58 }
  0x69   :  { %v258_v60 = vpop.permute.xlu2 %257 }
  0x71   :  { %v263_v6 = vpop.permute.xlu2 %262 }
  0x7e   :  { %v228_v3 = vpop.permute.xlu1 %227 }
  0x80   :  { %v218_v59 = vpop.permute.xlu0 %217 }
  0x87   :  { %v233_v18 = vpop.permute.xlu1 %232 }
  0x88   :  { %v223_v4 = vpop.permute.xlu0 %222 }
  0x8f   :  { %v273_v39 = vpop.permute.xlu1 %272 }
  0x90   :  { %v144_v61 = vpop.f32.mrf.mxu0  ;;  %v268_v27 = vpop.permute.xlu0 %267 }
  0x91   :  { %v235_v62 = vmul.f32 %v218_v59, %v144_v61  ;;  %v163_v63 = vpop.f32.mrf.mxu1 }
  0x92   :  { %v236_v0 = vmul.f32 %v218_v59, %v163_v63 }
  0x93   :  { %v275_v1 = vadd.f32 %v258_v60, %v235_v62 }
  0x94   :  { %v276_v2 = vadd.f32 %v258_v60, %v236_v0 }
  0x95   :  { %291 = vst [vmem:[%s625_s4] sm:$0xff] %v275_v1 }
  0x96   :  { %292 = vst [vmem:[%s625_s4 + $0x8] sm:$0xff] %v276_v2 }
  0x97   :  { %v182_v5 = vpop.f32.mrf.mxu2 }
  0x98   :  { %v237_v7 = vmul.f32 %v218_v59, %v182_v5  ;;  %v201_v8 = vpop.f32.mrf.mxu3  ;;  %v146_v9 = vpop.f32.mrf.mxu0 }
  0x99   :  { %v238_v10 = vmul.f32 %v218_v59, %v201_v8  ;;  %v239_v11 = vmul.f32 %v223_v4, %v146_v9  ;;  %v165_v12 = vpop.f32.mrf.mxu1 }
  0x9a   :  { %v277_v13 = vadd.f32 %v258_v60, %v237_v7  ;;  %v240_v14 = vmul.f32 %v223_v4, %v165_v12 }
  0x9b   :  { %v278_v15 = vadd.f32 %v258_v60, %v238_v10  ;;  %v279_v16 = vadd.f32 %v263_v6, %v239_v11 }
  0x9c   :  { %293 = vst [vmem:[%s625_s4 + $0x10] sm:$0xff] %v277_v13  ;;  %v280_v17 = vadd.f32 %v263_v6, %v240_v14 }
  0x9d   :  { %294 = vst [vmem:[%s625_s4 + $0x18] sm:$0xff] %v278_v15 }
  0x9e   :  { %295 = vst [vmem:[%s625_s4 + $0x20] sm:$0xff] %v279_v16 }
  0x9f   :  { %296 = vst [vmem:[%s625_s4 + $0x28] sm:$0xff] %v280_v17  ;;  %v184_v19 = vpop.f32.mrf.mxu2 }
  0xa0   :  { %v241_v20 = vmul.f32 %v223_v4, %v184_v19  ;;  %v203_v21 = vpop.f32.mrf.mxu3  ;;  %v149_v22 = vpop.f32.mrf.mxu0 }
  0xa1   :  { %v242_v23 = vmul.f32 %v223_v4, %v203_v21  ;;  %v243_v24 = vmul.f32 %v228_v3, %v149_v22  ;;  %v168_v25 = vpop.f32.mrf.mxu1 }
  0xa2   :  { %v281_v26 = vadd.f32 %v263_v6, %v241_v20  ;;  %v244_v28 = vmul.f32 %v228_v3, %v168_v25 }
  0xa3   :  { %v282_v29 = vadd.f32 %v263_v6, %v242_v23  ;;  %v283_v30 = vadd.f32 %v268_v27, %v243_v24 }
  0xa4   :  { %297 = vst [vmem:[%s625_s4 + $0x30] sm:$0xff] %v281_v26  ;;  %v284_v31 = vadd.f32 %v268_v27, %v244_v28 }
  0xa5   :  { %298 = vst [vmem:[%s625_s4 + $0x38] sm:$0xff] %v282_v29 }
  0xa6   :  { %299 = vst [vmem:[%s625_s4 + $0x40] sm:$0xff] %v283_v30 }
  0xa7   :  { %300 = vst [vmem:[%s625_s4 + $0x48] sm:$0xff] %v284_v31  ;;  %v187_v32 = vpop.f32.mrf.mxu2 }
  0xa8   :  { %v245_v33 = vmul.f32 %v228_v3, %v187_v32  ;;  %v206_v34 = vpop.f32.mrf.mxu3  ;;  %v151_v35 = vpop.f32.mrf.mxu0 }
  0xa9   :  { %v246_v36 = vmul.f32 %v228_v3, %v206_v34  ;;  %v247_v37 = vmul.f32 %v233_v18, %v151_v35  ;;  %v170_v38 = vpop.f32.mrf.mxu1 }
  0xaa   :  { %v285_v40 = vadd.f32 %v268_v27, %v245_v33  ;;  %v248_v41 = vmul.f32 %v233_v18, %v170_v38 }
  0xab   :  { %v286_v42 = vadd.f32 %v268_v27, %v246_v36  ;;  %v287_v43 = vadd.f32 %v273_v39, %v247_v37 }
  0xac   :  { %301 = vst [vmem:[%s625_s4 + $0x50] sm:$0xff] %v285_v40  ;;  %v288_v44 = vadd.f32 %v273_v39, %v248_v41 }
  0xad   :  { %302 = vst [vmem:[%s625_s4 + $0x58] sm:$0xff] %v286_v42 }
  0xae   :  { %303 = vst [vmem:[%s625_s4 + $0x60] sm:$0xff] %v287_v43 }
  0xaf   :  { %304 = vst [vmem:[%s625_s4 + $0x68] sm:$0xff] %v288_v44  ;;  %v189_v45 = vpop.f32.mrf.mxu2 }
  0xb0   :  { %v249_v46 = vmul.f32 %v233_v18, %v189_v45  ;;  %v208_v47 = vpop.f32.mrf.mxu3 }
  0xb1   :  { %v250_v48 = vmul.f32 %v233_v18, %v208_v47 }
  0xb2   :  { %v289_v49 = vadd.f32 %v273_v39, %v249_v46 }
  0xb3   :  { %v290_v50 = vadd.f32 %v273_v39, %v250_v48 }
  0xb4   :  { %305 = vst [vmem:[%s625_s4 + $0x70] sm:$0xff] %v289_v49 }
  0xb5   :  { %306 = vst [vmem:[%s625_s4 + $0x78] sm:$0xff] %v290_v50 }

// kernel: cva_forward.26
= control target key start
LH: loop header
LB: loop body
LE: loop exit
PB: predicated region body
PF: predicated region fallthrough
CT: control target
= control target key end

     0   :  { %v1410_v47 = vmov 0   ;;  %vm622_vm0 = vcmask 785408   ;;  %s1955_s1 = inlined_call_operand.vmem [shape: bf16[864,128], index: 1, kind: input, shape index: {}]   ;;  %s1956_s0 = inlined_call_operand.vmem [shape: bf16[64,864], index: 0, kind: input, shape index: {}]   ;;  %s1957_s2 = inlined_call_operand.vmem [shape: f32[64,1], index: 2, kind: input, shape index: {}]   ;;  %s1958_s3 = inlined_call_operand.vmem [shape: f32[64,1], index: 3, kind: input, shape index: {}]   ;;  %s1959_s4 = inlined_call_operand.vmem [shape: f32[64,128], index: 4, kind: output, shape index: {}]  }
   0x1   :  { %v1337_v0 = vld [vmem:[%s1955_s1 + $0x38] sm:$0xff]  ;;  %v1336_v3 = vld [vmem:[%s1955_s1 + $0x30] sm:$0xff]  ;;  %v1335_v6 = vld [vmem:[%s1955_s1 + $0x28] sm:$0xff]  ;;  %1407 = vset.pattern.permute.xlu0 %v1410_v47  ;;  %1408 = vset.pattern.permute.xlu1 %v1410_v47 }
   0x2   :  { %v1345_v1 = vld [vmem:[%s1955_s1 + $0x78] sm:$0xff]  ;;  %635 = vmatpush.bf16.msra.mxu0 %v1337_v0  ;;  %1384 = vmatpush.bf16.msra.mxu3 %v1337_v0  ;;  %v1344_v4 = vld [vmem:[%s1955_s1 + $0x70] sm:$0xff]  ;;  %v1343_v7 = vld [vmem:[%s1955_s1 + $0x68] sm:$0xff] }
   0x3   :  { %v1353_v2 = vld [vmem:[%s1955_s1 + $0xb8] sm:$0xff]  ;;  %664 = vmatpush.bf16.msra.mxu1 %v1345_v1  ;;  %v1352_v5 = vld [vmem:[%s1955_s1 + $0xb0] sm:$0xff]  ;;  %v1351_v8 = vld [vmem:[%s1955_s1 + $0xa8] sm:$0xff]  ;;  %1409 = vset.pattern.permute.xlu2 %v1410_v47 }
   0x4   :  { %693 = vmatpush.bf16.msra.mxu2 %v1353_v2  ;;  %v1334_v9 = vld [vmem:[%s1955_s1 + $0x20] sm:$0xff]  ;;  %v1333_v12 = vld [vmem:[%s1955_s1 + $0x18] sm:$0xff]  ;;  %v1332_v15 = vld [vmem:[%s1955_s1 + $0x10] sm:$0xff] }
   0x5   :  { %v1342_v10 = vld [vmem:[%s1955_s1 + $0x60] sm:$0xff]  ;;  %v1341_v13 = vld [vmem:[%s1955_s1 + $0x58] sm:$0xff]  ;;  %v1340_v16 = vld [vmem:[%s1955_s1 + $0x50] sm:$0xff] }
   0x6   :  { %636 = vmatpush.bf16.msra.mxu0 %v1336_v3  ;;  %1385 = vmatpush.bf16.msra.mxu3 %v1336_v3  ;;  %v1350_v11 = vld [vmem:[%s1955_s1 + $0xa0] sm:$0xff]  ;;  %v1349_v14 = vld [vmem:[%s1955_s1 + $0x98] sm:$0xff]  ;;  %v1348_v17 = vld [vmem:[%s1955_s1 + $0x90] sm:$0xff] }
   0x7   :  { %665 = vmatpush.bf16.msra.mxu1 %v1344_v4  ;;  %v1331_v18 = vld [vmem:[%s1955_s1 + $0x8] sm:$0xff]  ;;  %v1330_v21 = vld [vmem:[%s1955_s1] sm:$0xff]  ;;  %v1305_v25 = vld [vmem:[%s1956_s0 + $0x18] sm:$0xf0] }
   0x8   :  { %694 = vmatpush.bf16.msra.mxu2 %v1352_v5  ;;  %v1339_v19 = vld [vmem:[%s1955_s1 + $0x48] sm:$0xff]  ;;  %v1338_v22 = vld [vmem:[%s1955_s1 + $0x40] sm:$0xff]  ;;  %v1028_v26 = vld [vmem:[%s1956_s0 + $0x70] sm:$0xf] }
   0x9   :  { %v1347_v20 = vld [vmem:[%s1955_s1 + $0x88] sm:$0xff]  ;;  %v1346_v23 = vld [vmem:[%s1955_s1 + $0x80] sm:$0xff]  ;;  %v1361_v32 = vld [vmem:[%s1955_s1 + $0xf8] sm:$0xff] }
   0xa   :  { %637 = vmatpush.bf16.msra.mxu0 %v1335_v6  ;;  %1386 = vmatpush.bf16.msra.mxu3 %v1335_v6  ;;  %v972_v24 = vld [vmem:[%s1956_s0] sm:$0xf]  ;;  %v1319_v27 = vld [vmem:[%s1956_s0 + $0x88] sm:$0xf0]  ;;  %v1302_v28 = vld [vmem:[%s1956_s0 + $0x4] sm:$0xf] }
   0xb   :  { %666 = vmatpush.bf16.msra.mxu1 %v1343_v7  ;;  %v974_v29 = vld [vmem:[%s1956_s0 + $0x1c] sm:$0xf0]  ;;  %v980_v30 = vld [vmem:[%s1956_s0 + $0x8] sm:$0xf]  ;;  %v1306_v31 = vld [vmem:[%s1956_s0 + $0x20] sm:$0xf0]  ;;  %v973_v34 = vor.u32 %v1305_v25, %v972_v24  ;;  %v1029_v35 = vor.u32 %v1319_v27, %v1028_v26 }
   0xc   :  { %695 = vmatpush.bf16.msra.mxu2 %v1351_v8  ;;  %v1538_v33 = vld [vmem:[%s1955_s1 + $0x1a8] sm:$0xff]  ;;  %v977_v36 = vor.u32 %v1302_v28, %v974_v29  ;;  %v981_v37 = vor.u32 %v1306_v31, %v980_v30  ;;  %v1369_v38 = vld [vmem:[%s1955_s1 + $0x138] sm:$0xff]  ;;  %v1360_v40 = vld [vmem:[%s1955_s1 + $0xf0] sm:$0xff] }
   0xd   :  { %v1546_v39 = vld [vmem:[%s1955_s1 + $0x178] sm:$0xff]  ;;  %v1555_v41 = vld [vmem:[%s1955_s1 + $0x1a0] sm:$0xff]  ;;  %v1368_v42 = vld [vmem:[%s1955_s1 + $0x130] sm:$0xff] }
   0xe   :  { %638 = vmatpush.bf16.msra.mxu0 %v1334_v9  ;;  %1387 = vmatpush.bf16.msra.mxu3 %v1334_v9  ;;  %v1564_v43 = vld [vmem:[%s1955_s1 + $0x170] sm:$0xff]  ;;  %v1359_v44 = vld [vmem:[%s1955_s1 + $0xe8] sm:$0xff]  ;;  %v1573_v45 = vld [vmem:[%s1955_s1 + $0x198] sm:$0xff] }
   0xf   :  { %667 = vmatpush.bf16.msra.mxu1 %v1342_v10  ;;  %v838_v46 = vld [vmem:[%s1957_s2] sm:$0xff]  ;;  %v1367_v48 = vld [vmem:[%s1955_s1 + $0x128] sm:$0xff]  ;;  %v1594_v51 = vld [vmem:[%s1955_s1 + $0x190] sm:$0xff] }
  0x10   :  { %696 = vmatpush.bf16.msra.mxu2 %v1350_v11  ;;  %848 = vperm.xlu0 %1407, %v838_v46   ;;  %v1585_v49 = vld [vmem:[%s1955_s1 + $0x168] sm:$0xff]  ;;  %v1358_v50 = vld [vmem:[%s1955_s1 + $0xe0] sm:$0xff]  ;;  %v1000_v53 = vld [vmem:[%s1956_s0 + $0x38] sm:$0xf] }
  0x11   :  { %v1366_v52 = vld [vmem:[%s1955_s1 + $0x120] sm:$0xff]  ;;  %v1312_v54 = vld [vmem:[%s1956_s0 + $0x50] sm:$0xf0]  ;;  %v1056_v55 = vld [vmem:[%s1956_s0 + $0xa8] sm:$0xf] }
  0x12   :  { %639 = vmatpush.bf16.msra.mxu0 %v1333_v12  ;;  %1388 = vmatpush.bf16.msra.mxu3 %v1333_v12  ;;  %v1326_v56 = vld [vmem:[%s1956_s0 + $0xc0] sm:$0xf0]  ;;  %v1309_v57 = vld [vmem:[%s1956_s0 + $0x3c] sm:$0xf]  ;;  %v1002_v58 = vld [vmem:[%s1956_s0 + $0x54] sm:$0xf0]  ;;  %v1001_v0 = vor.u32 %v1312_v54, %v1000_v53 }
  0x13   :  { %668 = vmatpush.bf16.msra.mxu1 %v1341_v13  ;;  %v1008_v59 = vld [vmem:[%s1956_s0 + $0x40] sm:$0xf]  ;;  %v1313_v60 = vld [vmem:[%s1956_s0 + $0x58] sm:$0xf0]  ;;  %v1636_v63 = vld [vmem:[%s1955_s1 + $0x188] sm:$0xff]  ;;  %v1057_v1 = vor.u32 %v1326_v56, %v1056_v55  ;;  %v1005_v2 = vor.u32 %v1309_v57, %v1002_v58 }
  0x14   :  { %697 = vmatpush.bf16.msra.mxu2 %v1349_v14  ;;  %v1627_v61 = vld [vmem:[%s1955_s1 + $0x160] sm:$0xff]  ;;  %v1357_v62 = vld [vmem:[%s1955_s1 + $0xd8] sm:$0xff]  ;;  %v1009_v3 = vor.u32 %v1313_v60, %v1008_v59  ;;  %v1356_v6 = vld [vmem:[%s1955_s1 + $0xd0] sm:$0xff] }
  0x15   :  { %v1365_v4 = vld [vmem:[%s1955_s1 + $0x118] sm:$0xff]  ;;  %v1364_v7 = vld [vmem:[%s1955_s1 + $0x110] sm:$0xff]  ;;  %v839_v9 = vld [vmem:[%s1957_s2 + $0x8] sm:$0xff] }
  0x16   :  { %640 = vmatpush.bf16.msra.mxu0 %v1332_v15  ;;  %1389 = vmatpush.bf16.msra.mxu3 %v1332_v15  ;;  %v1645_v5 = vld [vmem:[%s1955_s1 + $0x158] sm:$0xff]  ;;  %v1658_v8 = vld [vmem:[%s1955_s1 + $0x150] sm:$0xff]  ;;  %v1666_v10 = vld [vmem:[%s1955_s1 + $0x180] sm:$0xff] }
  0x17   :  { %669 = vmatpush.bf16.msra.mxu1 %v1340_v16  ;;  %v1355_v11 = vld [vmem:[%s1955_s1 + $0xc8] sm:$0xff]  ;;  %v840_v12 = vld [vmem:[%s1957_s2 + $0x10] sm:$0xff]  ;;  %v1354_v15 = vld [vmem:[%s1955_s1 + $0xc0] sm:$0xff] }
  0x18   :  { %698 = vmatpush.bf16.msra.mxu2 %v1348_v17  ;;  %853 = vperm.xlu0 %1407, %v839_v9   ;;  %v1363_v13 = vld [vmem:[%s1955_s1 + $0x108] sm:$0xff]  ;;  %v1362_v16 = vld [vmem:[%s1955_s1 + $0x100] sm:$0xff]  ;;  %v1316_v17 = vld [vmem:[%s1956_s0 + $0x74] sm:$0xf] }
  0x19   :  { %858 = vperm.xlu1 %1408, %v840_v12   ;;  %v1682_v14 = vld [vmem:[%s1955_s1 + $0x148] sm:$0xff]  ;;  %v1715_v24 = vld [vmem:[%s1955_s1 + $0x140] sm:$0xff]  ;;  %v988_v25 = vld [vmem:[%s1956_s0 + $0x10] sm:$0xf] }
  0x1a   :  { %641 = vmatpush.bf16.msra.mxu0 %v1331_v18  ;;  %1390 = vmatpush.bf16.msra.mxu3 %v1331_v18  ;;  %v844_v18 = vld [vmem:[%s1957_s2 + $0x30] sm:$0xff]  ;;  %v1307_v26 = vld [vmem:[%s1956_s0 + $0x28] sm:$0xf0]  ;;  %v841_v31 = vld [vmem:[%s1957_s2 + $0x18] sm:$0xff] }
  0x1b   :  { %670 = vmatpush.bf16.msra.mxu1 %v1339_v19  ;;  %v1030_v19 = vld [vmem:[%s1956_s0 + $0x8c] sm:$0xf0]  ;;  %v989_v30 = vor.u32 %v1307_v26, %v988_v25  ;;  %v842_v47 = vld [vmem:[%s1957_s2 + $0x20] sm:$0xff]  ;;  %v1311_v53 = vld [vmem:[%s1956_s0 + $0x4c] sm:$0xf] }
  0x1c   :  { %699 = vmatpush.bf16.msra.mxu2 %v1347_v20  ;;  %v1303_v20 = vld [vmem:[%s1956_s0 + $0xc] sm:$0xf]  ;;  %v1033_v28 = vor.u32 %v1316_v17, %v1030_v19  ;;  %868 = vperm.xlu2 %1409, %v842_v47   ;;  %v1018_v55 = vld [vmem:[%s1956_s0 + $0x64] sm:$0xf0]  ;;  %v996_v56 = vld [vmem:[%s1956_s0 + $0x18] sm:$0xf] }
  0x1d   :  { %v899_v54 = vld [vmem:[%s1958_s3 + $0x28] sm:$0xff]  ;;  %v1308_v57 = vld [vmem:[%s1956_s0 + $0x30] sm:$0xf0]  ;;  %v1044_v58 = vld [vmem:[%s1956_s0 + $0x80] sm:$0xf] }
  0x1e   :  { %642 = vmatpush.bf16.msra.mxu0 %v1330_v21  ;;  %1391 = vmatpush.bf16.msra.mxu3 %v1330_v21  ;;  %v982_v21 = vld [vmem:[%s1956_s0 + $0x24] sm:$0xf0]  ;;  %v1321_v59 = vld [vmem:[%s1956_s0 + $0x98] sm:$0xf0]  ;;  %v1328_v9 = vld [vmem:[%s1956_s0 + $0xd0] sm:$0xf0] }
  0x1f   :  { %671 = vmatpush.bf16.msra.mxu1 %v1338_v22  ;;  %v1036_v22 = vld [vmem:[%s1956_s0 + $0x78] sm:$0xf]  ;;  %v985_v27 = vor.u32 %v1303_v20, %v982_v21  ;;  %v1329_v17 = vld [vmem:[%s1956_s0 + $0xd8] sm:$0xf0]  ;;  %v1052_v19 = vld [vmem:[%s1956_s0 + $0x88] sm:$0xf] }
  0x20   :  { %700 = vmatpush.bf16.msra.mxu2 %v1346_v23  ;;  %v1320_v23 = vld [vmem:[%s1956_s0 + $0x90] sm:$0xf0]  ;;  %878 = vperm.xlu0 %1407, %v844_v18   ;;  %v1074_v18 = vld [vmem:[%s1956_s0 + $0xd4] sm:$0xf0]  ;;  %v1322_v20 = vld [vmem:[%s1956_s0 + $0xa0] sm:$0xf0] }
  0x21   :  { %643 = vmatmul.bf16.vlgmr.msra.gmra.mxu0 %v973_v34  ;;  %653 = vmatmul.bf16.vlgmr.msra.gmra.mxu3 %v1029_v35  ;;  %v1037_v29 = vor.u32 %v1320_v23, %v1036_v22  ;;  %v845_v34 = vld [vmem:[%s1957_s2 + $0x38] sm:$0xff]  ;;  %v1310_v35 = vld [vmem:[%s1956_s0 + $0x44] sm:$0xf]  ;;  %v1304_v21 = vld [vmem:[%s1956_s0 + $0x14] sm:$0xf]  ;;  %v1053_v25 = vor.u32 %v1322_v20, %v1052_v19 }
  0x22   :  { %722 = vmatpush.bf16.msrb.mxu3 %v1361_v32  ;;  %672 = vmatmul.bf16.vlgmr.msra.gmra.mxu1 %v977_v36  ;;  %v895_v32 = vld [vmem:[%s1958_s3 + $0x8] sm:$0xff]  ;;  %v1010_v36 = vld [vmem:[%s1956_s0 + $0x5c] sm:$0xf0]  ;;  %v990_v22 = vld [vmem:[%s1956_s0 + $0x2c] sm:$0xf0] }
  0x23   :  { %701 = vmatmul.bf16.vlgmr.msra.gmra.mxu2 %v981_v37  ;;  %751 = vmatpush.bf16.msrb.mxu0 %v1369_v38  ;;  %v898_v37 = vld [vmem:[%s1958_s3 + $0x20] sm:$0xff]  ;;  %v1058_v38 = vld [vmem:[%s1956_s0 + $0xc4] sm:$0xf0]  ;;  %v993_v26 = vor.u32 %v1304_v21, %v990_v22 }
  0x24   :  { %811 = vmatpush.bf16.msrb.mxu2 %v1538_v33  ;;  %1392 = vmatpush.bf16.msrb.mxu1 %v1546_v39 }
  0x25   :  { %863 = vperm.xlu1 %1408, %v841_v31  }
  0x26   :  { %723 = vmatpush.bf16.msrb.mxu3 %v1360_v40  ;;  %v1327_v40 = vld [vmem:[%s1956_s0 + $0xc8] sm:$0xf0] }
  0x27   :  { %752 = vmatpush.bf16.msrb.mxu0 %v1368_v42  ;;  %v1314_v42 = vld [vmem:[%s1956_s0 + $0x60] sm:$0xf0] }
  0x28   :  { %812 = vmatpush.bf16.msrb.mxu2 %v1555_v41  ;;  %1393 = vmatpush.bf16.msrb.mxu1 %v1564_v43 }
  0x29   :  { %909 = vperm.xlu0 %1407, %v895_v32  }
  0x2a   :  { %724 = vmatpush.bf16.msrb.mxu3 %v1359_v44 }
  0x2b   :  { %753 = vmatpush.bf16.msrb.mxu0 %v1367_v48  ;;  %v896_v48 = vld [vmem:[%s1958_s3 + $0x10] sm:$0xff] }
  0x2c   :  { %813 = vmatpush.bf16.msrb.mxu2 %v1573_v45  ;;  %1394 = vmatpush.bf16.msrb.mxu1 %v1585_v49 }
  0x2d   :  { %883 = vperm.xlu1 %1408, %v845_v34  }
  0x2e   :  { %725 = vmatpush.bf16.msrb.mxu3 %v1358_v50  ;;  %v1317_v50 = vld [vmem:[%s1956_s0 + $0x7c] sm:$0xf] }
  0x2f   :  { %754 = vmatpush.bf16.msrb.mxu0 %v1366_v52  ;;  %v1038_v52 = vld [vmem:[%s1956_s0 + $0x94] sm:$0xf0] }
  0x30   :  { %814 = vmatpush.bf16.msrb.mxu2 %v1594_v51  ;;  %1395 = vmatpush.bf16.msrb.mxu1 %v1627_v61  ;;  %v1041_v60 = vor.u32 %v1317_v50, %v1038_v52 }
  0x31   :  { %648 = vmatmul.bf16.gmra.mxu0 %v1001_v0  ;;  %658 = vmatmul.bf16.gmra.mxu3 %v1057_v1  ;;  %v894_v0 = vld [vmem:[%s1958_s3] sm:$0xff]  ;;  %v897_v1 = vld [vmem:[%s1958_s3 + $0x18] sm:$0xff] }
  0x32   :  { %726 = vmatpush.bf16.msrb.mxu3 %v1357_v62  ;;  %677 = vmatmul.bf16.gmra.mxu1 %v1005_v2  ;;  %v997_v62 = vor.u32 %v1308_v57, %v996_v56  ;;  %v1324_v2 = vld [vmem:[%s1956_s0 + $0xb4] sm:$0xf] }
  0x33   :  { %706 = vmatmul.bf16.gmra.mxu2 %v1009_v3  ;;  %755 = vmatpush.bf16.msrb.mxu0 %v1365_v4  ;;  %v1066_v3 = vld [vmem:[%s1956_s0 + $0xcc] sm:$0xf0]  ;;  %v1318_v4 = vld [vmem:[%s1956_s0 + $0x84] sm:$0xf] }
  0x34   :  { %815 = vmatpush.bf16.msrb.mxu2 %v1636_v63  ;;  %1396 = vmatpush.bf16.msrb.mxu1 %v1645_v5 }
  0x35   :  { %924 = vperm.xlu0 %1407, %v898_v37   ;;  %914 = vperm.xlu1 %1408, %v896_v48  }
  0x36   :  { %727 = vmatpush.bf16.msrb.mxu3 %v1356_v6  ;;  %v1024_v6 = vld [vmem:[%s1956_s0 + $0x50] sm:$0xf] }
  0x37   :  { %756 = vmatpush.bf16.msrb.mxu0 %v1364_v7  ;;  %v1315_v7 = vld [vmem:[%s1956_s0 + $0x68] sm:$0xf0] }
  0x38   :  { %816 = vmatpush.bf16.msrb.mxu2 %v1666_v10  ;;  %1397 = vmatpush.bf16.msrb.mxu1 %v1658_v8  ;;  %v1025_v12 = vor.u32 %v1315_v7, %v1024_v6 }
  0x3a   :  { %728 = vmatpush.bf16.msrb.mxu3 %v1355_v11 }
  0x3b   :  { %757 = vmatpush.bf16.msrb.mxu0 %v1363_v13 }
  0x3c   :  { %1398 = vmatpush.bf16.msrb.mxu1 %v1682_v14 }
  0x3d   :  { %929 = vperm.xlu1 %1408, %v899_v54  }
  0x3e   :  { %729 = vmatpush.bf16.msrb.mxu3 %v1354_v15  ;;  %v1325_v15 = vld [vmem:[%s1956_s0 + $0xbc] sm:$0xf] }
  0x3f   :  { %758 = vmatpush.bf16.msrb.mxu0 %v1362_v16  ;;  %v1080_v16 = vld [vmem:[%s1956_s0 + $0xc0] sm:$0xf] }
  0x40   :  { %1399 = vmatpush.bf16.msrb.mxu1 %v1715_v24  ;;  %v1081_v23 = vor.u32 %v1329_v17, %v1080_v16 }
  0x41   :  { %730 = vmatmul.bf16.vlgmr.msrb.gmra.mxu3 %v985_v27 }
  0x42   :  { %1400 = vmatpush.bf16.msra.mxu3 %v1538_v33  ;;  %682 = vmatmul.bf16.gmra.mxu1 %v1033_v28  ;;  %v1323_v33 = vld [vmem:[%s1956_s0 + $0xac] sm:$0xf] }
  0x43   :  { %780 = vmatpush.bf16.msra.mxu0 %v1546_v39  ;;  %711 = vmatmul.bf16.gmra.mxu2 %v1037_v29  ;;  %v1064_v39 = vld [vmem:[%s1956_s0 + $0xb0] sm:$0xf]  ;;  %v1061_v44 = vor.u32 %v1323_v33, %v1058_v38 }
  0x44   :  { %759 = vmatmul.bf16.vlgmr.msrb.gmra.mxu0 %v989_v30 }
  0x46   :  { %1401 = vmatpush.bf16.msra.mxu3 %v1555_v41  ;;  %v1016_v41 = vld [vmem:[%s1956_s0 + $0x48] sm:$0xf] }
  0x47   :  { %781 = vmatpush.bf16.msra.mxu0 %v1564_v43  ;;  %v1013_v43 = vor.u32 %v1310_v35, %v1010_v36  ;;  %v1017_v46 = vor.u32 %v1314_v42, %v1016_v41 }
  0x4a   :  { %1402 = vmatpush.bf16.msra.mxu3 %v1573_v45  ;;  %v1065_v45 = vor.u32 %v1327_v40, %v1064_v39 }
  0x4b   :  { %782 = vmatpush.bf16.msra.mxu0 %v1585_v49  ;;  %v901_v49 = vld [vmem:[%s1958_s3 + $0x38] sm:$0xff] }
  0x4c   :  { %939 = vperm.xlu0 %1407, %v901_v49  }
  0x4e   :  { %1403 = vmatpush.bf16.msra.mxu3 %v1594_v51  ;;  %v843_v51 = vld [vmem:[%s1957_s2 + $0x28] sm:$0xff] }
  0x4f   :  { %783 = vmatpush.bf16.msra.mxu0 %v1627_v61  ;;  %873 = vperm.xlu2 %1409, %v843_v51   ;;  %v1021_v61 = vor.u32 %v1311_v53, %v1018_v55 }
  0x51   :  { %735 = vmatmul.bf16.gmra.mxu3 %v1013_v43 }
  0x52   :  { %1404 = vmatpush.bf16.msra.mxu3 %v1636_v63  ;;  %687 = vmatmul.bf16.gmra.mxu1 %v1061_v44  ;;  %v1045_v63 = vor.u32 %v1321_v59, %v1044_v58 }
  0x53   :  { %784 = vmatpush.bf16.msra.mxu0 %v1645_v5  ;;  %716 = vmatmul.bf16.gmra.mxu2 %v1065_v45  ;;  %v1046_v5 = vld [vmem:[%s1956_s0 + $0x9c] sm:$0xf0] }
  0x54   :  { %764 = vmatmul.bf16.gmra.mxu0 %v1017_v46  ;;  %v1049_v11 = vor.u32 %v1318_v4, %v1046_v5 }
  0x56   :  { %1405 = vmatpush.bf16.msra.mxu3 %v1666_v10  ;;  %v1069_v10 = vor.u32 %v1324_v2, %v1066_v3 }
  0x57   :  { %785 = vmatpush.bf16.msra.mxu0 %v1658_v8  ;;  %904 = vperm.xlu2 %1409, %v894_v0   ;;  %v1072_v8 = vld [vmem:[%s1956_s0 + $0xb8] sm:$0xf] }
  0x58   :  { %v1073_v13 = vor.u32 %v1328_v9, %v1072_v8 }
  0x5b   :  { %786 = vmatpush.bf16.msra.mxu0 %v1682_v14  ;;  %v900_v14 = vld [vmem:[%s1958_s3 + $0x30] sm:$0xff] }
  0x5f   :  { %787 = vmatpush.bf16.msra.mxu0 %v1715_v24  ;;  %919 = vperm.xlu2 %1409, %v897_v1   ;;  %v1077_v24 = vor.u32 %v1325_v15, %v1074_v18 }
  0x61   :  { %740 = vmatmul.bf16.gmra.mxu3 %v1041_v60 }
  0x62   :  { %793 = vmatmul.bf16.vlgmr.msrb.gmra.mxu1 %v1021_v61 }
  0x63   :  { %1298 = vmatmul.msk.bf16.vlgmr.msrb.gmra.mxu2 %vm622_vm0, %v997_v62 }
  0x64   :  { %769 = vmatmul.bf16.gmra.mxu0 %v1045_v63 }
  0x67   :  { %934 = vperm.xlu2 %1409, %v900_v14  }
  0x71   :  { %745 = vmatmul.bf16.gmra.mxu3 %v1069_v10 }
  0x72   :  { %798 = vmatmul.bf16.gmra.mxu1 %v1049_v11 }
  0x73   :  { %1299 = vmatmul.msk.bf16.gmra.mxu2 %vm622_vm0, %v1025_v12 }
  0x74   :  { %774 = vmatmul.bf16.gmra.mxu0 %v1073_v13 }
  0x76   :  { %v1898_v1 = vpop.permute.xlu2 %868 }
  0x81   :  { %1301 = vmatmul.msk.bf16.vlgmr.msra.gmra.mxu3 %vm622_vm0, %v1081_v23 }
  0x82   :  { %803 = vmatmul.bf16.gmra.mxu1 %v1077_v24  ;;  %v1896_v0 = vpop.permute.xlu0 %848 }
  0x83   :  { %1300 = vmatmul.msk.bf16.gmra.mxu2 %vm622_vm0, %v1053_v25 }
  0x84   :  { %788 = vmatmul.bf16.vlgmr.msra.gmra.mxu0 %v993_v26 }
  0x8a   :  { %v1900_v9 = vpop.permute.xlu0 %853 }
  0x8b   :  { %v859_v61 = vpop.permute.xlu1 %858 }
  0x92   :  { %v879_v20 = vpop.permute.xlu0 %878 }
  0x97   :  { %v864_v5 = vpop.permute.xlu1 %863 }
  0x9e   :  { %v644_v27 = vpop.f32.mrf.mxu0 }
  0x9f   :  { %v673_v28 = vpop.f32.mrf.mxu1  ;;  %v1908_v16 = vpop.permute.xlu1 %883 }
  0xa0   :  { %v674_v29 = vadd.f32 %v673_v28, %v644_v27 }
  0xa4   :  { %v1874_v30 = vpop.f32.mrf.mxu3 }
  0xa6   :  { %v702_v31 = vpop.f32.mrf.mxu2  ;;  %v646_v33 = vpop.f32.mrf.mxu0 }
  0xa7   :  { %v1876_v32 = vadd.f32 %v702_v31, %v674_v29  ;;  %v675_v34 = vpop.f32.mrf.mxu1 }
  0xa8   :  { %v676_v35 = vadd.f32 %v675_v34, %v646_v33 }
  0xa9   :  { %v1904_v11 = vpop.permute.xlu2 %873 }
  0xac   :  { %v1878_v36 = vpop.f32.mrf.mxu3 }
  0xae   :  { %v704_v37 = vpop.f32.mrf.mxu2  ;;  %v649_v39 = vpop.f32.mrf.mxu0 }
  0xaf   :  { %v1880_v38 = vadd.f32 %v704_v37, %v676_v35  ;;  %v678_v40 = vpop.f32.mrf.mxu1  ;;  %v915_v35 = vpop.permute.xlu1 %914 }
  0xb0   :  { %v679_v8 = vadd.f32 %v678_v40, %v649_v39 }
  0xb1   :  { %v905_v22 = vpop.permute.xlu2 %904 }
  0xb4   :  { %v659_v41 = vpop.f32.mrf.mxu3 }
  0xb6   :  { %v707_v42 = vpop.f32.mrf.mxu2  ;;  %v651_v43 = vpop.f32.mrf.mxu0 }
  0xb7   :  { %v680_v44 = vpop.f32.mrf.mxu1  ;;  %v708_v12 = vadd.f32 %v707_v42, %v679_v8 }
  0xb8   :  { %v681_v19 = vadd.f32 %v680_v44, %v651_v43 }
  0xbc   :  { %v1882_v45 = vpop.f32.mrf.mxu3 }
  0xbe   :  { %v709_v46 = vpop.f32.mrf.mxu2 }
  0xbf   :  { %v683_v47 = vpop.f32.mrf.mxu1  ;;  %v710_v23 = vadd.f32 %v709_v46, %v681_v19  ;;  %v910_v46 = vpop.permute.xlu0 %909 }
  0xc0   :  { %v684_v37 = vadd.f32 %v683_v47, %v1874_v30 }
  0xc1   :  { %v1884_v48 = vpop.f32.mrf.mxu0 }
  0xc4   :  { %v731_v49 = vpop.f32.mrf.mxu3 }
  0xc5   :  { %v732_v42 = vadd.f32 %v731_v49, %v1876_v32 }
  0xc6   :  { %v712_v50 = vpop.f32.mrf.mxu2 }
  0xc7   :  { %v1886_v51 = vpop.f32.mrf.mxu1  ;;  %v713_v44 = vadd.f32 %v712_v50, %v684_v37  ;;  %v761_v30 = vadd.f32 %v1884_v48, %v732_v42 }
  0xc9   :  { %v1888_v52 = vpop.f32.mrf.mxu0 }
  0xcc   :  { %v1890_v53 = vpop.f32.mrf.mxu3 }
  0xce   :  { %v1892_v54 = vpop.f32.mrf.mxu2 }
  0xcf   :  { %v688_v55 = vpop.f32.mrf.mxu1 }
  0xd0   :  { %v689_v34 = vadd.f32 %v688_v55, %v659_v41 }
  0xd1   :  { %v765_v56 = vpop.f32.mrf.mxu0 }
  0xd4   :  { %v736_v57 = vpop.f32.mrf.mxu3 }
  0xd5   :  { %v737_v15 = vadd.f32 %v736_v57, %v708_v12 }
  0xd6   :  { %v717_v58 = vpop.f32.mrf.mxu2 }
  0xd7   :  { %v690_v59 = vpop.f32.mrf.mxu1  ;;  %v766_v21 = vadd.f32 %v765_v56, %v737_v15  ;;  %v718_v43 = vadd.f32 %v717_v58, %v689_v34 }
  0xd8   :  { %v691_v49 = vadd.f32 %v690_v59, %v1882_v45 }
  0xd9   :  { %v767_v60 = vpop.f32.mrf.mxu0 }
  0xdc   :  { %v738_v62 = vpop.f32.mrf.mxu3 }
  0xdd   :  { %v739_v27 = vadd.f32 %v738_v62, %v710_v23  ;;  %v920_v62 = vpop.permute.xlu2 %919 }
  0xde   :  { %v1894_v63 = vpop.f32.mrf.mxu2 }
  0xdf   :  { %v794_v2 = vpop.f32.mrf.mxu1  ;;  %v768_v39 = vadd.f32 %v767_v60, %v739_v27  ;;  %v686_v60 = vadd.f32 %v1886_v51, %v1878_v36  ;;  %v720_v19 = vadd.f32 %v1894_v63, %v691_v49  ;;  %v925_v36 = vpop.permute.xlu0 %924 }
  0xe0   :  { %v795_v24 = vadd.f32 %v794_v2, %v766_v21 }
  0xe1   :  { %v770_v3 = vpop.f32.mrf.mxu0  ;;  %v715_v48 = vadd.f32 %v1892_v54, %v686_v60 }
  0xe4   :  { %v741_v4 = vpop.f32.mrf.mxu3 }
  0xe5   :  { %v742_v15 = vadd.f32 %v741_v4, %v713_v44  ;;  %v734_v4 = vadd.f32 %v1890_v53, %v1880_v38  ;;  %v935_v53 = vpop.permute.xlu2 %934 }
  0xe6   :  { %v818_v6 = vpop.f32.mrf.mxu2 }
  0xe7   :  { %v796_v7 = vpop.f32.mrf.mxu1  ;;  %v763_v54 = vadd.f32 %v1888_v52, %v734_v4  ;;  %v940_v44 = vpop.permute.xlu0 %939 }
  0xe8   :  { %v797_v56 = vadd.f32 %v796_v7, %v768_v39 }
  0xe9   :  { %v1902_v10 = vpop.f32.mrf.mxu0 }
  0xec   :  { %v743_v13 = vpop.f32.mrf.mxu3 }
  0xed   :  { %v744_v51 = vadd.f32 %v743_v13, %v715_v48 }
  0xee   :  { %v1906_v14 = vpop.f32.mrf.mxu2 }
  0xef   :  { %v799_v17 = vpop.f32.mrf.mxu1  ;;  %v773_v13 = vadd.f32 %v1902_v10, %v744_v51 }
  0xf1   :  { %v775_v18 = vpop.f32.mrf.mxu0 }
  0xf4   :  { %v746_v25 = vpop.f32.mrf.mxu3 }
  0xf5   :  { %v747_v8 = vadd.f32 %v746_v25, %v718_v43 }
  0xf6   :  { %v823_v26 = vpop.f32.mrf.mxu2 }
  0xf7   :  { %v824_v28 = vadd.f32 %v823_v26, %v795_v24  ;;  %v1910_v29 = vpop.f32.mrf.mxu1  ;;  %v776_v58 = vadd.f32 %v775_v18, %v747_v8 }
  0xf8   :  { %v802_v52 = vadd.f32 %v1910_v29, %v773_v13 }
  0xf9   :  { %v888_v31 = vmul.f32 %v859_v61, %v824_v28  ;;  %v777_v33 = vpop.f32.mrf.mxu0  ;;  %v771_v61 = vadd.f32 %v770_v3, %v742_v15 }
  0xfb   :  { %v944_v40 = vadd.f32 %v915_v35, %v888_v31 }
  0xfc   :  { %v748_v2 = vpop.f32.mrf.mxu3 }
  0xfd   :  { %v952_v57 = vmax.f32 %v944_v40, 0.0  ;;  %v749_v45 = vadd.f32 %v748_v2, %v720_v19 }
  0xfe   :  { %v825_v12 = vpop.f32.mrf.mxu2 }
  0xff   :  { %960 = vst [vmem:[%s1959_s4 + $0x10] sm:$0xff] %v952_v57  ;;  %v826_v41 = vadd.f32 %v825_v12, %v797_v56  ;;  %v804_v47 = vpop.f32.mrf.mxu1  ;;  %v778_v34 = vadd.f32 %v777_v33, %v749_v45  ;;  %v930_v56 = vpop.permute.xlu1 %929 }
 0x100   :  { %v805_v23 = vadd.f32 %v804_v47, %v776_v58 }
 0x101   :  { %v889_v55 = vmul.f32 %v864_v5, %v826_v41  ;;  %v789_v32 = vpop.f32.mrf.mxu0  ;;  %v800_v5 = vadd.f32 %v799_v17, %v771_v61 }
 0x102   :  { %v790_v50 = vadd.f32 %v789_v32, %v761_v30 }
 0x103   :  { %v945_v7 = vadd.f32 %v920_v62, %v889_v55 }
 0x104   :  { %v819_v21 = vadd.f32 %v818_v6, %v790_v50  ;;  %v833_v25 = vpop.f32.mrf.mxu3 }
 0x105   :  { %v953_v24 = vmax.f32 %v945_v7, 0.0  ;;  %v834_v26 = vadd.f32 %v833_v25, %v805_v23 }
 0x106   :  { %v886_v59 = vmul.f32 %v1896_v0, %v819_v21  ;;  %v828_v18 = vpop.f32.mrf.mxu2 }
 0x107   :  { %961 = vst [vmem:[%s1959_s4 + $0x18] sm:$0xff] %v953_v24  ;;  %v829_v38 = vadd.f32 %v828_v18, %v800_v5  ;;  %v892_v3 = vmul.f32 %v879_v20, %v834_v26  ;;  %v806_v27 = vpop.f32.mrf.mxu1 }
 0x108   :  { %v942_v63 = vadd.f32 %v905_v22, %v886_v59  ;;  %v807_v22 = vadd.f32 %v806_v27, %v778_v34 }
 0x109   :  { %v890_v6 = vmul.f32 %v1898_v1, %v829_v38  ;;  %v791_v17 = vpop.f32.mrf.mxu0  ;;  %v948_v0 = vadd.f32 %v935_v53, %v892_v3 }
 0x10a   :  { %v950_v28 = vmax.f32 %v942_v63, 0.0  ;;  %v792_v31 = vadd.f32 %v791_v17, %v763_v54 }
 0x10b   :  { %v946_v35 = vadd.f32 %v925_v36, %v890_v6  ;;  %v956_v37 = vmax.f32 %v948_v0, 0.0 }
 0x10c   :  { %958 = vst [vmem:[%s1959_s4] sm:$0xff] %v950_v28  ;;  %v821_v20 = vadd.f32 %v1906_v14, %v792_v31  ;;  %v835_v39 = vpop.f32.mrf.mxu3 }
 0x10d   :  { %v954_v1 = vmax.f32 %v946_v35, 0.0  ;;  %964 = vst [vmem:[%s1959_s4 + $0x30] sm:$0xff] %v956_v37  ;;  %v836_v40 = vadd.f32 %v835_v39, %v807_v22 }
 0x10e   :  { %v887_v33 = vmul.f32 %v1900_v9, %v821_v20  ;;  %v830_v10 = vpop.f32.mrf.mxu2 }
 0x10f   :  { %962 = vst [vmem:[%s1959_s4 + $0x20] sm:$0xff] %v954_v1  ;;  %v831_v42 = vadd.f32 %v830_v10, %v802_v52  ;;  %v893_v14 = vmul.f32 %v1908_v16, %v836_v40 }
 0x110   :  { %v943_v43 = vadd.f32 %v910_v46, %v887_v33 }
 0x111   :  { %v891_v29 = vmul.f32 %v1904_v11, %v831_v42  ;;  %v949_v2 = vadd.f32 %v940_v44, %v893_v14 }
 0x112   :  { %v951_v57 = vmax.f32 %v943_v43, 0.0 }
 0x113   :  { %v947_v62 = vadd.f32 %v930_v56, %v891_v29  ;;  %v957_v9 = vmax.f32 %v949_v2, 0.0 }
 0x114   :  { %959 = vst [vmem:[%s1959_s4 + $0x8] sm:$0xff] %v951_v57 }
 0x115   :  { %v955_v8 = vmax.f32 %v947_v62, 0.0  ;;  %965 = vst [vmem:[%s1959_s4 + $0x38] sm:$0xff] %v957_v9 }
 0x117   :  { %963 = vst [vmem:[%s1959_s4 + $0x28] sm:$0xff] %v955_v8 }

// kernel: cva_forward.27
= control target key start
LH: loop header
LB: loop body
LE: loop exit
PB: predicated region body
PF: predicated region fallthrough
CT: control target
= control target key end

     0   :  { %vm1214_vm0 = vcmask 523264   ;;  %s3494_s1 = inlined_call_operand.vmem [shape: bf16[1728,128], index: 1, kind: input, shape index: {}]   ;;  %s3495_s0 = inlined_call_operand.vmem [shape: bf16[64,1728], index: 0, kind: input, shape index: {}]   ;;  %s3496_s2 = inlined_call_operand.vmem [shape: f32[64,1], index: 2, kind: input, shape index: {}]   ;;  %s3497_s3 = inlined_call_operand.vmem [shape: f32[64,1], index: 3, kind: input, shape index: {}]   ;;  %s3498_s4 = inlined_call_operand.vmem [shape: f32[64,128], index: 4, kind: output, shape index: {}]  }
   0x1   :  { %v2488_v0 = vld [vmem:[%s3494_s1 + $0x38] sm:$0xff]  ;;  %v2487_v2 = vld [vmem:[%s3494_s1 + $0x30] sm:$0xff]  ;;  %v2486_v4 = vld [vmem:[%s3494_s1 + $0x28] sm:$0xff] }
   0x2   :  { %v2496_v1 = vld [vmem:[%s3494_s1 + $0x78] sm:$0xff]  ;;  %2589 = vmatpush.bf16.msra.mxu2 %v2488_v0  ;;  %v2495_v3 = vld [vmem:[%s3494_s1 + $0x70] sm:$0xff]  ;;  %1227 = vmatpush.bf16.msra.mxu0 %v2488_v0  ;;  %v2494_v5 = vld [vmem:[%s3494_s1 + $0x68] sm:$0xff] }
   0x3   :  { %2597 = vmatpush.bf16.msra.mxu3 %v2496_v1  ;;  %1256 = vmatpush.bf16.msra.mxu1 %v2496_v1  ;;  %v2485_v6 = vld [vmem:[%s3494_s1 + $0x20] sm:$0xff]  ;;  %v2484_v8 = vld [vmem:[%s3494_s1 + $0x18] sm:$0xff]  ;;  %v2483_v10 = vld [vmem:[%s3494_s1 + $0x10] sm:$0xff] }
   0x4   :  { %v2493_v7 = vld [vmem:[%s3494_s1 + $0x60] sm:$0xff]  ;;  %v2492_v9 = vld [vmem:[%s3494_s1 + $0x58] sm:$0xff]  ;;  %v2491_v11 = vld [vmem:[%s3494_s1 + $0x50] sm:$0xff] }
   0x5   :  { %v2482_v12 = vld [vmem:[%s3494_s1 + $0x8] sm:$0xff]  ;;  %v2481_v14 = vld [vmem:[%s3494_s1] sm:$0xff]  ;;  %v2460_v17 = vld [vmem:[%s3495_s0 + $0x114] sm:$0xf0] }
   0x6   :  { %2590 = vmatpush.bf16.msra.mxu2 %v2487_v2  ;;  %1228 = vmatpush.bf16.msra.mxu0 %v2487_v2  ;;  %v2490_v13 = vld [vmem:[%s3494_s1 + $0x48] sm:$0xff]  ;;  %v2489_v15 = vld [vmem:[%s3494_s1 + $0x40] sm:$0xff]  ;;  %v1881_v19 = vld [vmem:[%s3495_s0 + $0x118] sm:$0xf0] }
   0x7   :  { %2598 = vmatpush.bf16.msra.mxu3 %v2495_v3  ;;  %1257 = vmatpush.bf16.msra.mxu1 %v2495_v3  ;;  %v1879_v16 = vld [vmem:[%s3495_s0 + $0xe0] sm:$0xf]  ;;  %v2453_v18 = vld [vmem:[%s3495_s0 + $0xe4] sm:$0xf]  ;;  %v2432_v21 = vld [vmem:[%s3495_s0 + $0x34] sm:$0xf0] }
   0x8   :  { %v1767_v20 = vld [vmem:[%s3495_s0] sm:$0xf]  ;;  %v2425_v22 = vld [vmem:[%s3495_s0 + $0x4] sm:$0xf]  ;;  %v1769_v23 = vld [vmem:[%s3495_s0 + $0x38] sm:$0xf0]  ;;  %v1880_v26 = vor.u32 %v2460_v17, %v1879_v16  ;;  %v1884_v27 = vor.u32 %v2453_v18, %v1881_v19 }
   0x9   :  { %v2504_v24 = vld [vmem:[%s3494_s1 + $0xb8] sm:$0xff]  ;;  %v1768_v28 = vor.u32 %v2432_v21, %v1767_v20  ;;  %v1772_v29 = vor.u32 %v2425_v22, %v1769_v23  ;;  %v2503_v32 = vld [vmem:[%s3494_s1 + $0xb0] sm:$0xff]  ;;  %v2502_v36 = vld [vmem:[%s3494_s1 + $0xa8] sm:$0xff] }
   0xa   :  { %2591 = vmatpush.bf16.msra.mxu2 %v2486_v4  ;;  %1229 = vmatpush.bf16.msra.mxu0 %v2486_v4  ;;  %v2512_v25 = vld [vmem:[%s3494_s1 + $0xf8] sm:$0xff]  ;;  %v2511_v33 = vld [vmem:[%s3494_s1 + $0xf0] sm:$0xff]  ;;  %v2510_v37 = vld [vmem:[%s3494_s1 + $0xe8] sm:$0xff] }
   0xb   :  { %2599 = vmatpush.bf16.msra.mxu3 %v2494_v5  ;;  %1258 = vmatpush.bf16.msra.mxu1 %v2494_v5  ;;  %v2520_v30 = vld [vmem:[%s3494_s1 + $0x138] sm:$0xff]  ;;  %v2519_v34 = vld [vmem:[%s3494_s1 + $0x130] sm:$0xff]  ;;  %v2518_v38 = vld [vmem:[%s3494_s1 + $0x128] sm:$0xff] }
   0xc   :  { %v2528_v31 = vld [vmem:[%s3494_s1 + $0x178] sm:$0xff]  ;;  %v2527_v35 = vld [vmem:[%s3494_s1 + $0x170] sm:$0xff]  ;;  %v2526_v39 = vld [vmem:[%s3494_s1 + $0x168] sm:$0xff] }
   0xd   :  { %v2501_v40 = vld [vmem:[%s3494_s1 + $0xa0] sm:$0xff]  ;;  %v1935_v43 = vld [vmem:[%s3495_s0 + $0x150] sm:$0xf]  ;;  %v2474_v44 = vld [vmem:[%s3495_s0 + $0x184] sm:$0xf0] }
   0xe   :  { %2592 = vmatpush.bf16.msra.mxu2 %v2485_v6  ;;  %1230 = vmatpush.bf16.msra.mxu0 %v2485_v6  ;;  %v2509_v41 = vld [vmem:[%s3494_s1 + $0xe0] sm:$0xff]  ;;  %v2467_v45 = vld [vmem:[%s3495_s0 + $0x154] sm:$0xf]  ;;  %v1937_v46 = vld [vmem:[%s3495_s0 + $0x188] sm:$0xf0]  ;;  %v1936_v54 = vor.u32 %v2474_v44, %v1935_v43 }
   0xf   :  { %2600 = vmatpush.bf16.msra.mxu3 %v2493_v7  ;;  %1259 = vmatpush.bf16.msra.mxu1 %v2493_v7  ;;  %v2517_v42 = vld [vmem:[%s3494_s1 + $0x120] sm:$0xff]  ;;  %v1823_v48 = vld [vmem:[%s3495_s0 + $0x70] sm:$0xf]  ;;  %v2446_v49 = vld [vmem:[%s3495_s0 + $0xa4] sm:$0xf0]  ;;  %v1940_v55 = vor.u32 %v2467_v45, %v1937_v46 }
  0x10   :  { %v2525_v47 = vld [vmem:[%s3494_s1 + $0x160] sm:$0xff]  ;;  %v2439_v50 = vld [vmem:[%s3495_s0 + $0x74] sm:$0xf]  ;;  %v1825_v51 = vld [vmem:[%s3495_s0 + $0xa8] sm:$0xf0]  ;;  %v1824_v56 = vor.u32 %v2446_v49, %v1823_v48 }
  0x11   :  { %v2500_v52 = vld [vmem:[%s3494_s1 + $0x98] sm:$0xff]  ;;  %v1828_v57 = vor.u32 %v2439_v50, %v1825_v51  ;;  %v2499_v60 = vld [vmem:[%s3494_s1 + $0x90] sm:$0xff]  ;;  %v2498_v0 = vld [vmem:[%s3494_s1 + $0x88] sm:$0xff] }
  0x12   :  { %2593 = vmatpush.bf16.msra.mxu2 %v2484_v8  ;;  %1231 = vmatpush.bf16.msra.mxu0 %v2484_v8  ;;  %v2508_v53 = vld [vmem:[%s3494_s1 + $0xd8] sm:$0xff]  ;;  %v2507_v61 = vld [vmem:[%s3494_s1 + $0xd0] sm:$0xff]  ;;  %v2506_v1 = vld [vmem:[%s3494_s1 + $0xc8] sm:$0xff] }
  0x13   :  { %2601 = vmatpush.bf16.msra.mxu3 %v2492_v9  ;;  %1260 = vmatpush.bf16.msra.mxu1 %v2492_v9  ;;  %v2516_v58 = vld [vmem:[%s3494_s1 + $0x118] sm:$0xff]  ;;  %v2515_v62 = vld [vmem:[%s3494_s1 + $0x110] sm:$0xff]  ;;  %v2514_v2 = vld [vmem:[%s3494_s1 + $0x108] sm:$0xff] }
  0x14   :  { %v2524_v59 = vld [vmem:[%s3494_s1 + $0x158] sm:$0xff]  ;;  %v2523_v63 = vld [vmem:[%s3494_s1 + $0x150] sm:$0xff]  ;;  %v2497_v3 = vld [vmem:[%s3494_s1 + $0x80] sm:$0xff] }
  0x15   :  { %v2522_v4 = vld [vmem:[%s3494_s1 + $0x148] sm:$0xff]  ;;  %v2505_v5 = vld [vmem:[%s3494_s1 + $0xc0] sm:$0xff]  ;;  %v2427_v16 = vld [vmem:[%s3495_s0 + $0x14] sm:$0xf] }
  0x16   :  { %2594 = vmatpush.bf16.msra.mxu2 %v2483_v10  ;;  %1232 = vmatpush.bf16.msra.mxu0 %v2483_v10  ;;  %v1775_v6 = vld [vmem:[%s3495_s0 + $0x8] sm:$0xf]  ;;  %v2433_v7 = vld [vmem:[%s3495_s0 + $0x3c] sm:$0xf0]  ;;  %v2426_v9 = vld [vmem:[%s3495_s0 + $0xc] sm:$0xf] }
  0x17   :  { %2602 = vmatpush.bf16.msra.mxu3 %v2491_v11  ;;  %1261 = vmatpush.bf16.msra.mxu1 %v2491_v11  ;;  %v2513_v8 = vld [vmem:[%s3494_s1 + $0x100] sm:$0xff]  ;;  %v2536_v10 = vld [vmem:[%s3494_s1 + $0x1b8] sm:$0xff]  ;;  %v1785_v17 = vld [vmem:[%s3495_s0 + $0x48] sm:$0xf0]  ;;  %v1776_v20 = vor.u32 %v2433_v7, %v1775_v6 }
  0x18   :  { %v2544_v11 = vld [vmem:[%s3494_s1 + $0x1f8] sm:$0xff]  ;;  %v1788_v23 = vor.u32 %v2427_v16, %v1785_v17  ;;  %v1897_v6 = vld [vmem:[%s3495_s0 + $0x128] sm:$0xf0]  ;;  %v2575_v16 = vld [vmem:[%s3494_s1 + $0x2f0] sm:$0xff] }
  0x19   :  { %v2552_v18 = vld [vmem:[%s3494_s1 + $0x238] sm:$0xff] }
  0x1a   :  { %2595 = vmatpush.bf16.msra.mxu2 %v2482_v12  ;;  %1233 = vmatpush.bf16.msra.mxu0 %v2482_v12  ;;  %v1777_v12 = vld [vmem:[%s3495_s0 + $0x40] sm:$0xf0]  ;;  %v2560_v19 = vld [vmem:[%s3494_s1 + $0x278] sm:$0xff] }
  0x1b   :  { %2603 = vmatpush.bf16.msra.mxu3 %v2490_v13  ;;  %1262 = vmatpush.bf16.msra.mxu1 %v2490_v13  ;;  %v2521_v13 = vld [vmem:[%s3494_s1 + $0x140] sm:$0xff]  ;;  %v1780_v21 = vor.u32 %v2426_v9, %v1777_v12  ;;  %v1841_v43 = vld [vmem:[%s3495_s0 + $0xb8] sm:$0xf0] }
  0x1c   :  { %v2532_v44 = vld [vmem:[%s3494_s1 + $0x198] sm:$0xff] }
  0x1d   :  { %v2540_v45 = vld [vmem:[%s3494_s1 + $0x1d8] sm:$0xff] }
  0x1e   :  { %2596 = vmatpush.bf16.msra.mxu2 %v2481_v14  ;;  %1234 = vmatpush.bf16.msra.mxu0 %v2481_v14  ;;  %v1783_v14 = vld [vmem:[%s3495_s0 + $0x10] sm:$0xf]  ;;  %v2548_v46 = vld [vmem:[%s3494_s1 + $0x218] sm:$0xff] }
  0x1f   :  { %2604 = vmatpush.bf16.msra.mxu3 %v2489_v15  ;;  %1263 = vmatpush.bf16.msra.mxu1 %v2489_v15  ;;  %v2434_v15 = vld [vmem:[%s3495_s0 + $0x44] sm:$0xf0]  ;;  %v2568_v12 = vld [vmem:[%s3494_s1 + $0x2b8] sm:$0xff] }
  0x20   :  { %v1784_v22 = vor.u32 %v2434_v15, %v1783_v14  ;;  %v2567_v14 = vld [vmem:[%s3494_s1 + $0x2b0] sm:$0xff]  ;;  %v2584_v15 = vld [vmem:[%s3494_s1 + $0x338] sm:$0xff] }
  0x21   :  { %1245 = vmatmul.bf16.vlgmr.msra.gmra.mxu2 %v1880_v26  ;;  %1235 = vmatmul.bf16.vlgmr.msra.gmra.mxu0 %v1768_v28  ;;  %v2551_v26 = vld [vmem:[%s3494_s1 + $0x230] sm:$0xff]  ;;  %v2534_v28 = vld [vmem:[%s3494_s1 + $0x1a8] sm:$0xff]  ;;  %v2588_v17 = vld [vmem:[%s3494_s1 + $0x358] sm:$0xff] }
  0x22   :  { %1285 = vmatpush.bf16.msrb.mxu2 %v2504_v24  ;;  %1274 = vmatmul.bf16.vlgmr.msra.gmra.mxu3 %v1884_v27  ;;  %v2535_v24 = vld [vmem:[%s3494_s1 + $0x1b0] sm:$0xff] }
  0x23   :  { %1314 = vmatpush.bf16.msrb.mxu3 %v2512_v25  ;;  %1264 = vmatmul.bf16.vlgmr.msra.gmra.mxu1 %v1772_v29  ;;  %v2543_v25 = vld [vmem:[%s3494_s1 + $0x1f0] sm:$0xff]  ;;  %v2542_v29 = vld [vmem:[%s3494_s1 + $0x1e8] sm:$0xff] }
  0x24   :  { %1343 = vmatpush.bf16.msrb.mxu0 %v2520_v30  ;;  %1372 = vmatpush.bf16.msrb.mxu1 %v2528_v31  ;;  %v2559_v27 = vld [vmem:[%s3494_s1 + $0x270] sm:$0xff]  ;;  %v2550_v30 = vld [vmem:[%s3494_s1 + $0x228] sm:$0xff] }
  0x25   :  { %v2558_v31 = vld [vmem:[%s3494_s1 + $0x268] sm:$0xff] }
  0x26   :  { %1286 = vmatpush.bf16.msrb.mxu2 %v2503_v32  ;;  %v2533_v32 = vld [vmem:[%s3494_s1 + $0x1a0] sm:$0xff] }
  0x27   :  { %1315 = vmatpush.bf16.msrb.mxu3 %v2511_v33  ;;  %v2541_v33 = vld [vmem:[%s3494_s1 + $0x1e0] sm:$0xff] }
  0x28   :  { %1344 = vmatpush.bf16.msrb.mxu0 %v2519_v34  ;;  %1373 = vmatpush.bf16.msrb.mxu1 %v2527_v35  ;;  %v1831_v34 = vld [vmem:[%s3495_s0 + $0x78] sm:$0xf]  ;;  %v2549_v35 = vld [vmem:[%s3494_s1 + $0x220] sm:$0xff] }
  0x2a   :  { %1287 = vmatpush.bf16.msrb.mxu2 %v2502_v36  ;;  %v2557_v36 = vld [vmem:[%s3494_s1 + $0x260] sm:$0xff] }
  0x2b   :  { %1316 = vmatpush.bf16.msrb.mxu3 %v2510_v37  ;;  %v2447_v37 = vld [vmem:[%s3495_s0 + $0xac] sm:$0xf0] }
  0x2c   :  { %1345 = vmatpush.bf16.msrb.mxu0 %v2518_v38  ;;  %1374 = vmatpush.bf16.msrb.mxu1 %v2526_v39  ;;  %v2440_v38 = vld [vmem:[%s3495_s0 + $0x7c] sm:$0xf]  ;;  %v1833_v39 = vld [vmem:[%s3495_s0 + $0xb0] sm:$0xf0]  ;;  %v1832_v48 = vor.u32 %v2447_v37, %v1831_v34  ;;  %v2573_v34 = vld [vmem:[%s3494_s1 + $0x2e0] sm:$0xff] }
  0x2d   :  { %v1836_v49 = vor.u32 %v2440_v38, %v1833_v39  ;;  %v1791_v37 = vld [vmem:[%s3495_s0 + $0x18] sm:$0xf]  ;;  %v2435_v38 = vld [vmem:[%s3495_s0 + $0x4c] sm:$0xf0]  ;;  %v2428_v39 = vld [vmem:[%s3495_s0 + $0x1c] sm:$0xf] }
  0x2e   :  { %1288 = vmatpush.bf16.msrb.mxu2 %v2501_v40  ;;  %v1839_v40 = vld [vmem:[%s3495_s0 + $0x80] sm:$0xf] }
  0x2f   :  { %1317 = vmatpush.bf16.msrb.mxu3 %v2509_v41  ;;  %v2448_v41 = vld [vmem:[%s3495_s0 + $0xb4] sm:$0xf0] }
  0x30   :  { %1346 = vmatpush.bf16.msrb.mxu0 %v2517_v42  ;;  %1375 = vmatpush.bf16.msrb.mxu1 %v2525_v47  ;;  %v2441_v42 = vld [vmem:[%s3495_s0 + $0x84] sm:$0xf]  ;;  %v2556_v47 = vld [vmem:[%s3494_s1 + $0x258] sm:$0xff]  ;;  %v1840_v50 = vor.u32 %v2448_v41, %v1839_v40  ;;  %v1793_v40 = vld [vmem:[%s3495_s0 + $0x50] sm:$0xf0] }
  0x31   :  { %1250 = vmatmul.bf16.gmra.mxu2 %v1936_v54  ;;  %1240 = vmatmul.bf16.gmra.mxu0 %v1824_v56  ;;  %v1844_v51 = vor.u32 %v2441_v42, %v1841_v43  ;;  %v2547_v54 = vld [vmem:[%s3494_s1 + $0x210] sm:$0xff]  ;;  %v2538_v56 = vld [vmem:[%s3494_s1 + $0x1c8] sm:$0xff]  ;;  %v1799_v41 = vld [vmem:[%s3495_s0 + $0x20] sm:$0xf] }
  0x32   :  { %1289 = vmatpush.bf16.msrb.mxu2 %v2500_v52  ;;  %1279 = vmatmul.bf16.gmra.mxu3 %v1940_v55  ;;  %v2531_v52 = vld [vmem:[%s3494_s1 + $0x190] sm:$0xff]  ;;  %v2530_v55 = vld [vmem:[%s3494_s1 + $0x188] sm:$0xff]  ;;  %v2436_v42 = vld [vmem:[%s3495_s0 + $0x54] sm:$0xf0] }
  0x33   :  { %1318 = vmatpush.bf16.msrb.mxu3 %v2508_v53  ;;  %1269 = vmatmul.bf16.gmra.mxu1 %v1828_v57  ;;  %v2539_v53 = vld [vmem:[%s3494_s1 + $0x1d0] sm:$0xff]  ;;  %v2429_v43 = vld [vmem:[%s3495_s0 + $0x24] sm:$0xf] }
  0x34   :  { %1347 = vmatpush.bf16.msrb.mxu0 %v2516_v58  ;;  %1376 = vmatpush.bf16.msrb.mxu1 %v2524_v59  ;;  %v2555_v57 = vld [vmem:[%s3494_s1 + $0x250] sm:$0xff]  ;;  %v2546_v58 = vld [vmem:[%s3494_s1 + $0x208] sm:$0xff] }
  0x35   :  { %v2554_v59 = vld [vmem:[%s3494_s1 + $0x248] sm:$0xff] }
  0x36   :  { %1290 = vmatpush.bf16.msrb.mxu2 %v2499_v60  ;;  %v2529_v60 = vld [vmem:[%s3494_s1 + $0x180] sm:$0xff] }
  0x37   :  { %1319 = vmatpush.bf16.msrb.mxu3 %v2507_v61  ;;  %v2537_v61 = vld [vmem:[%s3494_s1 + $0x1c0] sm:$0xff] }
  0x38   :  { %1348 = vmatpush.bf16.msrb.mxu0 %v2515_v62  ;;  %1377 = vmatpush.bf16.msrb.mxu1 %v2523_v63  ;;  %v2545_v62 = vld [vmem:[%s3494_s1 + $0x200] sm:$0xff]  ;;  %v1887_v63 = vld [vmem:[%s3495_s0 + $0xe8] sm:$0xf] }
  0x3a   :  { %1291 = vmatpush.bf16.msrb.mxu2 %v2498_v0  ;;  %v2461_v0 = vld [vmem:[%s3495_s0 + $0x11c] sm:$0xf0] }
  0x3b   :  { %1320 = vmatpush.bf16.msrb.mxu3 %v2506_v1  ;;  %v2454_v1 = vld [vmem:[%s3495_s0 + $0xec] sm:$0xf]  ;;  %v1888_v7 = vor.u32 %v2461_v0, %v1887_v63 }
  0x3c   :  { %1349 = vmatpush.bf16.msrb.mxu0 %v2514_v2  ;;  %1378 = vmatpush.bf16.msrb.mxu1 %v2522_v4  ;;  %v1889_v2 = vld [vmem:[%s3495_s0 + $0x120] sm:$0xf0]  ;;  %v2462_v4 = vld [vmem:[%s3495_s0 + $0x124] sm:$0xf0] }
  0x3e   :  { %1292 = vmatpush.bf16.msrb.mxu2 %v2497_v3  ;;  %v1895_v3 = vld [vmem:[%s3495_s0 + $0xf0] sm:$0xf] }
  0x3f   :  { %1321 = vmatpush.bf16.msrb.mxu3 %v2505_v5  ;;  %v2455_v5 = vld [vmem:[%s3495_s0 + $0xf4] sm:$0xf]  ;;  %v1896_v9 = vor.u32 %v2462_v4, %v1895_v3  ;;  %v2562_v4 = vld [vmem:[%s3494_s1 + $0x288] sm:$0xff] }
  0x40   :  { %1350 = vmatpush.bf16.msrb.mxu0 %v2513_v8  ;;  %1379 = vmatpush.bf16.msrb.mxu1 %v2521_v13  ;;  %v1892_v8 = vor.u32 %v2454_v1, %v1889_v2  ;;  %v2576_v13 = vld [vmem:[%s3494_s1 + $0x2f8] sm:$0xff]  ;;  %v2586_v1 = vld [vmem:[%s3494_s1 + $0x348] sm:$0xff] }
  0x41   :  { %1293 = vmatmul.bf16.vlgmr.msrb.gmra.mxu2 %v1776_v20  ;;  %v2468_v20 = vld [vmem:[%s3495_s0 + $0x15c] sm:$0xf] }
  0x42   :  { %1401 = vmatpush.bf16.msra.mxu2 %v2536_v10  ;;  %1322 = vmatmul.bf16.vlgmr.msrb.gmra.mxu3 %v1780_v21  ;;  %v1900_v10 = vor.u32 %v2455_v5, %v1897_v6  ;;  %v1945_v21 = vld [vmem:[%s3495_s0 + $0x190] sm:$0xf0]  ;;  %v2570_v5 = vld [vmem:[%s3494_s1 + $0x2c8] sm:$0xff] }
  0x43   :  { %1430 = vmatpush.bf16.msra.mxu3 %v2544_v11  ;;  %1351 = vmatmul.bf16.vlgmr.msrb.gmra.mxu0 %v1784_v22  ;;  %v2553_v11 = vld [vmem:[%s3494_s1 + $0x240] sm:$0xff]  ;;  %v2579_v6 = vld [vmem:[%s3494_s1 + $0x310] sm:$0xff] }
  0x44   :  { %1459 = vmatpush.bf16.msra.mxu0 %v2552_v18  ;;  %1488 = vmatpush.bf16.msra.mxu1 %v2560_v19  ;;  %v1943_v18 = vld [vmem:[%s3495_s0 + $0x158] sm:$0xf]  ;;  %v2475_v19 = vld [vmem:[%s3495_s0 + $0x18c] sm:$0xf0]  ;;  %v1951_v22 = vld [vmem:[%s3495_s0 + $0x160] sm:$0xf] }
  0x45   :  { %1380 = vmatmul.bf16.vlgmr.msrb.gmra.mxu1 %v1788_v23  ;;  %v2476_v23 = vld [vmem:[%s3495_s0 + $0x194] sm:$0xf0] }
  0x46   :  { %1402 = vmatpush.bf16.msra.mxu2 %v2535_v24  ;;  %v2469_v24 = vld [vmem:[%s3495_s0 + $0x164] sm:$0xf] }
  0x47   :  { %1431 = vmatpush.bf16.msra.mxu3 %v2543_v25  ;;  %v1953_v25 = vld [vmem:[%s3495_s0 + $0x198] sm:$0xf0] }
  0x48   :  { %1460 = vmatpush.bf16.msra.mxu0 %v2551_v26  ;;  %1489 = vmatpush.bf16.msra.mxu1 %v2559_v27  ;;  %v1944_v26 = vor.u32 %v2475_v19, %v1943_v18  ;;  %v1948_v27 = vor.u32 %v2468_v20, %v1945_v21  ;;  %v2585_v20 = vld [vmem:[%s3494_s1 + $0x340] sm:$0xff] }
  0x4a   :  { %1403 = vmatpush.bf16.msra.mxu2 %v2534_v28  ;;  %v1952_v28 = vor.u32 %v2476_v23, %v1951_v22  ;;  %v2577_v23 = vld [vmem:[%s3494_s1 + $0x300] sm:$0xff] }
  0x4b   :  { %1432 = vmatpush.bf16.msra.mxu3 %v2542_v29  ;;  %v1956_v29 = vor.u32 %v2469_v24, %v1953_v25 }
  0x4c   :  { %1461 = vmatpush.bf16.msra.mxu0 %v2550_v30  ;;  %1490 = vmatpush.bf16.msra.mxu1 %v2558_v31  ;;  %v2566_v30 = vld [vmem:[%s3494_s1 + $0x2a8] sm:$0xff] }
  0x4d   :  { %v2574_v31 = vld [vmem:[%s3494_s1 + $0x2e8] sm:$0xff] }
  0x4e   :  { %1404 = vmatpush.bf16.msra.mxu2 %v2533_v32  ;;  %v2583_v32 = vld [vmem:[%s3494_s1 + $0x330] sm:$0xff] }
  0x4f   :  { %1433 = vmatpush.bf16.msra.mxu3 %v2541_v33  ;;  %v2565_v33 = vld [vmem:[%s3494_s1 + $0x2a0] sm:$0xff] }
  0x50   :  { %1462 = vmatpush.bf16.msra.mxu0 %v2549_v35  ;;  %1491 = vmatpush.bf16.msra.mxu1 %v2557_v36  ;;  %v2582_v35 = vld [vmem:[%s3494_s1 + $0x328] sm:$0xff]  ;;  %v2587_v36 = vld [vmem:[%s3494_s1 + $0x350] sm:$0xff] }
  0x51   :  { %1298 = vmatmul.bf16.gmra.mxu2 %v1832_v48 }
  0x52   :  { %1405 = vmatpush.bf16.msra.mxu2 %v2532_v44  ;;  %1327 = vmatmul.bf16.gmra.mxu3 %v1836_v49  ;;  %v1801_v44 = vld [vmem:[%s3495_s0 + $0x58] sm:$0xf0] }
  0x53   :  { %1434 = vmatpush.bf16.msra.mxu3 %v2540_v45  ;;  %1356 = vmatmul.bf16.gmra.mxu0 %v1840_v50  ;;  %v1792_v45 = vor.u32 %v2435_v38, %v1791_v37  ;;  %v1804_v48 = vor.u32 %v2429_v43, %v1801_v44  ;;  %v2564_v49 = vld [vmem:[%s3494_s1 + $0x298] sm:$0xff]  ;;  %v1634_v37 = vld [vmem:[%s3496_s2 + $0x8] sm:$0xff] }
  0x54   :  { %1463 = vmatpush.bf16.msra.mxu0 %v2548_v46  ;;  %1492 = vmatpush.bf16.msra.mxu1 %v2556_v47  ;;  %v1796_v46 = vor.u32 %v2428_v39, %v1793_v40  ;;  %v1800_v47 = vor.u32 %v2436_v42, %v1799_v41  ;;  %v2572_v50 = vld [vmem:[%s3494_s1 + $0x2d8] sm:$0xff]  ;;  %v2470_v38 = vld [vmem:[%s3495_s0 + $0x16c] sm:$0xf]  ;;  %v1961_v39 = vld [vmem:[%s3495_s0 + $0x1a0] sm:$0xf0] }
  0x55   :  { %1385 = vmatmul.bf16.gmra.mxu1 %v1844_v51  ;;  %v2581_v51 = vld [vmem:[%s3494_s1 + $0x320] sm:$0xff]  ;;  %v1967_v40 = vld [vmem:[%s3495_s0 + $0x170] sm:$0xf]  ;;  %v2478_v41 = vld [vmem:[%s3495_s0 + $0x1a4] sm:$0xf0] }
  0x56   :  { %1406 = vmatpush.bf16.msra.mxu2 %v2531_v52  ;;  %v2563_v52 = vld [vmem:[%s3494_s1 + $0x290] sm:$0xff]  ;;  %v1969_v43 = vld [vmem:[%s3495_s0 + $0x1a8] sm:$0xf0] }
  0x57   :  { %1435 = vmatpush.bf16.msra.mxu3 %v2539_v53  ;;  %v2571_v53 = vld [vmem:[%s3494_s1 + $0x2d0] sm:$0xff] }
  0x58   :  { %1464 = vmatpush.bf16.msra.mxu0 %v2547_v54  ;;  %1493 = vmatpush.bf16.msra.mxu1 %v2555_v57  ;;  %v2580_v54 = vld [vmem:[%s3494_s1 + $0x318] sm:$0xff]  ;;  %v2442_v57 = vld [vmem:[%s3495_s0 + $0x8c] sm:$0xf]  ;;  %v2471_v42 = vld [vmem:[%s3495_s0 + $0x174] sm:$0xf] }
  0x5a   :  { %1407 = vmatpush.bf16.msra.mxu2 %v2530_v55  ;;  %v1847_v55 = vld [vmem:[%s3495_s0 + $0x88] sm:$0xf] }
  0x5b   :  { %1436 = vmatpush.bf16.msra.mxu3 %v2538_v56  ;;  %v2449_v56 = vld [vmem:[%s3495_s0 + $0xbc] sm:$0xf0] }
  0x5c   :  { %1465 = vmatpush.bf16.msra.mxu0 %v2546_v58  ;;  %1494 = vmatpush.bf16.msra.mxu1 %v2554_v59  ;;  %v1849_v58 = vld [vmem:[%s3495_s0 + $0xc0] sm:$0xf0]  ;;  %v1855_v59 = vld [vmem:[%s3495_s0 + $0x90] sm:$0xf]  ;;  %v1848_v63 = vor.u32 %v2449_v56, %v1847_v55 }
  0x5d   :  { %v1852_v0 = vor.u32 %v2442_v57, %v1849_v58  ;;  %v1639_v55 = vld [vmem:[%s3496_s2 + $0x30] sm:$0xff] }
  0x5e   :  { %1408 = vmatpush.bf16.msra.mxu2 %v2529_v60  ;;  %v2450_v60 = vld [vmem:[%s3495_s0 + $0xc4] sm:$0xf0] }
  0x5f   :  { %1437 = vmatpush.bf16.msra.mxu3 %v2537_v61  ;;  %v2443_v61 = vld [vmem:[%s3495_s0 + $0x94] sm:$0xf]  ;;  %v1856_v2 = vor.u32 %v2450_v60, %v1855_v59 }
  0x60   :  { %1466 = vmatpush.bf16.msra.mxu0 %v2545_v62  ;;  %1495 = vmatpush.bf16.msra.mxu1 %v2553_v11  ;;  %v1857_v62 = vld [vmem:[%s3495_s0 + $0xc8] sm:$0xf0]  ;;  %v2463_v11 = vld [vmem:[%s3495_s0 + $0x12c] sm:$0xf0] }
  0x61   :  { %1303 = vmatmul.bf16.gmra.mxu2 %v1888_v7  ;;  %v1860_v3 = vor.u32 %v2443_v61, %v1857_v62  ;;  %v2561_v7 = vld [vmem:[%s3494_s1 + $0x280] sm:$0xff]  ;;  %v1807_v62 = vld [vmem:[%s3495_s0 + $0x28] sm:$0xf] }
  0x62   :  { %1332 = vmatmul.bf16.gmra.mxu3 %v1892_v8  ;;  %1517 = vmatpush.bf16.msrb.mxu2 %v2568_v12  ;;  %v2569_v8 = vld [vmem:[%s3494_s1 + $0x2c0] sm:$0xff]  ;;  %v2456_v12 = vld [vmem:[%s3495_s0 + $0xfc] sm:$0xf] }
  0x63   :  { %1361 = vmatmul.bf16.gmra.mxu0 %v1896_v9  ;;  %1546 = vmatpush.bf16.msrb.mxu3 %v2576_v13  ;;  %v2578_v9 = vld [vmem:[%s3494_s1 + $0x308] sm:$0xff]  ;;  %v1905_v13 = vld [vmem:[%s3495_s0 + $0x130] sm:$0xf0] }
  0x64   :  { %1575 = vmatpush.bf16.msrb.mxu0 %v2584_v15  ;;  %1608 = vmatpush.bf16.msrb.mxu1 %v2588_v17  ;;  %v2464_v15 = vld [vmem:[%s3495_s0 + $0x134] sm:$0xf0]  ;;  %v1913_v17 = vld [vmem:[%s3495_s0 + $0x138] sm:$0xf0]  ;;  %v1908_v19 = vor.u32 %v2456_v12, %v1905_v13 }
  0x65   :  { %1390 = vmatmul.bf16.gmra.mxu1 %v1900_v10  ;;  %v1903_v10 = vld [vmem:[%s3495_s0 + $0xf8] sm:$0xf] }
  0x66   :  { %1518 = vmatpush.bf16.msrb.mxu2 %v2567_v14  ;;  %v1911_v14 = vld [vmem:[%s3495_s0 + $0x100] sm:$0xf]  ;;  %v1904_v18 = vor.u32 %v2463_v11, %v1903_v10 }
  0x67   :  { %1547 = vmatpush.bf16.msrb.mxu3 %v2575_v16  ;;  %v2457_v16 = vld [vmem:[%s3495_s0 + $0x104] sm:$0xf]  ;;  %v1912_v21 = vor.u32 %v2464_v15, %v1911_v14 }
  0x68   :  { %1576 = vmatpush.bf16.msrb.mxu0 %v2583_v32  ;;  %1609 = vmatpush.bf16.msrb.mxu1 %v2587_v36  ;;  %v1916_v22 = vor.u32 %v2457_v16, %v1913_v17  ;;  %v2477_v36 = vld [vmem:[%s3495_s0 + $0x19c] sm:$0xf0] }
  0x69   :  { %v1637_v17 = vld [vmem:[%s3496_s2 + $0x20] sm:$0xff] }
  0x6a   :  { %1519 = vmatpush.bf16.msrb.mxu2 %v2566_v30 }
  0x6b   :  { %1548 = vmatpush.bf16.msrb.mxu3 %v2574_v31 }
  0x6c   :  { %1577 = vmatpush.bf16.msrb.mxu0 %v2582_v35  ;;  %1610 = vmatpush.bf16.msrb.mxu1 %v2586_v1  ;;  %v1959_v35 = vld [vmem:[%s3495_s0 + $0x168] sm:$0xf] }
  0x6d   :  { %v1690_v1 = vld [vmem:[%s3497_s3 + $0x8] sm:$0xff] }
  0x6e   :  { %1520 = vmatpush.bf16.msrb.mxu2 %v2565_v33 }
  0x6f   :  { %1549 = vmatpush.bf16.msrb.mxu3 %v2573_v34 }
  0x70   :  { %1578 = vmatpush.bf16.msrb.mxu0 %v2581_v51  ;;  %1611 = vmatpush.bf16.msrb.mxu1 %v2585_v20 }
  0x71   :  { %1308 = vmatmul.bf16.gmra.mxu2 %v1944_v26 }
  0x72   :  { %1337 = vmatmul.bf16.gmra.mxu3 %v1948_v27  ;;  %1521 = vmatpush.bf16.msrb.mxu2 %v2564_v49  ;;  %v1633_v27 = vld [vmem:[%s3496_s2] sm:$0xff]  ;;  %v1968_v49 = vor.u32 %v2478_v41, %v1967_v40 }
  0x73   :  { %1366 = vmatmul.bf16.gmra.mxu0 %v1952_v28  ;;  %1550 = vmatpush.bf16.msrb.mxu3 %v2572_v50  ;;  %v2609_v28 = vmov 0   ;;  %v1972_v50 = vor.u32 %v2471_v42, %v1969_v43 }
  0x74   :  { %1579 = vmatpush.bf16.msrb.mxu0 %v2580_v54  ;;  %2606 = vset.pattern.permute.xlu0 %v2609_v28  ;;  %v1635_v54 = vld [vmem:[%s3496_s2 + $0x10] sm:$0xff] }
  0x75   :  { %1395 = vmatmul.bf16.gmra.mxu1 %v1956_v29  ;;  %2607 = vset.pattern.permute.xlu1 %v2609_v28 }
  0x76   :  { %1522 = vmatpush.bf16.msrb.mxu2 %v2563_v52  ;;  %1643 = vperm.xlu0 %2606, %v1633_v27   ;;  %v1863_v27 = vld [vmem:[%s3495_s0 + $0x98] sm:$0xf] }
  0x77   :  { %1551 = vmatpush.bf16.msrb.mxu3 %v2571_v53  ;;  %2608 = vset.pattern.permute.xlu2 %v2609_v28  ;;  %v2451_v28 = vld [vmem:[%s3495_s0 + $0xcc] sm:$0xf0] }
  0x78   :  { %1580 = vmatpush.bf16.msrb.mxu0 %v2579_v6  ;;  %1653 = vperm.xlu1 %2607, %v1635_v54   ;;  %v2431_v6 = vld [vmem:[%s3495_s0 + $0x34] sm:$0xf]  ;;  %v1689_v54 = vld [vmem:[%s3497_s3] sm:$0xff] }
  0x79   :  { %1663 = vperm.xlu2 %2608, %v1637_v17  }
  0x7a   :  { %1523 = vmatpush.bf16.msrb.mxu2 %v2562_v4  ;;  %v1815_v4 = vld [vmem:[%s3495_s0 + $0x30] sm:$0xf] }
  0x7b   :  { %1552 = vmatpush.bf16.msrb.mxu3 %v2570_v5  ;;  %v2438_v5 = vld [vmem:[%s3495_s0 + $0x64] sm:$0xf0] }
  0x7c   :  { %1581 = vmatpush.bf16.msrb.mxu0 %v2578_v9  ;;  %v1816_v13 = vor.u32 %v2438_v5, %v1815_v4  ;;  %v1927_v4 = vld [vmem:[%s3495_s0 + $0x110] sm:$0xf]  ;;  %v2466_v5 = vld [vmem:[%s3495_s0 + $0x144] sm:$0xf0] }
  0x7e   :  { %1524 = vmatpush.bf16.msrb.mxu2 %v2561_v7  ;;  %1648 = vperm.xlu0 %2606, %v1634_v37   ;;  %v1817_v7 = vld [vmem:[%s3495_s0 + $0x68] sm:$0xf0]  ;;  %v2452_v37 = vld [vmem:[%s3495_s0 + $0xd4] sm:$0xf0] }
  0x7f   :  { %1553 = vmatpush.bf16.msrb.mxu3 %v2569_v8  ;;  %v1820_v14 = vor.u32 %v2431_v6, %v1817_v7  ;;  %v2459_v6 = vld [vmem:[%s3495_s0 + $0x114] sm:$0xf]  ;;  %v1929_v7 = vld [vmem:[%s3495_s0 + $0x148] sm:$0xf0] }
  0x80   :  { %1582 = vmatpush.bf16.msrb.mxu0 %v2577_v23 }
  0x81   :  { %1409 = vmatmul.bf16.vlgmr.msra.gmra.mxu2 %v1792_v45 }
  0x82   :  { %1438 = vmatmul.bf16.vlgmr.msra.gmra.mxu3 %v1796_v46 }
  0x83   :  { %1467 = vmatmul.bf16.vlgmr.msra.gmra.mxu0 %v1800_v47  ;;  %v1960_v47 = vor.u32 %v2477_v36, %v1959_v35  ;;  %v1865_v35 = vld [vmem:[%s3495_s0 + $0xd0] sm:$0xf0]  ;;  %v1871_v36 = vld [vmem:[%s3495_s0 + $0xa0] sm:$0xf] }
  0x85   :  { %1496 = vmatmul.bf16.vlgmr.msra.gmra.mxu1 %v1804_v48  ;;  %v1964_v48 = vor.u32 %v2470_v38, %v1961_v39  ;;  %v2445_v38 = vld [vmem:[%s3495_s0 + $0xa4] sm:$0xf]  ;;  %v1873_v39 = vld [vmem:[%s3495_s0 + $0xd8] sm:$0xf0] }
  0x86   :  { %1673 = vperm.xlu0 %2606, %v1639_v55  }
  0x8e   :  { %1704 = vperm.xlu0 %2606, %v1690_v1   ;;  %v1919_v1 = vld [vmem:[%s3495_s0 + $0x108] sm:$0xf] }
  0x91   :  { %1414 = vmatmul.bf16.gmra.mxu2 %v1848_v63  ;;  %v2437_v63 = vld [vmem:[%s3495_s0 + $0x5c] sm:$0xf0] }
  0x92   :  { %1443 = vmatmul.bf16.gmra.mxu3 %v1852_v0  ;;  %v1636_v0 = vld [vmem:[%s3496_s2 + $0x18] sm:$0xff]  ;;  %v1808_v11 = vor.u32 %v2437_v63, %v1807_v62 }
  0x93   :  { %1472 = vmatmul.bf16.gmra.mxu0 %v1856_v2  ;;  %v2430_v2 = vld [vmem:[%s3495_s0 + $0x2c] sm:$0xf]  ;;  %1658 = vperm.xlu1 %2607, %v1636_v0  }
  0x95   :  { %1501 = vmatmul.bf16.gmra.mxu1 %v1860_v3  ;;  %v1809_v3 = vld [vmem:[%s3495_s0 + $0x60] sm:$0xf0] }
  0x96   :  { %v1812_v12 = vor.u32 %v2430_v2, %v1809_v3  ;;  %v2465_v2 = vld [vmem:[%s3495_s0 + $0x13c] sm:$0xf0]  ;;  %v2458_v3 = vld [vmem:[%s3495_s0 + $0x10c] sm:$0xf] }
  0x9e   :  { %v1236_v24 = vpop.f32.mrf.mxu0 }
  0xa0   :  { %v1265_v25 = vpop.f32.mrf.mxu1 }
  0xa1   :  { %v3175_v26 = vadd.f32 %v1265_v25, %v1236_v24  ;;  %1419 = vmatmul.bf16.gmra.mxu2 %v1904_v18  ;;  %v1640_v18 = vld [vmem:[%s3496_s2 + $0x38] sm:$0xff] }
  0xa2   :  { %1448 = vmatmul.bf16.gmra.mxu3 %v1908_v19  ;;  %v1693_v19 = vld [vmem:[%s3497_s3 + $0x20] sm:$0xff]  ;;  %1678 = vperm.xlu1 %2607, %v1640_v18  }
  0xa3   :  { %1477 = vmatmul.bf16.gmra.mxu0 %v1912_v21  ;;  %1719 = vperm.xlu0 %2606, %v1693_v19  }
  0xa4   :  { %v1246_v29 = vpop.f32.mrf.mxu2 }
  0xa5   :  { %1506 = vmatmul.bf16.gmra.mxu1 %v1916_v22  ;;  %v1275_v30 = vpop.f32.mrf.mxu3 }
  0xa6   :  { %v3180_v31 = vadd.f32 %v1275_v30, %v1246_v29  ;;  %v1238_v32 = vpop.f32.mrf.mxu0  ;;  %v1638_v30 = vld [vmem:[%s3496_s2 + $0x28] sm:$0xff] }
  0xa7   :  { %1668 = vperm.xlu2 %2608, %v1638_v30   ;;  %v1975_v30 = vld [vmem:[%s3495_s0 + $0x178] sm:$0xf] }
  0xa8   :  { %v1267_v33 = vpop.f32.mrf.mxu1 }
  0xa9   :  { %v3182_v34 = vadd.f32 %v1267_v33, %v1238_v32  ;;  %v1696_v32 = vld [vmem:[%s3497_s3 + $0x38] sm:$0xff] }
  0xaa   :  { %v2444_v33 = vld [vmem:[%s3495_s0 + $0x9c] sm:$0xf] }
  0xab   :  { %1734 = vperm.xlu0 %2606, %v1696_v32   ;;  %v1695_v32 = vld [vmem:[%s3497_s3 + $0x30] sm:$0xff] }
  0xac   :  { %v1248_v44 = vpop.f32.mrf.mxu2 }
  0xad   :  { %v1277_v45 = vpop.f32.mrf.mxu3 }
  0xae   :  { %v3211_v46 = vadd.f32 %v1277_v45, %v1248_v44  ;;  %v1241_v51 = vpop.f32.mrf.mxu0  ;;  %v1864_v44 = vor.u32 %v2451_v28, %v1863_v27  ;;  %v1868_v45 = vor.u32 %v2444_v33, %v1865_v35  ;;  %v1977_v33 = vld [vmem:[%s3495_s0 + $0x1b0] sm:$0xf0]  ;;  %v1983_v35 = vld [vmem:[%s3495_s0 + $0x180] sm:$0xf] }
  0xaf   :  { %1699 = vperm.xlu2 %2608, %v1689_v54  }
  0xb0   :  { %v1270_v52 = vpop.f32.mrf.mxu1 }
  0xb1   :  { %v3213_v53 = vadd.f32 %v1270_v52, %v1241_v51  ;;  %1424 = vmatmul.bf16.gmra.mxu2 %v1960_v47  ;;  %v1872_v47 = vor.u32 %v2452_v37, %v1871_v36  ;;  %v2480_v36 = vld [vmem:[%s3495_s0 + $0x1b4] sm:$0xf0]  ;;  %v2473_v37 = vld [vmem:[%s3495_s0 + $0x184] sm:$0xf] }
  0xb2   :  { %1453 = vmatmul.bf16.gmra.mxu3 %v1964_v48  ;;  %v1876_v48 = vor.u32 %v2445_v38, %v1873_v39  ;;  %v1985_v38 = vld [vmem:[%s3495_s0 + $0x1b8] sm:$0xf0] }
  0xb3   :  { %1482 = vmatmul.bf16.gmra.mxu0 %v1968_v49 }
  0xb4   :  { %v1251_v56 = vpop.f32.mrf.mxu2 }
  0xb5   :  { %1511 = vmatmul.bf16.gmra.mxu1 %v1972_v50  ;;  %v1280_v57 = vpop.f32.mrf.mxu3 }
  0xb6   :  { %v3221_v58 = vadd.f32 %v1280_v57, %v1251_v56  ;;  %v1243_v59 = vpop.f32.mrf.mxu0 }
  0xb8   :  { %v1272_v60 = vpop.f32.mrf.mxu1 }
  0xb9   :  { %v3223_v61 = vadd.f32 %v1272_v60, %v1243_v59 }
  0xbc   :  { %v1253_v8 = vpop.f32.mrf.mxu2 }
  0xbd   :  { %v1282_v9 = vpop.f32.mrf.mxu3 }
  0xbe   :  { %v3255_v10 = vadd.f32 %v1282_v9, %v1253_v8 }
  0xc0   :  { %v1352_v15 = vpop.f32.mrf.mxu0 }
  0xc1   :  { %1525 = vmatmul.bf16.vlgmr.msrb.gmra.mxu2 %v1808_v11 }
  0xc2   :  { %v1381_v16 = vpop.f32.mrf.mxu1  ;;  %1554 = vmatmul.bf16.vlgmr.msrb.gmra.mxu3 %v1812_v12 }
  0xc3   :  { %1583 = vmatmul.bf16.vlgmr.msrb.gmra.mxu0 %v1816_v13  ;;  %v1920_v13 = vor.u32 %v2465_v2, %v1919_v1 }
  0xc4   :  { %v1294_v20 = vpop.f32.mrf.mxu2 }
  0xc5   :  { %2421 = vmatmul.msk.bf16.vlgmr.msrb.gmra.mxu1 %vm1214_vm0, %v1820_v14  ;;  %v1323_v21 = vpop.f32.mrf.mxu3  ;;  %v1295_v22 = vadd.f32 %v1294_v20, %v3175_v26  ;;  %v1691_v26 = vld [vmem:[%s3497_s3 + $0x10] sm:$0xff] }
  0xc6   :  { %1709 = vperm.xlu1 %2607, %v1691_v26   ;;  %v2479_v26 = vld [vmem:[%s3495_s0 + $0x1ac] sm:$0xf0] }
  0xc7   :  { %v1324_v23 = vadd.f32 %v1323_v21, %v1295_v22  ;;  %v1692_v21 = vld [vmem:[%s3497_s3 + $0x18] sm:$0xff] }
  0xc8   :  { %v1354_v24 = vpop.f32.mrf.mxu0  ;;  %1714 = vperm.xlu2 %2608, %v1692_v21  }
  0xc9   :  { %v1353_v29 = vadd.f32 %v1352_v15, %v1324_v23  ;;  %v1928_v15 = vor.u32 %v2466_v5, %v1927_v4 }
  0xca   :  { %v1383_v25 = vpop.f32.mrf.mxu1 }
  0xcb   :  { %v3301_v40 = vadd.f32 %v1381_v16, %v1353_v29  ;;  %v1932_v16 = vor.u32 %v2459_v6, %v1929_v7 }
  0xcc   :  { %v1296_v41 = vpop.f32.mrf.mxu2 }
  0xcd   :  { %v1325_v42 = vpop.f32.mrf.mxu3  ;;  %v1297_v43 = vadd.f32 %v1296_v41, %v3182_v34  ;;  %v1694_v34 = vld [vmem:[%s3497_s3 + $0x28] sm:$0xff] }
  0xce   :  { %1724 = vperm.xlu1 %2607, %v1694_v34  }
  0xcf   :  { %v1326_v49 = vadd.f32 %v1325_v42, %v1297_v43 }
  0xd0   :  { %v1357_v50 = vpop.f32.mrf.mxu0  ;;  %1729 = vperm.xlu2 %2608, %v1695_v32  }
  0xd1   :  { %v1355_v52 = vadd.f32 %v1354_v24, %v1326_v49  ;;  %1530 = vmatmul.bf16.gmra.mxu2 %v1864_v44  ;;  %v1976_v44 = vor.u32 %v2479_v26, %v1975_v30 }
  0xd2   :  { %v1386_v51 = vpop.f32.mrf.mxu1  ;;  %1559 = vmatmul.bf16.gmra.mxu3 %v1868_v45 }
  0xd3   :  { %1588 = vmatmul.bf16.gmra.mxu0 %v1872_v47  ;;  %v3311_v55 = vadd.f32 %v1383_v25, %v1355_v52  ;;  %v1984_v47 = vor.u32 %v2480_v36, %v1983_v35  ;;  %v3417_v35 = vpop.permute.xlu2 %1663 }
  0xd4   :  { %v1299_v56 = vpop.f32.mrf.mxu2 }
  0xd5   :  { %2422 = vmatmul.msk.bf16.gmra.mxu1 %vm1214_vm0, %v1876_v48  ;;  %v1328_v57 = vpop.f32.mrf.mxu3  ;;  %v1300_v59 = vadd.f32 %v1299_v56, %v3213_v53  ;;  %v1921_v53 = vld [vmem:[%s3495_s0 + $0x140] sm:$0xf0]  ;;  %v1988_v48 = vor.u32 %v2473_v37, %v1985_v38 }
  0xd6   :  { %v1924_v14 = vor.u32 %v2458_v3, %v1921_v53 }
  0xd7   :  { %v1329_v60 = vadd.f32 %v1328_v57, %v1300_v59 }
  0xd8   :  { %v1359_v62 = vpop.f32.mrf.mxu0 }
  0xd9   :  { %v1358_v0 = vadd.f32 %v1357_v50, %v1329_v60 }
  0xda   :  { %v1388_v63 = vpop.f32.mrf.mxu1 }
  0xdb   :  { %v3338_v8 = vadd.f32 %v1386_v51, %v1358_v0 }
  0xdc   :  { %v1301_v9 = vpop.f32.mrf.mxu2 }
  0xdd   :  { %v1330_v11 = vpop.f32.mrf.mxu3  ;;  %v1302_v12 = vadd.f32 %v1301_v9, %v3223_v61 }
  0xdf   :  { %v1331_v17 = vadd.f32 %v1330_v11, %v1302_v12 }
  0xe0   :  { %v1362_v18 = vpop.f32.mrf.mxu0 }
  0xe1   :  { %v1360_v20 = vadd.f32 %v1359_v62, %v1331_v17  ;;  %1535 = vmatmul.bf16.gmra.mxu2 %v1920_v13 }
  0xe2   :  { %v1391_v19 = vpop.f32.mrf.mxu1  ;;  %1564 = vmatmul.bf16.gmra.mxu3 %v1924_v14 }
  0xe3   :  { %1593 = vmatmul.bf16.gmra.mxu0 %v1928_v15  ;;  %v3345_v22 = vadd.f32 %v1388_v63, %v1360_v20 }
  0xe4   :  { %v1304_v61 = vpop.f32.mrf.mxu2 }
  0xe5   :  { %2423 = vmatmul.msk.bf16.gmra.mxu1 %vm1214_vm0, %v1932_v16  ;;  %v1333_v23 = vpop.f32.mrf.mxu3  ;;  %v1305_v24 = vadd.f32 %v1304_v61, %v3180_v31  ;;  %v2472_v31 = vld [vmem:[%s3495_s0 + $0x17c] sm:$0xf] }
  0xe6   :  { %v1980_v45 = vor.u32 %v2472_v31, %v1977_v33 }
  0xe7   :  { %v1334_v25 = vadd.f32 %v1333_v23, %v1305_v24 }
  0xe8   :  { %v1364_v27 = vpop.f32.mrf.mxu0  ;;  %v1644_v33 = vpop.permute.xlu0 %1643 }
  0xe9   :  { %v1363_v29 = vadd.f32 %v1362_v18, %v1334_v25 }
  0xea   :  { %v1393_v28 = vpop.f32.mrf.mxu1 }
  0xeb   :  { %v3375_v39 = vadd.f32 %v1391_v19, %v1363_v29 }
  0xec   :  { %v1306_v41 = vpop.f32.mrf.mxu2 }
  0xed   :  { %v1335_v42 = vpop.f32.mrf.mxu3  ;;  %v1307_v43 = vadd.f32 %v1306_v41, %v3211_v46 }
  0xef   :  { %v1336_v49 = vadd.f32 %v1335_v42, %v1307_v43  ;;  %v3424_v42 = vpop.permute.xlu1 %1653 }
  0xf0   :  { %v1367_v50 = vpop.f32.mrf.mxu0 }
  0xf1   :  { %v1365_v52 = vadd.f32 %v1364_v27, %v1336_v49  ;;  %1540 = vmatmul.bf16.gmra.mxu2 %v1976_v44 }
  0xf2   :  { %v1396_v51 = vpop.f32.mrf.mxu1  ;;  %1569 = vmatmul.bf16.gmra.mxu3 %v1980_v45 }
  0xf3   :  { %1598 = vmatmul.bf16.gmra.mxu0 %v1984_v47  ;;  %v3379_v54 = vadd.f32 %v1393_v28, %v1365_v52 }
  0xf4   :  { %v1309_v34 = vpop.f32.mrf.mxu2 }
  0xf5   :  { %2424 = vmatmul.msk.bf16.gmra.mxu1 %vm1214_vm0, %v1988_v48  ;;  %v1338_v56 = vpop.f32.mrf.mxu3  ;;  %v1310_v57 = vadd.f32 %v1309_v34, %v3221_v58 }
  0xf7   :  { %v1339_v46 = vadd.f32 %v1338_v56, %v1310_v57 }
  0xf8   :  { %v1369_v59 = vpop.f32.mrf.mxu0 }
  0xf9   :  { %v1368_v62 = vadd.f32 %v1367_v50, %v1339_v46  ;;  %v1649_v50 = vpop.permute.xlu0 %1648 }
  0xfa   :  { %v1398_v60 = vpop.f32.mrf.mxu1 }
  0xfb   :  { %v3382_v63 = vadd.f32 %v1396_v51, %v1368_v62 }
  0xfc   :  { %v1311_v0 = vpop.f32.mrf.mxu2 }
  0xfd   :  { %v1340_v1 = vpop.f32.mrf.mxu3  ;;  %v1312_v2 = vadd.f32 %v1311_v0, %v3255_v10 }
  0xff   :  { %v1341_v3 = vadd.f32 %v1340_v1, %v1312_v2 }
 0x100   :  { %v1468_v53 = vpop.f32.mrf.mxu0 }
 0x101   :  { %v1370_v5 = vadd.f32 %v1369_v59, %v1341_v3  ;;  %v3431_v51 = vpop.permute.xlu2 %1668  ;;  %v3436_v3 = vpop.permute.xlu0 %1673 }
 0x102   :  { %v1497_v4 = vpop.f32.mrf.mxu1 }
 0x103   :  { %v3385_v6 = vadd.f32 %v1398_v60, %v1370_v5 }
 0x104   :  { %v1410_v7 = vpop.f32.mrf.mxu2 }
 0x105   :  { %v1439_v9 = vpop.f32.mrf.mxu3  ;;  %v1411_v36 = vadd.f32 %v1410_v7, %v3301_v40  ;;  %v3433_v46 = vpop.permute.xlu1 %1658 }
 0x107   :  { %v1440_v41 = vadd.f32 %v1439_v9, %v1411_v36 }
 0x108   :  { %v1470_v11 = vpop.f32.mrf.mxu0 }
 0x109   :  { %v1469_v45 = vadd.f32 %v1468_v53, %v1440_v41  ;;  %v1700_v5 = vpop.permute.xlu2 %1699 }
 0x10a   :  { %v1499_v58 = vpop.f32.mrf.mxu1 }
 0x10b   :  { %v1498_v52 = vadd.f32 %v1497_v4, %v1469_v45 }
 0x10c   :  { %v1412_v12 = vpop.f32.mrf.mxu2 }
 0x10d   :  { %v1441_v13 = vpop.f32.mrf.mxu3  ;;  %v1413_v47 = vadd.f32 %v1412_v12, %v3311_v55 }
 0x10f   :  { %v1442_v40 = vadd.f32 %v1441_v13, %v1413_v47 }
 0x110   :  { %v1473_v14 = vpop.f32.mrf.mxu0 }
 0x111   :  { %v1471_v59 = vadd.f32 %v1470_v11, %v1442_v40 }
 0x112   :  { %v3387_v15 = vpop.f32.mrf.mxu1 }
 0x113   :  { %v1500_v53 = vadd.f32 %v1499_v58, %v1471_v59 }
 0x114   :  { %v1415_v16 = vpop.f32.mrf.mxu2 }
 0x115   :  { %v1444_v17 = vpop.f32.mrf.mxu3  ;;  %v1416_v60 = vadd.f32 %v1415_v16, %v3338_v8 }
 0x117   :  { %v1445_v55 = vadd.f32 %v1444_v17, %v1416_v60 }
 0x118   :  { %v3389_v18 = vpop.f32.mrf.mxu0 }
 0x119   :  { %v1474_v36 = vadd.f32 %v1473_v14, %v1445_v55 }
 0x11a   :  { %v3391_v10 = vpop.f32.mrf.mxu1 }
 0x11c   :  { %v1417_v19 = vpop.f32.mrf.mxu2 }
 0x11d   :  { %v1446_v20 = vpop.f32.mrf.mxu3  ;;  %v1418_v41 = vadd.f32 %v1417_v19, %v3345_v22  ;;  %v1705_v19 = vpop.permute.xlu0 %1704 }
 0x11f   :  { %v1447_v17 = vadd.f32 %v1446_v20, %v1418_v41 }
 0x120   :  { %v3393_v21 = vpop.f32.mrf.mxu0 }
 0x122   :  { %v3395_v61 = vpop.f32.mrf.mxu1 }
 0x124   :  { %v3397_v23 = vpop.f32.mrf.mxu2 }
 0x125   :  { %v3399_v24 = vpop.f32.mrf.mxu3 }
 0x128   :  { %v3401_v25 = vpop.f32.mrf.mxu0 }
 0x12a   :  { %v3403_v27 = vpop.f32.mrf.mxu1 }
 0x12c   :  { %v3405_v28 = vpop.f32.mrf.mxu2 }
 0x12d   :  { %v3407_v29 = vpop.f32.mrf.mxu3 }
 0x130   :  { %v3409_v30 = vpop.f32.mrf.mxu0 }
 0x132   :  { %v3411_v26 = vpop.f32.mrf.mxu1 }
 0x134   :  { %v3413_v32 = vpop.f32.mrf.mxu2 }
 0x135   :  { %v3415_v31 = vpop.f32.mrf.mxu3 }
 0x138   :  { %v3420_v37 = vpop.f32.mrf.mxu0 }
 0x13a   :  { %v3422_v38 = vpop.f32.mrf.mxu1 }
 0x13c   :  { %v3426_v43 = vpop.f32.mrf.mxu2 }
 0x13d   :  { %v3428_v44 = vpop.f32.mrf.mxu3 }
 0x140   :  { %v1584_v48 = vpop.f32.mrf.mxu0 }
 0x142   :  { %v1613_v49 = vpop.f32.mrf.mxu1 }
 0x144   :  { %v1526_v34 = vpop.f32.mrf.mxu2 }
 0x145   :  { %v1555_v56 = vpop.f32.mrf.mxu3  ;;  %v1527_v57 = vadd.f32 %v1526_v34, %v1498_v52  ;;  %v1476_v34 = vadd.f32 %v3389_v18, %v1447_v17 }
 0x147   :  { %v1556_v62 = vadd.f32 %v1555_v56, %v1527_v57  ;;  %v1421_v56 = vadd.f32 %v3397_v23, %v3375_v39 }
 0x148   :  { %v1586_v0 = vpop.f32.mrf.mxu0 }
 0x149   :  { %v1585_v2 = vadd.f32 %v1584_v48, %v1556_v62  ;;  %v3439_v48 = vpop.permute.xlu1 %1678 }
 0x14a   :  { %v1615_v1 = vpop.f32.mrf.mxu1 }
 0x14b   :  { %v1614_v7 = vadd.f32 %v1613_v49, %v1585_v2  ;;  %v1503_v49 = vadd.f32 %v3387_v15, %v1474_v36  ;;  %v1505_v15 = vadd.f32 %v3391_v10, %v1476_v34 }
 0x14c   :  { %v1528_v9 = vpop.f32.mrf.mxu2 }
 0x14d   :  { %v1557_v4 = vpop.f32.mrf.mxu3  ;;  %v1529_v12 = vadd.f32 %v1528_v9, %v1500_v53  ;;  %v1681_v13 = vmul.f32 %v1644_v33, %v1614_v7 }
 0x14f   :  { %v1558_v11 = vadd.f32 %v1557_v4, %v1529_v12  ;;  %v1737_v45 = vadd.f32 %v1700_v5, %v1681_v13  ;;  %v1423_v5 = vadd.f32 %v3405_v28, %v3379_v54  ;;  %v1715_v28 = vpop.permute.xlu2 %1714 }
 0x150   :  { %v1589_v8 = vpop.f32.mrf.mxu0 }
 0x151   :  { %v1587_v47 = vadd.f32 %v1586_v0, %v1558_v11  ;;  %v1745_v40 = vmax.f32 %v1737_v45, 0.0  ;;  %v1452_v13 = vadd.f32 %v3407_v29, %v1423_v5 }
 0x152   :  { %v1618_v16 = vpop.f32.mrf.mxu1 }
 0x153   :  { %1753 = vst [vmem:[%s3498_s4] sm:$0xff] %v1745_v40  ;;  %v1616_v58 = vadd.f32 %v1615_v1, %v1587_v47  ;;  %v1450_v1 = vadd.f32 %v3399_v24, %v1421_v56  ;;  %v1481_v45 = vadd.f32 %v3401_v25, %v1452_v13 }
 0x154   :  { %v1531_v33 = vpop.f32.mrf.mxu2 }
 0x155   :  { %v1560_v14 = vpop.f32.mrf.mxu3  ;;  %v1682_v52 = vmul.f32 %v1649_v50, %v1616_v58  ;;  %v1532_v22 = vadd.f32 %v1531_v33, %v1503_v49  ;;  %v1710_v50 = vpop.permute.xlu1 %1709  ;;  %v1479_v23 = vadd.f32 %v3393_v21, %v1450_v1 }
 0x157   :  { %v1738_v57 = vadd.f32 %v1705_v19, %v1682_v52  ;;  %v1561_v59 = vadd.f32 %v1560_v14, %v1532_v22 }
 0x158   :  { %v1591_v20 = vpop.f32.mrf.mxu0 }
 0x159   :  { %v1746_v60 = vmax.f32 %v1738_v57, 0.0  ;;  %v1590_v62 = vadd.f32 %v1589_v8, %v1561_v59  ;;  %v1426_v8 = vadd.f32 %v3413_v32, %v3382_v63  ;;  %v1720_v63 = vpop.permute.xlu0 %1719 }
 0x15a   :  { %v1620_v0 = vpop.f32.mrf.mxu1 }
 0x15b   :  { %1754 = vst [vmem:[%s3498_s4 + $0x8] sm:$0xff] %v1746_v60  ;;  %v1619_v2 = vadd.f32 %v1618_v16, %v1590_v62  ;;  %v1455_v17 = vadd.f32 %v3415_v31, %v1426_v8  ;;  %v1428_v31 = vadd.f32 %v3426_v43, %v3385_v6 }
 0x15c   :  { %v1533_v18 = vpop.f32.mrf.mxu2 }
 0x15d   :  { %v1562_v55 = vpop.f32.mrf.mxu3  ;;  %v1534_v53 = vadd.f32 %v1533_v18, %v1505_v15  ;;  %v1683_v39 = vmul.f32 %v3424_v42, %v1619_v2  ;;  %v1508_v42 = vadd.f32 %v3395_v61, %v1479_v23  ;;  %v1484_v52 = vadd.f32 %v3409_v30, %v1455_v17  ;;  %v1725_v62 = vpop.permute.xlu1 %1724 }
 0x15e   :  { %v1457_v57 = vadd.f32 %v3428_v44, %v1428_v31 }
 0x15f   :  { %v1563_v7 = vadd.f32 %v1562_v55, %v1534_v53  ;;  %v1739_v24 = vadd.f32 %v1710_v50, %v1683_v39  ;;  %v1730_v53 = vpop.permute.xlu2 %1729 }
 0x160   :  { %v1594_v12 = vpop.f32.mrf.mxu0  ;;  %v1486_v43 = vadd.f32 %v3420_v37, %v1457_v57 }
 0x161   :  { %v1592_v9 = vadd.f32 %v1591_v20, %v1563_v7  ;;  %v1747_v4 = vmax.f32 %v1739_v24, 0.0 }
 0x162   :  { %v1623_v36 = vpop.f32.mrf.mxu1 }
 0x163   :  { %v1621_v10 = vadd.f32 %v1620_v0, %v1592_v9  ;;  %1755 = vst [vmem:[%s3498_s4 + $0x10] sm:$0xff] %v1747_v4 }
 0x164   :  { %v1536_v41 = vpop.f32.mrf.mxu2 }
 0x165   :  { %v1565_v21 = vpop.f32.mrf.mxu3  ;;  %v1684_v11 = vmul.f32 %v3433_v46, %v1621_v10  ;;  %v1537_v54 = vadd.f32 %v1536_v41, %v1508_v42  ;;  %v1510_v46 = vadd.f32 %v3403_v27, %v1481_v45 }
 0x167   :  { %v1740_v29 = vadd.f32 %v1715_v28, %v1684_v11  ;;  %v1566_v16 = vadd.f32 %v1565_v21, %v1537_v54 }
 0x168   :  { %v1596_v58 = vpop.f32.mrf.mxu0 }
 0x169   :  { %v1748_v47 = vmax.f32 %v1740_v29, 0.0  ;;  %v1595_v40 = vadd.f32 %v1594_v12, %v1566_v16 }
 0x16a   :  { %v1625_v32 = vpop.f32.mrf.mxu1 }
 0x16b   :  { %1756 = vst [vmem:[%s3498_s4 + $0x18] sm:$0xff] %v1748_v47  ;;  %v1624_v61 = vadd.f32 %v1623_v36, %v1595_v40 }
 0x16c   :  { %v1538_v49 = vpop.f32.mrf.mxu2 }
 0x16d   :  { %v1567_v33 = vpop.f32.mrf.mxu3  ;;  %v1685_v25 = vmul.f32 %v3417_v35, %v1624_v61  ;;  %v1539_v14 = vadd.f32 %v1538_v49, %v1510_v46  ;;  %v1513_v35 = vadd.f32 %v3411_v26, %v1484_v52  ;;  %v1515_v26 = vadd.f32 %v3422_v38, %v1486_v43  ;;  %v1735_v38 = vpop.permute.xlu0 %1734 }
 0x16f   :  { %v1741_v22 = vadd.f32 %v1720_v63, %v1685_v25  ;;  %v1568_v19 = vadd.f32 %v1567_v33, %v1539_v14 }
 0x170   :  { %v1599_v6 = vpop.f32.mrf.mxu0 }
 0x171   :  { %v1749_v34 = vmax.f32 %v1741_v22, 0.0  ;;  %v1597_v56 = vadd.f32 %v1596_v58, %v1568_v19 }
 0x172   :  { %v1628_v15 = vpop.f32.mrf.mxu1 }
 0x173   :  { %1757 = vst [vmem:[%s3498_s4 + $0x20] sm:$0xff] %v1749_v34  ;;  %v1626_v27 = vadd.f32 %v1625_v32, %v1597_v56 }
 0x174   :  { %v1541_v59 = vpop.f32.mrf.mxu2 }
 0x175   :  { %v1570_v20 = vpop.f32.mrf.mxu3  ;;  %v1686_v30 = vmul.f32 %v3431_v51, %v1626_v27  ;;  %v1542_v60 = vadd.f32 %v1541_v59, %v1513_v35 }
 0x177   :  { %v1742_v0 = vadd.f32 %v1725_v62, %v1686_v30  ;;  %v1571_v1 = vadd.f32 %v1570_v20, %v1542_v60 }
 0x178   :  { %v1601_v5 = vpop.f32.mrf.mxu0 }
 0x179   :  { %v1750_v44 = vmax.f32 %v1742_v0, 0.0  ;;  %v1600_v50 = vadd.f32 %v1599_v6, %v1571_v1 }
 0x17a   :  { %v1630_v9 = vpop.f32.mrf.mxu1 }
 0x17b   :  { %1758 = vst [vmem:[%s3498_s4 + $0x28] sm:$0xff] %v1750_v44  ;;  %v1629_v2 = vadd.f32 %v1628_v15, %v1600_v50 }
 0x17c   :  { %v1543_v18 = vpop.f32.mrf.mxu2 }
 0x17d   :  { %v1687_v51 = vmul.f32 %v3436_v3, %v1629_v2  ;;  %v1544_v55 = vadd.f32 %v1543_v18, %v1515_v26  ;;  %v1572_v39 = vpop.f32.mrf.mxu3 }
 0x17f   :  { %v1743_v23 = vadd.f32 %v1730_v53, %v1687_v51  ;;  %v1573_v37 = vadd.f32 %v1572_v39, %v1544_v55 }
 0x181   :  { %v1751_v7 = vmax.f32 %v1743_v23, 0.0  ;;  %v1602_v24 = vadd.f32 %v1601_v5, %v1573_v37 }
 0x183   :  { %1759 = vst [vmem:[%s3498_s4 + $0x30] sm:$0xff] %v1751_v7  ;;  %v1631_v4 = vadd.f32 %v1630_v9, %v1602_v24 }
 0x185   :  { %v1688_v12 = vmul.f32 %v3439_v48, %v1631_v4 }
 0x187   :  { %v1744_v13 = vadd.f32 %v1735_v38, %v1688_v12 }
 0x189   :  { %v1752_v10 = vmax.f32 %v1744_v13, 0.0 }
 0x18b   :  { %1760 = vst [vmem:[%s3498_s4 + $0x38] sm:$0xff] %v1752_v10 }

// kernel: cva_forward.28
= control target key start
LH: loop header
LB: loop body
LE: loop exit
PB: predicated region body
PF: predicated region fallthrough
CT: control target
= control target key end

     0   :  { %v325_v3 = vmov 0   ;;  %vm80_vm0 = vcmask 261120   ;;  %s485_s1 = inlined_call_operand.vmem [shape: bf16[32,512], index: 1, kind: input, shape index: {}]   ;;  %s486_s2 = inlined_call_operand.vmem [shape: f32[32,1], index: 2, kind: input, shape index: {}]   ;;  %s487_s0 = inlined_call_operand.vmem [shape: bf16[32,32], index: 0, kind: input, shape index: {}]   ;;  %s488_s3 = inlined_call_operand.vmem [shape: f32[32,1], index: 3, kind: input, shape index: {}]   ;;  %s489_s4 = inlined_call_operand.vmem [shape: f32[32,512], index: 4, kind: output, shape index: {}]  }
   0x1   :  { %v289_v0 = vld [vmem:[%s485_s1 + $0x20] sm:$0xf]  ;;  %v319_v1 = vld [vmem:[%s485_s1 + $0x2c] sm:$0xf0]  ;;  %v317_v2 = vld [vmem:[%s485_s1 + $0x24] sm:$0xf]  ;;  %323 = vset.pattern.permute.xlu1 %v325_v3  ;;  %322 = vset.pattern.permute.xlu0 %v325_v3 }
   0x2   :  { %v290_v4 = vor.u32 %v319_v1, %v289_v0  ;;  %v291_v5 = vld [vmem:[%s485_s1 + $0x30] sm:$0xf0]  ;;  %v297_v6 = vld [vmem:[%s485_s1 + $0x28] sm:$0xf]  ;;  %v320_v7 = vld [vmem:[%s485_s1 + $0x34] sm:$0xf0]  ;;  %324 = vset.pattern.permute.xlu2 %v325_v3 }
   0x3   :  { %v294_v8 = vor.u32 %v317_v2, %v291_v5  ;;  %v298_v9 = vor.u32 %v320_v7, %v297_v6  ;;  %v318_v10 = vld [vmem:[%s485_s1 + $0x2c] sm:$0xf]  ;;  %v299_v11 = vld [vmem:[%s485_s1 + $0x38] sm:$0xf0]  ;;  %v273_v12 = vld [vmem:[%s485_s1] sm:$0xf] }
   0x4   :  { %93 = vmatpush.bf16.msra.mxu0 %v290_v4  ;;  %v302_v13 = vor.u32 %v318_v10, %v299_v11  ;;  %v315_v14 = vld [vmem:[%s485_s1 + $0xc] sm:$0xf0]  ;;  %v313_v15 = vld [vmem:[%s485_s1 + $0x4] sm:$0xf]  ;;  %v275_v16 = vld [vmem:[%s485_s1 + $0x10] sm:$0xf0] }
   0x5   :  { %112 = vmatpush.bf16.msra.mxu1 %v294_v8  ;;  %131 = vmatpush.bf16.msra.mxu2 %v298_v9  ;;  %v274_v17 = vor.u32 %v315_v14, %v273_v12  ;;  %v278_v18 = vor.u32 %v313_v15, %v275_v16  ;;  %v281_v19 = vld [vmem:[%s485_s1 + $0x8] sm:$0xf]  ;;  %v316_v20 = vld [vmem:[%s485_s1 + $0x14] sm:$0xf0]  ;;  %v314_v21 = vld [vmem:[%s485_s1 + $0xc] sm:$0xf] }
   0x6   :  { %150 = vmatpush.bf16.msra.mxu3 %v302_v13  ;;  %v282_v22 = vor.u32 %v316_v20, %v281_v19  ;;  %v283_v23 = vld [vmem:[%s485_s1 + $0x18] sm:$0xf0]  ;;  %v165_v24 = vld [vmem:[%s486_s2 + $0x10] sm:$0xff]  ;;  %v311_v26 = vld [vmem:[%s487_s0] sm:$0xff] }
   0x7   :  { %v286_v25 = vor.u32 %v314_v21, %v283_v23  ;;  %179 = vperm.xlu1 %323, %v165_v24   ;;  %v163_v27 = vld [vmem:[%s486_s2] sm:$0xff]  ;;  %v166_v29 = vld [vmem:[%s486_s2 + $0x18] sm:$0xff]  ;;  %v164_v30 = vld [vmem:[%s486_s2 + $0x8] sm:$0xff] }
   0x8   :  { %94 = vmatpush.bf16.msra.mxu0 %v274_v17  ;;  %169 = vperm.xlu0 %322, %v163_v27   ;;  %v203_v28 = vld [vmem:[%s488_s3] sm:$0xff]  ;;  %v204_v31 = vld [vmem:[%s488_s3 + $0x8] sm:$0xff]  ;;  %v206_v32 = vld [vmem:[%s488_s3 + $0x18] sm:$0xff] }
   0x9   :  { %113 = vmatpush.bf16.msra.mxu1 %v278_v18  ;;  %132 = vmatpush.bf16.msra.mxu2 %v282_v22  ;;  %v205_v33 = vld [vmem:[%s488_s3 + $0x10] sm:$0xff]  ;;  %v312_v34 = vld [vmem:[%s487_s0 + $0x8] sm:$0xff] }
   0xa   :  { %151 = vmatpush.bf16.msra.mxu3 %v286_v25  ;;  %209 = vperm.xlu2 %324, %v203_v28  }
   0xb   :  { %303 = vmatmul.msk.bf16.vlgmr.msra.gmra.mxu0 %vm80_vm0, %v311_v26 }
   0xc   :  { %305 = vmatmul.msk.bf16.vlgmr.msra.gmra.mxu1 %vm80_vm0, %v311_v26  ;;  %307 = vmatmul.msk.bf16.vlgmr.msra.gmra.mxu2 %vm80_vm0, %v311_v26 }
   0xd   :  { %309 = vmatmul.msk.bf16.vlgmr.msra.gmra.mxu3 %vm80_vm0, %v311_v26 }
   0xf   :  { %184 = vperm.xlu1 %323, %v166_v29  }
  0x10   :  { %174 = vperm.xlu0 %322, %v164_v30  }
  0x12   :  { %214 = vperm.xlu2 %324, %v204_v31  }
  0x17   :  { %224 = vperm.xlu1 %323, %v206_v32  }
  0x18   :  { %219 = vperm.xlu0 %322, %v205_v33  }
  0x1b   :  { %304 = vmatmul.msk.bf16.gmra.mxu0 %vm80_vm0, %v312_v34 }
  0x1c   :  { %306 = vmatmul.msk.bf16.gmra.mxu1 %vm80_vm0, %v312_v34  ;;  %308 = vmatmul.msk.bf16.gmra.mxu2 %vm80_vm0, %v312_v34 }
  0x1d   :  { %310 = vmatmul.msk.bf16.gmra.mxu3 %vm80_vm0, %v312_v34 }
  0x64   :  { %v210_v36 = vpop.permute.xlu2 %209 }
  0x6c   :  { %v215_v46 = vpop.permute.xlu2 %214 }
  0x79   :  { %v180_v43 = vpop.permute.xlu1 %179 }
  0x7a   :  { %v170_v35 = vpop.permute.xlu0 %169 }
  0x81   :  { %v185_v58 = vpop.permute.xlu1 %184 }
  0x82   :  { %v175_v44 = vpop.permute.xlu0 %174 }
  0x88   :  { %v96_v37 = vpop.f32.mrf.mxu0 }
  0x89   :  { %v187_v38 = vmul.f32 %v170_v35, %v96_v37  ;;  %v115_v39 = vpop.f32.mrf.mxu1  ;;  %v225_v15 = vpop.permute.xlu1 %224 }
  0x8a   :  { %v188_v40 = vmul.f32 %v170_v35, %v115_v39  ;;  %v220_v3 = vpop.permute.xlu0 %219 }
  0x8b   :  { %v227_v41 = vadd.f32 %v210_v36, %v187_v38 }
  0x8c   :  { %v228_v42 = vadd.f32 %v210_v36, %v188_v40 }
  0x8d   :  { %243 = vst [vmem:[%s489_s4] sm:$0xff] %v227_v41 }
  0x8e   :  { %244 = vst [vmem:[%s489_s4 + $0x8] sm:$0xff] %v228_v42 }
  0x8f   :  { %v134_v45 = vpop.f32.mrf.mxu2 }
  0x90   :  { %v189_v47 = vmul.f32 %v170_v35, %v134_v45  ;;  %v153_v48 = vpop.f32.mrf.mxu3  ;;  %v98_v49 = vpop.f32.mrf.mxu0 }
  0x91   :  { %v190_v50 = vmul.f32 %v170_v35, %v153_v48  ;;  %v191_v51 = vmul.f32 %v175_v44, %v98_v49  ;;  %v117_v52 = vpop.f32.mrf.mxu1 }
  0x92   :  { %v229_v53 = vadd.f32 %v210_v36, %v189_v47  ;;  %v192_v54 = vmul.f32 %v175_v44, %v117_v52 }
  0x93   :  { %v230_v55 = vadd.f32 %v210_v36, %v190_v50  ;;  %v231_v56 = vadd.f32 %v215_v46, %v191_v51 }
  0x94   :  { %245 = vst [vmem:[%s489_s4 + $0x10] sm:$0xff] %v229_v53  ;;  %v232_v57 = vadd.f32 %v215_v46, %v192_v54 }
  0x95   :  { %246 = vst [vmem:[%s489_s4 + $0x18] sm:$0xff] %v230_v55 }
  0x96   :  { %247 = vst [vmem:[%s489_s4 + $0x20] sm:$0xff] %v231_v56 }
  0x97   :  { %248 = vst [vmem:[%s489_s4 + $0x28] sm:$0xff] %v232_v57  ;;  %v136_v59 = vpop.f32.mrf.mxu2 }
  0x98   :  { %v193_v60 = vmul.f32 %v175_v44, %v136_v59  ;;  %v155_v61 = vpop.f32.mrf.mxu3  ;;  %v101_v62 = vpop.f32.mrf.mxu0 }
  0x99   :  { %v194_v63 = vmul.f32 %v175_v44, %v155_v61  ;;  %v195_v0 = vmul.f32 %v180_v43, %v101_v62  ;;  %v120_v1 = vpop.f32.mrf.mxu1 }
  0x9a   :  { %v233_v2 = vadd.f32 %v215_v46, %v193_v60  ;;  %v196_v4 = vmul.f32 %v180_v43, %v120_v1 }
  0x9b   :  { %v234_v5 = vadd.f32 %v215_v46, %v194_v63  ;;  %v235_v6 = vadd.f32 %v220_v3, %v195_v0 }
  0x9c   :  { %249 = vst [vmem:[%s489_s4 + $0x30] sm:$0xff] %v233_v2  ;;  %v236_v7 = vadd.f32 %v220_v3, %v196_v4 }
  0x9d   :  { %250 = vst [vmem:[%s489_s4 + $0x38] sm:$0xff] %v234_v5 }
  0x9e   :  { %251 = vst [vmem:[%s489_s4 + $0x40] sm:$0xff] %v235_v6 }
  0x9f   :  { %252 = vst [vmem:[%s489_s4 + $0x48] sm:$0xff] %v236_v7  ;;  %v139_v8 = vpop.f32.mrf.mxu2 }
  0xa0   :  { %v197_v9 = vmul.f32 %v180_v43, %v139_v8  ;;  %v158_v10 = vpop.f32.mrf.mxu3  ;;  %v103_v11 = vpop.f32.mrf.mxu0 }
  0xa1   :  { %v198_v12 = vmul.f32 %v180_v43, %v158_v10  ;;  %v199_v13 = vmul.f32 %v185_v58, %v103_v11  ;;  %v122_v14 = vpop.f32.mrf.mxu1 }
  0xa2   :  { %v237_v16 = vadd.f32 %v220_v3, %v197_v9  ;;  %v200_v17 = vmul.f32 %v185_v58, %v122_v14 }
  0xa3   :  { %v238_v18 = vadd.f32 %v220_v3, %v198_v12  ;;  %v239_v19 = vadd.f32 %v225_v15, %v199_v13 }
  0xa4   :  { %253 = vst [vmem:[%s489_s4 + $0x50] sm:$0xff] %v237_v16  ;;  %v240_v20 = vadd.f32 %v225_v15, %v200_v17 }
  0xa5   :  { %254 = vst [vmem:[%s489_s4 + $0x58] sm:$0xff] %v238_v18 }
  0xa6   :  { %255 = vst [vmem:[%s489_s4 + $0x60] sm:$0xff] %v239_v19 }
  0xa7   :  { %256 = vst [vmem:[%s489_s4 + $0x68] sm:$0xff] %v240_v20  ;;  %v141_v21 = vpop.f32.mrf.mxu2 }
  0xa8   :  { %v201_v22 = vmul.f32 %v185_v58, %v141_v21  ;;  %v160_v23 = vpop.f32.mrf.mxu3 }
  0xa9   :  { %v202_v24 = vmul.f32 %v185_v58, %v160_v23 }
  0xaa   :  { %v241_v25 = vadd.f32 %v225_v15, %v201_v22 }
  0xab   :  { %v242_v26 = vadd.f32 %v225_v15, %v202_v24 }
  0xac   :  { %257 = vst [vmem:[%s489_s4 + $0x70] sm:$0xff] %v241_v25 }
  0xad   :  { %258 = vst [vmem:[%s489_s4 + $0x78] sm:$0xff] %v242_v26 }

// kernel: cva_forward.29
= control target key start
LH: loop header
LB: loop body
LE: loop exit
PB: predicated region body
PF: predicated region fallthrough
CT: control target
= control target key end

     0   :  { %vm2779_vm0 = vcmask 523264   ;;  %s9679_s1 = inlined_call_operand.vmem [shape: bf16[1728,512], index: 1, kind: input, shape index: {}]   ;;  %s9680_s0 = inlined_call_operand.vmem [shape: bf16[32,1728], index: 0, kind: input, shape index: {}]   ;;  %s9681_s2 = inlined_call_operand.vmem [shape: f32[32,1], index: 2, kind: input, shape index: {}]   ;;  %s9682_s3 = inlined_call_operand.vmem [shape: f32[32,1], index: 3, kind: input, shape index: {}]   ;;  %s9683_s4 = inlined_call_operand.vmem [shape: f32[32,512], index: 4, kind: input, shape index: {}]   ;;  %s9684_s5 = inlined_call_operand.vmem [shape: f32[32,512], index: 5, kind: output, shape index: {}]  }
   0x1   :  { %v4224_v0 = vld [vmem:[%s9679_s1 + $0xe0] sm:$0xf]  ;;  %v5904_v1 = vld [vmem:[%s9679_s1 + $0xec] sm:$0xf0] }
   0x2   :  { %v4352_v2 = vld [vmem:[%s9679_s1 + $0x1e0] sm:$0xf]  ;;  %v4225_v3 = vor.u32 %v5904_v1, %v4224_v0  ;;  %v5936_v4 = vld [vmem:[%s9679_s1 + $0x1ec] sm:$0xf0] }
   0x3   :  { %v4480_v5 = vld [vmem:[%s9679_s1 + $0x2e0] sm:$0xf]  ;;  %v5968_v6 = vld [vmem:[%s9679_s1 + $0x2ec] sm:$0xf0]  ;;  %v4353_v7 = vor.u32 %v5936_v4, %v4352_v2 }
   0x4   :  { %v4481_v8 = vor.u32 %v5968_v6, %v4480_v5  ;;  %v4608_v9 = vld [vmem:[%s9679_s1 + $0x3e0] sm:$0xf]  ;;  %v6000_v10 = vld [vmem:[%s9679_s1 + $0x3ec] sm:$0xf0]  ;;  %2786 = vmatpush.bf16.msra.mxu0 %v4225_v3 }
   0x5   :  { %v4208_v11 = vld [vmem:[%s9679_s1 + $0xc0] sm:$0xf]  ;;  %v4609_v12 = vor.u32 %v6000_v10, %v4608_v9  ;;  %v5900_v13 = vld [vmem:[%s9679_s1 + $0xcc] sm:$0xf0]  ;;  %2805 = vmatpush.bf16.msra.mxu1 %v4353_v7 }
   0x6   :  { %v4336_v14 = vld [vmem:[%s9679_s1 + $0x1c0] sm:$0xf]  ;;  %v5932_v15 = vld [vmem:[%s9679_s1 + $0x1cc] sm:$0xf0]  ;;  %2824 = vmatpush.bf16.msra.mxu2 %v4481_v8  ;;  %v4209_v16 = vor.u32 %v5900_v13, %v4208_v11 }
   0x7   :  { %v4337_v17 = vor.u32 %v5932_v15, %v4336_v14  ;;  %v4464_v18 = vld [vmem:[%s9679_s1 + $0x2c0] sm:$0xf]  ;;  %v5964_v19 = vld [vmem:[%s9679_s1 + $0x2cc] sm:$0xf0]  ;;  %2843 = vmatpush.bf16.msra.mxu3 %v4609_v12 }
   0x8   :  { %v4592_v20 = vld [vmem:[%s9679_s1 + $0x3c0] sm:$0xf]  ;;  %v4465_v21 = vor.u32 %v5964_v19, %v4464_v18  ;;  %v5996_v22 = vld [vmem:[%s9679_s1 + $0x3cc] sm:$0xf0]  ;;  %2787 = vmatpush.bf16.msra.mxu0 %v4209_v16 }
   0x9   :  { %v4192_v23 = vld [vmem:[%s9679_s1 + $0xa0] sm:$0xf]  ;;  %v5896_v24 = vld [vmem:[%s9679_s1 + $0xac] sm:$0xf0]  ;;  %v4593_v25 = vor.u32 %v5996_v22, %v4592_v20  ;;  %2806 = vmatpush.bf16.msra.mxu1 %v4337_v17 }
   0xa   :  { %v4320_v26 = vld [vmem:[%s9679_s1 + $0x1a0] sm:$0xf]  ;;  %v5928_v27 = vld [vmem:[%s9679_s1 + $0x1ac] sm:$0xf0]  ;;  %v4193_v29 = vor.u32 %v5896_v24, %v4192_v23  ;;  %2825 = vmatpush.bf16.msra.mxu2 %v4465_v21 }
   0xb   :  { %v4448_v28 = vld [vmem:[%s9679_s1 + $0x2a0] sm:$0xf]  ;;  %v5960_v30 = vld [vmem:[%s9679_s1 + $0x2ac] sm:$0xf0]  ;;  %v4321_v33 = vor.u32 %v5928_v27, %v4320_v26  ;;  %2844 = vmatpush.bf16.msra.mxu3 %v4593_v25 }
   0xc   :  { %v4576_v31 = vld [vmem:[%s9679_s1 + $0x3a0] sm:$0xf]  ;;  %v5992_v32 = vld [vmem:[%s9679_s1 + $0x3ac] sm:$0xf0]  ;;  %v4449_v34 = vor.u32 %v5960_v30, %v4448_v28  ;;  %2788 = vmatpush.bf16.msra.mxu0 %v4193_v29  ;;  %v5853_v29 = vld [vmem:[%s9680_s0 + $0x34] sm:$0xf0] }
   0xd   :  { %v4176_v35 = vld [vmem:[%s9679_s1 + $0x80] sm:$0xf]  ;;  %v5892_v36 = vld [vmem:[%s9679_s1 + $0x8c] sm:$0xf0]  ;;  %v4577_v38 = vor.u32 %v5992_v32, %v4576_v31  ;;  %2807 = vmatpush.bf16.msra.mxu1 %v4321_v33  ;;  %v5846_v30 = vld [vmem:[%s9680_s0 + $0x4] sm:$0xf] }
   0xe   :  { %v4304_v37 = vld [vmem:[%s9679_s1 + $0x180] sm:$0xf]  ;;  %v5924_v39 = vld [vmem:[%s9679_s1 + $0x18c] sm:$0xf0]  ;;  %v4177_v44 = vor.u32 %v5892_v36, %v4176_v35  ;;  %2826 = vmatpush.bf16.msra.mxu2 %v4449_v34  ;;  %v4002_v31 = vld [vmem:[%s9680_s0 + $0x38] sm:$0xf0] }
   0xf   :  { %v4432_v40 = vld [vmem:[%s9679_s1 + $0x280] sm:$0xf]  ;;  %v5956_v41 = vld [vmem:[%s9679_s1 + $0x28c] sm:$0xf0]  ;;  %v4305_v45 = vor.u32 %v5924_v39, %v4304_v37  ;;  %2845 = vmatpush.bf16.msra.mxu3 %v4577_v38  ;;  %v4008_v35 = vld [vmem:[%s9680_s0 + $0x8] sm:$0xf] }
  0x10   :  { %v4560_v42 = vld [vmem:[%s9679_s1 + $0x380] sm:$0xf]  ;;  %v5988_v43 = vld [vmem:[%s9679_s1 + $0x38c] sm:$0xf0]  ;;  %v4433_v46 = vor.u32 %v5956_v41, %v4432_v40  ;;  %2789 = vmatpush.bf16.msra.mxu0 %v4177_v44  ;;  %v5847_v41 = vld [vmem:[%s9680_s0 + $0xc] sm:$0xf] }
  0x11   :  { %v4160_v47 = vld [vmem:[%s9679_s1 + $0x60] sm:$0xf]  ;;  %v5888_v48 = vld [vmem:[%s9679_s1 + $0x6c] sm:$0xf0]  ;;  %v4561_v50 = vor.u32 %v5988_v43, %v4560_v42  ;;  %2808 = vmatpush.bf16.msra.mxu1 %v4305_v45  ;;  %v4010_v42 = vld [vmem:[%s9680_s0 + $0x40] sm:$0xf0] }
  0x12   :  { %v4288_v49 = vld [vmem:[%s9679_s1 + $0x160] sm:$0xf]  ;;  %v5920_v51 = vld [vmem:[%s9679_s1 + $0x16c] sm:$0xf0]  ;;  %v4161_v56 = vor.u32 %v5888_v48, %v4160_v47  ;;  %2827 = vmatpush.bf16.msra.mxu2 %v4433_v46 }
  0x13   :  { %v4416_v52 = vld [vmem:[%s9679_s1 + $0x260] sm:$0xf]  ;;  %v5952_v53 = vld [vmem:[%s9679_s1 + $0x26c] sm:$0xf0]  ;;  %v4289_v57 = vor.u32 %v5920_v51, %v4288_v49  ;;  %2846 = vmatpush.bf16.msra.mxu3 %v4561_v50 }
  0x14   :  { %v4544_v54 = vld [vmem:[%s9679_s1 + $0x360] sm:$0xf]  ;;  %v5984_v55 = vld [vmem:[%s9679_s1 + $0x36c] sm:$0xf0]  ;;  %v4417_v58 = vor.u32 %v5952_v53, %v4416_v52  ;;  %2790 = vmatpush.bf16.msra.mxu0 %v4161_v56  ;;  %v6589_v53 = vor.u32 %v5846_v30, %v4002_v31 }
  0x15   :  { %v4144_v59 = vld [vmem:[%s9679_s1 + $0x40] sm:$0xf]  ;;  %v5884_v60 = vld [vmem:[%s9679_s1 + $0x4c] sm:$0xf0]  ;;  %v4545_v62 = vor.u32 %v5984_v55, %v4544_v54  ;;  %2809 = vmatpush.bf16.msra.mxu1 %v4289_v57  ;;  %v6599_v57 = vor.u32 %v5847_v41, %v4010_v42 }
  0x16   :  { %v4272_v61 = vld [vmem:[%s9679_s1 + $0x140] sm:$0xf]  ;;  %v5916_v63 = vld [vmem:[%s9679_s1 + $0x14c] sm:$0xf0]  ;;  %v4145_v4 = vor.u32 %v5884_v60, %v4144_v59  ;;  %2828 = vmatpush.bf16.msra.mxu2 %v4417_v58 }
  0x17   :  { %v4400_v0 = vld [vmem:[%s9679_s1 + $0x240] sm:$0xf]  ;;  %v5948_v1 = vld [vmem:[%s9679_s1 + $0x24c] sm:$0xf0]  ;;  %v4273_v5 = vor.u32 %v5916_v63, %v4272_v61  ;;  %2847 = vmatpush.bf16.msra.mxu3 %v4545_v62 }
  0x18   :  { %v4528_v2 = vld [vmem:[%s9679_s1 + $0x340] sm:$0xf]  ;;  %v5980_v3 = vld [vmem:[%s9679_s1 + $0x34c] sm:$0xf0]  ;;  %v4401_v6 = vor.u32 %v5948_v1, %v4400_v0  ;;  %2791 = vmatpush.bf16.msra.mxu0 %v4145_v4 }
  0x19   :  { %v4128_v7 = vld [vmem:[%s9679_s1 + $0x20] sm:$0xf]  ;;  %v5880_v8 = vld [vmem:[%s9679_s1 + $0x2c] sm:$0xf0]  ;;  %v4529_v10 = vor.u32 %v5980_v3, %v4528_v2  ;;  %2810 = vmatpush.bf16.msra.mxu1 %v4273_v5 }
  0x1a   :  { %v4256_v9 = vld [vmem:[%s9679_s1 + $0x120] sm:$0xf]  ;;  %v5912_v11 = vld [vmem:[%s9679_s1 + $0x12c] sm:$0xf0]  ;;  %v4129_v17 = vor.u32 %v5880_v8, %v4128_v7  ;;  %2829 = vmatpush.bf16.msra.mxu2 %v4401_v6 }
  0x1b   :  { %v4384_v12 = vld [vmem:[%s9679_s1 + $0x220] sm:$0xf]  ;;  %v5944_v13 = vld [vmem:[%s9679_s1 + $0x22c] sm:$0xf0]  ;;  %v4257_v21 = vor.u32 %v5912_v11, %v4256_v9  ;;  %2848 = vmatpush.bf16.msra.mxu3 %v4529_v10 }
  0x1c   :  { %v4512_v14 = vld [vmem:[%s9679_s1 + $0x320] sm:$0xf]  ;;  %v5976_v15 = vld [vmem:[%s9679_s1 + $0x32c] sm:$0xf0]  ;;  %v4385_v22 = vor.u32 %v5944_v13, %v4384_v12  ;;  %2792 = vmatpush.bf16.msra.mxu0 %v4129_v17 }
  0x1d   :  { %v4112_v16 = vld [vmem:[%s9679_s1] sm:$0xf]  ;;  %v5876_v18 = vld [vmem:[%s9679_s1 + $0xc] sm:$0xf0]  ;;  %v4513_v26 = vor.u32 %v5976_v15, %v4512_v14  ;;  %2811 = vmatpush.bf16.msra.mxu1 %v4257_v21 }
  0x1e   :  { %v4240_v19 = vld [vmem:[%s9679_s1 + $0x100] sm:$0xf]  ;;  %v5908_v20 = vld [vmem:[%s9679_s1 + $0x10c] sm:$0xf0]  ;;  %v4113_v34 = vor.u32 %v5876_v18, %v4112_v16  ;;  %2830 = vmatpush.bf16.msra.mxu2 %v4385_v22 }
  0x1f   :  { %v4368_v23 = vld [vmem:[%s9679_s1 + $0x200] sm:$0xf]  ;;  %v5940_v24 = vld [vmem:[%s9679_s1 + $0x20c] sm:$0xf0]  ;;  %v4241_v38 = vor.u32 %v5908_v20, %v4240_v19  ;;  %2849 = vmatpush.bf16.msra.mxu3 %v4513_v26  ;;  %v5867_v26 = vld [vmem:[%s9680_s0 + $0xa4] sm:$0xf0] }
  0x20   :  { %v4496_v25 = vld [vmem:[%s9679_s1 + $0x300] sm:$0xf]  ;;  %v5972_v27 = vld [vmem:[%s9679_s1 + $0x30c] sm:$0xf0]  ;;  %v4369_v39 = vor.u32 %v5940_v24, %v4368_v23  ;;  %2793 = vmatpush.bf16.msra.mxu0 %v4113_v34 }
  0x21   :  { %v4000_v28 = vld [vmem:[%s9680_s0] sm:$0xf]  ;;  %v6096_v33 = vld [vmem:[%s9679_s1 + $0x6ec] sm:$0xf0]  ;;  %v4497_v43 = vor.u32 %v5972_v27, %v4496_v25  ;;  %2812 = vmatpush.bf16.msra.mxu1 %v4241_v38  ;;  %v4066_v38 = vld [vmem:[%s9680_s0 + $0xb0] sm:$0xf0] }
  0x22   :  { %v4992_v32 = vld [vmem:[%s9679_s1 + $0x6e0] sm:$0xf]  ;;  %v6064_v37 = vld [vmem:[%s9679_s1 + $0x5ec] sm:$0xf0]  ;;  %v6578_v48 = vor.u32 %v5853_v29, %v4000_v28  ;;  %2831 = vmatpush.bf16.msra.mxu2 %v4369_v39  ;;  %v5860_v28 = vld [vmem:[%s9680_s0 + $0x74] sm:$0xf] }
  0x23   :  { %v4864_v36 = vld [vmem:[%s9679_s1 + $0x5e0] sm:$0xf]  ;;  %v4993_v44 = vor.u32 %v6096_v33, %v4992_v32  ;;  %v6032_v46 = vld [vmem:[%s9679_s1 + $0x4ec] sm:$0xf0]  ;;  %2850 = vmatpush.bf16.msra.mxu3 %v4497_v43  ;;  %v4058_v29 = vld [vmem:[%s9680_s0 + $0xa8] sm:$0xf0] }
  0x24   :  { %v5854_v40 = vld [vmem:[%s9680_s0 + $0x3c] sm:$0xf0]  ;;  %v4865_v49 = vor.u32 %v6064_v37, %v4864_v36  ;;  %v6128_v50 = vld [vmem:[%s9679_s1 + $0x7ec] sm:$0xf0]  ;;  %2794 = vmatmul.bf16.vlgmr.msra.gmra.mxu0 %v6578_v48  ;;  %2813 = vmatmul.bf16.vlgmr.msra.gmra.mxu1 %v6589_v53  ;;  %v4064_v32 = vld [vmem:[%s9680_s0 + $0x78] sm:$0xf] }
  0x25   :  { %v4736_v45 = vld [vmem:[%s9679_s1 + $0x4e0] sm:$0xf]  ;;  %v6092_v52 = vld [vmem:[%s9679_s1 + $0x6cc] sm:$0xf0]  ;;  %v6591_v54 = vor.u32 %v5854_v40, %v4008_v35  ;;  %v5861_v37 = vld [vmem:[%s9680_s0 + $0x7c] sm:$0xf] }
  0x26   :  { %v5120_v47 = vld [vmem:[%s9679_s1 + $0x7e0] sm:$0xf]  ;;  %v6060_v56 = vld [vmem:[%s9679_s1 + $0x5cc] sm:$0xf0]  ;;  %v4737_v58 = vor.u32 %v6032_v46, %v4736_v45  ;;  %2900 = vmatpush.bf16.msrb.mxu2 %v4993_v44  ;;  %2881 = vmatpush.bf16.msrb.mxu1 %v4865_v49 }
  0x27   :  { %v4976_v51 = vld [vmem:[%s9679_s1 + $0x6c0] sm:$0xf]  ;;  %v5121_v59 = vor.u32 %v6128_v50, %v5120_v47  ;;  %v6028_v62 = vld [vmem:[%s9679_s1 + $0x4cc] sm:$0xf0]  ;;  %2832 = vmatmul.bf16.vlgmr.msra.gmra.mxu2 %v6591_v54  ;;  %2851 = vmatmul.bf16.vlgmr.msra.gmra.mxu3 %v6599_v57  ;;  %v6721_v50 = vor.u32 %v5860_v28, %v4058_v29 }
  0x28   :  { %v4848_v55 = vld [vmem:[%s9679_s1 + $0x5c0] sm:$0xf]  ;;  %v4977_v60 = vor.u32 %v6092_v52, %v4976_v51  ;;  %v6124_v1 = vld [vmem:[%s9679_s1 + $0x7cc] sm:$0xf0]  ;;  %2862 = vmatpush.bf16.msrb.mxu0 %v4737_v58 }
  0x29   :  { %v4720_v61 = vld [vmem:[%s9679_s1 + $0x4c0] sm:$0xf]  ;;  %v4849_v0 = vor.u32 %v6060_v56, %v4848_v55  ;;  %v6088_v3 = vld [vmem:[%s9679_s1 + $0x6ac] sm:$0xf0]  ;;  %2919 = vmatpush.bf16.msrb.mxu3 %v5121_v59  ;;  %v6731_v56 = vor.u32 %v5861_v37, %v4066_v38 }
  0x2a   :  { %v5104_v63 = vld [vmem:[%s9679_s1 + $0x7c0] sm:$0xf]  ;;  %v6056_v5 = vld [vmem:[%s9679_s1 + $0x5ac] sm:$0xf0]  ;;  %v4721_v6 = vor.u32 %v6028_v62, %v4720_v61  ;;  %2901 = vmatpush.bf16.msrb.mxu2 %v4977_v60 }
  0x2b   :  { %v4960_v2 = vld [vmem:[%s9679_s1 + $0x6a0] sm:$0xf]  ;;  %v5105_v7 = vor.u32 %v6124_v1, %v5104_v63  ;;  %v6024_v10 = vld [vmem:[%s9679_s1 + $0x4ac] sm:$0xf0]  ;;  %2882 = vmatpush.bf16.msrb.mxu1 %v4849_v0  ;;  %9720 = vst [vmem:[#allocation3_spill] sm:$0xff] %v6731_v56 }
  0x2c   :  { %v4832_v4 = vld [vmem:[%s9679_s1 + $0x5a0] sm:$0xf]  ;;  %v4961_v8 = vor.u32 %v6088_v3, %v4960_v2  ;;  %v6120_v13 = vld [vmem:[%s9679_s1 + $0x7ac] sm:$0xf0]  ;;  %2863 = vmatpush.bf16.msrb.mxu0 %v4721_v6 }
  0x2d   :  { %v4704_v9 = vld [vmem:[%s9679_s1 + $0x4a0] sm:$0xf]  ;;  %v4833_v12 = vor.u32 %v6056_v5, %v4832_v4  ;;  %v6084_v15 = vld [vmem:[%s9679_s1 + $0x68c] sm:$0xf0]  ;;  %2920 = vmatpush.bf16.msrb.mxu3 %v5105_v7 }
  0x2e   :  { %v5088_v11 = vld [vmem:[%s9679_s1 + $0x7a0] sm:$0xf]  ;;  %v6052_v17 = vld [vmem:[%s9679_s1 + $0x58c] sm:$0xf0]  ;;  %v4705_v18 = vor.u32 %v6024_v10, %v4704_v9  ;;  %2902 = vmatpush.bf16.msrb.mxu2 %v4961_v8 }
  0x2f   :  { %v4944_v14 = vld [vmem:[%s9679_s1 + $0x680] sm:$0xf]  ;;  %v6020_v20 = vld [vmem:[%s9679_s1 + $0x48c] sm:$0xf0]  ;;  %v5089_v22 = vor.u32 %v6120_v13, %v5088_v11  ;;  %2883 = vmatpush.bf16.msrb.mxu1 %v4833_v12 }
  0x30   :  { %v4816_v16 = vld [vmem:[%s9679_s1 + $0x580] sm:$0xf]  ;;  %v4945_v23 = vor.u32 %v6084_v15, %v4944_v14  ;;  %v6116_v24 = vld [vmem:[%s9679_s1 + $0x78c] sm:$0xf0]  ;;  %2864 = vmatpush.bf16.msrb.mxu0 %v4705_v18 }
  0x31   :  { %v4688_v19 = vld [vmem:[%s9679_s1 + $0x480] sm:$0xf]  ;;  %v4056_v25 = vld [vmem:[%s9680_s0 + $0x70] sm:$0xf]  ;;  %v4817_v27 = vor.u32 %v6052_v17, %v4816_v16  ;;  %2921 = vmatpush.bf16.msrb.mxu3 %v5089_v22 }
  0x32   :  { %v5072_v21 = vld [vmem:[%s9679_s1 + $0x780] sm:$0xf]  ;;  %v6080_v31 = vld [vmem:[%s9679_s1 + $0x66c] sm:$0xf0]  ;;  %v4689_v35 = vor.u32 %v6020_v20, %v4688_v19  ;;  %2903 = vmatpush.bf16.msrb.mxu2 %v4945_v23  ;;  %v6710_v44 = vor.u32 %v5867_v26, %v4056_v25 }
  0x33   :  { %v4928_v30 = vld [vmem:[%s9679_s1 + $0x660] sm:$0xf]  ;;  %v6048_v34 = vld [vmem:[%s9679_s1 + $0x56c] sm:$0xf0]  ;;  %v5073_v39 = vor.u32 %v6116_v24, %v5072_v21  ;;  %2884 = vmatpush.bf16.msrb.mxu1 %v4817_v27 }
  0x34   :  { %v4800_v33 = vld [vmem:[%s9679_s1 + $0x560] sm:$0xf]  ;;  %v5868_v36 = vld [vmem:[%s9680_s0 + $0xac] sm:$0xf0]  ;;  %v4929_v40 = vor.u32 %v6080_v31, %v4928_v30  ;;  %2865 = vmatpush.bf16.msrb.mxu0 %v4689_v35  ;;  %2818 = vmatmul.bf16.gmra.mxu1 %v6721_v50  ;;  %v5855_v31 = vld [vmem:[%s9680_s0 + $0x44] sm:$0xf0] }
  0x35   :  { %v4672_v41 = vld [vmem:[%s9679_s1 + $0x460] sm:$0xf]  ;;  %v6016_v42 = vld [vmem:[%s9679_s1 + $0x46c] sm:$0xf0]  ;;  %v4801_v45 = vor.u32 %v6048_v34, %v4800_v33  ;;  %v6723_v51 = vor.u32 %v5868_v36, %v4064_v32  ;;  %2922 = vmatpush.bf16.msrb.mxu3 %v5073_v39  ;;  %2799 = vmatmul.bf16.gmra.mxu0 %v6710_v44  ;;  %v5848_v32 = vld [vmem:[%s9680_s0 + $0x14] sm:$0xf] }
  0x36   :  { %v5056_v43 = vld [vmem:[%s9679_s1 + $0x760] sm:$0xf]  ;;  %v6112_v46 = vld [vmem:[%s9679_s1 + $0x76c] sm:$0xf0]  ;;  %v4673_v58 = vor.u32 %v6016_v42, %v4672_v41  ;;  %2904 = vmatpush.bf16.msrb.mxu2 %v4929_v40  ;;  %v4018_v33 = vld [vmem:[%s9680_s0 + $0x48] sm:$0xf0] }
  0x37   :  { %v4912_v47 = vld [vmem:[%s9679_s1 + $0x640] sm:$0xf]  ;;  %v6076_v49 = vld [vmem:[%s9679_s1 + $0x64c] sm:$0xf0]  ;;  %9719 = vst [vmem:[#allocation2_spill] sm:$0xff] %v6723_v51  ;;  %v5057_v59 = vor.u32 %v6112_v46, %v5056_v43  ;;  %2885 = vmatpush.bf16.msrb.mxu1 %v4801_v45  ;;  %2837 = vmatmul.bf16.gmra.mxu2 %v6723_v51 }
  0x38   :  { %v4784_v52 = vld [vmem:[%s9679_s1 + $0x540] sm:$0xf]  ;;  %v6044_v55 = vld [vmem:[%s9679_s1 + $0x54c] sm:$0xf0]  ;;  %v4913_v60 = vor.u32 %v6076_v49, %v4912_v47  ;;  %2856 = vmatmul.bf16.gmra.mxu3 %v6731_v56  ;;  %2866 = vmatpush.bf16.msrb.mxu0 %v4673_v58  ;;  %v4024_v43 = vld [vmem:[%s9680_s0 + $0x18] sm:$0xf] }
  0x39   :  { %v4656_v61 = vld [vmem:[%s9679_s1 + $0x440] sm:$0xf]  ;;  %v6012_v62 = vld [vmem:[%s9679_s1 + $0x44c] sm:$0xf0]  ;;  %v4785_v0 = vor.u32 %v6044_v55, %v4784_v52  ;;  %2923 = vmatpush.bf16.msrb.mxu3 %v5057_v59  ;;  %v5849_v46 = vld [vmem:[%s9680_s0 + $0x1c] sm:$0xf] }
  0x3a   :  { %v5040_v63 = vld [vmem:[%s9679_s1 + $0x740] sm:$0xf]  ;;  %v6108_v1 = vld [vmem:[%s9679_s1 + $0x74c] sm:$0xf0]  ;;  %v4657_v6 = vor.u32 %v6012_v62, %v4656_v61  ;;  %2905 = vmatpush.bf16.msrb.mxu2 %v4913_v60  ;;  %v4026_v49 = vld [vmem:[%s9680_s0 + $0x50] sm:$0xf0] }
  0x3b   :  { %v4896_v2 = vld [vmem:[%s9679_s1 + $0x620] sm:$0xf]  ;;  %v6072_v3 = vld [vmem:[%s9679_s1 + $0x62c] sm:$0xf0]  ;;  %v5041_v8 = vor.u32 %v6108_v1, %v5040_v63  ;;  %2886 = vmatpush.bf16.msrb.mxu1 %v4785_v0  ;;  %v6868_v1 = vor.u32 %v5848_v32, %v4018_v33 }
  0x3c   :  { %v4768_v4 = vld [vmem:[%s9679_s1 + $0x520] sm:$0xf]  ;;  %v6040_v5 = vld [vmem:[%s9679_s1 + $0x52c] sm:$0xf0]  ;;  %v4897_v9 = vor.u32 %v6072_v3, %v4896_v2  ;;  %2867 = vmatpush.bf16.msrb.mxu0 %v4657_v6  ;;  %v6881_v6 = vor.u32 %v5849_v46, %v4026_v49  ;;  %v4080_v49 = vld [vmem:[%s9680_s0 + $0x88] sm:$0xf] }
  0x3d   :  { %v4640_v7 = vld [vmem:[%s9679_s1 + $0x420] sm:$0xf]  ;;  %v6008_v10 = vld [vmem:[%s9679_s1 + $0x42c] sm:$0xf0]  ;;  %v4769_v13 = vor.u32 %v6040_v5, %v4768_v4  ;;  %2924 = vmatpush.bf16.msrb.mxu3 %v5041_v8  ;;  %9722 = vst [vmem:[#allocation5_spill] sm:$0xff] %v6868_v1 }
  0x3e   :  { %v5024_v11 = vld [vmem:[%s9679_s1 + $0x720] sm:$0xf]  ;;  %v6104_v12 = vld [vmem:[%s9679_s1 + $0x72c] sm:$0xf0]  ;;  %v4641_v20 = vor.u32 %v6008_v10, %v4640_v7  ;;  %2906 = vmatpush.bf16.msrb.mxu2 %v4897_v9  ;;  %9724 = vst [vmem:[#allocation7_spill] sm:$0xff] %v6881_v6 }
  0x3f   :  { %v4880_v14 = vld [vmem:[%s9679_s1 + $0x600] sm:$0xf]  ;;  %v6068_v15 = vld [vmem:[%s9679_s1 + $0x60c] sm:$0xf0]  ;;  %v5025_v24 = vor.u32 %v6104_v12, %v5024_v11  ;;  %2887 = vmatpush.bf16.msrb.mxu1 %v4769_v13 }
  0x40   :  { %v4752_v16 = vld [vmem:[%s9679_s1 + $0x500] sm:$0xf]  ;;  %v6036_v17 = vld [vmem:[%s9679_s1 + $0x50c] sm:$0xf0]  ;;  %v4881_v25 = vor.u32 %v6068_v15, %v4880_v14  ;;  %2868 = vmatpush.bf16.msrb.mxu0 %v4641_v20 }
  0x41   :  { %v5504_v18 = vld [vmem:[%s9679_s1 + $0xae0] sm:$0xf]  ;;  %v6224_v19 = vld [vmem:[%s9679_s1 + $0xaec] sm:$0xf0]  ;;  %v4753_v29 = vor.u32 %v6036_v17, %v4752_v16  ;;  %2925 = vmatpush.bf16.msrb.mxu3 %v5025_v24 }
  0x42   :  { %v4624_v21 = vld [vmem:[%s9679_s1 + $0x400] sm:$0xf]  ;;  %v6192_v23 = vld [vmem:[%s9679_s1 + $0x9ec] sm:$0xf0]  ;;  %v5505_v34 = vor.u32 %v6224_v19, %v5504_v18  ;;  %2907 = vmatpush.bf16.msrb.mxu2 %v4881_v25 }
  0x43   :  { %v5376_v22 = vld [vmem:[%s9679_s1 + $0x9e0] sm:$0xf]  ;;  %v6004_v26 = vld [vmem:[%s9679_s1 + $0x40c] sm:$0xf0]  ;;  %2888 = vmatpush.bf16.msrb.mxu1 %v4753_v29 }
  0x44   :  { %v5008_v27 = vld [vmem:[%s9679_s1 + $0x700] sm:$0xf]  ;;  %v6100_v28 = vld [vmem:[%s9679_s1 + $0x70c] sm:$0xf0]  ;;  %v5377_v38 = vor.u32 %v6192_v23, %v5376_v22  ;;  %v4625_v42 = vor.u32 %v6004_v26, %v4624_v21 }
  0x45   :  { %v4016_v30 = vld [vmem:[%s9680_s0 + $0x10] sm:$0xf]  ;;  %v5248_v35 = vld [vmem:[%s9679_s1 + $0x8e0] sm:$0xf]  ;;  %v5009_v47 = vor.u32 %v6100_v28, %v5008_v27 }
  0x46   :  { %v6160_v36 = vld [vmem:[%s9679_s1 + $0x8ec] sm:$0xf0]  ;;  %v5632_v37 = vld [vmem:[%s9679_s1 + $0xbe0] sm:$0xf]  ;;  %2976 = vmatpush.bf16.msra.mxu2 %v5505_v34  ;;  %v6866_v0 = vor.u32 %v5855_v31, %v4016_v30  ;;  %2869 = vmatpush.bf16.msrb.mxu0 %v4625_v42 }
  0x47   :  { %v6256_v39 = vld [vmem:[%s9679_s1 + $0xbec] sm:$0xf0]  ;;  %v5488_v40 = vld [vmem:[%s9679_s1 + $0xac0] sm:$0xf]  ;;  %v5249_v52 = vor.u32 %v6160_v36, %v5248_v35  ;;  %2957 = vmatpush.bf16.msra.mxu1 %v5377_v38  ;;  %2926 = vmatpush.bf16.msrb.mxu3 %v5009_v47  ;;  %v5862_v38 = vld [vmem:[%s9680_s0 + $0x84] sm:$0xf] }
  0x48   :  { %v6220_v41 = vld [vmem:[%s9679_s1 + $0xacc] sm:$0xf0]  ;;  %v5232_v55 = vld [vmem:[%s9679_s1 + $0x8c0] sm:$0xf]  ;;  %v5633_v59 = vor.u32 %v6256_v39, %v5632_v37  ;;  %9721 = vst [vmem:[#allocation4_spill] sm:$0xff] %v6866_v0  ;;  %2889 = vmatmul.bf16.vlgmr.msrb.gmra.mxu1 %v6868_v1 }
  0x49   :  { %v5856_v45 = vld [vmem:[%s9680_s0 + $0x4c] sm:$0xf0]  ;;  %v5489_v60 = vor.u32 %v6220_v41, %v5488_v40  ;;  %v5360_v61 = vld [vmem:[%s9679_s1 + $0x9c0] sm:$0xf]  ;;  %2870 = vmatmul.bf16.vlgmr.msrb.gmra.mxu0 %v6866_v0  ;;  %v5869_v37 = vld [vmem:[%s9680_s0 + $0xb4] sm:$0xf0] }
  0x4a   :  { %v6156_v58 = vld [vmem:[%s9679_s1 + $0x8cc] sm:$0xf0]  ;;  %v5616_v63 = vld [vmem:[%s9679_s1 + $0xbc0] sm:$0xf]  ;;  %v6879_v5 = vor.u32 %v5856_v45, %v4024_v43  ;;  %2938 = vmatpush.bf16.msra.mxu0 %v5249_v52  ;;  %2927 = vmatmul.bf16.vlgmr.msrb.gmra.mxu3 %v6881_v6  ;;  %v4074_v39 = vld [vmem:[%s9680_s0 + $0xb8] sm:$0xf0] }
  0x4b   :  { %v6188_v62 = vld [vmem:[%s9679_s1 + $0x9cc] sm:$0xf0]  ;;  %v5472_v3 = vld [vmem:[%s9679_s1 + $0xaa0] sm:$0xf]  ;;  %v5233_v7 = vor.u32 %v6156_v58, %v5232_v55  ;;  %2995 = vmatpush.bf16.msra.mxu3 %v5633_v59  ;;  %2977 = vmatpush.bf16.msra.mxu2 %v5489_v60  ;;  %v5863_v55 = vld [vmem:[%s9680_s0 + $0x8c] sm:$0xf] }
  0x4c   :  { %v6252_v2 = vld [vmem:[%s9679_s1 + $0xbcc] sm:$0xf0]  ;;  %9723 = vst [vmem:[#allocation6_spill] sm:$0xff] %v6879_v5  ;;  %v5361_v8 = vor.u32 %v6188_v62, %v5360_v61  ;;  %v5216_v9 = vld [vmem:[%s9679_s1 + $0x8a0] sm:$0xf]  ;;  %2908 = vmatmul.bf16.vlgmr.msrb.gmra.mxu2 %v6879_v5 }
  0x4d   :  { %v6216_v4 = vld [vmem:[%s9679_s1 + $0xaac] sm:$0xf0]  ;;  %v5617_v11 = vor.u32 %v6252_v2, %v5616_v63  ;;  %v5344_v13 = vld [vmem:[%s9679_s1 + $0x9a0] sm:$0xf]  ;;  %v4082_v58 = vld [vmem:[%s9680_s0 + $0xc0] sm:$0xf0] }
  0x4e   :  { %v6152_v10 = vld [vmem:[%s9679_s1 + $0x8ac] sm:$0xf0]  ;;  %v5473_v12 = vor.u32 %v6216_v4, %v5472_v3  ;;  %v5600_v15 = vld [vmem:[%s9679_s1 + $0xba0] sm:$0xf]  ;;  %2939 = vmatpush.bf16.msra.mxu0 %v5233_v7  ;;  %2958 = vmatpush.bf16.msra.mxu1 %v5361_v8 }
  0x4f   :  { %v6184_v14 = vld [vmem:[%s9679_s1 + $0x9ac] sm:$0xf0]  ;;  %v5456_v17 = vld [vmem:[%s9679_s1 + $0xa80] sm:$0xf]  ;;  %v5217_v19 = vor.u32 %v6152_v10, %v5216_v9  ;;  %2996 = vmatpush.bf16.msra.mxu3 %v5617_v11  ;;  %v7000_v9 = vor.u32 %v5862_v38, %v4074_v39 }
  0x50   :  { %v6248_v16 = vld [vmem:[%s9679_s1 + $0xbac] sm:$0xf0]  ;;  %v5345_v20 = vor.u32 %v6184_v14, %v5344_v13  ;;  %v5200_v21 = vld [vmem:[%s9679_s1 + $0x880] sm:$0xf]  ;;  %2978 = vmatpush.bf16.msra.mxu2 %v5473_v12  ;;  %v7013_v14 = vor.u32 %v5863_v55, %v4082_v58  ;;  %v4210_v55 = vld [vmem:[%s9679_s1 + $0xd0] sm:$0xf0] }
  0x51   :  { %v6212_v18 = vld [vmem:[%s9679_s1 + $0xa8c] sm:$0xf0]  ;;  %v5601_v23 = vor.u32 %v6248_v16, %v5600_v15  ;;  %v5328_v25 = vld [vmem:[%s9679_s1 + $0x980] sm:$0xf]  ;;  %9726 = vst [vmem:[#allocation9_spill] sm:$0xff] %v7000_v9 }
  0x52   :  { %v6148_v22 = vld [vmem:[%s9679_s1 + $0x88c] sm:$0xf0]  ;;  %v5457_v24 = vor.u32 %v6212_v18, %v5456_v17  ;;  %v5584_v27 = vld [vmem:[%s9679_s1 + $0xb80] sm:$0xf]  ;;  %2940 = vmatpush.bf16.msra.mxu0 %v5217_v19  ;;  %2959 = vmatpush.bf16.msra.mxu1 %v5345_v20  ;;  %9728 = vst [vmem:[#allocation11_spill] sm:$0xff] %v7013_v14 }
  0x53   :  { %v6180_v26 = vld [vmem:[%s9679_s1 + $0x98c] sm:$0xf0]  ;;  %v5440_v29 = vld [vmem:[%s9679_s1 + $0xa60] sm:$0xf]  ;;  %v5201_v31 = vor.u32 %v6148_v22, %v5200_v21  ;;  %2997 = vmatpush.bf16.msra.mxu3 %v5601_v23 }
  0x54   :  { %v6244_v28 = vld [vmem:[%s9679_s1 + $0xb8c] sm:$0xf0]  ;;  %v5329_v32 = vor.u32 %v6180_v26, %v5328_v25  ;;  %v5184_v33 = vld [vmem:[%s9679_s1 + $0x860] sm:$0xf]  ;;  %2979 = vmatpush.bf16.msra.mxu2 %v5457_v24 }
  0x55   :  { %v6208_v30 = vld [vmem:[%s9679_s1 + $0xa6c] sm:$0xf0]  ;;  %v5585_v35 = vor.u32 %v6244_v28, %v5584_v27  ;;  %v4072_v36 = vld [vmem:[%s9680_s0 + $0x80] sm:$0xf]  ;;  %v5902_v27 = vld [vmem:[%s9679_s1 + $0xe4] sm:$0xf] }
  0x56   :  { %v6144_v34 = vld [vmem:[%s9679_s1 + $0x86c] sm:$0xf0]  ;;  %v5441_v40 = vor.u32 %v6208_v30, %v5440_v29  ;;  %v5312_v41 = vld [vmem:[%s9679_s1 + $0x960] sm:$0xf]  ;;  %2941 = vmatpush.bf16.msra.mxu0 %v5201_v31  ;;  %2960 = vmatpush.bf16.msra.mxu1 %v5329_v32  ;;  %v6998_v8 = vor.u32 %v5869_v37, %v4072_v36  ;;  %v4226_v28 = vld [vmem:[%s9679_s1 + $0xf0] sm:$0xf0] }
  0x57   :  { %v6176_v42 = vld [vmem:[%s9679_s1 + $0x96c] sm:$0xf0]  ;;  %v5568_v43 = vld [vmem:[%s9679_s1 + $0xb60] sm:$0xf]  ;;  %v5185_v59 = vor.u32 %v6144_v34, %v5184_v33  ;;  %2998 = vmatpush.bf16.msra.mxu3 %v5585_v35  ;;  %v4229_v39 = vor.u32 %v5902_v27, %v4226_v28 }
  0x58   :  { %v6240_v45 = vld [vmem:[%s9679_s1 + $0xb6c] sm:$0xf0]  ;;  %v5424_v46 = vld [vmem:[%s9679_s1 + $0xa40] sm:$0xf]  ;;  %v5313_v60 = vor.u32 %v6176_v42, %v5312_v41  ;;  %2980 = vmatpush.bf16.msra.mxu2 %v5441_v40  ;;  %9725 = vst [vmem:[#allocation8_spill] sm:$0xff] %v6998_v8  ;;  %2894 = vmatmul.bf16.gmra.mxu1 %v7000_v9 }
  0x59   :  { %v6204_v47 = vld [vmem:[%s9679_s1 + $0xa4c] sm:$0xf0]  ;;  %v5870_v52 = vld [vmem:[%s9680_s0 + $0xbc] sm:$0xf0]  ;;  %v5569_v63 = vor.u32 %v6240_v45, %v5568_v43  ;;  %2875 = vmatmul.bf16.gmra.mxu0 %v6998_v8  ;;  %v5934_v42 = vld [vmem:[%s9679_s1 + $0x1e4] sm:$0xf] }
  0x5a   :  { %v5168_v61 = vld [vmem:[%s9679_s1 + $0x840] sm:$0xf]  ;;  %v6140_v62 = vld [vmem:[%s9679_s1 + $0x84c] sm:$0xf0]  ;;  %v5425_v2 = vor.u32 %v6204_v47, %v5424_v46  ;;  %v7011_v13 = vor.u32 %v5870_v52, %v4080_v49  ;;  %2942 = vmatpush.bf16.msra.mxu0 %v5185_v59  ;;  %2961 = vmatpush.bf16.msra.mxu1 %v5313_v60  ;;  %v4354_v43 = vld [vmem:[%s9679_s1 + $0x1f0] sm:$0xf0] }
  0x5b   :  { %v5296_v3 = vld [vmem:[%s9679_s1 + $0x940] sm:$0xf]  ;;  %v6172_v4 = vld [vmem:[%s9679_s1 + $0x94c] sm:$0xf0]  ;;  %v5169_v15 = vor.u32 %v6140_v62, %v5168_v61  ;;  %2999 = vmatpush.bf16.msra.mxu3 %v5569_v63  ;;  %v5898_v52 = vld [vmem:[%s9679_s1 + $0xc4] sm:$0xf] }
  0x5c   :  { %v5552_v7 = vld [vmem:[%s9679_s1 + $0xb40] sm:$0xf]  ;;  %v6236_v10 = vld [vmem:[%s9679_s1 + $0xb4c] sm:$0xf0]  ;;  %9727 = vst [vmem:[#allocation10_spill] sm:$0xff] %v7011_v13  ;;  %v5297_v16 = vor.u32 %v6172_v4, %v5296_v3  ;;  %2981 = vmatpush.bf16.msra.mxu2 %v5425_v2  ;;  %2932 = vmatmul.bf16.gmra.mxu3 %v7013_v14  ;;  %v4357_v2 = vor.u32 %v5934_v42, %v4354_v43 }
  0x5d   :  { %v5408_v11 = vld [vmem:[%s9679_s1 + $0xa20] sm:$0xf]  ;;  %v6200_v12 = vld [vmem:[%s9679_s1 + $0xa2c] sm:$0xf0]  ;;  %v5553_v19 = vor.u32 %v6236_v10, %v5552_v7  ;;  %2913 = vmatmul.bf16.gmra.mxu2 %v7011_v13  ;;  %v5857_v60 = vld [vmem:[%s9680_s0 + $0x54] sm:$0xf0] }
  0x5e   :  { %v5152_v17 = vld [vmem:[%s9679_s1 + $0x820] sm:$0xf]  ;;  %v6136_v18 = vld [vmem:[%s9679_s1 + $0x82c] sm:$0xf0]  ;;  %v5409_v20 = vor.u32 %v6200_v12, %v5408_v11  ;;  %2943 = vmatpush.bf16.msra.mxu0 %v5169_v15  ;;  %2962 = vmatpush.bf16.msra.mxu1 %v5297_v16  ;;  %v5850_v61 = vld [vmem:[%s9680_s0 + $0x24] sm:$0xf]  ;;  %v4213_v15 = vor.u32 %v5898_v52, %v4210_v55 }
  0x5f   :  { %v5280_v21 = vld [vmem:[%s9679_s1 + $0x920] sm:$0xf]  ;;  %v6168_v22 = vld [vmem:[%s9679_s1 + $0x92c] sm:$0xf0]  ;;  %v5153_v29 = vor.u32 %v6136_v18, %v5152_v17  ;;  %3000 = vmatpush.bf16.msra.mxu3 %v5553_v19  ;;  %v4034_v63 = vld [vmem:[%s9680_s0 + $0x58] sm:$0xf0] }
  0x60   :  { %v5536_v23 = vld [vmem:[%s9679_s1 + $0xb20] sm:$0xf]  ;;  %v6232_v24 = vld [vmem:[%s9679_s1 + $0xb2c] sm:$0xf0]  ;;  %v5281_v30 = vor.u32 %v6168_v22, %v5280_v21  ;;  %2982 = vmatpush.bf16.msra.mxu2 %v5409_v20  ;;  %v4040_v10 = vld [vmem:[%s9680_s0 + $0x28] sm:$0xf] }
  0x61   :  { %v5392_v25 = vld [vmem:[%s9679_s1 + $0xa00] sm:$0xf]  ;;  %v6196_v26 = vld [vmem:[%s9679_s1 + $0xa0c] sm:$0xf0]  ;;  %v5537_v34 = vor.u32 %v6232_v24, %v5536_v23  ;;  %v5851_v12 = vld [vmem:[%s9680_s0 + $0x2c] sm:$0xf]  ;;  %v7138_v24 = vor.u32 %v5850_v61, %v4034_v63 }
  0x62   :  { %v5136_v31 = vld [vmem:[%s9679_s1 + $0x800] sm:$0xf]  ;;  %v6132_v32 = vld [vmem:[%s9679_s1 + $0x80c] sm:$0xf0]  ;;  %v5393_v35 = vor.u32 %v6196_v26, %v5392_v25  ;;  %2944 = vmatpush.bf16.msra.mxu0 %v5153_v29  ;;  %2963 = vmatpush.bf16.msra.mxu1 %v5281_v30  ;;  %v4042_v16 = vld [vmem:[%s9680_s0 + $0x60] sm:$0xf0] }
  0x63   :  { %v5264_v33 = vld [vmem:[%s9679_s1 + $0x900] sm:$0xf]  ;;  %v6164_v36 = vld [vmem:[%s9679_s1 + $0x90c] sm:$0xf0]  ;;  %v5137_v47 = vor.u32 %v6132_v32, %v5136_v31  ;;  %3001 = vmatpush.bf16.msra.mxu3 %v5537_v34  ;;  %v5930_v17 = vld [vmem:[%s9679_s1 + $0x1c4] sm:$0xf]  ;;  %v7151_v29 = vor.u32 %v5851_v12, %v4042_v16 }
  0x64   :  { %v5520_v37 = vld [vmem:[%s9679_s1 + $0xb00] sm:$0xf]  ;;  %v6228_v38 = vld [vmem:[%s9679_s1 + $0xb0c] sm:$0xf0]  ;;  %v5265_v49 = vor.u32 %v6164_v36, %v5264_v33  ;;  %2983 = vmatpush.bf16.msra.mxu2 %v5393_v35  ;;  %v4338_v18 = vld [vmem:[%s9679_s1 + $0x1d0] sm:$0xf0] }
  0x65   :  { %v5760_v40 = vld [vmem:[%s9679_s1 + $0xce0] sm:$0xf]  ;;  %v6288_v41 = vld [vmem:[%s9679_s1 + $0xcec] sm:$0xf0]  ;;  %v5521_v58 = vor.u32 %v6228_v38, %v5520_v37  ;;  %v5894_v20 = vld [vmem:[%s9679_s1 + $0xa4] sm:$0xf]  ;;  %v4341_v30 = vor.u32 %v5930_v17, %v4338_v18 }
  0x66   :  { %v5824_v45 = vld [vmem:[%s9679_s1 + $0xd60] sm:$0xf]  ;;  %v6304_v46 = vld [vmem:[%s9679_s1 + $0xd6c] sm:$0xf0]  ;;  %v5761_v62 = vor.u32 %v6288_v41, %v5760_v40  ;;  %2945 = vmatpush.bf16.msra.mxu0 %v5137_v47  ;;  %2964 = vmatpush.bf16.msra.mxu1 %v5265_v49  ;;  %v4194_v21 = vld [vmem:[%s9679_s1 + $0xb0] sm:$0xf0] }
  0x67   :  { %v4032_v59 = vld [vmem:[%s9680_s0 + $0x20] sm:$0xf]  ;;  %v5825_v3 = vor.u32 %v6304_v46, %v5824_v45  ;;  %v6284_v7 = vld [vmem:[%s9679_s1 + $0xccc] sm:$0xf0]  ;;  %3002 = vmatpush.bf16.msra.mxu3 %v5521_v58  ;;  %9730 = vst [vmem:[#allocation13_spill] sm:$0xff] %v7138_v24  ;;  %v4197_v31 = vor.u32 %v5894_v20, %v4194_v21 }
  0x68   :  { %3052 = vmatpush.bf16.msrb.mxu2 %v4229_v39  ;;  %v5744_v4 = vld [vmem:[%s9679_s1 + $0xcc0] sm:$0xf]  ;;  %v7136_v23 = vor.u32 %v5857_v60, %v4032_v59  ;;  %v6280_v25 = vld [vmem:[%s9679_s1 + $0xcac] sm:$0xf0]  ;;  %9732 = vst [vmem:[#allocation15_spill] sm:$0xff] %v7151_v29 }
  0x69   :  { %v5858_v11 = vld [vmem:[%s9680_s0 + $0x5c] sm:$0xf0]  ;;  %v5745_v19 = vor.u32 %v6284_v7, %v5744_v4  ;;  %v6300_v27 = vld [vmem:[%s9679_s1 + $0xd4c] sm:$0xf0]  ;;  %v5926_v32 = vld [vmem:[%s9679_s1 + $0x1a4] sm:$0xf]  ;;  %2965 = vmatmul.bf16.vlgmr.msra.gmra.mxu1 %v7138_v24 }
  0x6a   :  { %3014 = vmatpush.bf16.msrb.mxu0 %v5761_v62  ;;  %v5728_v22 = vld [vmem:[%s9679_s1 + $0xca0] sm:$0xf]  ;;  %9729 = vst [vmem:[#allocation12_spill] sm:$0xff] %v7136_v23  ;;  %3037 = vmatpush.bf16.msrb.mxu1 %v5825_v3  ;;  %v7149_v28 = vor.u32 %v5858_v11, %v4040_v10  ;;  %v4322_v33 = vld [vmem:[%s9679_s1 + $0x1b0] sm:$0xf0] }
  0x6b   :  { %3071 = vmatpush.bf16.msrb.mxu3 %v4357_v2  ;;  %v5808_v26 = vld [vmem:[%s9679_s1 + $0xd40] sm:$0xf]  ;;  %v5729_v34 = vor.u32 %v6280_v25, %v5728_v22  ;;  %v5890_v36 = vld [vmem:[%s9679_s1 + $0x84] sm:$0xf]  ;;  %v4178_v37 = vld [vmem:[%s9679_s1 + $0x90] sm:$0xf0]  ;;  %2946 = vmatmul.bf16.vlgmr.msra.gmra.mxu0 %v7136_v23  ;;  %v4325_v42 = vor.u32 %v5926_v32, %v4322_v33 }
  0x6c   :  { %9731 = vst [vmem:[#allocation14_spill] sm:$0xff] %v7149_v28  ;;  %3053 = vmatpush.bf16.msrb.mxu2 %v4213_v15  ;;  %v5809_v35 = vor.u32 %v6300_v27, %v5808_v26  ;;  %v5712_v38 = vld [vmem:[%s9679_s1 + $0xc80] sm:$0xf]  ;;  %v6276_v39 = vld [vmem:[%s9679_s1 + $0xc8c] sm:$0xf0]  ;;  %3003 = vmatmul.bf16.vlgmr.msra.gmra.mxu3 %v7151_v29  ;;  %v4181_v43 = vor.u32 %v5890_v36, %v4178_v37 }
  0x6d   :  { %v5792_v40 = vld [vmem:[%s9679_s1 + $0xd20] sm:$0xf]  ;;  %v6296_v41 = vld [vmem:[%s9679_s1 + $0xd2c] sm:$0xf0]  ;;  %2984 = vmatmul.bf16.vlgmr.msra.gmra.mxu2 %v7149_v28  ;;  %v5922_v45 = vld [vmem:[%s9679_s1 + $0x184] sm:$0xf]  ;;  %v5713_v47 = vor.u32 %v6276_v39, %v5712_v38 }
  0x6e   :  { %3015 = vmatpush.bf16.msrb.mxu0 %v5745_v19  ;;  %v4306_v46 = vld [vmem:[%s9679_s1 + $0x190] sm:$0xf0]  ;;  %3038 = vmatpush.bf16.msrb.mxu1 %v5809_v35  ;;  %v5886_v49 = vld [vmem:[%s9679_s1 + $0x64] sm:$0xf]  ;;  %v5696_v55 = vld [vmem:[%s9679_s1 + $0xc60] sm:$0xf]  ;;  %v5793_v58 = vor.u32 %v6296_v41, %v5792_v40 }
  0x6f   :  { %3072 = vmatpush.bf16.msrb.mxu3 %v4341_v30  ;;  %v4162_v52 = vld [vmem:[%s9679_s1 + $0x70] sm:$0xf0]  ;;  %v6272_v59 = vld [vmem:[%s9679_s1 + $0xc6c] sm:$0xf0]  ;;  %v5776_v60 = vld [vmem:[%s9679_s1 + $0xd00] sm:$0xf]  ;;  %v4309_v2 = vor.u32 %v5922_v45, %v4306_v46 }
  0x70   :  { %3054 = vmatpush.bf16.msrb.mxu2 %v4197_v31  ;;  %v6292_v61 = vld [vmem:[%s9679_s1 + $0xd0c] sm:$0xf0]  ;;  %v5998_v62 = vld [vmem:[%s9679_s1 + $0x3e4] sm:$0xf]  ;;  %v4610_v63 = vld [vmem:[%s9679_s1 + $0x3f0] sm:$0xf0]  ;;  %v4165_v3 = vor.u32 %v5886_v49, %v4162_v52  ;;  %v5697_v15 = vor.u32 %v6272_v59, %v5696_v55 }
  0x71   :  { %v5918_v4 = vld [vmem:[%s9679_s1 + $0x164] sm:$0xf]  ;;  %v4088_v7 = vld [vmem:[%s9680_s0 + $0x90] sm:$0xf]  ;;  %v5871_v10 = vld [vmem:[%s9680_s0 + $0xc4] sm:$0xf0]  ;;  %v5777_v19 = vor.u32 %v6292_v61, %v5776_v60  ;;  %v4613_v25 = vor.u32 %v5998_v62, %v4610_v63 }
  0x72   :  { %3016 = vmatpush.bf16.msrb.mxu0 %v5729_v34  ;;  %v5864_v11 = vld [vmem:[%s9680_s0 + $0x94] sm:$0xf]  ;;  %v4090_v12 = vld [vmem:[%s9680_s0 + $0xc8] sm:$0xf0]  ;;  %3039 = vmatpush.bf16.msrb.mxu1 %v5793_v58  ;;  %v5882_v17 = vld [vmem:[%s9679_s1 + $0x44] sm:$0xf]  ;;  %v7271_v40 = vor.u32 %v5871_v10, %v4088_v7 }
  0x73   :  { %3073 = vmatpush.bf16.msrb.mxu3 %v4325_v42  ;;  %v4290_v16 = vld [vmem:[%s9679_s1 + $0x170] sm:$0xf0]  ;;  %v4096_v20 = vld [vmem:[%s9680_s0 + $0x98] sm:$0xf]  ;;  %v5680_v21 = vld [vmem:[%s9679_s1 + $0xc40] sm:$0xf]  ;;  %v7273_v41 = vor.u32 %v5864_v11, %v4090_v12 }
  0x74   :  { %3055 = vmatpush.bf16.msrb.mxu2 %v4181_v43  ;;  %v4146_v18 = vld [vmem:[%s9679_s1 + $0x50] sm:$0xf0]  ;;  %v6268_v22 = vld [vmem:[%s9679_s1 + $0xc4c] sm:$0xf0]  ;;  %v5865_v27 = vld [vmem:[%s9680_s0 + $0x9c] sm:$0xf]  ;;  %v4293_v31 = vor.u32 %v5918_v4, %v4290_v16 }
  0x75   :  { %v5872_v26 = vld [vmem:[%s9680_s0 + $0xcc] sm:$0xf0]  ;;  %v4098_v30 = vld [vmem:[%s9680_s0 + $0xd0] sm:$0xf0]  ;;  %v4149_v32 = vor.u32 %v5882_v17, %v4146_v18  ;;  %v5914_v33 = vld [vmem:[%s9679_s1 + $0x144] sm:$0xf]  ;;  %v5681_v36 = vor.u32 %v6268_v22, %v5680_v21 }
  0x76   :  { %3017 = vmatpush.bf16.msrb.mxu0 %v5713_v47  ;;  %v4274_v34 = vld [vmem:[%s9679_s1 + $0x150] sm:$0xf0]  ;;  %v5878_v35 = vld [vmem:[%s9679_s1 + $0x24] sm:$0xf]  ;;  %v5664_v38 = vld [vmem:[%s9679_s1 + $0xc20] sm:$0xf]  ;;  %3040 = vmatpush.bf16.msrb.mxu1 %v5777_v19  ;;  %v7284_v46 = vor.u32 %v5872_v26, %v4096_v20  ;;  %v7286_v47 = vor.u32 %v5865_v27, %v4098_v30 }
  0x77   :  { %3074 = vmatpush.bf16.msrb.mxu3 %v4309_v2  ;;  %v4130_v37 = vld [vmem:[%s9679_s1 + $0x30] sm:$0xf0]  ;;  %v6264_v39 = vld [vmem:[%s9679_s1 + $0xc2c] sm:$0xf0]  ;;  %9733 = vst [vmem:[#allocation16_spill] sm:$0xff] %v7271_v40  ;;  %v3850_v45 = vld [vmem:[%s9681_s2] sm:$0xff]  ;;  %v4277_v52 = vor.u32 %v5914_v33, %v4274_v34 }
  0x78   :  { %3056 = vmatpush.bf16.msrb.mxu2 %v4165_v3  ;;  %9734 = vst [vmem:[#allocation17_spill] sm:$0xff] %v7273_v41  ;;  %v5994_v42 = vld [vmem:[%s9679_s1 + $0x3c4] sm:$0xf]  ;;  %v4594_v43 = vld [vmem:[%s9679_s1 + $0x3d0] sm:$0xf0]  ;;  %v6310_v49 = vmov 0   ;;  %v4133_v55 = vor.u32 %v5878_v35, %v4130_v37  ;;  %v5665_v61 = vor.u32 %v6264_v39, %v5664_v38 }
  0x79   :  { %6307 = vset.pattern.permute.xlu0 %v6310_v49  ;;  %6308 = vset.pattern.permute.xlu1 %v6310_v49  ;;  %v5910_v58 = vld [vmem:[%s9679_s1 + $0x124] sm:$0xf]  ;;  %v4258_v59 = vld [vmem:[%s9679_s1 + $0x130] sm:$0xf0]  ;;  %v5648_v63 = vld [vmem:[%s9679_s1 + $0xc00] sm:$0xf]  ;;  %v4597_v3 = vor.u32 %v5994_v42, %v4594_v43 }
  0x7a   :  { %3018 = vmatpush.bf16.msrb.mxu0 %v5697_v15  ;;  %3109 = vmatpush.bf16.msra.mxu1 %v4613_v25  ;;  %v5874_v60 = vld [vmem:[%s9679_s1 + $0x4] sm:$0xf]  ;;  %v4114_v62 = vld [vmem:[%s9679_s1 + $0x10] sm:$0xf0]  ;;  %v6260_v2 = vld [vmem:[%s9679_s1 + $0xc0c] sm:$0xf0]  ;;  %v4261_v16 = vor.u32 %v5910_v58, %v4258_v59 }
  0x7b   :  { %3075 = vmatpush.bf16.msrb.mxu3 %v4293_v31  ;;  %3856 = vperm.xlu0 %6307, %v3850_v45   ;;  %v6030_v4 = vld [vmem:[%s9679_s1 + $0x4e4] sm:$0xf]  ;;  %v4738_v7 = vld [vmem:[%s9679_s1 + $0x4f0] sm:$0xf0]  ;;  %v4117_v17 = vor.u32 %v5874_v60, %v4114_v62  ;;  %v5649_v19 = vor.u32 %v6260_v2, %v5648_v63  ;;  %v3851_v37 = vld [vmem:[%s9681_s2 + $0x8] sm:$0xff] }
  0x7c   :  { %3057 = vmatpush.bf16.msrb.mxu2 %v4149_v32  ;;  %2951 = vmatmul.bf16.gmra.mxu0 %v7271_v40  ;;  %v5966_v10 = vld [vmem:[%s9679_s1 + $0x2e4] sm:$0xf]  ;;  %v4482_v11 = vld [vmem:[%s9679_s1 + $0x2f0] sm:$0xf0]  ;;  %v4741_v21 = vor.u32 %v6030_v4, %v4738_v7  ;;  %v4048_v39 = vld [vmem:[%s9680_s0 + $0x30] sm:$0xf] }
  0x7d   :  { %2970 = vmatmul.bf16.gmra.mxu1 %v7273_v41  ;;  %2989 = vmatmul.bf16.gmra.mxu2 %v7284_v46  ;;  %v5990_v12 = vld [vmem:[%s9679_s1 + $0x3a4] sm:$0xf]  ;;  %v4578_v15 = vld [vmem:[%s9679_s1 + $0x3b0] sm:$0xf0]  ;;  %v4485_v26 = vor.u32 %v5966_v10, %v4482_v11  ;;  %v5859_v60 = vld [vmem:[%s9680_s0 + $0x64] sm:$0xf0] }
  0x7e   :  { %3019 = vmatpush.bf16.msrb.mxu0 %v5681_v36  ;;  %3008 = vmatmul.bf16.gmra.mxu3 %v7286_v47  ;;  %v5906_v18 = vld [vmem:[%s9679_s1 + $0x104] sm:$0xf]  ;;  %v4242_v20 = vld [vmem:[%s9679_s1 + $0x110] sm:$0xf0]  ;;  %v4581_v32 = vor.u32 %v5990_v12, %v4578_v15  ;;  %v4050_v62 = vld [vmem:[%s9680_s0 + $0x68] sm:$0xf0]  ;;  %v7403_v12 = vor.u32 %v5859_v60, %v4048_v39 }
  0x7f   :  { %3076 = vmatpush.bf16.msrb.mxu3 %v4277_v52  ;;  %v6062_v22 = vld [vmem:[%s9679_s1 + $0x5e4] sm:$0xf]  ;;  %v4866_v25 = vld [vmem:[%s9679_s1 + $0x5f0] sm:$0xf0]  ;;  %3110 = vmatpush.bf16.msra.mxu1 %v4597_v3  ;;  %v4245_v36 = vor.u32 %v5906_v18, %v4242_v20 }
  0x80   :  { %3058 = vmatpush.bf16.msrb.mxu2 %v4133_v55  ;;  %v6026_v27 = vld [vmem:[%s9679_s1 + $0x4c4] sm:$0xf]  ;;  %v4722_v30 = vld [vmem:[%s9679_s1 + $0x4d0] sm:$0xf0]  ;;  %6309 = vset.pattern.permute.xlu2 %v6310_v49  ;;  %v4869_v42 = vor.u32 %v6062_v22, %v4866_v25  ;;  %9735 = vst [vmem:[#allocation18_spill] sm:$0xff] %v7403_v12 }
  0x81   :  { %v5962_v31 = vld [vmem:[%s9679_s1 + $0x2c4] sm:$0xf]  ;;  %v4466_v33 = vld [vmem:[%s9679_s1 + $0x2d0] sm:$0xf0]  ;;  %v4725_v43 = vor.u32 %v6026_v27, %v4722_v30 }
  0x82   :  { %3020 = vmatpush.bf16.msrb.mxu0 %v5665_v61  ;;  %v5986_v34 = vld [vmem:[%s9679_s1 + $0x384] sm:$0xf]  ;;  %v4562_v35 = vld [vmem:[%s9679_s1 + $0x390] sm:$0xf0]  ;;  %v4469_v49 = vor.u32 %v5962_v31, %v4466_v33 }
  0x83   :  { %3077 = vmatpush.bf16.msrb.mxu3 %v4261_v16  ;;  %v3852_v38 = vld [vmem:[%s9681_s2 + $0x10] sm:$0xff]  ;;  %v6058_v45 = vld [vmem:[%s9679_s1 + $0x5c4] sm:$0xf]  ;;  %3111 = vmatpush.bf16.msra.mxu1 %v4581_v32  ;;  %v4565_v59 = vor.u32 %v5986_v34, %v4562_v35  ;;  %v3853_v35 = vld [vmem:[%s9681_s2 + $0x18] sm:$0xff] }
  0x84   :  { %3059 = vmatpush.bf16.msrb.mxu2 %v4117_v17  ;;  %v4850_v52 = vld [vmem:[%s9679_s1 + $0x5d0] sm:$0xf0]  ;;  %v6022_v55 = vld [vmem:[%s9679_s1 + $0x4a4] sm:$0xf]  ;;  %3861 = vperm.xlu0 %6307, %v3851_v37  }
  0x85   :  { %v4706_v58 = vld [vmem:[%s9679_s1 + $0x4b0] sm:$0xf0]  ;;  %3866 = vperm.xlu1 %6308, %v3852_v38   ;;  %v5958_v63 = vld [vmem:[%s9679_s1 + $0x2a4] sm:$0xf]  ;;  %v4853_v3 = vor.u32 %v6058_v45, %v4850_v52 }
  0x86   :  { %3021 = vmatpush.bf16.msrb.mxu0 %v5649_v19  ;;  %v5852_v61 = vld [vmem:[%s9680_s0 + $0x34] sm:$0xf]  ;;  %v4709_v4 = vor.u32 %v6022_v55, %v4706_v58  ;;  %v6054_v7 = vld [vmem:[%s9679_s1 + $0x5a4] sm:$0xf] }
  0x87   :  { %3078 = vmatpush.bf16.msrb.mxu3 %v4245_v36  ;;  %v4450_v2 = vld [vmem:[%s9679_s1 + $0x2b0] sm:$0xf0]  ;;  %v5982_v10 = vld [vmem:[%s9679_s1 + $0x364] sm:$0xf]  ;;  %v7405_v15 = vor.u32 %v5852_v61, %v4050_v62  ;;  %3112 = vmatpush.bf16.msra.mxu1 %v4565_v59 }
  0x88   :  { %3128 = vmatpush.bf16.msra.mxu2 %v4741_v21  ;;  %v4546_v11 = vld [vmem:[%s9679_s1 + $0x370] sm:$0xf0]  ;;  %v6018_v17 = vld [vmem:[%s9679_s1 + $0x484] sm:$0xf]  ;;  %v4453_v19 = vor.u32 %v5958_v63, %v4450_v2 }
  0x89   :  { %9736 = vst [vmem:[#allocation19_spill] sm:$0xff] %v7405_v15  ;;  %v4834_v16 = vld [vmem:[%s9679_s1 + $0x5b0] sm:$0xf0]  ;;  %v5954_v20 = vld [vmem:[%s9679_s1 + $0x284] sm:$0xf]  ;;  %v4549_v22 = vor.u32 %v5982_v10, %v4546_v11 }
  0x8a   :  { %3090 = vmatpush.bf16.msra.mxu0 %v4485_v26  ;;  %v4690_v18 = vld [vmem:[%s9679_s1 + $0x490] sm:$0xf0]  ;;  %v4837_v25 = vor.u32 %v6054_v7, %v4834_v16  ;;  %v6050_v27 = vld [vmem:[%s9679_s1 + $0x584] sm:$0xf]  ;;  %v5873_v7 = vld [vmem:[%s9680_s0 + $0xd4] sm:$0xf0] }
  0x8b   :  { %3147 = vmatpush.bf16.msra.mxu3 %v4869_v42  ;;  %v4434_v21 = vld [vmem:[%s9679_s1 + $0x290] sm:$0xf0]  ;;  %v4693_v26 = vor.u32 %v6018_v17, %v4690_v18  ;;  %v5978_v30 = vld [vmem:[%s9679_s1 + $0x344] sm:$0xf]  ;;  %3113 = vmatpush.bf16.msra.mxu1 %v4549_v22 }
  0x8c   :  { %3129 = vmatpush.bf16.msra.mxu2 %v4725_v43  ;;  %v4530_v31 = vld [vmem:[%s9679_s1 + $0x350] sm:$0xf0]  ;;  %3022 = vmatmul.bf16.vlgmr.msrb.gmra.mxu0 %v7403_v12  ;;  %v6014_v33 = vld [vmem:[%s9679_s1 + $0x464] sm:$0xf]  ;;  %v4437_v37 = vor.u32 %v5954_v20, %v4434_v21 }
  0x8d   :  { %5838 = vmatmul.msk.bf16.vlgmr.msrb.gmra.mxu1 %vm2779_vm0, %v7405_v15  ;;  %v4818_v32 = vld [vmem:[%s9679_s1 + $0x590] sm:$0xf0]  ;;  %3060 = vmatmul.bf16.vlgmr.msrb.gmra.mxu2 %v6578_v48  ;;  %v5950_v38 = vld [vmem:[%s9679_s1 + $0x264] sm:$0xf]  ;;  %v4533_v42 = vor.u32 %v5978_v30, %v4530_v31 }
  0x8e   :  { %3091 = vmatpush.bf16.msra.mxu0 %v4469_v49  ;;  %v4674_v34 = vld [vmem:[%s9679_s1 + $0x470] sm:$0xf0]  ;;  %3079 = vmatmul.bf16.vlgmr.msrb.gmra.mxu3 %v6589_v53  ;;  %v4821_v43 = vor.u32 %v6050_v27, %v4818_v32  ;;  %v6046_v49 = vld [vmem:[%s9679_s1 + $0x564] sm:$0xf] }
  0x8f   :  { %3148 = vmatpush.bf16.msra.mxu3 %v4853_v3  ;;  %v3892_v36 = vld [vmem:[%s9682_s3 + $0x10] sm:$0xff]  ;;  %v4677_v45 = vor.u32 %v6014_v33, %v4674_v34  ;;  %v5974_v52 = vld [vmem:[%s9679_s1 + $0x324] sm:$0xf]  ;;  %3871 = vperm.xlu1 %6308, %v3853_v35  }
  0x90   :  { %3130 = vmatpush.bf16.msra.mxu2 %v4709_v4  ;;  %v4418_v39 = vld [vmem:[%s9679_s1 + $0x270] sm:$0xf0]  ;;  %v6010_v59 = vld [vmem:[%s9679_s1 + $0x444] sm:$0xf]  ;;  %3906 = vperm.xlu0 %6307, %v3892_v36   ;;  %v4104_v4 = vld [vmem:[%s9680_s0 + $0xa0] sm:$0xf] }
  0x91   :  { %v4514_v55 = vld [vmem:[%s9679_s1 + $0x330] sm:$0xf0]  ;;  %v4421_v61 = vor.u32 %v5950_v38, %v4418_v39  ;;  %v5946_v62 = vld [vmem:[%s9679_s1 + $0x244] sm:$0xf]  ;;  %3114 = vmatpush.bf16.msra.mxu1 %v4533_v42  ;;  %v7532_v38 = vor.u32 %v5873_v7, %v4104_v4 }
  0x92   :  { %3092 = vmatpush.bf16.msra.mxu0 %v4453_v19  ;;  %v4802_v58 = vld [vmem:[%s9679_s1 + $0x570] sm:$0xf0]  ;;  %v4517_v2 = vor.u32 %v5974_v52, %v4514_v55  ;;  %v3890_v3 = vld [vmem:[%s9682_s3] sm:$0xff] }
  0x93   :  { %3149 = vmatpush.bf16.msra.mxu3 %v4837_v25  ;;  %v4658_v60 = vld [vmem:[%s9679_s1 + $0x450] sm:$0xf0]  ;;  %v4805_v10 = vor.u32 %v6046_v49, %v4802_v58  ;;  %v6042_v16 = vld [vmem:[%s9679_s1 + $0x544] sm:$0xf]  ;;  %3896 = vperm.xlu2 %6309, %v3890_v3   ;;  %v4106_v25 = vld [vmem:[%s9680_s0 + $0xd8] sm:$0xf0] }
  0x94   :  { %3131 = vmatpush.bf16.msra.mxu2 %v4693_v26  ;;  %v4402_v63 = vld [vmem:[%s9679_s1 + $0x250] sm:$0xf0]  ;;  %v4661_v11 = vor.u32 %v6010_v59, %v4658_v60  ;;  %v5970_v17 = vld [vmem:[%s9679_s1 + $0x304] sm:$0xf]  ;;  %v3893_v26 = vld [vmem:[%s9682_s3 + $0x18] sm:$0xff] }
  0x95   :  { %v4498_v18 = vld [vmem:[%s9679_s1 + $0x310] sm:$0xf0]  ;;  %v6006_v20 = vld [vmem:[%s9679_s1 + $0x424] sm:$0xf]  ;;  %v4405_v27 = vor.u32 %v5946_v62, %v4402_v63  ;;  %3115 = vmatpush.bf16.msra.mxu1 %v4517_v2 }
  0x96   :  { %3093 = vmatpush.bf16.msra.mxu0 %v4437_v37  ;;  %v4786_v19 = vld [vmem:[%s9679_s1 + $0x550] sm:$0xf0]  ;;  %v5866_v22 = vld [vmem:[%s9680_s0 + $0xa4] sm:$0xf]  ;;  %v4501_v32 = vor.u32 %v5970_v17, %v4498_v18 }
  0x97   :  { %3150 = vmatpush.bf16.msra.mxu3 %v4821_v43  ;;  %v4642_v21 = vld [vmem:[%s9679_s1 + $0x430] sm:$0xf0]  ;;  %v5942_v30 = vld [vmem:[%s9679_s1 + $0x224] sm:$0xf]  ;;  %v4789_v33 = vor.u32 %v6042_v16, %v4786_v19  ;;  %v7534_v39 = vor.u32 %v5866_v22, %v4106_v25  ;;  %3911 = vperm.xlu1 %6308, %v3893_v26  }
  0x98   :  { %3132 = vmatpush.bf16.msra.mxu2 %v4677_v45  ;;  %v4386_v31 = vld [vmem:[%s9679_s1 + $0x230] sm:$0xf0]  ;;  %v4645_v34 = vor.u32 %v6006_v20, %v4642_v21  ;;  %v6038_v35 = vld [vmem:[%s9679_s1 + $0x524] sm:$0xf]  ;;  %v3891_v20 = vld [vmem:[%s9682_s3 + $0x8] sm:$0xff] }
  0x99   :  { %v6126_v36 = vld [vmem:[%s9679_s1 + $0x7e4] sm:$0xf]  ;;  %v5122_v37 = vld [vmem:[%s9679_s1 + $0x7f0] sm:$0xf0]  ;;  %v4389_v58 = vor.u32 %v5942_v30, %v4386_v31  ;;  %3116 = vmatpush.bf16.msra.mxu1 %v4501_v32 }
  0x9a   :  { %3094 = vmatpush.bf16.msra.mxu0 %v4421_v61  ;;  %v4770_v42 = vld [vmem:[%s9679_s1 + $0x530] sm:$0xf0]  ;;  %v6002_v43 = vld [vmem:[%s9679_s1 + $0x404] sm:$0xf]  ;;  %v5125_v62 = vor.u32 %v6126_v36, %v5122_v37 }
  0x9b   :  { %3151 = vmatpush.bf16.msra.mxu3 %v4805_v10  ;;  %v4626_v45 = vld [vmem:[%s9679_s1 + $0x410] sm:$0xf0]  ;;  %v5938_v49 = vld [vmem:[%s9679_s1 + $0x204] sm:$0xf]  ;;  %v4773_v63 = vor.u32 %v6038_v35, %v4770_v42  ;;  %3901 = vperm.xlu2 %6309, %v3891_v20  }
  0x9c   :  { %3133 = vmatpush.bf16.msra.mxu2 %v4661_v11  ;;  %v6158_v52 = vld [vmem:[%s9679_s1 + $0x8e4] sm:$0xf]  ;;  %v5250_v55 = vld [vmem:[%s9679_s1 + $0x8f0] sm:$0xf0]  ;;  %v4629_v2 = vor.u32 %v6002_v43, %v4626_v45  ;;  %3027 = vmatmul.bf16.gmra.mxu0 %v7532_v38 }
  0x9d   :  { %v4370_v59 = vld [vmem:[%s9679_s1 + $0x210] sm:$0xf0]  ;;  %v6034_v60 = vld [vmem:[%s9679_s1 + $0x504] sm:$0xf]  ;;  %5839 = vmatmul.msk.bf16.gmra.mxu1 %vm2779_vm0, %v7534_v39  ;;  %v5253_v10 = vor.u32 %v6158_v52, %v5250_v55  ;;  %3065 = vmatmul.bf16.gmra.mxu2 %v6710_v44 }
  0x9e   :  { %3095 = vmatpush.bf16.msra.mxu0 %v4405_v27  ;;  %v4754_v61 = vld [vmem:[%s9679_s1 + $0x510] sm:$0xf0]  ;;  %v6094_v3 = vld [vmem:[%s9679_s1 + $0x6e4] sm:$0xf]  ;;  %3084 = vmatmul.bf16.gmra.mxu3 %v6721_v50  ;;  %v4373_v21 = vor.u32 %v5938_v49, %v4370_v59 }
  0x9f   :  { %3152 = vmatpush.bf16.msra.mxu3 %v4789_v33  ;;  %v6122_v4 = vld [vmem:[%s9679_s1 + $0x7c4] sm:$0xf]  ;;  %v5106_v7 = vld [vmem:[%s9679_s1 + $0x7d0] sm:$0xf0]  ;;  %3185 = vmatpush.bf16.msrb.mxu1 %v5125_v62  ;;  %v4757_v25 = vor.u32 %v6034_v60, %v4754_v61 }
  0xa0   :  { %3134 = vmatpush.bf16.msra.mxu2 %v4645_v34  ;;  %v4994_v11 = vld [vmem:[%s9679_s1 + $0x6f0] sm:$0xf0]  ;;  %v6190_v16 = vld [vmem:[%s9679_s1 + $0x9e4] sm:$0xf]  ;;  %v5109_v22 = vor.u32 %v6122_v4, %v5106_v7 }
  0xa1   :  { %v5378_v17 = vld [vmem:[%s9679_s1 + $0x9f0] sm:$0xf0]  ;;  %v6154_v18 = vld [vmem:[%s9679_s1 + $0x8c4] sm:$0xf]  ;;  %v4997_v26 = vor.u32 %v6094_v3, %v4994_v11 }
  0xa2   :  { %v5234_v19 = vld [vmem:[%s9679_s1 + $0x8d0] sm:$0xf0]  ;;  %3096 = vmatpush.bf16.msra.mxu0 %v4389_v58  ;;  %v6118_v27 = vld [vmem:[%s9679_s1 + $0x7a4] sm:$0xf]  ;;  %v5381_v31 = vor.u32 %v6190_v16, %v5378_v17 }
  0xa3   :  { %3153 = vmatpush.bf16.msra.mxu3 %v4773_v63  ;;  %v5090_v30 = vld [vmem:[%s9679_s1 + $0x7b0] sm:$0xf0]  ;;  %v5237_v32 = vor.u32 %v6154_v18, %v5234_v19  ;;  %v6090_v33 = vld [vmem:[%s9679_s1 + $0x6c4] sm:$0xf]  ;;  %3186 = vmatpush.bf16.msrb.mxu1 %v5109_v22  ;;  %v2814_v18 = vpop.f32.mrf.mxu1 }
  0xa4   :  { %3135 = vmatpush.bf16.msra.mxu2 %v4629_v2  ;;  %v4978_v34 = vld [vmem:[%s9679_s1 + $0x6d0] sm:$0xf0]  ;;  %v6186_v35 = vld [vmem:[%s9679_s1 + $0x9c4] sm:$0xf]  ;;  %v5093_v43 = vor.u32 %v6118_v27, %v5090_v30 }
  0xa5   :  { %v5362_v36 = vld [vmem:[%s9679_s1 + $0x9d0] sm:$0xf0]  ;;  %v6150_v37 = vld [vmem:[%s9679_s1 + $0x8a4] sm:$0xf]  ;;  %v4981_v45 = vor.u32 %v6090_v33, %v4978_v34 }
  0xa6   :  { %v5218_v42 = vld [vmem:[%s9679_s1 + $0x8b0] sm:$0xf0]  ;;  %3097 = vmatpush.bf16.msra.mxu0 %v4373_v21  ;;  %v6114_v49 = vld [vmem:[%s9679_s1 + $0x784] sm:$0xf]  ;;  %v5365_v55 = vor.u32 %v6186_v35, %v5362_v36 }
  0xa7   :  { %3154 = vmatpush.bf16.msra.mxu3 %v4757_v25  ;;  %v5074_v52 = vld [vmem:[%s9679_s1 + $0x790] sm:$0xf0]  ;;  %v5221_v58 = vor.u32 %v6150_v37, %v5218_v42  ;;  %v6086_v59 = vld [vmem:[%s9679_s1 + $0x6a4] sm:$0xf]  ;;  %3187 = vmatpush.bf16.msrb.mxu1 %v5093_v43 }
  0xa8   :  { %3204 = vmatpush.bf16.msrb.mxu2 %v5253_v10  ;;  %v4962_v60 = vld [vmem:[%s9679_s1 + $0x6b0] sm:$0xf0]  ;;  %v6182_v61 = vld [vmem:[%s9679_s1 + $0x9a4] sm:$0xf]  ;;  %v5077_v63 = vor.u32 %v6114_v49, %v5074_v52  ;;  %v2795_v10 = vpop.f32.mrf.mxu0 }
  0xa9   :  { %v5346_v62 = vld [vmem:[%s9679_s1 + $0x9b0] sm:$0xf0]  ;;  %v4965_v2 = vor.u32 %v6086_v59, %v4962_v60  ;;  %v6146_v3 = vld [vmem:[%s9679_s1 + $0x884] sm:$0xf]  ;;  %v2815_v19 = vadd.f32 %v2814_v18, %v2795_v10 }
  0xaa   :  { %3166 = vmatpush.bf16.msrb.mxu0 %v4997_v26  ;;  %v5202_v4 = vld [vmem:[%s9679_s1 + $0x890] sm:$0xf0]  ;;  %v6082_v7 = vld [vmem:[%s9679_s1 + $0x684] sm:$0xf]  ;;  %v5349_v20 = vor.u32 %v6182_v61, %v5346_v62  ;;  %v2852_v61 = vpop.f32.mrf.mxu3 }
  0xab   :  { %3223 = vmatpush.bf16.msrb.mxu3 %v5381_v31  ;;  %v4946_v11 = vld [vmem:[%s9679_s1 + $0x690] sm:$0xf0]  ;;  %v6110_v16 = vld [vmem:[%s9679_s1 + $0x764] sm:$0xf]  ;;  %v5205_v21 = vor.u32 %v6146_v3, %v5202_v4  ;;  %3188 = vmatpush.bf16.msrb.mxu1 %v5077_v63  ;;  %v2816_v4 = vpop.f32.mrf.mxu1 }
  0xac   :  { %3205 = vmatpush.bf16.msrb.mxu2 %v5237_v32  ;;  %v5058_v17 = vld [vmem:[%s9679_s1 + $0x770] sm:$0xf0]  ;;  %v6178_v22 = vld [vmem:[%s9679_s1 + $0x984] sm:$0xf]  ;;  %v4949_v26 = vor.u32 %v6082_v7, %v4946_v11  ;;  %3098 = vmatmul.bf16.vlgmr.msra.gmra.mxu0 %v6591_v54 }
  0xad   :  { %v5330_v25 = vld [vmem:[%s9679_s1 + $0x990] sm:$0xf0]  ;;  %v6142_v27 = vld [vmem:[%s9679_s1 + $0x864] sm:$0xf]  ;;  %v5061_v32 = vor.u32 %v6110_v16, %v5058_v17  ;;  %3117 = vmatmul.bf16.vlgmr.msra.gmra.mxu1 %v6599_v57  ;;  %3136 = vmatmul.bf16.vlgmr.msra.gmra.mxu2 %v6866_v0 }
  0xae   :  { %3167 = vmatpush.bf16.msrb.mxu0 %v4981_v45  ;;  %v5186_v30 = vld [vmem:[%s9679_s1 + $0x870] sm:$0xf0]  ;;  %v6078_v31 = vld [vmem:[%s9679_s1 + $0x664] sm:$0xf]  ;;  %3155 = vmatmul.bf16.vlgmr.msra.gmra.mxu3 %v6868_v1  ;;  %v5333_v36 = vor.u32 %v6178_v22, %v5330_v25  ;;  %v2833_v45 = vpop.f32.mrf.mxu2 }
  0xaf   :  { %3224 = vmatpush.bf16.msrb.mxu3 %v5365_v55  ;;  %v4930_v33 = vld [vmem:[%s9679_s1 + $0x670] sm:$0xf0]  ;;  %v6106_v34 = vld [vmem:[%s9679_s1 + $0x744] sm:$0xf]  ;;  %v5189_v37 = vor.u32 %v6142_v27, %v5186_v30  ;;  %3189 = vmatpush.bf16.msrb.mxu1 %v5061_v32  ;;  %v2834_v60 = vadd.f32 %v2833_v45, %v2815_v19 }
  0xb0   :  { %3206 = vmatpush.bf16.msrb.mxu2 %v5221_v58  ;;  %v5042_v35 = vld [vmem:[%s9679_s1 + $0x750] sm:$0xf0]  ;;  %v6174_v42 = vld [vmem:[%s9679_s1 + $0x964] sm:$0xf]  ;;  %v4933_v49 = vor.u32 %v6078_v31, %v4930_v33  ;;  %v2797_v62 = vpop.f32.mrf.mxu0 }
  0xb1   :  { %v5314_v43 = vld [vmem:[%s9679_s1 + $0x970] sm:$0xf0]  ;;  %v6138_v52 = vld [vmem:[%s9679_s1 + $0x844] sm:$0xf]  ;;  %v5045_v59 = vor.u32 %v6106_v34, %v5042_v35  ;;  %v7707_v10 = vadd.f32 %v2852_v61, %v2834_v60  ;;  %v2817_v11 = vadd.f32 %v2816_v4, %v2797_v62 }
  0xb2   :  { %3168 = vmatpush.bf16.msrb.mxu0 %v4965_v2  ;;  %v5170_v55 = vld [vmem:[%s9679_s1 + $0x850] sm:$0xf0]  ;;  %v6074_v58 = vld [vmem:[%s9679_s1 + $0x644] sm:$0xf]  ;;  %v5317_v7 = vor.u32 %v6174_v42, %v5314_v43 }
  0xb3   :  { %3225 = vmatpush.bf16.msrb.mxu3 %v5349_v20  ;;  %v4914_v63 = vld [vmem:[%s9679_s1 + $0x650] sm:$0xf0]  ;;  %v6102_v2 = vld [vmem:[%s9679_s1 + $0x724] sm:$0xf]  ;;  %v5173_v16 = vor.u32 %v6138_v52, %v5170_v55  ;;  %3190 = vmatpush.bf16.msrb.mxu1 %v5045_v59  ;;  %v2854_v55 = vpop.f32.mrf.mxu3  ;;  %v2819_v62 = vpop.f32.mrf.mxu1 }
  0xb4   :  { %3207 = vmatpush.bf16.msrb.mxu2 %v5205_v21  ;;  %v5026_v3 = vld [vmem:[%s9679_s1 + $0x730] sm:$0xf0]  ;;  %v6170_v17 = vld [vmem:[%s9679_s1 + $0x944] sm:$0xf]  ;;  %v4917_v19 = vor.u32 %v6074_v58, %v4914_v63 }
  0xb5   :  { %v5298_v18 = vld [vmem:[%s9679_s1 + $0x950] sm:$0xf0]  ;;  %v6134_v20 = vld [vmem:[%s9679_s1 + $0x824] sm:$0xf]  ;;  %v5029_v25 = vor.u32 %v6102_v2, %v5026_v3 }
  0xb6   :  { %3169 = vmatpush.bf16.msrb.mxu0 %v4949_v26  ;;  %v5154_v21 = vld [vmem:[%s9679_s1 + $0x830] sm:$0xf0]  ;;  %v6070_v22 = vld [vmem:[%s9679_s1 + $0x624] sm:$0xf]  ;;  %v5301_v31 = vor.u32 %v6170_v17, %v5298_v18 }
  0xb7   :  { %3226 = vmatpush.bf16.msrb.mxu3 %v5333_v36  ;;  %v4898_v26 = vld [vmem:[%s9679_s1 + $0x630] sm:$0xf0]  ;;  %v6098_v27 = vld [vmem:[%s9679_s1 + $0x704] sm:$0xf]  ;;  %v5157_v32 = vor.u32 %v6134_v20, %v5154_v21  ;;  %v2835_v36 = vpop.f32.mrf.mxu2  ;;  %3191 = vmatpush.bf16.msrb.mxu1 %v5029_v25 }
  0xb8   :  { %3208 = vmatpush.bf16.msrb.mxu2 %v5189_v37  ;;  %v5010_v30 = vld [vmem:[%s9679_s1 + $0x710] sm:$0xf0]  ;;  %v6166_v33 = vld [vmem:[%s9679_s1 + $0x924] sm:$0xf]  ;;  %v4901_v37 = vor.u32 %v6070_v22, %v4898_v26  ;;  %v2836_v52 = vadd.f32 %v2835_v36, %v2817_v11  ;;  %v2800_v58 = vpop.f32.mrf.mxu0 }
  0xb9   :  { %v5282_v34 = vld [vmem:[%s9679_s1 + $0x930] sm:$0xf0]  ;;  %v6130_v35 = vld [vmem:[%s9679_s1 + $0x804] sm:$0xf]  ;;  %v2820_v11 = vadd.f32 %v2819_v62, %v2800_v58 }
  0xba   :  { %3170 = vmatpush.bf16.msrb.mxu0 %v4933_v49  ;;  %v5138_v42 = vld [vmem:[%s9679_s1 + $0x810] sm:$0xf0]  ;;  %v6066_v43 = vld [vmem:[%s9679_s1 + $0x604] sm:$0xf]  ;;  %v5013_v49 = vor.u32 %v6098_v27, %v5010_v30  ;;  %v5285_v63 = vor.u32 %v6166_v33, %v5282_v34 }
  0xbb   :  { %3227 = vmatpush.bf16.msrb.mxu3 %v5317_v7  ;;  %v4882_v45 = vld [vmem:[%s9679_s1 + $0x610] sm:$0xf0]  ;;  %v6286_v59 = vld [vmem:[%s9679_s1 + $0xce4] sm:$0xf]  ;;  %v7769_v7 = vadd.f32 %v2854_v55, %v2836_v52  ;;  %v2857_v52 = vpop.f32.mrf.mxu3 }
  0xbc   :  { %3209 = vmatpush.bf16.msrb.mxu2 %v5173_v16  ;;  %v5762_v60 = vld [vmem:[%s9679_s1 + $0xcf0] sm:$0xf0]  ;;  %v6222_v61 = vld [vmem:[%s9679_s1 + $0xae4] sm:$0xf]  ;;  %v5141_v16 = vor.u32 %v6130_v35, %v5138_v42  ;;  %v4885_v18 = vor.u32 %v6066_v43, %v4882_v45  ;;  %3192 = vmatpush.bf16.msrb.mxu1 %v5013_v49 }
  0xbd   :  { %v5506_v2 = vld [vmem:[%s9679_s1 + $0xaf0] sm:$0xf0]  ;;  %v6254_v3 = vld [vmem:[%s9679_s1 + $0xbe4] sm:$0xf]  ;;  %v5765_v20 = vor.u32 %v6286_v59, %v5762_v60  ;;  %3103 = vmatmul.bf16.gmra.mxu0 %v6723_v51  ;;  %3122 = vmatmul.bf16.gmra.mxu1 %v6731_v56 }
  0xbe   :  { %3171 = vmatpush.bf16.msrb.mxu0 %v4917_v19  ;;  %v5634_v4 = vld [vmem:[%s9679_s1 + $0xbf0] sm:$0xf0]  ;;  %v6162_v17 = vld [vmem:[%s9679_s1 + $0x904] sm:$0xf]  ;;  %v5509_v25 = vor.u32 %v6222_v61, %v5506_v2  ;;  %3141 = vmatmul.bf16.gmra.mxu2 %v6998_v8  ;;  %v4728_v8 = vld [vmem:[%s9679_s1 + $0x4c8] sm:$0xf] }
  0xbf   :  { %3228 = vmatpush.bf16.msrb.mxu3 %v5301_v31  ;;  %v5266_v19 = vld [vmem:[%s9679_s1 + $0x910] sm:$0xf0]  ;;  %v6302_v21 = vld [vmem:[%s9679_s1 + $0xd64] sm:$0xf]  ;;  %v5637_v26 = vor.u32 %v6254_v3, %v5634_v4  ;;  %v2838_v36 = vpop.f32.mrf.mxu2 }
  0xc0   :  { %3210 = vmatpush.bf16.msrb.mxu2 %v5157_v32  ;;  %v5826_v22 = vld [vmem:[%s9679_s1 + $0xd70] sm:$0xf0]  ;;  %v6282_v27 = vld [vmem:[%s9679_s1 + $0xcc4] sm:$0xf]  ;;  %3160 = vmatmul.bf16.gmra.mxu3 %v7000_v9  ;;  %v5269_v35 = vor.u32 %v6162_v17, %v5266_v19  ;;  %v2839_v49 = vadd.f32 %v2838_v36, %v2820_v11  ;;  %v2802_v55 = vpop.f32.mrf.mxu0  ;;  %v6093_v9 = vld [vmem:[%s9679_s1 + $0x6d4] sm:$0xf0] }
  0xc1   :  { %v5746_v30 = vld [vmem:[%s9679_s1 + $0xcd0] sm:$0xf0]  ;;  %v6218_v31 = vld [vmem:[%s9679_s1 + $0xac4] sm:$0xf]  ;;  %3261 = vmatpush.bf16.msra.mxu1 %v5637_v26 }
  0xc2   :  { %3172 = vmatpush.bf16.msrb.mxu0 %v4901_v37  ;;  %v5490_v32 = vld [vmem:[%s9679_s1 + $0xad0] sm:$0xf0]  ;;  %v6250_v33 = vld [vmem:[%s9679_s1 + $0xbc4] sm:$0xf]  ;;  %v5829_v37 = vor.u32 %v6302_v21, %v5826_v22  ;;  %v5749_v42 = vor.u32 %v6282_v27, %v5746_v30  ;;  %v7829_v11 = vadd.f32 %v2857_v52, %v2839_v49 }
  0xc3   :  { %v5618_v34 = vld [vmem:[%s9679_s1 + $0xbd0] sm:$0xf0]  ;;  %3229 = vmatpush.bf16.msrb.mxu3 %v5285_v63  ;;  %v6278_v43 = vld [vmem:[%s9679_s1 + $0xca4] sm:$0xf]  ;;  %v5493_v58 = vor.u32 %v6218_v31, %v5490_v32  ;;  %v2821_v63 = vpop.f32.mrf.mxu1 }
  0xc4   :  { %3211 = vmatpush.bf16.msrb.mxu2 %v5141_v16  ;;  %v5730_v45 = vld [vmem:[%s9679_s1 + $0xcb0] sm:$0xf0]  ;;  %v5621_v59 = vor.u32 %v6250_v33, %v5618_v34  ;;  %v6214_v60 = vld [vmem:[%s9679_s1 + $0xaa4] sm:$0xf]  ;;  %v2822_v16 = vadd.f32 %v2821_v63, %v2802_v55 }
  0xc5   :  { %v6298_v61 = vld [vmem:[%s9679_s1 + $0xd44] sm:$0xf]  ;;  %v5810_v62 = vld [vmem:[%s9679_s1 + $0xd50] sm:$0xf0]  ;;  %v5733_v17 = vor.u32 %v6278_v43, %v5730_v45 }
  0xc6   :  { %3173 = vmatpush.bf16.msrb.mxu0 %v4885_v18  ;;  %v5474_v2 = vld [vmem:[%s9679_s1 + $0xab0] sm:$0xf0]  ;;  %v6246_v3 = vld [vmem:[%s9679_s1 + $0xba4] sm:$0xf]  ;;  %v5813_v18 = vor.u32 %v6298_v61, %v5810_v62  ;;  %3262 = vmatpush.bf16.msra.mxu1 %v5621_v59 }
  0xc7   :  { %v5602_v4 = vld [vmem:[%s9679_s1 + $0xbb0] sm:$0xf0]  ;;  %3230 = vmatpush.bf16.msrb.mxu3 %v5269_v35  ;;  %v6274_v19 = vld [vmem:[%s9679_s1 + $0xc84] sm:$0xf]  ;;  %v2840_v31 = vpop.f32.mrf.mxu2 }
  0xc8   :  { %3280 = vmatpush.bf16.msra.mxu2 %v5765_v20  ;;  %v5477_v20 = vor.u32 %v6214_v60, %v5474_v2  ;;  %v5605_v21 = vor.u32 %v6246_v3, %v5602_v4  ;;  %v5714_v22 = vld [vmem:[%s9679_s1 + $0xc90] sm:$0xf0]  ;;  %v6210_v27 = vld [vmem:[%s9679_s1 + $0xa84] sm:$0xf]  ;;  %v7867_v52 = vpop.f32.mrf.mxu0 }
  0xc9   :  { %v5794_v26 = vld [vmem:[%s9679_s1 + $0xd30] sm:$0xf0]  ;;  %v5717_v32 = vor.u32 %v6274_v19, %v5714_v22  ;;  %v6242_v33 = vld [vmem:[%s9679_s1 + $0xb84] sm:$0xf]  ;;  %v6001_v19 = vld [vmem:[%s9679_s1 + $0x3f4] sm:$0xf0] }
  0xca   :  { %3242 = vmatpush.bf16.msra.mxu0 %v5509_v25  ;;  %v6294_v25 = vld [vmem:[%s9679_s1 + $0xd24] sm:$0xf]  ;;  %v5458_v30 = vld [vmem:[%s9679_s1 + $0xa90] sm:$0xf0]  ;;  %3263 = vmatpush.bf16.msra.mxu1 %v5605_v21 }
  0xcb   :  { %3303 = vmatpush.bf16.msra.mxu3 %v5829_v37  ;;  %v5586_v34 = vld [vmem:[%s9679_s1 + $0xb90] sm:$0xf0]  ;;  %v6270_v35 = vld [vmem:[%s9679_s1 + $0xc64] sm:$0xf]  ;;  %v5797_v36 = vor.u32 %v6294_v25, %v5794_v26  ;;  %v2841_v37 = vadd.f32 %v2840_v31, %v2822_v16  ;;  %v7869_v55 = vpop.f32.mrf.mxu1  ;;  %v5461_v59 = vor.u32 %v6210_v27, %v5458_v30 }
  0xcc   :  { %3281 = vmatpush.bf16.msra.mxu2 %v5749_v42  ;;  %v2859_v42 = vpop.f32.mrf.mxu3  ;;  %v5698_v43 = vld [vmem:[%s9679_s1 + $0xc70] sm:$0xf0]  ;;  %v6290_v45 = vld [vmem:[%s9679_s1 + $0xd04] sm:$0xf]  ;;  %v5589_v60 = vor.u32 %v6242_v33, %v5586_v34 }
  0xcd   :  { %v5778_v49 = vld [vmem:[%s9679_s1 + $0xd10] sm:$0xf0]  ;;  %v6206_v61 = vld [vmem:[%s9679_s1 + $0xa64] sm:$0xf]  ;;  %v5701_v62 = vor.u32 %v6270_v35, %v5698_v43  ;;  %3174 = vmatmul.bf16.vlgmr.msrb.gmra.mxu0 %v6879_v5  ;;  %3193 = vmatmul.bf16.vlgmr.msrb.gmra.mxu1 %v6881_v6  ;;  %v5997_v43 = vld [vmem:[%s9679_s1 + $0x3d4] sm:$0xf0] }
  0xce   :  { %3243 = vmatpush.bf16.msra.mxu0 %v5493_v58  ;;  %v7871_v58 = vadd.f32 %v2859_v42, %v2841_v37  ;;  %v5442_v63 = vld [vmem:[%s9679_s1 + $0xa70] sm:$0xf0]  ;;  %v6238_v2 = vld [vmem:[%s9679_s1 + $0xb64] sm:$0xf]  ;;  %v5781_v4 = vor.u32 %v6290_v45, %v5778_v49  ;;  %3212 = vmatmul.bf16.vlgmr.msrb.gmra.mxu2 %v7136_v23  ;;  %v4600_v42 = vld [vmem:[%s9679_s1 + $0x3c8] sm:$0xf] }
  0xcf   :  { %3304 = vmatpush.bf16.msra.mxu3 %v5813_v18  ;;  %v5570_v3 = vld [vmem:[%s9679_s1 + $0xb70] sm:$0xf0]  ;;  %v6266_v16 = vld [vmem:[%s9679_s1 + $0xc44] sm:$0xf]  ;;  %v4616_v18 = vld [vmem:[%s9679_s1 + $0x3e8] sm:$0xf]  ;;  %3264 = vmatpush.bf16.msra.mxu1 %v5589_v60  ;;  %v4601_v60 = vor.u32 %v5997_v43, %v4600_v42 }
  0xd0   :  { %3282 = vmatpush.bf16.msra.mxu2 %v5733_v17  ;;  %v5682_v17 = vld [vmem:[%s9679_s1 + $0xc50] sm:$0xf0]  ;;  %3231 = vmatmul.bf16.vlgmr.msrb.gmra.mxu3 %v7138_v24  ;;  %v5573_v21 = vor.u32 %v6238_v2, %v5570_v3  ;;  %v6202_v22 = vld [vmem:[%s9679_s1 + $0xa44] sm:$0xf]  ;;  %v4617_v25 = vor.u32 %v6001_v19, %v4616_v18  ;;  %v4232_v42 = vld [vmem:[%s9679_s1 + $0xe8] sm:$0xf] }
  0xd1   :  { %v5685_v26 = vor.u32 %v6266_v16, %v5682_v17  ;;  %v5426_v27 = vld [vmem:[%s9679_s1 + $0xa50] sm:$0xf0]  ;;  %v6234_v30 = vld [vmem:[%s9679_s1 + $0xb44] sm:$0xf]  ;;  %v4584_v16 = vld [vmem:[%s9679_s1 + $0x3a8] sm:$0xf] }
  0xd2   :  { %3244 = vmatpush.bf16.msra.mxu0 %v5477_v20  ;;  %v5445_v20 = vor.u32 %v6206_v61, %v5442_v63  ;;  %v5554_v31 = vld [vmem:[%s9679_s1 + $0xb50] sm:$0xf0]  ;;  %v6262_v34 = vld [vmem:[%s9679_s1 + $0xc24] sm:$0xf]  ;;  %v5429_v45 = vor.u32 %v6202_v22, %v5426_v27  ;;  %v5993_v17 = vld [vmem:[%s9679_s1 + $0x3b4] sm:$0xf0] }
  0xd3   :  { %3305 = vmatpush.bf16.msra.mxu3 %v5797_v36  ;;  %v5666_v35 = vld [vmem:[%s9679_s1 + $0xc30] sm:$0xf0]  ;;  %v7923_v36 = vpop.f32.mrf.mxu0  ;;  %v7925_v37 = vpop.f32.mrf.mxu1  ;;  %3265 = vmatpush.bf16.msra.mxu1 %v5573_v21  ;;  %v5557_v49 = vor.u32 %v6234_v30, %v5554_v31  ;;  %v6230_v63 = vld [vmem:[%s9679_s1 + $0xb24] sm:$0xf]  ;;  %v4488_v30 = vld [vmem:[%s9679_s1 + $0x2e8] sm:$0xf] }
  0xd4   :  { %3283 = vmatpush.bf16.msra.mxu2 %v5717_v32  ;;  %v7913_v32 = vpop.f32.mrf.mxu2  ;;  %v7915_v33 = vpop.f32.mrf.mxu3  ;;  %v5669_v61 = vor.u32 %v6262_v34, %v5666_v35  ;;  %v5538_v2 = vld [vmem:[%s9679_s1 + $0xb30] sm:$0xf0]  ;;  %v6258_v3 = vld [vmem:[%s9679_s1 + $0xc04] sm:$0xf]  ;;  %v5969_v31 = vld [vmem:[%s9679_s1 + $0x2f4] sm:$0xf0] }
  0xd5   :  { %v5541_v19 = vor.u32 %v6230_v63, %v5538_v2  ;;  %v5394_v21 = vld [vmem:[%s9679_s1 + $0xa10] sm:$0xf0]  ;;  %v6226_v22 = vld [vmem:[%s9679_s1 + $0xb04] sm:$0xf]  ;;  %v5905_v43 = vld [vmem:[%s9679_s1 + $0xf4] sm:$0xf0] }
  0xd6   :  { %3245 = vmatpush.bf16.msra.mxu0 %v5461_v59  ;;  %v6198_v59 = vld [vmem:[%s9679_s1 + $0xa24] sm:$0xf]  ;;  %v5522_v27 = vld [vmem:[%s9679_s1 + $0xb10] sm:$0xf0]  ;;  %v4264_v23 = vld [vmem:[%s9679_s1 + $0x128] sm:$0xf] }
  0xd7   :  { %3306 = vmatpush.bf16.msra.mxu3 %v5781_v4  ;;  %v5650_v4 = vld [vmem:[%s9679_s1 + $0xc10] sm:$0xf0]  ;;  %3266 = vmatpush.bf16.msra.mxu1 %v5557_v49  ;;  %v5525_v2 = vor.u32 %v6226_v22, %v5522_v27  ;;  %v5933_v22 = vld [vmem:[%s9679_s1 + $0x1d4] sm:$0xf0] }
  0xd8   :  { %3284 = vmatpush.bf16.msra.mxu2 %v5701_v62  ;;  %v5410_v62 = vld [vmem:[%s9679_s1 + $0xa30] sm:$0xf0]  ;;  %v5985_v27 = vld [vmem:[%s9679_s1 + $0x374] sm:$0xf0] }
  0xd9   :  { %v5413_v18 = vor.u32 %v6198_v59, %v5410_v62  ;;  %v5989_v62 = vld [vmem:[%s9679_s1 + $0x394] sm:$0xf0] }
  0xda   :  { %3246 = vmatpush.bf16.msra.mxu0 %v5445_v20  ;;  %v6194_v20 = vld [vmem:[%s9679_s1 + $0xa04] sm:$0xf] }
  0xdb   :  { %3375 = vmatpush.bf16.msrb.mxu3 %v4617_v25  ;;  %v4585_v25 = vor.u32 %v5993_v17, %v4584_v16  ;;  %v7988_v49 = vpop.f32.mrf.mxu0  ;;  %v7990_v59 = vpop.f32.mrf.mxu1  ;;  %3267 = vmatpush.bf16.msra.mxu1 %v5541_v19  ;;  %v5397_v63 = vor.u32 %v6194_v20, %v5394_v21  ;;  %v4472_v16 = vld [vmem:[%s9679_s1 + $0x2c8] sm:$0xf]  ;;  %v5965_v17 = vld [vmem:[%s9679_s1 + $0x2d4] sm:$0xf0] }
  0xdc   :  { %3285 = vmatpush.bf16.msra.mxu2 %v5685_v26  ;;  %v5653_v26 = vor.u32 %v6258_v3, %v5650_v4  ;;  %v7975_v34 = vpop.f32.mrf.mxu2  ;;  %v7977_v35 = vpop.f32.mrf.mxu3  ;;  %v4489_v3 = vor.u32 %v5969_v31, %v4488_v30  ;;  %v4233_v4 = vor.u32 %v5905_v43, %v4232_v42  ;;  %v5901_v19 = vld [vmem:[%s9679_s1 + $0xd4] sm:$0xf0]  ;;  %v4344_v20 = vld [vmem:[%s9679_s1 + $0x1c8] sm:$0xf]  ;;  %v4473_v30 = vor.u32 %v5965_v17, %v4472_v16 }
  0xdd   :  { %3179 = vmatmul.bf16.gmra.mxu0 %v7011_v13  ;;  %3198 = vmatmul.bf16.gmra.mxu1 %v7013_v14  ;;  %v4456_v42 = vld [vmem:[%s9679_s1 + $0x2a8] sm:$0xf]  ;;  %v5961_v43 = vld [vmem:[%s9679_s1 + $0x2b4] sm:$0xf0] }
  0xde   :  { %3247 = vmatpush.bf16.msra.mxu0 %v5429_v45  ;;  %v4360_v45 = vld [vmem:[%s9679_s1 + $0x1e8] sm:$0xf]  ;;  %3217 = vmatmul.bf16.gmra.mxu2 %v7271_v40  ;;  %v5929_v17 = vld [vmem:[%s9679_s1 + $0x1b4] sm:$0xf0] }
  0xdf   :  { %3376 = vmatpush.bf16.msrb.mxu3 %v4601_v60  ;;  %v5937_v60 = vld [vmem:[%s9679_s1 + $0x1f4] sm:$0xf0]  ;;  %3268 = vmatpush.bf16.msra.mxu1 %v5525_v2  ;;  %v4328_v2 = vld [vmem:[%s9679_s1 + $0x1a8] sm:$0xf] }
  0xe0   :  { %3286 = vmatpush.bf16.msra.mxu2 %v5669_v61  ;;  %v4568_v61 = vld [vmem:[%s9679_s1 + $0x388] sm:$0xf]  ;;  %3236 = vmatmul.bf16.gmra.mxu3 %v7273_v41  ;;  %v5913_v14 = vld [vmem:[%s9679_s1 + $0x134] sm:$0xf0] }
  0xe1   :  { %v4569_v21 = vor.u32 %v5989_v62, %v4568_v61  ;;  %v4345_v61 = vor.u32 %v5933_v22, %v4344_v20  ;;  %v4200_v62 = vld [vmem:[%s9679_s1 + $0xa8] sm:$0xf]  ;;  %v4329_v22 = vor.u32 %v5929_v17, %v4328_v2 }
  0xe2   :  { %3248 = vmatpush.bf16.msra.mxu0 %v5413_v18  ;;  %v4216_v18 = vld [vmem:[%s9679_s1 + $0xc8] sm:$0xf] }
  0xe3   :  { %3377 = vmatpush.bf16.msrb.mxu3 %v4585_v25  ;;  %v4361_v25 = vor.u32 %v5937_v60, %v4360_v45  ;;  %v4217_v31 = vor.u32 %v5901_v19, %v4216_v18  ;;  %v8050_v16 = vpop.f32.mrf.mxu1  ;;  %v5981_v18 = vld [vmem:[%s9679_s1 + $0x354] sm:$0xf0]  ;;  %v4457_v19 = vor.u32 %v5961_v43, %v4456_v42  ;;  %v4312_v42 = vld [vmem:[%s9679_s1 + $0x188] sm:$0xf] }
  0xe4   :  { %3287 = vmatpush.bf16.msra.mxu2 %v5653_v26  ;;  %v4552_v26 = vld [vmem:[%s9679_s1 + $0x368] sm:$0xf]  ;;  %v8035_v45 = vpop.f32.mrf.mxu2  ;;  %v8037_v60 = vpop.f32.mrf.mxu3  ;;  %v5925_v43 = vld [vmem:[%s9679_s1 + $0x194] sm:$0xf0] }
  0xe5   :  { %3337 = vmatpush.bf16.msrb.mxu1 %v4361_v25  ;;  %v4536_v25 = vld [vmem:[%s9679_s1 + $0x348] sm:$0xf] }
  0xe6   :  { %3249 = vmatpush.bf16.msra.mxu0 %v5397_v63  ;;  %v5897_v63 = vld [vmem:[%s9679_s1 + $0xb4] sm:$0xf0]  ;;  %v4520_v2 = vld [vmem:[%s9679_s1 + $0x328] sm:$0xf] }
  0xe7   :  { %3378 = vmatpush.bf16.msrb.mxu3 %v4569_v21  ;;  %v4201_v20 = vor.u32 %v5897_v63, %v4200_v62  ;;  %v4440_v21 = vld [vmem:[%s9679_s1 + $0x288] sm:$0xf] }
  0xe8   :  { %3356 = vmatpush.bf16.msrb.mxu2 %v4489_v3  ;;  %v4553_v3 = vor.u32 %v5985_v27, %v4552_v26  ;;  %v5957_v26 = vld [vmem:[%s9679_s1 + $0x294] sm:$0xf0]  ;;  %v4184_v27 = vld [vmem:[%s9679_s1 + $0x88] sm:$0xf] }
  0xe9   :  { %3338 = vmatpush.bf16.msrb.mxu1 %v4345_v61  ;;  %v4441_v61 = vor.u32 %v5957_v26, %v4440_v21  ;;  %v4424_v63 = vld [vmem:[%s9679_s1 + $0x268] sm:$0xf] }
  0xea   :  { %3318 = vmatpush.bf16.msrb.mxu0 %v4233_v4  ;;  %v8048_v4 = vpop.f32.mrf.mxu0  ;;  %v4376_v13 = vld [vmem:[%s9679_s1 + $0x208] sm:$0xf] }
  0xeb   :  { %3379 = vmatpush.bf16.msrb.mxu3 %v4553_v3  ;;  %v5977_v3 = vld [vmem:[%s9679_s1 + $0x334] sm:$0xf0]  ;;  %v8103_v26 = vpop.f32.mrf.mxu1 }
  0xec   :  { %3357 = vmatpush.bf16.msrb.mxu2 %v4473_v30  ;;  %v5893_v30 = vld [vmem:[%s9679_s1 + $0x94] sm:$0xf0]  ;;  %v8088_v17 = vpop.f32.mrf.mxu2  ;;  %v4521_v41 = vor.u32 %v5977_v3, %v4520_v2  ;;  %v5128_v2 = vld [vmem:[%s9679_s1 + $0x7e8] sm:$0xf] }
  0xed   :  { %v4185_v62 = vor.u32 %v5893_v30, %v4184_v27  ;;  %3339 = vmatpush.bf16.msrb.mxu1 %v4329_v22  ;;  %v4313_v27 = vor.u32 %v5925_v43, %v4312_v42  ;;  %v4296_v22 = vld [vmem:[%s9679_s1 + $0x168] sm:$0xf]  ;;  %v5921_v30 = vld [vmem:[%s9679_s1 + $0x174] sm:$0xf0]  ;;  %3250 = vmatmul.bf16.vlgmr.msra.gmra.mxu0 %v7149_v28 }
  0xee   :  { %3319 = vmatpush.bf16.msrb.mxu0 %v4217_v31  ;;  %v4537_v31 = vor.u32 %v5981_v18, %v4536_v25  ;;  %v8090_v25 = vpop.f32.mrf.mxu3  ;;  %v5953_v18 = vld [vmem:[%s9679_s1 + $0x274] sm:$0xf0]  ;;  %v4504_v42 = vld [vmem:[%s9679_s1 + $0x308] sm:$0xf]  ;;  %3269 = vmatmul.bf16.vlgmr.msra.gmra.mxu1 %v7151_v29 }
  0xef   :  { %v4425_v40 = vor.u32 %v5953_v18, %v4424_v63  ;;  %v5973_v43 = vld [vmem:[%s9679_s1 + $0x314] sm:$0xf0]  ;;  %3288 = vmatmul.bf16.vlgmr.msra.gmra.mxu2 %v7403_v12  ;;  %v4297_v18 = vor.u32 %v5921_v30, %v4296_v22  ;;  %v4392_v28 = vld [vmem:[%s9679_s1 + $0x228] sm:$0xf] }
  0xf0   :  { %3358 = vmatpush.bf16.msrb.mxu2 %v4457_v19  ;;  %v4168_v19 = vld [vmem:[%s9679_s1 + $0x68] sm:$0xf]  ;;  %3380 = vmatpush.bf16.msrb.mxu3 %v4537_v31  ;;  %v5885_v63 = vld [vmem:[%s9679_s1 + $0x54] sm:$0xf0] }
  0xf1   :  { %v4408_v31 = vld [vmem:[%s9679_s1 + $0x248] sm:$0xf]  ;;  %5840 = vmatmul.msk.bf16.vlgmr.msra.gmra.mxu3 %vm2779_vm0, %v7405_v15  ;;  %v6129_v3 = vld [vmem:[%s9679_s1 + $0x7f4] sm:$0xf0]  ;;  %3340 = vmatpush.bf16.msrb.mxu1 %v4313_v27 }
  0xf2   :  { %3320 = vmatpush.bf16.msrb.mxu0 %v4201_v20  ;;  %v5889_v20 = vld [vmem:[%s9679_s1 + $0x74] sm:$0xf0]  ;;  %v8101_v21 = vpop.f32.mrf.mxu0  ;;  %v4280_v15 = vld [vmem:[%s9679_s1 + $0x148] sm:$0xf]  ;;  %v5129_v30 = vor.u32 %v6129_v3, %v5128_v2 }
  0xf3   :  { %v4169_v24 = vor.u32 %v5889_v20, %v4168_v19  ;;  %v4505_v19 = vor.u32 %v5973_v43, %v4504_v42  ;;  %v5917_v12 = vld [vmem:[%s9679_s1 + $0x154] sm:$0xf0]  ;;  %v8164_v42 = vpop.f32.mrf.mxu1  ;;  %v5112_v43 = vld [vmem:[%s9679_s1 + $0x7c8] sm:$0xf] }
  0xf4   :  { %3359 = vmatpush.bf16.msrb.mxu2 %v4441_v61  ;;  %v5949_v61 = vld [vmem:[%s9679_s1 + $0x254] sm:$0xf0]  ;;  %3381 = vmatpush.bf16.msrb.mxu3 %v4521_v41  ;;  %v8149_v27 = vpop.f32.mrf.mxu2 }
  0xf5   :  { %v4409_v20 = vor.u32 %v5949_v61, %v4408_v31  ;;  %v5881_v22 = vld [vmem:[%s9679_s1 + $0x34] sm:$0xf0]  ;;  %3341 = vmatpush.bf16.msrb.mxu1 %v4297_v18  ;;  %v4248_v18 = vld [vmem:[%s9679_s1 + $0x108] sm:$0xf] }
  0xf6   :  { %3321 = vmatpush.bf16.msrb.mxu0 %v4185_v62  ;;  %v4152_v62 = vld [vmem:[%s9679_s1 + $0x48] sm:$0xf]  ;;  %v8151_v41 = vpop.f32.mrf.mxu3  ;;  %v6125_v61 = vld [vmem:[%s9679_s1 + $0x7d4] sm:$0xf0] }
  0xf7   :  { %v4153_v29 = vor.u32 %v5885_v63, %v4152_v62  ;;  %v2872_v62 = vadd.f32 %v7867_v52, %v7707_v10  ;;  %v4281_v63 = vor.u32 %v5917_v12, %v4280_v15  ;;  %v5941_v12 = vld [vmem:[%s9679_s1 + $0x214] sm:$0xf0]  ;;  %v5113_v15 = vor.u32 %v6125_v61, %v5112_v43  ;;  %v4872_v43 = vld [vmem:[%s9679_s1 + $0x5e8] sm:$0xf] }
  0xf8   :  { %3360 = vmatpush.bf16.msrb.mxu2 %v4425_v40  ;;  %v4136_v40 = vld [vmem:[%s9679_s1 + $0x28] sm:$0xf]  ;;  %3382 = vmatpush.bf16.msrb.mxu3 %v4505_v19  ;;  %v4265_v52 = vor.u32 %v5913_v14, %v4264_v23  ;;  %v5909_v19 = vld [vmem:[%s9679_s1 + $0x114] sm:$0xf0] }
  0xf9   :  { %v4137_v3 = vor.u32 %v5881_v22, %v4136_v40  ;;  %v2891_v10 = vadd.f32 %v7869_v55, %v2872_v62  ;;  %3342 = vmatpush.bf16.msrb.mxu1 %v4281_v63  ;;  %v5000_v40 = vld [vmem:[%s9679_s1 + $0x6e8] sm:$0xf]  ;;  %v6097_v14 = vld [vmem:[%s9679_s1 + $0x6f4] sm:$0xf0] }
  0xfa   :  { %3322 = vmatpush.bf16.msrb.mxu0 %v4169_v24  ;;  %v5945_v24 = vld [vmem:[%s9679_s1 + $0x234] sm:$0xf0]  ;;  %v8162_v31 = vpop.f32.mrf.mxu0  ;;  %v4744_v23 = vld [vmem:[%s9679_s1 + $0x4e8] sm:$0xf] }
  0xfb   :  { %v4393_v2 = vor.u32 %v5945_v24, %v4392_v28  ;;  %v4120_v28 = vld [vmem:[%s9679_s1 + $0x8] sm:$0xf]  ;;  %v2910_v55 = vadd.f32 %v7913_v32, %v2891_v10  ;;  %v6065_v61 = vld [vmem:[%s9679_s1 + $0x5f4] sm:$0xf0]  ;;  %v8224_v32 = vpop.f32.mrf.mxu1 }
  0xfc   :  { %3361 = vmatpush.bf16.msrb.mxu2 %v4409_v20  ;;  %3451 = vmatpush.bf16.msra.mxu3 %v5129_v30  ;;  %v4377_v20 = vor.u32 %v5941_v12, %v4376_v13  ;;  %v8209_v22 = vpop.f32.mrf.mxu2  ;;  %v6033_v13 = vld [vmem:[%s9679_s1 + $0x4f4] sm:$0xf0]  ;;  %v5096_v63 = vld [vmem:[%s9679_s1 + $0x7a8] sm:$0xf]  ;;  %v4249_v12 = vor.u32 %v5909_v19, %v4248_v18 }
  0xfd   :  { %3343 = vmatpush.bf16.msrb.mxu1 %v4265_v52  ;;  %v4984_v10 = vld [vmem:[%s9679_s1 + $0x6c8] sm:$0xf]  ;;  %3255 = vmatmul.bf16.gmra.mxu0 %v7284_v46  ;;  %v6061_v18 = vld [vmem:[%s9679_s1 + $0x5d4] sm:$0xf0] }
  0xfe   :  { %3323 = vmatpush.bf16.msrb.mxu0 %v4153_v29  ;;  %v5877_v29 = vld [vmem:[%s9679_s1 + $0x14] sm:$0xf0]  ;;  %v8211_v30 = vpop.f32.mrf.mxu3  ;;  %3274 = vmatmul.bf16.gmra.mxu1 %v7286_v47  ;;  %v4856_v52 = vld [vmem:[%s9679_s1 + $0x5c8] sm:$0xf] }
  0xff   :  { %v4121_v24 = vor.u32 %v5877_v29, %v4120_v28  ;;  %v5001_v28 = vor.u32 %v6097_v14, %v5000_v40  ;;  %v4745_v29 = vor.u32 %v6033_v13, %v4744_v23  ;;  %3293 = vmatmul.bf16.gmra.mxu2 %v7532_v38  ;;  %v4985_v14 = vor.u32 %v6093_v9, %v4984_v10  ;;  %v4968_v13 = vld [vmem:[%s9679_s1 + $0x6a8] sm:$0xf] }
 0x100   :  { %3362 = vmatpush.bf16.msrb.mxu2 %v4393_v2  ;;  %3452 = vmatpush.bf16.msra.mxu3 %v5113_v15  ;;  %v6121_v2 = vld [vmem:[%s9679_s1 + $0x7b4] sm:$0xf0]  ;;  %v4873_v15 = vor.u32 %v6065_v61, %v4872_v43 }
 0x101   :  { %v5097_v19 = vor.u32 %v6121_v2, %v5096_v63  ;;  %5841 = vmatmul.msk.bf16.gmra.mxu3 %vm2779_vm0, %v7534_v39  ;;  %3344 = vmatpush.bf16.msrb.mxu1 %v4249_v12  ;;  %v6089_v43 = vld [vmem:[%s9679_s1 + $0x6b4] sm:$0xf0]  ;;  %v4840_v63 = vld [vmem:[%s9679_s1 + $0x5a8] sm:$0xf] }
 0x102   :  { %3324 = vmatpush.bf16.msrb.mxu0 %v4137_v3  ;;  %v8222_v62 = vpop.f32.mrf.mxu0  ;;  %v2874_v3 = vadd.f32 %v7923_v36, %v7769_v7  ;;  %v2929_v7 = vadd.f32 %v7915_v33, %v2910_v55  ;;  %v6029_v36 = vld [vmem:[%s9679_s1 + $0x4d4] sm:$0xf0]  ;;  %v5080_v33 = vld [vmem:[%s9679_s1 + $0x788] sm:$0xf]  ;;  %v4857_v55 = vor.u32 %v6061_v18, %v4856_v52 }
 0x103   :  { %v4729_v23 = vor.u32 %v6029_v36, %v4728_v8  ;;  %v6025_v8 = vld [vmem:[%s9679_s1 + $0x4b4] sm:$0xf0]  ;;  %v4696_v18 = vld [vmem:[%s9679_s1 + $0x488] sm:$0xf] }
 0x104   :  { %3363 = vmatpush.bf16.msrb.mxu2 %v4377_v20  ;;  %v6117_v20 = vld [vmem:[%s9679_s1 + $0x794] sm:$0xf0]  ;;  %v2948_v40 = vadd.f32 %v8101_v21, %v2929_v7  ;;  %v8276_v61 = vpop.f32.mrf.mxu2  ;;  %3453 = vmatpush.bf16.msra.mxu3 %v5097_v19  ;;  %v4969_v7 = vor.u32 %v6089_v43, %v4968_v13  ;;  %v8331_v43 = vpop.permute.xlu0 %3856 }
 0x105   :  { %3413 = vmatpush.bf16.msra.mxu1 %v4873_v15  ;;  %v6057_v2 = vld [vmem:[%s9679_s1 + $0x5b4] sm:$0xf0] }
 0x106   :  { %3325 = vmatpush.bf16.msrb.mxu0 %v4121_v24  ;;  %v2893_v24 = vadd.f32 %v7925_v37, %v2874_v3  ;;  %v4712_v37 = vld [vmem:[%s9679_s1 + $0x4a8] sm:$0xf]  ;;  %v8278_v9 = vpop.f32.mrf.mxu3  ;;  %v5081_v3 = vor.u32 %v6117_v20, %v5080_v33  ;;  %v6113_v15 = vld [vmem:[%s9679_s1 + $0x774] sm:$0xf0]  ;;  %v2967_v10 = vadd.f32 %v8103_v26, %v2948_v40 }
 0x107   :  { %v4713_v36 = vor.u32 %v6025_v8, %v4712_v37  ;;  %v6085_v52 = vld [vmem:[%s9679_s1 + $0x694] sm:$0xf0]  ;;  %v4824_v20 = vld [vmem:[%s9679_s1 + $0x588] sm:$0xf] }
 0x108   :  { %3432 = vmatpush.bf16.msra.mxu2 %v5001_v28  ;;  %v2912_v21 = vadd.f32 %v7975_v34, %v2893_v24  ;;  %v2877_v34 = vadd.f32 %v7988_v49, %v7829_v11  ;;  %v8293_v28 = vpop.f32.mrf.mxu1  ;;  %v4841_v11 = vor.u32 %v6057_v2, %v4840_v63  ;;  %v4952_v49 = vld [vmem:[%s9679_s1 + $0x688] sm:$0xf]  ;;  %v2986_v19 = vadd.f32 %v8149_v27, %v2967_v10  ;;  %v6021_v33 = vld [vmem:[%s9679_s1 + $0x494] sm:$0xf0] }
 0x109   :  { %3414 = vmatpush.bf16.msra.mxu1 %v4857_v55  ;;  %v6053_v24 = vld [vmem:[%s9679_s1 + $0x594] sm:$0xf0]  ;;  %3454 = vmatpush.bf16.msra.mxu3 %v5081_v3  ;;  %v4953_v27 = vor.u32 %v6085_v52, %v4952_v49  ;;  %v4697_v37 = vor.u32 %v6021_v33, %v4696_v18  ;;  %v4920_v49 = vld [vmem:[%s9679_s1 + $0x648] sm:$0xf] }
 0x10a   :  { %3394 = vmatpush.bf16.msra.mxu0 %v4745_v29  ;;  %v8291_v12 = vpop.f32.mrf.mxu0  ;;  %v5064_v29 = vld [vmem:[%s9679_s1 + $0x768] sm:$0xf]  ;;  %v2931_v26 = vadd.f32 %v7977_v35, %v2912_v21  ;;  %v6081_v55 = vld [vmem:[%s9679_s1 + $0x674] sm:$0xf0] }
 0x10b   :  { %v5065_v40 = vor.u32 %v6113_v15, %v5064_v29  ;;  %v5048_v21 = vld [vmem:[%s9679_s1 + $0x748] sm:$0xf]  ;;  %v6109_v8 = vld [vmem:[%s9679_s1 + $0x754] sm:$0xf0] }
 0x10c   :  { %3433 = vmatpush.bf16.msra.mxu2 %v4985_v14  ;;  %v2896_v14 = vadd.f32 %v7990_v59, %v2877_v34  ;;  %v2950_v35 = vadd.f32 %v8162_v31, %v2931_v26  ;;  %v4825_v59 = vor.u32 %v6053_v24, %v4824_v20  ;;  %v4680_v31 = vld [vmem:[%s9679_s1 + $0x468] sm:$0xf]  ;;  %v8343_v63 = vpop.f32.mrf.mxu2  ;;  %v6017_v3 = vld [vmem:[%s9679_s1 + $0x474] sm:$0xf0]  ;;  %v5049_v18 = vor.u32 %v6109_v8, %v5048_v21 }
 0x10d   :  { %3415 = vmatpush.bf16.msra.mxu1 %v4841_v11  ;;  %v4808_v34 = vld [vmem:[%s9679_s1 + $0x568] sm:$0xf]  ;;  %v6049_v29 = vld [vmem:[%s9679_s1 + $0x574] sm:$0xf0]  ;;  %3455 = vmatpush.bf16.msra.mxu3 %v5065_v40 }
 0x10e   :  { %3395 = vmatpush.bf16.msra.mxu0 %v4729_v23  ;;  %v4936_v23 = vld [vmem:[%s9679_s1 + $0x668] sm:$0xf]  ;;  %v2915_v13 = vadd.f32 %v8035_v45, %v2896_v14  ;;  %v3005_v45 = vadd.f32 %v8151_v41, %v2986_v19  ;;  %v8345_v2 = vpop.f32.mrf.mxu3  ;;  %v2879_v41 = vadd.f32 %v8048_v4, %v7871_v58  ;;  %v6077_v52 = vld [vmem:[%s9679_s1 + $0x654] sm:$0xf0]  ;;  %v8366_v19 = vpop.permute.xlu2 %3896  ;;  %v4681_v58 = vor.u32 %v6017_v3, %v4680_v31 }
 0x10f   :  { %v4937_v11 = vor.u32 %v6081_v55, %v4936_v23  ;;  %v4809_v4 = vor.u32 %v6049_v29, %v4808_v34  ;;  %v5032_v33 = vld [vmem:[%s9679_s1 + $0x728] sm:$0xf]  ;;  %v6105_v20 = vld [vmem:[%s9679_s1 + $0x734] sm:$0xf0]  ;;  %3326 = vmatmul.bf16.vlgmr.msrb.gmra.mxu0 %v6578_v48  ;;  %3345 = vmatmul.bf16.vlgmr.msrb.gmra.mxu1 %v6589_v53  ;;  %v3930_v55 = vld [vmem:[%s9683_s4] sm:$0xff]  ;;  %v8404_v31 = vpop.permute.xlu1 %3866 }
 0x110   :  { %3434 = vmatpush.bf16.msra.mxu2 %v4969_v7  ;;  %v3042_v10 = vpop.f32.mrf.mxu1  ;;  %v2969_v7 = vadd.f32 %v8164_v42, %v2950_v35  ;;  %v2934_v26 = vadd.f32 %v8037_v60, %v2915_v13  ;;  %v4664_v42 = vld [vmem:[%s9679_s1 + $0x448] sm:$0xf]  ;;  %v6013_v40 = vld [vmem:[%s9679_s1 + $0x454] sm:$0xf0]  ;;  %v4921_v13 = vor.u32 %v6077_v52, %v4920_v49 }
 0x111   :  { %3416 = vmatpush.bf16.msra.mxu1 %v4825_v59  ;;  %v4792_v14 = vld [vmem:[%s9679_s1 + $0x548] sm:$0xf]  ;;  %v6045_v35 = vld [vmem:[%s9679_s1 + $0x554] sm:$0xf0]  ;;  %3364 = vmatmul.bf16.vlgmr.msrb.gmra.mxu2 %v6591_v54  ;;  %v4665_v21 = vor.u32 %v6013_v40, %v4664_v42 }
 0x112   :  { %3396 = vmatpush.bf16.msra.mxu0 %v4713_v36  ;;  %v3023_v15 = vpop.f32.mrf.mxu0  ;;  %v2988_v60 = vadd.f32 %v8209_v22, %v2969_v7  ;;  %v2953_v22 = vadd.f32 %v8222_v62, %v2934_v26  ;;  %3383 = vmatmul.bf16.vlgmr.msrb.gmra.mxu3 %v6599_v57  ;;  %v5033_v62 = vor.u32 %v6105_v20, %v5032_v33  ;;  %v5016_v3 = vld [vmem:[%s9679_s1 + $0x708] sm:$0xf]  ;;  %v6101_v34 = vld [vmem:[%s9679_s1 + $0x714] sm:$0xf0] }
 0x113   :  { %v3024_v36 = vadd.f32 %v3023_v15, %v3005_v45  ;;  %3456 = vmatpush.bf16.msra.mxu3 %v5049_v18  ;;  %v4793_v8 = vor.u32 %v6045_v35, %v4792_v14  ;;  %v4648_v45 = vld [vmem:[%s9679_s1 + $0x428] sm:$0xf]  ;;  %v5017_v33 = vor.u32 %v6101_v34, %v5016_v3  ;;  %v6069_v14 = vld [vmem:[%s9679_s1 + $0x614] sm:$0xf0] }
 0x114   :  { %3435 = vmatpush.bf16.msra.mxu2 %v4953_v27  ;;  %v2898_v27 = vadd.f32 %v8050_v16, %v2879_v41  ;;  %v6073_v16 = vld [vmem:[%s9679_s1 + $0x634] sm:$0xf0]  ;;  %v3061_v41 = vpop.f32.mrf.mxu2  ;;  %v4776_v7 = vld [vmem:[%s9679_s1 + $0x528] sm:$0xf] }
 0x115   :  { %v3043_v24 = vadd.f32 %v3042_v10, %v3024_v36  ;;  %3417 = vmatpush.bf16.msra.mxu1 %v4809_v4  ;;  %v6009_v10 = vld [vmem:[%s9679_s1 + $0x434] sm:$0xf0]  ;;  %v5640_v26 = vld [vmem:[%s9679_s1 + $0xbe8] sm:$0xf] }
 0x116   :  { %3397 = vmatpush.bf16.msra.mxu0 %v4697_v37  ;;  %v4904_v37 = vld [vmem:[%s9679_s1 + $0x628] sm:$0xf]  ;;  %v2917_v59 = vadd.f32 %v8088_v17, %v2898_v27  ;;  %v3007_v17 = vadd.f32 %v8211_v30, %v2988_v60  ;;  %v3080_v15 = vpop.f32.mrf.mxu3  ;;  %v6041_v36 = vld [vmem:[%s9679_s1 + $0x534] sm:$0xf0]  ;;  %v8439_v60 = vpop.permute.xlu0 %3861 }
 0x117   :  { %v3874_v23 = vmul.f32 %v8331_v43, %v3043_v24  ;;  %v8427_v49 = vadd.f32 %v3080_v15, %v3061_v41  ;;  %v4905_v18 = vor.u32 %v6073_v16, %v4904_v37  ;;  %3457 = vmatpush.bf16.msra.mxu3 %v5033_v62  ;;  %v4649_v24 = vor.u32 %v6009_v10, %v4648_v45  ;;  %v4632_v35 = vld [vmem:[%s9679_s1 + $0x408] sm:$0xf]  ;;  %v6005_v27 = vld [vmem:[%s9679_s1 + $0x414] sm:$0xf0]  ;;  %v8458_v62 = vpop.permute.xlu2 %3901 }
 0x118   :  { %3436 = vmatpush.bf16.msra.mxu2 %v4937_v11  ;;  %v2972_v11 = vadd.f32 %v8224_v32, %v2953_v22  ;;  %v3044_v52 = vpop.f32.mrf.mxu1  ;;  %v4888_v32 = vld [vmem:[%s9679_s1 + $0x608] sm:$0xf]  ;;  %v2936_v20 = vadd.f32 %v8090_v25, %v2917_v59  ;;  %v4777_v40 = vor.u32 %v6041_v36, %v4776_v7  ;;  %v4633_v45 = vor.u32 %v6005_v27, %v4632_v35  ;;  %v6193_v36 = vld [vmem:[%s9679_s1 + $0x9f4] sm:$0xf0] }
 0x119   :  { %v3914_v29 = vadd.f32 %v8366_v19, %v3874_v23  ;;  %3418 = vmatpush.bf16.msra.mxu1 %v4793_v8  ;;  %v5512_v8 = vld [vmem:[%s9679_s1 + $0xae8] sm:$0xf]  ;;  %v6189_v27 = vld [vmem:[%s9679_s1 + $0x9d4] sm:$0xf0] }
 0x11a   :  { %3398 = vmatpush.bf16.msra.mxu0 %v4681_v58  ;;  %v3025_v30 = vpop.f32.mrf.mxu0  ;;  %v6257_v58 = vld [vmem:[%s9679_s1 + $0xbf4] sm:$0xf0]  ;;  %v2991_v25 = vadd.f32 %v8276_v61, %v2972_v11  ;;  %v2955_v16 = vadd.f32 %v8291_v12, %v2936_v20  ;;  %v3934_v61 = vld [vmem:[%s9683_s4 + $0x20] sm:$0xff]  ;;  %v5256_v34 = vld [vmem:[%s9679_s1 + $0x8e8] sm:$0xf] }
 0x11b   :  { %v3946_v4 = vadd.f32 %v3930_v55, %v3914_v29  ;;  %v3026_v42 = vadd.f32 %v3025_v30, %v3007_v17  ;;  %v4760_v55 = vld [vmem:[%s9679_s1 + $0x508] sm:$0xf]  ;;  %v5641_v37 = vor.u32 %v6257_v58, %v5640_v26  ;;  %3458 = vmatpush.bf16.msra.mxu3 %v5017_v33  ;;  %v6225_v12 = vld [vmem:[%s9679_s1 + $0xaf4] sm:$0xf0] }
 0x11c   :  { %3437 = vmatpush.bf16.msra.mxu2 %v4921_v13  ;;  %v6037_v13 = vld [vmem:[%s9679_s1 + $0x514] sm:$0xf0]  ;;  %v5384_v29 = vld [vmem:[%s9679_s1 + $0x9e8] sm:$0xf]  ;;  %v3010_v41 = vadd.f32 %v8278_v9, %v2991_v25  ;;  %v3063_v10 = vpop.f32.mrf.mxu2 }
 0x11d   :  { %v3962_v22 = vmax.f32 %v3946_v4, 0.0  ;;  %v3045_v23 = vadd.f32 %v3044_v52, %v3026_v42  ;;  %3419 = vmatpush.bf16.msra.mxu1 %v4777_v40  ;;  %v4761_v3 = vor.u32 %v6037_v13, %v4760_v55  ;;  %v6161_v17 = vld [vmem:[%s9679_s1 + $0x8f4] sm:$0xf0]  ;;  %v5624_v11 = vld [vmem:[%s9679_s1 + $0xbc8] sm:$0xf]  ;;  %v2974_v52 = vadd.f32 %v8293_v28, %v2955_v16 }
 0x11e   :  { %3399 = vmatpush.bf16.msra.mxu0 %v4665_v21  ;;  %v4889_v21 = vor.u32 %v6069_v14, %v4888_v32  ;;  %v3082_v7 = vpop.f32.mrf.mxu3  ;;  %v6253_v30 = vld [vmem:[%s9679_s1 + $0xbd4] sm:$0xf0]  ;;  %v5513_v42 = vor.u32 %v6225_v12, %v5512_v8  ;;  %v5257_v32 = vor.u32 %v6161_v17, %v5256_v34  ;;  %v5496_v33 = vld [vmem:[%s9679_s1 + $0xac8] sm:$0xf]  ;;  %v5385_v40 = vor.u32 %v6193_v36, %v5384_v29  ;;  %v8527_v16 = vpop.permute.xlu0 %3906 }
 0x11f   :  { %3978 = vst [vmem:[%s9684_s5] sm:$0xff] %v3962_v22  ;;  %v3878_v59 = vmul.f32 %v8439_v60, %v3045_v23  ;;  %3527 = vmatpush.bf16.msrb.mxu3 %v5641_v37  ;;  %v8494_v9 = vadd.f32 %v3082_v7, %v3063_v10  ;;  %v6221_v20 = vld [vmem:[%s9679_s1 + $0xad4] sm:$0xf0]  ;;  %v5240_v28 = vld [vmem:[%s9679_s1 + $0x8c8] sm:$0xf]  ;;  %v5625_v25 = vor.u32 %v6253_v30, %v5624_v11 }
 0x120   :  { %3438 = vmatpush.bf16.msra.mxu2 %v4905_v18  ;;  %v3047_v26 = vpop.f32.mrf.mxu1  ;;  %v6157_v14 = vld [vmem:[%s9679_s1 + $0x8d4] sm:$0xf0]  ;;  %v5368_v35 = vld [vmem:[%s9679_s1 + $0x9c8] sm:$0xf]  ;;  %v2993_v22 = vadd.f32 %v8343_v63, %v2974_v52  ;;  %3331 = vmatmul.bf16.gmra.mxu0 %v6710_v44 }
 0x121   :  { %v3918_v15 = vadd.f32 %v8458_v62, %v3878_v59  ;;  %3420 = vmatpush.bf16.msra.mxu1 %v4761_v3  ;;  %v5608_v13 = vld [vmem:[%s9679_s1 + $0xba8] sm:$0xf]  ;;  %v6249_v37 = vld [vmem:[%s9679_s1 + $0xbb4] sm:$0xf0]  ;;  %3369 = vmatmul.bf16.gmra.mxu2 %v6723_v51  ;;  %v5497_v59 = vor.u32 %v6221_v20, %v5496_v33 }
 0x122   :  { %3400 = vmatpush.bf16.msra.mxu0 %v4649_v24  ;;  %v3028_v18 = vpop.f32.mrf.mxu0  ;;  %v8505_v24 = vpop.permute.xlu1 %3871  ;;  %3350 = vmatmul.bf16.gmra.mxu1 %v6721_v50  ;;  %v5480_v8 = vld [vmem:[%s9679_s1 + $0xaa8] sm:$0xf]  ;;  %v6217_v12 = vld [vmem:[%s9679_s1 + $0xab4] sm:$0xf0]  ;;  %v5609_v29 = vor.u32 %v6249_v37, %v5608_v13 }
 0x123   :  { %v3950_v58 = vadd.f32 %v3934_v61, %v3918_v15  ;;  %v3029_v4 = vadd.f32 %v3028_v18, %v3010_v41  ;;  %9737 = vst [vmem:[#allocation20_spill] sm:$0xff] %v8505_v24  ;;  %3388 = vmatmul.bf16.gmra.mxu3 %v6731_v56  ;;  %v3938_v61 = vld [vmem:[%s9683_s4 + $0x40] sm:$0xff]  ;;  %v5224_v3 = vld [vmem:[%s9679_s1 + $0x8a8] sm:$0xf]  ;;  %v6153_v34 = vld [vmem:[%s9679_s1 + $0x8b4] sm:$0xf0]  ;;  %v3012_v41 = vadd.f32 %v8345_v2, %v2993_v22 }
 0x124   :  { %3439 = vmatpush.bf16.msra.mxu2 %v4889_v21  ;;  %v5241_v21 = vor.u32 %v6157_v14, %v5240_v28  ;;  %3528 = vmatpush.bf16.msrb.mxu3 %v5625_v25  ;;  %v5352_v17 = vld [vmem:[%s9679_s1 + $0x9a8] sm:$0xf]  ;;  %v3066_v10 = vpop.f32.mrf.mxu2  ;;  %v6185_v36 = vld [vmem:[%s9679_s1 + $0x9b4] sm:$0xf0] }
 0x125   :  { %v3966_v23 = vmax.f32 %v3950_v58, 0.0  ;;  %v3048_v55 = vadd.f32 %v3047_v26, %v3029_v4  ;;  %3489 = vmatpush.bf16.msrb.mxu1 %v5385_v40  ;;  %v5592_v11 = vld [vmem:[%s9679_s1 + $0xb88] sm:$0xf]  ;;  %v6245_v30 = vld [vmem:[%s9679_s1 + $0xb94] sm:$0xf0]  ;;  %v5481_v26 = vor.u32 %v6217_v12, %v5480_v8  ;;  %v5353_v28 = vor.u32 %v6185_v36, %v5352_v17 }
 0x126   :  { %3401 = vmatpush.bf16.msra.mxu0 %v4633_v45  ;;  %v5369_v45 = vor.u32 %v6189_v27, %v5368_v35  ;;  %v3085_v7 = vpop.f32.mrf.mxu3  ;;  %v6213_v33 = vld [vmem:[%s9679_s1 + $0xa94] sm:$0xf0]  ;;  %v5208_v20 = vld [vmem:[%s9679_s1 + $0x888] sm:$0xf]  ;;  %v5593_v27 = vor.u32 %v6245_v30, %v5592_v11 }
 0x127   :  { %3982 = vst [vmem:[%s9684_s5 + $0x20] sm:$0xff] %v3966_v23  ;;  %v3882_v63 = vmul.f32 %v8404_v31, %v3048_v55  ;;  %v8562_v52 = vadd.f32 %v3085_v7, %v3066_v10  ;;  %v6149_v40 = vld [vmem:[%s9679_s1 + $0x894] sm:$0xf0]  ;;  %v5336_v14 = vld [vmem:[%s9679_s1 + $0x988] sm:$0xf] }
 0x128   :  { %3508 = vmatpush.bf16.msrb.mxu2 %v5513_v42  ;;  %v3049_v2 = vpop.f32.mrf.mxu1  ;;  %v5225_v42 = vor.u32 %v6153_v34, %v5224_v3  ;;  %3529 = vmatpush.bf16.msrb.mxu3 %v5609_v29  ;;  %v6181_v35 = vld [vmem:[%s9679_s1 + $0x994] sm:$0xf0]  ;;  %v5576_v23 = vld [vmem:[%s9679_s1 + $0xb68] sm:$0xf] }
 0x129   :  { %v3922_v15 = vadd.f32 %v8527_v16, %v3882_v63  ;;  %3490 = vmatpush.bf16.msrb.mxu1 %v5369_v45  ;;  %v6241_v55 = vld [vmem:[%s9679_s1 + $0xb74] sm:$0xf0]  ;;  %v3942_v63 = vld [vmem:[%s9683_s4 + $0x60] sm:$0xff]  ;;  %v5337_v12 = vor.u32 %v6181_v35, %v5336_v14  ;;  %v5192_v45 = vld [vmem:[%s9679_s1 + $0x868] sm:$0xf] }
 0x12a   :  { %3470 = vmatpush.bf16.msrb.mxu0 %v5257_v32  ;;  %v3030_v18 = vpop.f32.mrf.mxu0  ;;  %v5464_v32 = vld [vmem:[%s9679_s1 + $0xa88] sm:$0xf]  ;;  %v8588_v13 = vpop.permute.xlu1 %3911  ;;  %v6209_v8 = vld [vmem:[%s9679_s1 + $0xa74] sm:$0xf0]  ;;  %v5577_v17 = vor.u32 %v6241_v55, %v5576_v23 }
 0x12b   :  { %v3954_v58 = vadd.f32 %v3938_v61, %v3922_v15  ;;  %v3031_v4 = vadd.f32 %v3030_v18, %v3012_v41  ;;  %9738 = vst [vmem:[#allocation21_spill] sm:$0xff] %v8588_v13  ;;  %v5465_v61 = vor.u32 %v6213_v33, %v5464_v32  ;;  %v6145_v3 = vld [vmem:[%s9679_s1 + $0x874] sm:$0xf0]  ;;  %v5320_v34 = vld [vmem:[%s9679_s1 + $0x968] sm:$0xf] }
 0x12c   :  { %3509 = vmatpush.bf16.msrb.mxu2 %v5497_v59  ;;  %v5209_v59 = vor.u32 %v6149_v40, %v5208_v20  ;;  %3530 = vmatpush.bf16.msrb.mxu3 %v5593_v27  ;;  %v3068_v41 = vpop.f32.mrf.mxu2  ;;  %v6177_v10 = vld [vmem:[%s9679_s1 + $0x974] sm:$0xf0]  ;;  %v5560_v7 = vld [vmem:[%s9679_s1 + $0xb48] sm:$0xf] }
 0x12d   :  { %v3970_v25 = vmax.f32 %v3954_v58, 0.0  ;;  %v3050_v22 = vadd.f32 %v3049_v2, %v3031_v4  ;;  %3491 = vmatpush.bf16.msrb.mxu1 %v5353_v28  ;;  %v6237_v36 = vld [vmem:[%s9679_s1 + $0xb54] sm:$0xf0]  ;;  %v5193_v58 = vor.u32 %v6145_v3, %v5192_v45  ;;  %v5432_v4 = vld [vmem:[%s9679_s1 + $0xa48] sm:$0xf]  ;;  %v5321_v33 = vor.u32 %v6177_v10, %v5320_v34 }
 0x12e   :  { %3471 = vmatpush.bf16.msrb.mxu0 %v5241_v21  ;;  %v5448_v21 = vld [vmem:[%s9679_s1 + $0xa68] sm:$0xf]  ;;  %v3087_v15 = vpop.f32.mrf.mxu3  ;;  %v6141_v20 = vld [vmem:[%s9679_s1 + $0x854] sm:$0xf0]  ;;  %v5561_v14 = vor.u32 %v6237_v36, %v5560_v7  ;;  %v4362_v10 = vld [vmem:[%s9679_s1 + $0x1f8] sm:$0xf0] }
 0x12f   :  { %3986 = vst [vmem:[%s9684_s5 + $0x40] sm:$0xff] %v3970_v25  ;;  %v3886_v37 = vmul.f32 %v8505_v24, %v3050_v22  ;;  %v8622_v11 = vadd.f32 %v3087_v15, %v3068_v41  ;;  %v5176_v32 = vld [vmem:[%s9679_s1 + $0x848] sm:$0xf]  ;;  %v6173_v40 = vld [vmem:[%s9679_s1 + $0x954] sm:$0xf0] }
 0x130   :  { %3510 = vmatpush.bf16.msrb.mxu2 %v5481_v26  ;;  %v8626_v18 = vpop.f32.mrf.mxu1  ;;  %v5449_v26 = vor.u32 %v6209_v8, %v5448_v21  ;;  %3531 = vmatpush.bf16.msrb.mxu3 %v5577_v17  ;;  %v5304_v28 = vld [vmem:[%s9679_s1 + $0x948] sm:$0xf]  ;;  %v6233_v25 = vld [vmem:[%s9679_s1 + $0xb34] sm:$0xf0]  ;;  %v5177_v23 = vor.u32 %v6141_v20, %v5176_v32  ;;  %v5935_v15 = vld [vmem:[%s9679_s1 + $0x1ec] sm:$0xf] }
 0x131   :  { %v3926_v29 = vadd.f32 %v8588_v13, %v3886_v37  ;;  %3492 = vmatpush.bf16.msrb.mxu1 %v5337_v12  ;;  %3402 = vmatmul.bf16.vlgmr.msra.gmra.mxu0 %v6866_v0  ;;  %v5544_v27 = vld [vmem:[%s9679_s1 + $0xb28] sm:$0xf]  ;;  %v6201_v37 = vld [vmem:[%s9679_s1 + $0xa34] sm:$0xf0] }
 0x132   :  { %3472 = vmatpush.bf16.msrb.mxu0 %v5225_v42  ;;  %v8624_v30 = vpop.f32.mrf.mxu0  ;;  %v6205_v42 = vld [vmem:[%s9679_s1 + $0xa54] sm:$0xf0]  ;;  %3421 = vmatmul.bf16.vlgmr.msra.gmra.mxu1 %v6868_v1  ;;  %v5416_v55 = vld [vmem:[%s9679_s1 + $0xa28] sm:$0xf]  ;;  %v5545_v8 = vor.u32 %v6233_v25, %v5544_v27 }
 0x133   :  { %v3958_v2 = vadd.f32 %v3942_v63, %v3926_v29  ;;  %3440 = vmatmul.bf16.vlgmr.msra.gmra.mxu2 %v6879_v5  ;;  %3459 = vmatmul.bf16.vlgmr.msra.gmra.mxu3 %v6881_v6  ;;  %v5433_v22 = vor.u32 %v6205_v42, %v5432_v4  ;;  %v5305_v63 = vor.u32 %v6173_v40, %v5304_v28  ;;  %v5288_v21 = vld [vmem:[%s9679_s1 + $0x928] sm:$0xf]  ;;  %v6169_v3 = vld [vmem:[%s9679_s1 + $0x934] sm:$0xf0]  ;;  %v5903_v28 = vld [vmem:[%s9679_s1 + $0xec] sm:$0xf] }
 0x134   :  { %3511 = vmatpush.bf16.msrb.mxu2 %v5465_v61  ;;  %3532 = vmatpush.bf16.msrb.mxu3 %v5561_v14  ;;  %v5160_v61 = vld [vmem:[%s9679_s1 + $0x828] sm:$0xf]  ;;  %v8674_v12 = vpop.f32.mrf.mxu2  ;;  %v6229_v17 = vld [vmem:[%s9679_s1 + $0xb14] sm:$0xf0]  ;;  %v5417_v7 = vor.u32 %v6201_v37, %v5416_v55  ;;  %v4234_v40 = vld [vmem:[%s9679_s1 + $0xf8] sm:$0xf0]  ;;  %v4365_v14 = vor.u32 %v5935_v15, %v4362_v10  ;;  %v3100_v51 = vadd.f32 %v8624_v30, %v8427_v49 }
 0x135   :  { %v3974_v35 = vmax.f32 %v3958_v2, 0.0  ;;  %3493 = vmatpush.bf16.msrb.mxu1 %v5321_v33  ;;  %v5528_v34 = vld [vmem:[%s9679_s1 + $0xb08] sm:$0xf]  ;;  %v6133_v42 = vld [vmem:[%s9679_s1 + $0x814] sm:$0xf0]  ;;  %v4237_v55 = vor.u32 %v5903_v28, %v4234_v40 }
 0x136   :  { %3473 = vmatpush.bf16.msrb.mxu0 %v5209_v59  ;;  %v6137_v59 = vld [vmem:[%s9679_s1 + $0x834] sm:$0xf0]  ;;  %v8676_v45 = vpop.f32.mrf.mxu3  ;;  %v5400_v2 = vld [vmem:[%s9679_s1 + $0xa08] sm:$0xf]  ;;  %v5529_v33 = vor.u32 %v6229_v17, %v5528_v34  ;;  %v4346_v34 = vld [vmem:[%s9679_s1 + $0x1d8] sm:$0xf0] }
 0x137   :  { %3990 = vst [vmem:[%s9684_s5 + $0x60] sm:$0xff] %v3974_v35  ;;  %v5161_v36 = vor.u32 %v6137_v59, %v5160_v61  ;;  %v5144_v4 = vld [vmem:[%s9679_s1 + $0x808] sm:$0xf]  ;;  %v6165_v20 = vld [vmem:[%s9679_s1 + $0x914] sm:$0xf0] }
 0x138   :  { %3512 = vmatpush.bf16.msrb.mxu2 %v5449_v26  ;;  %v8689_v41 = vpop.f32.mrf.mxu1  ;;  %v6197_v26 = vld [vmem:[%s9679_s1 + $0xa14] sm:$0xf0]  ;;  %3533 = vmatpush.bf16.msrb.mxu3 %v5545_v8  ;;  %v5272_v32 = vld [vmem:[%s9679_s1 + $0x908] sm:$0xf]  ;;  %v5145_v27 = vor.u32 %v6133_v42, %v5144_v4  ;;  %v5899_v61 = vld [vmem:[%s9679_s1 + $0xcc] sm:$0xf] }
 0x139   :  { %3494 = vmatpush.bf16.msrb.mxu1 %v5305_v63  ;;  %v5401_v35 = vor.u32 %v6197_v26, %v5400_v2  ;;  %v5768_v25 = vld [vmem:[%s9679_s1 + $0xce8] sm:$0xf]  ;;  %v6305_v63 = vld [vmem:[%s9679_s1 + $0xd74] sm:$0xf0]  ;;  %v4218_v8 = vld [vmem:[%s9679_s1 + $0xd8] sm:$0xf0] }
 0x13a   :  { %3474 = vmatpush.bf16.msrb.mxu0 %v5193_v58  ;;  %v8687_v29 = vpop.f32.mrf.mxu0  ;;  %v5289_v58 = vor.u32 %v6169_v3, %v5288_v21  ;;  %v5832_v37 = vld [vmem:[%s9679_s1 + $0xd68] sm:$0xf]  ;;  %v5931_v3 = vld [vmem:[%s9679_s1 + $0x1cc] sm:$0xf]  ;;  %v6285_v2 = vld [vmem:[%s9679_s1 + $0xcd4] sm:$0xf0]  ;;  %v4221_v26 = vor.u32 %v5899_v61, %v4218_v8 }
 0x13b   :  { %v5895_v4 = vld [vmem:[%s9679_s1 + $0xac] sm:$0xf]  ;;  %v5816_v42 = vld [vmem:[%s9679_s1 + $0xd48] sm:$0xf]  ;;  %v4202_v28 = vld [vmem:[%s9679_s1 + $0xb8] sm:$0xf0] }
 0x13c   :  { %3513 = vmatpush.bf16.msrb.mxu2 %v5433_v22  ;;  %v6289_v22 = vld [vmem:[%s9679_s1 + $0xcf4] sm:$0xf0]  ;;  %3534 = vmatpush.bf16.msrb.mxu3 %v5529_v33  ;;  %v8736_v59 = vpop.f32.mrf.mxu2  ;;  %v9739_v33 = vld [vmem:[#allocation8_spill] sm:$0xff]  ;;  %v5927_v40 = vld [vmem:[%s9679_s1 + $0x1ac] sm:$0xf] }
 0x13d   :  { %3495 = vmatpush.bf16.msrb.mxu1 %v5289_v58  ;;  %v5769_v10 = vor.u32 %v6289_v22, %v5768_v25  ;;  %v4349_v58 = vor.u32 %v5931_v3, %v4346_v34  ;;  %v5891_v61 = vld [vmem:[%s9679_s1 + $0x8c] sm:$0xf]  ;;  %v4186_v34 = vld [vmem:[%s9679_s1 + $0x98] sm:$0xf0]  ;;  %v5656_v1 = vld [vmem:[%s9679_s1 + $0xc08] sm:$0xf] }
 0x13e   :  { %3475 = vmatpush.bf16.msrb.mxu0 %v5177_v23  ;;  %v5273_v23 = vor.u32 %v6165_v20, %v5272_v32  ;;  %v8738_v21 = vpop.f32.mrf.mxu3  ;;  %v6301_v32 = vld [vmem:[%s9679_s1 + $0xd54] sm:$0xf0]  ;;  %v5875_v5 = vld [vmem:[%s9679_s1 + $0xc] sm:$0xf]  ;;  %v4490_v49 = vld [vmem:[%s9679_s1 + $0x2f8] sm:$0xf0] }
 0x13f   :  { %v9740_v20 = vld [vmem:[#allocation9_spill] sm:$0xff]  ;;  %v5817_v22 = vor.u32 %v6301_v32, %v5816_v42  ;;  %v4189_v42 = vor.u32 %v5891_v61, %v4186_v34 }
 0x140   :  { %3514 = vmatpush.bf16.msrb.mxu2 %v5417_v7  ;;  %3603 = vmatpush.bf16.msra.mxu3 %v4365_v14  ;;  %v8751_v15 = vpop.f32.mrf.mxu1  ;;  %v5833_v7 = vor.u32 %v6305_v63, %v5832_v37  ;;  %v4330_v14 = vld [vmem:[%s9679_s1 + $0x1b8] sm:$0xf0]  ;;  %v6281_v37 = vld [vmem:[%s9679_s1 + $0xcb4] sm:$0xf0] }
 0x141   :  { %3496 = vmatpush.bf16.msrb.mxu1 %v5273_v23  ;;  %3407 = vmatmul.bf16.gmra.mxu0 %v9739_v33  ;;  %v4205_v23 = vor.u32 %v5895_v4, %v4202_v28  ;;  %v4333_v63 = vor.u32 %v5927_v40, %v4330_v14  ;;  %v6277_v4 = vld [vmem:[%s9679_s1 + $0xc94] sm:$0xf0]  ;;  %v5887_v28 = vld [vmem:[%s9679_s1 + $0x6c] sm:$0xf]  ;;  %v5800_v40 = vld [vmem:[%s9679_s1 + $0xd28] sm:$0xf] }
 0x142   :  { %3476 = vmatpush.bf16.msrb.mxu0 %v5161_v36  ;;  %v8749_v17 = vpop.f32.mrf.mxu0  ;;  %v5752_v36 = vld [vmem:[%s9679_s1 + $0xcc8] sm:$0xf]  ;;  %3426 = vmatmul.bf16.gmra.mxu1 %v9740_v20  ;;  %v6297_v14 = vld [vmem:[%s9679_s1 + $0xd34] sm:$0xf0] }
 0x143   :  { %v5753_v25 = vor.u32 %v6285_v2, %v5752_v36  ;;  %v6273_v61 = vld [vmem:[%s9679_s1 + $0xc74] sm:$0xf0] }
 0x144   :  { %3515 = vmatpush.bf16.msrb.mxu2 %v5401_v35  ;;  %v9741_v35 = vld [vmem:[#allocation10_spill] sm:$0xff]  ;;  %3604 = vmatpush.bf16.msra.mxu3 %v4349_v58  ;;  %v8790_v8 = vpop.f32.mrf.mxu2  ;;  %v5720_v58 = vld [vmem:[%s9679_s1 + $0xc88] sm:$0xf]  ;;  %v6261_v0 = vld [vmem:[%s9679_s1 + $0xc14] sm:$0xf0] }
 0x145   :  { %3445 = vmatmul.bf16.gmra.mxu2 %v9741_v35  ;;  %3569 = vmatpush.bf16.msra.mxu1 %v5833_v7  ;;  %v4314_v7 = vld [vmem:[%s9679_s1 + $0x198] sm:$0xf0] }
 0x146   :  { %3477 = vmatpush.bf16.msrb.mxu0 %v5145_v27  ;;  %v9742_v27 = vld [vmem:[#allocation11_spill] sm:$0xff]  ;;  %v8792_v3 = vpop.f32.mrf.mxu3 }
 0x147   :  { %3464 = vmatmul.bf16.gmra.mxu3 %v9742_v27  ;;  %v6269_v27 = vld [vmem:[%s9679_s1 + $0xc54] sm:$0xf0] }
 0x148   :  { %3584 = vmatpush.bf16.msra.mxu2 %v4237_v55  ;;  %v5736_v55 = vld [vmem:[%s9679_s1 + $0xca8] sm:$0xf]  ;;  %v8805_v2 = vpop.f32.mrf.mxu1  ;;  %3605 = vmatpush.bf16.msra.mxu3 %v4333_v63 }
 0x149   :  { %3570 = vmatpush.bf16.msra.mxu1 %v5817_v22  ;;  %v5919_v22 = vld [vmem:[%s9679_s1 + $0x16c] sm:$0xf]  ;;  %v5704_v63 = vld [vmem:[%s9679_s1 + $0xc68] sm:$0xf] }
 0x14a   :  { %3546 = vmatpush.bf16.msra.mxu0 %v5769_v10  ;;  %v5923_v10 = vld [vmem:[%s9679_s1 + $0x18c] sm:$0xf]  ;;  %v8803_v36 = vpop.f32.mrf.mxu0 }
 0x14b   :  { %v4317_v32 = vor.u32 %v5923_v10, %v4314_v7  ;;  %v5883_v7 = vld [vmem:[%s9679_s1 + $0x4c] sm:$0xf] }
 0x14c   :  { %3585 = vmatpush.bf16.msra.mxu2 %v4221_v26  ;;  %v5737_v26 = vor.u32 %v6281_v37, %v5736_v55  ;;  %v5801_v55 = vor.u32 %v6297_v14, %v5800_v40  ;;  %v5721_v37 = vor.u32 %v6277_v4, %v5720_v58  ;;  %v6293_v58 = vld [vmem:[%s9679_s1 + $0xd14] sm:$0xf0]  ;;  %v8846_v4 = vpop.f32.mrf.mxu2 }
 0x14d   :  { %3606 = vmatpush.bf16.msra.mxu3 %v4317_v32  ;;  %v5915_v32 = vld [vmem:[%s9679_s1 + $0x14c] sm:$0xf] }
 0x14e   :  { %3547 = vmatpush.bf16.msra.mxu0 %v5753_v25  ;;  %v4170_v25 = vld [vmem:[%s9679_s1 + $0x78] sm:$0xf0]  ;;  %3571 = vmatpush.bf16.msra.mxu1 %v5801_v55  ;;  %v8848_v40 = vpop.f32.mrf.mxu3  ;;  %v5688_v55 = vld [vmem:[%s9679_s1 + $0xc48] sm:$0xf] }
 0x14f   :  { %v4173_v34 = vor.u32 %v5887_v28, %v4170_v25  ;;  %v4282_v28 = vld [vmem:[%s9679_s1 + $0x158] sm:$0xf0] }
 0x150   :  { %3586 = vmatpush.bf16.msra.mxu2 %v4205_v23  ;;  %v4298_v23 = vld [vmem:[%s9679_s1 + $0x178] sm:$0xf0]  ;;  %v4285_v6 = vor.u32 %v5915_v32, %v4282_v28  ;;  %v9746_v32 = vld [vmem:[#allocation15_spill] sm:$0xff] }
 0x151   :  { %v4301_v10 = vor.u32 %v5919_v22, %v4298_v23  ;;  %v8861_v22 = vpop.f32.mrf.mxu1  ;;  %v5705_v23 = vor.u32 %v6273_v61, %v5704_v63  ;;  %v5911_v63 = vld [vmem:[%s9679_s1 + $0x12c] sm:$0xf]  ;;  %v9743_v61 = vld [vmem:[#allocation12_spill] sm:$0xff] }
 0x152   :  { %3548 = vmatpush.bf16.msra.mxu0 %v5737_v26  ;;  %v5784_v26 = vld [vmem:[%s9679_s1 + $0xd08] sm:$0xf]  ;;  %v8859_v25 = vpop.f32.mrf.mxu0 }
 0x153   :  { %v5785_v14 = vor.u32 %v6293_v58, %v5784_v26  ;;  %3607 = vmatpush.bf16.msra.mxu3 %v4301_v10  ;;  %v5879_v26 = vld [vmem:[%s9679_s1 + $0x2c] sm:$0xf]  ;;  %3478 = vmatmul.bf16.vlgmr.msrb.gmra.mxu0 %v9743_v61  ;;  %v9744_v58 = vld [vmem:[#allocation13_spill] sm:$0xff] }
 0x154   :  { %3587 = vmatpush.bf16.msra.mxu2 %v4189_v42  ;;  %v4154_v42 = vld [vmem:[%s9679_s1 + $0x58] sm:$0xf0]  ;;  %3497 = vmatmul.bf16.vlgmr.msrb.gmra.mxu1 %v9744_v58  ;;  %v5999_v10 = vld [vmem:[%s9679_s1 + $0x3ec] sm:$0xf]  ;;  %v5672_v58 = vld [vmem:[%s9679_s1 + $0xc28] sm:$0xf] }
 0x155   :  { %3572 = vmatpush.bf16.msra.mxu1 %v5785_v14  ;;  %v4157_v35 = vor.u32 %v5883_v7, %v4154_v42  ;;  %v4618_v7 = vld [vmem:[%s9679_s1 + $0x3f8] sm:$0xf0]  ;;  %v9745_v42 = vld [vmem:[#allocation14_spill] sm:$0xff]  ;;  %v5689_v14 = vor.u32 %v6269_v27, %v5688_v55  ;;  %v6265_v61 = vld [vmem:[%s9679_s1 + $0xc34] sm:$0xf0] }
 0x156   :  { %3549 = vmatpush.bf16.msra.mxu0 %v5721_v37  ;;  %v4138_v37 = vld [vmem:[%s9679_s1 + $0x38] sm:$0xf0]  ;;  %3516 = vmatmul.bf16.vlgmr.msrb.gmra.mxu2 %v9745_v42  ;;  %v4621_v28 = vor.u32 %v5999_v10, %v4618_v7  ;;  %v8909_v10 = vpop.f32.mrf.mxu2  ;;  %v8911_v7 = vpop.f32.mrf.mxu3  ;;  %v5673_v56 = vor.u32 %v6265_v61, %v5672_v58 }
 0x157   :  { %3535 = vmatmul.bf16.vlgmr.msrb.gmra.mxu3 %v9746_v32  ;;  %v4141_v42 = vor.u32 %v5879_v26, %v4138_v37  ;;  %v4122_v27 = vld [vmem:[%s9679_s1 + $0x18] sm:$0xf0] }
 0x158   :  { %3588 = vmatpush.bf16.msra.mxu2 %v4173_v34  ;;  %v4266_v34 = vld [vmem:[%s9679_s1 + $0x138] sm:$0xf0]  ;;  %3608 = vmatpush.bf16.msra.mxu3 %v4285_v6  ;;  %v6031_v6 = vld [vmem:[%s9679_s1 + $0x4ec] sm:$0xf]  ;;  %v4125_v13 = vor.u32 %v5875_v5, %v4122_v27 }
 0x159   :  { %v4269_v20 = vor.u32 %v5911_v63, %v4266_v34  ;;  %v4250_v55 = vld [vmem:[%s9679_s1 + $0x118] sm:$0xf0]  ;;  %3641 = vmatpush.bf16.msrb.mxu1 %v4621_v28  ;;  %v8924_v63 = vpop.f32.mrf.mxu1  ;;  %v6063_v28 = vld [vmem:[%s9679_s1 + $0x5ec] sm:$0xf] }
 0x15a   :  { %3550 = vmatpush.bf16.msra.mxu0 %v5705_v23  ;;  %v5907_v23 = vld [vmem:[%s9679_s1 + $0x10c] sm:$0xf]  ;;  %v4602_v26 = vld [vmem:[%s9679_s1 + $0x3d8] sm:$0xf0]  ;;  %v8922_v37 = vpop.f32.mrf.mxu0 }
 0x15b   :  { %v4746_v34 = vld [vmem:[%s9679_s1 + $0x4f8] sm:$0xf0]  ;;  %v4253_v24 = vor.u32 %v5907_v23, %v4250_v55  ;;  %v5991_v5 = vld [vmem:[%s9679_s1 + $0x3ac] sm:$0xf]  ;;  %v3119_v23 = vadd.f32 %v8626_v18, %v3100_v51 }
 0x15c   :  { %3589 = vmatpush.bf16.msra.mxu2 %v4157_v35  ;;  %v5995_v35 = vld [vmem:[%s9679_s1 + $0x3cc] sm:$0xf]  ;;  %v4874_v32 = vld [vmem:[%s9679_s1 + $0x5f8] sm:$0xf0]  ;;  %3609 = vmatpush.bf16.msra.mxu3 %v4269_v20  ;;  %v4749_v61 = vor.u32 %v6031_v6, %v4746_v34  ;;  %v3102_v6 = vadd.f32 %v8687_v29, %v8494_v9 }
 0x15d   :  { %v4605_v33 = vor.u32 %v5995_v35, %v4602_v26  ;;  %v4877_v30 = vor.u32 %v6063_v28, %v4874_v32  ;;  %v4586_v20 = vld [vmem:[%s9679_s1 + $0x3b8] sm:$0xf0]  ;;  %v6027_v27 = vld [vmem:[%s9679_s1 + $0x4cc] sm:$0xf]  ;;  %v3138_v18 = vadd.f32 %v8674_v12, %v3119_v23 }
 0x15e   :  { %3551 = vmatpush.bf16.msra.mxu0 %v5689_v14  ;;  %v5967_v14 = vld [vmem:[%s9679_s1 + $0x2ec] sm:$0xf]  ;;  %v4589_v58 = vor.u32 %v5991_v5, %v4586_v20  ;;  %v4730_v32 = vld [vmem:[%s9679_s1 + $0x4d8] sm:$0xf0]  ;;  %v9747_v20 = vld [vmem:[#allocation16_spill] sm:$0xff] }
 0x15f   :  { %3642 = vmatpush.bf16.msrb.mxu1 %v4605_v33  ;;  %v4493_v33 = vor.u32 %v5967_v14, %v4490_v49  ;;  %v6059_v55 = vld [vmem:[%s9679_s1 + $0x5cc] sm:$0xf]  ;;  %v4570_v34 = vld [vmem:[%s9679_s1 + $0x398] sm:$0xf0]  ;;  %v4733_v28 = vor.u32 %v6027_v27, %v4730_v32  ;;  %v3121_v32 = vadd.f32 %v8689_v41, %v3102_v6 }
 0x160   :  { %3590 = vmatpush.bf16.msra.mxu2 %v4141_v42  ;;  %v5657_v42 = vor.u32 %v6261_v0, %v5656_v1  ;;  %3610 = vmatpush.bf16.msra.mxu3 %v4253_v24  ;;  %v8968_v0 = vpop.f32.mrf.mxu2  ;;  %v8970_v1 = vpop.f32.mrf.mxu3  ;;  %v5963_v51 = vld [vmem:[%s9679_s1 + $0x2cc] sm:$0xf]  ;;  %v4474_v24 = vld [vmem:[%s9679_s1 + $0x2d8] sm:$0xf0] }
 0x161   :  { %v8986_v26 = vpop.f32.mrf.mxu1  ;;  %v4714_v9 = vld [vmem:[%s9679_s1 + $0x4b8] sm:$0xf0]  ;;  %v4477_v12 = vor.u32 %v5963_v51, %v4474_v24  ;;  %v5959_v29 = vld [vmem:[%s9679_s1 + $0x2ac] sm:$0xf]  ;;  %v3140_v6 = vadd.f32 %v8736_v59, %v3121_v32 }
 0x162   :  { %3552 = vmatpush.bf16.msra.mxu0 %v5673_v56  ;;  %v4858_v56 = vld [vmem:[%s9679_s1 + $0x5d8] sm:$0xf0]  ;;  %v8984_v35 = vpop.f32.mrf.mxu0  ;;  %v6055_v49 = vld [vmem:[%s9679_s1 + $0x5ac] sm:$0xf] }
 0x163   :  { %3643 = vmatpush.bf16.msrb.mxu1 %v4589_v58  ;;  %v4861_v14 = vor.u32 %v6059_v55, %v4858_v56  ;;  %3483 = vmatmul.bf16.gmra.mxu0 %v9747_v20  ;;  %v9748_v58 = vld [vmem:[#allocation17_spill] sm:$0xff]  ;;  %v5983_v27 = vld [vmem:[%s9679_s1 + $0x36c] sm:$0xf]  ;;  %v3105_v55 = vadd.f32 %v8749_v17, %v8562_v52 }
 0x164   :  { %3591 = vmatpush.bf16.msra.mxu2 %v4125_v13  ;;  %3679 = vmatpush.bf16.msrb.mxu3 %v4877_v30  ;;  %v5987_v13 = vld [vmem:[%s9679_s1 + $0x38c] sm:$0xf]  ;;  %v4842_v30 = vld [vmem:[%s9679_s1 + $0x5b8] sm:$0xf0] }
 0x165   :  { %v4573_v5 = vor.u32 %v5987_v13, %v4570_v34  ;;  %3502 = vmatmul.bf16.gmra.mxu1 %v9748_v58  ;;  %v4554_v23 = vld [vmem:[%s9679_s1 + $0x378] sm:$0xf0]  ;;  %v4845_v51 = vor.u32 %v6055_v49, %v4842_v30  ;;  %v6019_v24 = vld [vmem:[%s9679_s1 + $0x48c] sm:$0xf] }
 0x166   :  { %3553 = vmatpush.bf16.msra.mxu0 %v5657_v42  ;;  %v4458_v42 = vld [vmem:[%s9679_s1 + $0x2b8] sm:$0xf0]  ;;  %3521 = vmatmul.bf16.gmra.mxu2 %v7284_v46  ;;  %v6051_v52 = vld [vmem:[%s9679_s1 + $0x58c] sm:$0xf] }
 0x167   :  { %3540 = vmatmul.bf16.gmra.mxu3 %v7286_v47  ;;  %v4698_v41 = vld [vmem:[%s9679_s1 + $0x498] sm:$0xf0]  ;;  %3644 = vmatpush.bf16.msrb.mxu1 %v4573_v5  ;;  %v6015_v5 = vld [vmem:[%s9679_s1 + $0x46c] sm:$0xf] }
 0x168   :  { %3660 = vmatpush.bf16.msrb.mxu2 %v4749_v61  ;;  %v6023_v61 = vld [vmem:[%s9679_s1 + $0x4ac] sm:$0xf]  ;;  %3680 = vmatpush.bf16.msrb.mxu3 %v4861_v14  ;;  %v4826_v17 = vld [vmem:[%s9679_s1 + $0x598] sm:$0xf0]  ;;  %v9037_v34 = vpop.f32.mrf.mxu2  ;;  %v4701_v49 = vor.u32 %v6019_v24, %v4698_v41 }
 0x169   :  { %v4717_v56 = vor.u32 %v6023_v61, %v4714_v9  ;;  %v4442_v14 = vld [vmem:[%s9679_s1 + $0x298] sm:$0xf0]  ;;  %v5979_v61 = vld [vmem:[%s9679_s1 + $0x34c] sm:$0xf]  ;;  %v4829_v30 = vor.u32 %v6051_v52, %v4826_v17 }
 0x16a   :  { %3622 = vmatpush.bf16.msrb.mxu0 %v4493_v33  ;;  %v3157_v33 = vadd.f32 %v8676_v45, %v3138_v18  ;;  %v4461_v45 = vor.u32 %v5959_v29, %v4458_v42  ;;  %v4557_v18 = vor.u32 %v5983_v27, %v4554_v23  ;;  %v9050_v9 = vpop.f32.mrf.mxu0  ;;  %v4538_v59 = vld [vmem:[%s9679_s1 + $0x358] sm:$0xf0]  ;;  %v3124_v29 = vadd.f32 %v8751_v15, %v3105_v55  ;;  %v5951_v15 = vld [vmem:[%s9679_s1 + $0x26c] sm:$0xf] }
 0x16b   :  { %v4682_v42 = vld [vmem:[%s9679_s1 + $0x478] sm:$0xf0]  ;;  %v4541_v55 = vor.u32 %v5979_v61, %v4538_v59  ;;  %v6011_v17 = vld [vmem:[%s9679_s1 + $0x44c] sm:$0xf] }
 0x16c   :  { %3661 = vmatpush.bf16.msrb.mxu2 %v4733_v28  ;;  %v3176_v13 = vadd.f32 %v8859_v25, %v3157_v33  ;;  %v9039_v25 = vpop.f32.mrf.mxu3  ;;  %v5955_v28 = vld [vmem:[%s9679_s1 + $0x28c] sm:$0xf]  ;;  %3681 = vmatpush.bf16.msrb.mxu3 %v4845_v51  ;;  %v4810_v32 = vld [vmem:[%s9679_s1 + $0x578] sm:$0xf0] }
 0x16d   :  { %v4445_v23 = vor.u32 %v5955_v28, %v4442_v14  ;;  %3645 = vmatpush.bf16.msrb.mxu1 %v4557_v18  ;;  %v6047_v33 = vld [vmem:[%s9679_s1 + $0x56c] sm:$0xf]  ;;  %v4522_v24 = vld [vmem:[%s9679_s1 + $0x338] sm:$0xf0] }
 0x16e   :  { %3623 = vmatpush.bf16.msrb.mxu0 %v4477_v12  ;;  %v9052_v12 = vpop.f32.mrf.mxu1  ;;  %v3195_v27 = vadd.f32 %v8861_v22, %v3176_v13  ;;  %v4426_v22 = vld [vmem:[%s9679_s1 + $0x278] sm:$0xf0]  ;;  %v5975_v51 = vld [vmem:[%s9679_s1 + $0x32c] sm:$0xf]  ;;  %v3143_v13 = vadd.f32 %v8790_v8, %v3124_v29  ;;  %v4813_v52 = vor.u32 %v6047_v33, %v4810_v32 }
 0x16f   :  { %v4429_v18 = vor.u32 %v5951_v15, %v4426_v22  ;;  %v6043_v8 = vld [vmem:[%s9679_s1 + $0x54c] sm:$0xf]  ;;  %v4410_v59 = vld [vmem:[%s9679_s1 + $0x258] sm:$0xf0] }
 0x170   :  { %3662 = vmatpush.bf16.msrb.mxu2 %v4717_v56  ;;  %v3159_v56 = vadd.f32 %v8738_v21, %v3140_v6  ;;  %3682 = vmatpush.bf16.msrb.mxu3 %v4829_v30  ;;  %v4685_v21 = vor.u32 %v6015_v5, %v4682_v42  ;;  %v4666_v6 = vld [vmem:[%s9679_s1 + $0x458] sm:$0xf0]  ;;  %v9099_v28 = vpop.f32.mrf.mxu2  ;;  %v5947_v61 = vld [vmem:[%s9679_s1 + $0x24c] sm:$0xf]  ;;  %v3107_v30 = vadd.f32 %v8803_v36, %v8622_v11 }
 0x171   :  { %3646 = vmatpush.bf16.msrb.mxu1 %v4541_v55  ;;  %v5971_v29 = vld [vmem:[%s9679_s1 + $0x30c] sm:$0xf]  ;;  %v4669_v33 = vor.u32 %v6011_v17, %v4666_v6  ;;  %v4650_v11 = vld [vmem:[%s9679_s1 + $0x438] sm:$0xf0] }
 0x172   :  { %3624 = vmatpush.bf16.msrb.mxu0 %v4461_v45  ;;  %v3214_v45 = vadd.f32 %v8909_v10, %v3195_v27  ;;  %v3178_v41 = vadd.f32 %v8922_v37, %v3159_v56  ;;  %v4794_v10 = vld [vmem:[%s9679_s1 + $0x558] sm:$0xf0]  ;;  %v4525_v37 = vor.u32 %v5975_v51, %v4522_v24  ;;  %v3251_v42 = vpop.f32.mrf.mxu0  ;;  %v5943_v55 = vld [vmem:[%s9679_s1 + $0x22c] sm:$0xf]  ;;  %v9749_v51 = vld [vmem:[#allocation18_spill] sm:$0xff] }
 0x173   :  { %v4797_v32 = vor.u32 %v6043_v8, %v4794_v10  ;;  %v4778_v56 = vld [vmem:[%s9679_s1 + $0x538] sm:$0xf0]  ;;  %3554 = vmatmul.bf16.vlgmr.msra.gmra.mxu0 %v9749_v51  ;;  %v9750_v24 = vld [vmem:[#allocation19_spill] sm:$0xff]  ;;  %v3126_v8 = vadd.f32 %v8805_v2, %v3107_v30 }
 0x174   :  { %3663 = vmatpush.bf16.msrb.mxu2 %v4701_v49  ;;  %v9101_v14 = vpop.f32.mrf.mxu3  ;;  %v3162_v49 = vadd.f32 %v8792_v3, %v3143_v13  ;;  %v3233_v5 = vadd.f32 %v8911_v7, %v3214_v45  ;;  %v3197_v15 = vadd.f32 %v8924_v63, %v3178_v41  ;;  %3683 = vmatpush.bf16.msrb.mxu3 %v4813_v52  ;;  %v6007_v3 = vld [vmem:[%s9679_s1 + $0x42c] sm:$0xf]  ;;  %v4394_v13 = vld [vmem:[%s9679_s1 + $0x238] sm:$0xf0] }
 0x175   :  { %v4413_v7 = vor.u32 %v5947_v61, %v4410_v59  ;;  %3647 = vmatpush.bf16.msrb.mxu1 %v4525_v37  ;;  %v6039_v63 = vld [vmem:[%s9679_s1 + $0x52c] sm:$0xf]  ;;  %v5130_v41 = vld [vmem:[%s9679_s1 + $0x7f8] sm:$0xf0]  ;;  %v4397_v61 = vor.u32 %v5943_v55, %v4394_v13 }
 0x176   :  { %3625 = vmatpush.bf16.msrb.mxu0 %v4445_v23  ;;  %v3270_v27 = vpop.f32.mrf.mxu1  ;;  %v4506_v23 = vld [vmem:[%s9679_s1 + $0x318] sm:$0xf0]  ;;  %v3252_v36 = vadd.f32 %v3251_v42, %v3233_v5  ;;  %5842 = vmatmul.msk.bf16.vlgmr.msra.gmra.mxu1 %vm2779_vm0, %v9750_v24  ;;  %v6127_v45 = vld [vmem:[%s9679_s1 + $0x7ec] sm:$0xf]  ;;  %v3181_v52 = vadd.f32 %v8984_v35, %v3162_v49  ;;  %v4781_v10 = vor.u32 %v6039_v63, %v4778_v56 }
 0x177   :  { %v4509_v22 = vor.u32 %v5971_v29, %v4506_v23  ;;  %3592 = vmatmul.bf16.vlgmr.msra.gmra.mxu2 %v6578_v48  ;;  %3611 = vmatmul.bf16.vlgmr.msra.gmra.mxu3 %v6589_v53  ;;  %v6003_v17 = vld [vmem:[%s9679_s1 + $0x40c] sm:$0xf]  ;;  %v5133_v6 = vor.u32 %v6127_v45, %v5130_v41  ;;  %v4378_v53 = vld [vmem:[%s9679_s1 + $0x218] sm:$0xf0]  ;;  %v3145_v49 = vadd.f32 %v8846_v4, %v3126_v8 }
 0x178   :  { %3664 = vmatpush.bf16.msrb.mxu2 %v4685_v21  ;;  %v3216_v21 = vadd.f32 %v8968_v0, %v3197_v15  ;;  %3684 = vmatpush.bf16.msrb.mxu3 %v4797_v32  ;;  %v4653_v0 = vor.u32 %v6007_v3, %v4650_v11  ;;  %v5939_v48 = vld [vmem:[%s9679_s1 + $0x20c] sm:$0xf]  ;;  %v3271_v37 = vadd.f32 %v3270_v27, %v3252_v36  ;;  %v4762_v2 = vld [vmem:[%s9679_s1 + $0x518] sm:$0xf0]  ;;  %v3289_v30 = vpop.f32.mrf.mxu2 }
 0x179   :  { %v6035_v35 = vld [vmem:[%s9679_s1 + $0x50c] sm:$0xf]  ;;  %3648 = vmatpush.bf16.msrb.mxu1 %v4509_v22  ;;  %v5258_v29 = vld [vmem:[%s9679_s1 + $0x8f8] sm:$0xf0]  ;;  %v4381_v22 = vor.u32 %v5939_v48, %v4378_v53  ;;  %v3164_v41 = vadd.f32 %v8848_v40, %v3145_v49 }
 0x17a   :  { %3626 = vmatpush.bf16.msrb.mxu0 %v4429_v18  ;;  %v4634_v18 = vld [vmem:[%s9679_s1 + $0x418] sm:$0xf0]  ;;  %v6159_v59 = vld [vmem:[%s9679_s1 + $0x8ec] sm:$0xf]  ;;  %v3235_v15 = vadd.f32 %v8970_v1, %v3216_v21  ;;  %v3290_v4 = vadd.f32 %v3289_v30, %v3271_v37  ;;  %v3253_v32 = vpop.f32.mrf.mxu0  ;;  %v4765_v55 = vor.u32 %v6035_v35, %v4762_v2 }
 0x17b   :  { %v6095_v42 = vld [vmem:[%s9679_s1 + $0x6ec] sm:$0xf]  ;;  %v5002_v27 = vld [vmem:[%s9679_s1 + $0x6f8] sm:$0xf0]  ;;  %v4637_v1 = vor.u32 %v6003_v17, %v4634_v18  ;;  %v5261_v13 = vor.u32 %v6159_v59, %v5258_v29  ;;  %v3183_v48 = vadd.f32 %v9050_v9, %v3164_v41 }
 0x17c   :  { %3665 = vmatpush.bf16.msrb.mxu2 %v4669_v33  ;;  %v3308_v5 = vpop.f32.mrf.mxu3  ;;  %v6123_v23 = vld [vmem:[%s9679_s1 + $0x7cc] sm:$0xf]  ;;  %v3200_v33 = vadd.f32 %v8986_v26, %v3181_v52  ;;  %v5386_v36 = vld [vmem:[%s9679_s1 + $0x9f8] sm:$0xf0]  ;;  %3685 = vmatpush.bf16.msrb.mxu3 %v4781_v10  ;;  %v3254_v56 = vadd.f32 %v3253_v32, %v3235_v15  ;;  %v5005_v21 = vor.u32 %v6095_v42, %v5002_v27 }
 0x17d   :  { %3717 = vmatpush.bf16.msra.mxu1 %v5133_v6  ;;  %v6191_v11 = vld [vmem:[%s9679_s1 + $0x9ec] sm:$0xf]  ;;  %v3309_v63 = vadd.f32 %v3308_v5, %v3290_v4  ;;  %v5242_v6 = vld [vmem:[%s9679_s1 + $0x8d8] sm:$0xf0] }
 0x17e   :  { %3627 = vmatpush.bf16.msrb.mxu0 %v4413_v7  ;;  %v3272_v3 = vpop.f32.mrf.mxu1  ;;  %v5114_v7 = vld [vmem:[%s9679_s1 + $0x7d8] sm:$0xf0]  ;;  %v6155_v45 = vld [vmem:[%s9679_s1 + $0x8cc] sm:$0xf]  ;;  %v5389_v52 = vor.u32 %v6191_v11, %v5386_v36  ;;  %v3219_v8 = vadd.f32 %v9037_v34, %v3200_v33 }
 0x17f   :  { %v5117_v26 = vor.u32 %v6123_v23, %v5114_v7  ;;  %v6119_v17 = vld [vmem:[%s9679_s1 + $0x7ac] sm:$0xf]  ;;  %v5098_v18 = vld [vmem:[%s9679_s1 + $0x7b8] sm:$0xf0]  ;;  %v5245_v9 = vor.u32 %v6155_v45, %v5242_v6 }
 0x180   :  { %3666 = vmatpush.bf16.msrb.mxu2 %v4653_v0  ;;  %v3875_v0 = vmul.f32 %v8331_v43, %v3309_v63  ;;  %v3931_v40 = vld [vmem:[%s9683_s4 + $0x8] sm:$0xff]  ;;  %v5101_v10 = vor.u32 %v6119_v17, %v5098_v18  ;;  %3686 = vmatpush.bf16.msrb.mxu3 %v4765_v55  ;;  %v4986_v35 = vld [vmem:[%s9679_s1 + $0x6d8] sm:$0xf0]  ;;  %v3291_v49 = vpop.f32.mrf.mxu2  ;;  %v3238_v27 = vadd.f32 %v9039_v25, %v3219_v8 }
 0x181   :  { %3718 = vmatpush.bf16.msra.mxu1 %v5117_v26  ;;  %v6091_v53 = vld [vmem:[%s9679_s1 + $0x6cc] sm:$0xf]  ;;  %v5370_v2 = vld [vmem:[%s9679_s1 + $0x9d8] sm:$0xf0] }
 0x182   :  { %3628 = vmatpush.bf16.msrb.mxu0 %v4397_v61  ;;  %v6187_v34 = vld [vmem:[%s9679_s1 + $0x9cc] sm:$0xf]  ;;  %v3915_v37 = vadd.f32 %v8366_v19, %v3875_v0  ;;  %v3273_v61 = vadd.f32 %v3272_v3, %v3254_v56  ;;  %v5226_v29 = vld [vmem:[%s9679_s1 + $0x8b8] sm:$0xf0]  ;;  %v3256_v33 = vpop.f32.mrf.mxu0  ;;  %v3202_v3 = vadd.f32 %v9052_v12, %v3183_v48  ;;  %v4989_v11 = vor.u32 %v6091_v53, %v4986_v35 }
 0x183   :  { %v6151_v59 = vld [vmem:[%s9679_s1 + $0x8ac] sm:$0xf]  ;;  %v5082_v42 = vld [vmem:[%s9679_s1 + $0x798] sm:$0xf0]  ;;  %v5373_v36 = vor.u32 %v6187_v34, %v5370_v2  ;;  %v3257_v56 = vadd.f32 %v3256_v33, %v3238_v27  ;;  %3559 = vmatmul.bf16.gmra.mxu0 %v7532_v38 }
 0x184   :  { %3667 = vmatpush.bf16.msrb.mxu2 %v4637_v1  ;;  %v3310_v30 = vpop.f32.mrf.mxu3  ;;  %3755 = vmatpush.bf16.msra.mxu3 %v5389_v52  ;;  %v6115_v5 = vld [vmem:[%s9679_s1 + $0x78c] sm:$0xf]  ;;  %v3947_v23 = vadd.f32 %v3931_v40, %v3915_v37  ;;  %v3292_v15 = vadd.f32 %v3291_v49, %v3273_v61  ;;  %v5229_v7 = vor.u32 %v6151_v59, %v5226_v29  ;;  %v4970_v1 = vld [vmem:[%s9679_s1 + $0x6b8] sm:$0xf0] }
 0x185   :  { %v6087_v32 = vld [vmem:[%s9679_s1 + $0x6ac] sm:$0xf]  ;;  %3719 = vmatpush.bf16.msra.mxu1 %v5101_v10  ;;  %v5354_v55 = vld [vmem:[%s9679_s1 + $0x9b8] sm:$0xf0]  ;;  %v3221_v41 = vadd.f32 %v9099_v28, %v3202_v3 }
 0x186   :  { %3629 = vmatpush.bf16.msrb.mxu0 %v4381_v22  ;;  %v3275_v4 = vpop.f32.mrf.mxu1  ;;  %v6183_v25 = vld [vmem:[%s9679_s1 + $0x9ac] sm:$0xf]  ;;  %v3963_v26 = vmax.f32 %v3947_v23, 0.0  ;;  %v3311_v63 = vadd.f32 %v3310_v30, %v3292_v15  ;;  %v5210_v22 = vld [vmem:[%s9679_s1 + $0x898] sm:$0xf0]  ;;  %5843 = vmatmul.msk.bf16.gmra.mxu1 %vm2779_vm0, %v7534_v39  ;;  %v4973_v28 = vor.u32 %v6087_v32, %v4970_v1 }
 0x187   :  { %v6147_v12 = vld [vmem:[%s9679_s1 + $0x88c] sm:$0xf]  ;;  %3597 = vmatmul.bf16.gmra.mxu2 %v6710_v44  ;;  %3616 = vmatmul.bf16.gmra.mxu3 %v6721_v50  ;;  %v5066_v6 = vld [vmem:[%s9679_s1 + $0x778] sm:$0xf0]  ;;  %v5357_v17 = vor.u32 %v6183_v25, %v5354_v55  ;;  %v3276_v40 = vadd.f32 %v3275_v4, %v3257_v56  ;;  %v3240_v2 = vadd.f32 %v9101_v14, %v3221_v41 }
 0x188   :  { %3736 = vmatpush.bf16.msra.mxu2 %v5261_v13  ;;  %v5085_v13 = vor.u32 %v6115_v5, %v5082_v42  ;;  %v6111_v45 = vld [vmem:[%s9679_s1 + $0x76c] sm:$0xf]  ;;  %3979 = vst [vmem:[%s9684_s5 + $0x8] sm:$0xff] %v3963_v26  ;;  %3756 = vmatpush.bf16.msra.mxu3 %v5373_v36  ;;  %v5213_v18 = vor.u32 %v6147_v12, %v5210_v22  ;;  %v4954_v0 = vld [vmem:[%s9679_s1 + $0x698] sm:$0xf0]  ;;  %v3294_v34 = vpop.f32.mrf.mxu2 }
 0x189   :  { %v3935_v52 = vld [vmem:[%s9683_s4 + $0x28] sm:$0xff]  ;;  %v5338_v10 = vld [vmem:[%s9679_s1 + $0x998] sm:$0xf0]  ;;  %v5069_v35 = vor.u32 %v6111_v45, %v5066_v6  ;;  %v3295_v29 = vadd.f32 %v3294_v34, %v3276_v40 }
 0x18a   :  { %3698 = vmatpush.bf16.msra.mxu0 %v5005_v21  ;;  %v3879_v21 = vmul.f32 %v8439_v60, %v3311_v63  ;;  %v6083_v8 = vld [vmem:[%s9679_s1 + $0x68c] sm:$0xf]  ;;  %3720 = vmatpush.bf16.msra.mxu1 %v5085_v13  ;;  %v5194_v53 = vld [vmem:[%s9679_s1 + $0x878] sm:$0xf0]  ;;  %v3258_v49 = vpop.f32.mrf.mxu0 }
 0x18b   :  { %v6179_v44 = vld [vmem:[%s9679_s1 + $0x98c] sm:$0xf]  ;;  %v4957_v42 = vor.u32 %v6083_v8, %v4954_v0  ;;  %v4938_v15 = vld [vmem:[%s9679_s1 + $0x678] sm:$0xf0]  ;;  %v3259_v3 = vadd.f32 %v3258_v49, %v3240_v2 }
 0x18c   :  { %3737 = vmatpush.bf16.msra.mxu2 %v5245_v9  ;;  %v3919_v50 = vadd.f32 %v8458_v62, %v3879_v21  ;;  %v6143_v48 = vld [vmem:[%s9679_s1 + $0x86c] sm:$0xf]  ;;  %v3313_v37 = vpop.f32.mrf.mxu3  ;;  %v5050_v9 = vld [vmem:[%s9679_s1 + $0x758] sm:$0xf0]  ;;  %3757 = vmatpush.bf16.msra.mxu3 %v5357_v17  ;;  %v5341_v27 = vor.u32 %v6179_v44, %v5338_v10 }
 0x18d   :  { %v6107_v61 = vld [vmem:[%s9679_s1 + $0x74c] sm:$0xf]  ;;  %v5197_v23 = vor.u32 %v6143_v48, %v5194_v53  ;;  %v5322_v33 = vld [vmem:[%s9679_s1 + $0x978] sm:$0xf0]  ;;  %v3314_v32 = vadd.f32 %v3313_v37, %v3295_v29 }
 0x18e   :  { %3699 = vmatpush.bf16.msra.mxu0 %v4989_v11  ;;  %v3951_v59 = vadd.f32 %v3935_v52, %v3919_v50  ;;  %v3277_v30 = vpop.f32.mrf.mxu1  ;;  %v6079_v5 = vld [vmem:[%s9679_s1 + $0x66c] sm:$0xf]  ;;  %3721 = vmatpush.bf16.msra.mxu1 %v5069_v35  ;;  %v5178_v36 = vld [vmem:[%s9679_s1 + $0x858] sm:$0xf0] }
 0x18f   :  { %v6175_v14 = vld [vmem:[%s9679_s1 + $0x96c] sm:$0xf]  ;;  %v3883_v25 = vmul.f32 %v8404_v31, %v3314_v32  ;;  %v5034_v55 = vld [vmem:[%s9679_s1 + $0x738] sm:$0xf0]  ;;  %v4941_v63 = vor.u32 %v6079_v5, %v4938_v15  ;;  %v3278_v41 = vadd.f32 %v3277_v30, %v3259_v3  ;;  %v9751_v15 = vld [vmem:[#allocation20_spill] sm:$0xff] }
 0x190   :  { %3738 = vmatpush.bf16.msra.mxu2 %v5229_v7  ;;  %v3967_v4 = vmax.f32 %v3951_v59, 0.0  ;;  %v6139_v11 = vld [vmem:[%s9679_s1 + $0x84c] sm:$0xf]  ;;  %v5053_v7 = vor.u32 %v6107_v61, %v5050_v9  ;;  %3758 = vmatpush.bf16.msra.mxu3 %v5341_v27  ;;  %v5325_v56 = vor.u32 %v6175_v14, %v5322_v33  ;;  %v4922_v13 = vld [vmem:[%s9679_s1 + $0x658] sm:$0xf0]  ;;  %v3296_v17 = vpop.f32.mrf.mxu2  ;;  %v9752_v14 = vld [vmem:[#allocation4_spill] sm:$0xff] }
 0x191   :  { %v6103_v1 = vld [vmem:[%s9679_s1 + $0x72c] sm:$0xf]  ;;  %v5181_v12 = vor.u32 %v6139_v11, %v5178_v36  ;;  %v3923_v45 = vadd.f32 %v8527_v16, %v3883_v25  ;;  %v5306_v52 = vld [vmem:[%s9679_s1 + $0x958] sm:$0xf0]  ;;  %v3297_v40 = vadd.f32 %v3296_v17, %v3278_v41 }
 0x192   :  { %3700 = vmatpush.bf16.msra.mxu0 %v4973_v28  ;;  %3983 = vst [vmem:[%s9684_s5 + $0x28] sm:$0xff] %v3967_v4  ;;  %v3939_v26 = vld [vmem:[%s9683_s4 + $0x48] sm:$0xff]  ;;  %3722 = vmatpush.bf16.msra.mxu1 %v5053_v7  ;;  %v5037_v28 = vor.u32 %v6103_v1, %v5034_v55  ;;  %v5162_v8 = vld [vmem:[%s9679_s1 + $0x838] sm:$0xf0]  ;;  %v3327_v10 = vpop.f32.mrf.mxu0 }
 0x193   :  { %v6075_v22 = vld [vmem:[%s9679_s1 + $0x64c] sm:$0xf]  ;;  %v5018_v44 = vld [vmem:[%s9679_s1 + $0x718] sm:$0xf0]  ;;  %v3955_v50 = vadd.f32 %v3939_v26, %v3923_v45  ;;  %3630 = vmatmul.bf16.vlgmr.msrb.gmra.mxu0 %v6591_v54 }
 0x194   :  { %3739 = vmatpush.bf16.msra.mxu2 %v5213_v18  ;;  %v6171_v21 = vld [vmem:[%s9679_s1 + $0x94c] sm:$0xf]  ;;  %v3315_v18 = vpop.f32.mrf.mxu3  ;;  %3759 = vmatpush.bf16.msra.mxu3 %v5325_v56  ;;  %v4925_v35 = vor.u32 %v6075_v22, %v4922_v13  ;;  %v4906_v61 = vld [vmem:[%s9679_s1 + $0x638] sm:$0xf0] }
 0x195   :  { %v6135_v6 = vld [vmem:[%s9679_s1 + $0x82c] sm:$0xf]  ;;  %v5309_v34 = vor.u32 %v6171_v21, %v5306_v52  ;;  %v3971_v2 = vmax.f32 %v3955_v50, 0.0  ;;  %v3316_v59 = vadd.f32 %v3315_v18, %v3297_v40  ;;  %v5290_v49 = vld [vmem:[%s9679_s1 + $0x938] sm:$0xf0] }
 0x196   :  { %3701 = vmatpush.bf16.msra.mxu0 %v4957_v42  ;;  %v6099_v0 = vld [vmem:[%s9679_s1 + $0x70c] sm:$0xf]  ;;  %v3346_v48 = vpop.f32.mrf.mxu1  ;;  %v5165_v29 = vor.u32 %v6135_v6, %v5162_v8  ;;  %3723 = vmatpush.bf16.msra.mxu1 %v5037_v28  ;;  %v5146_v42 = vld [vmem:[%s9679_s1 + $0x818] sm:$0xf0] }
 0x197   :  { %v3347_v53 = vadd.f32 %v3346_v48, %v3327_v10  ;;  %v6071_v37 = vld [vmem:[%s9679_s1 + $0x62c] sm:$0xf]  ;;  %v5021_v5 = vor.u32 %v6099_v0, %v5018_v44  ;;  %3649 = vmatmul.bf16.vlgmr.msrb.gmra.mxu1 %v6599_v57  ;;  %3987 = vst [vmem:[%s9684_s5 + $0x48] sm:$0xff] %v3971_v2  ;;  %v3887_v54 = vmul.f32 %v9751_v15, %v3316_v59  ;;  %v9753_v33 = vld [vmem:[#allocation5_spill] sm:$0xff] }
 0x198   :  { %3740 = vmatpush.bf16.msra.mxu2 %v5197_v23  ;;  %v6167_v9 = vld [vmem:[%s9679_s1 + $0x92c] sm:$0xf]  ;;  %3687 = vmatmul.bf16.vlgmr.msrb.gmra.mxu3 %v9753_v33  ;;  %v5770_v32 = vld [vmem:[%s9679_s1 + $0xcf8] sm:$0xf0]  ;;  %v4909_v11 = vor.u32 %v6071_v37, %v4906_v61  ;;  %v3365_v45 = vpop.f32.mrf.mxu2 }
 0x199   :  { %v6131_v30 = vld [vmem:[%s9679_s1 + $0x80c] sm:$0xf]  ;;  %3668 = vmatmul.bf16.vlgmr.msrb.gmra.mxu2 %v9752_v14  ;;  %v5642_v3 = vld [vmem:[%s9679_s1 + $0xbf8] sm:$0xf0]  ;;  %3760 = vmatpush.bf16.msra.mxu3 %v5309_v34  ;;  %v5293_v36 = vor.u32 %v6167_v9, %v5290_v49  ;;  %v3366_v18 = vadd.f32 %v3365_v45, %v3347_v53 }
 0x19a   :  { %3702 = vmatpush.bf16.msra.mxu0 %v4941_v63  ;;  %v6287_v27 = vld [vmem:[%s9679_s1 + $0xcec] sm:$0xf]  ;;  %v4890_v7 = vld [vmem:[%s9679_s1 + $0x618] sm:$0xf0]  ;;  %v5149_v56 = vor.u32 %v6131_v30, %v5146_v42  ;;  %3724 = vmatpush.bf16.msra.mxu1 %v5021_v5  ;;  %v3329_v8 = vpop.f32.mrf.mxu0 }
 0x19b   :  { %v6255_v23 = vld [vmem:[%s9679_s1 + $0xbec] sm:$0xf]  ;;  %v5274_v25 = vld [vmem:[%s9679_s1 + $0x918] sm:$0xf0]  ;;  %v5773_v21 = vor.u32 %v6287_v27, %v5770_v32 }
 0x19c   :  { %3741 = vmatpush.bf16.msra.mxu2 %v5181_v12  ;;  %v3943_v57 = vld [vmem:[%s9683_s4 + $0x68] sm:$0xff]  ;;  %v5645_v55 = vor.u32 %v6255_v23, %v5642_v3  ;;  %v9754_v26 = vld [vmem:[#allocation21_spill] sm:$0xff]  ;;  %v3384_v41 = vpop.f32.mrf.mxu3 }
 0x19d   :  { %v6067_v4 = vld [vmem:[%s9679_s1 + $0x60c] sm:$0xf]  ;;  %v3927_v63 = vadd.f32 %v9754_v26, %v3887_v54  ;;  %v5514_v22 = vld [vmem:[%s9679_s1 + $0xaf8] sm:$0xf0]  ;;  %3761 = vmatpush.bf16.msra.mxu3 %v5293_v36  ;;  %v9440_v37 = vadd.f32 %v3384_v41, %v3366_v18  ;;  %v9755_v41 = vld [vmem:[#allocation2_spill] sm:$0xff] }
 0x19e   :  { %3703 = vmatpush.bf16.msra.mxu0 %v4925_v35  ;;  %v6163_v1 = vld [vmem:[%s9679_s1 + $0x90c] sm:$0xf]  ;;  %3793 = vmatpush.bf16.msrb.mxu1 %v5645_v55  ;;  %v5834_v52 = vld [vmem:[%s9679_s1 + $0xd78] sm:$0xf0]  ;;  %v3348_v0 = vpop.f32.mrf.mxu1  ;;  %v4893_v48 = vor.u32 %v6067_v4, %v4890_v7 }
 0x19f   :  { %v6223_v12 = vld [vmem:[%s9679_s1 + $0xaec] sm:$0xf]  ;;  %v5626_v28 = vld [vmem:[%s9679_s1 + $0xbd8] sm:$0xf0]  ;;  %v3959_v17 = vadd.f32 %v3943_v57, %v3927_v63  ;;  %v3349_v10 = vadd.f32 %v3348_v0, %v3329_v8  ;;  %v5277_v35 = vor.u32 %v6163_v1, %v5274_v25 }
 0x1a0   :  { %3742 = vmatpush.bf16.msra.mxu2 %v5165_v29  ;;  %v6303_v13 = vld [vmem:[%s9679_s1 + $0xd6c] sm:$0xf]  ;;  %v5754_v50 = vld [vmem:[%s9679_s1 + $0xcd8] sm:$0xf0]  ;;  %v5517_v53 = vor.u32 %v6223_v12, %v5514_v22  ;;  %v3367_v33 = vpop.f32.mrf.mxu2 }
 0x1a1   :  { %v6251_v6 = vld [vmem:[%s9679_s1 + $0xbcc] sm:$0xf]  ;;  %v3975_v34 = vmax.f32 %v3959_v17, 0.0  ;;  %v5837_v61 = vor.u32 %v6303_v13, %v5834_v52  ;;  %v5498_v59 = vld [vmem:[%s9679_s1 + $0xad8] sm:$0xf0]  ;;  %3762 = vmatpush.bf16.msra.mxu3 %v5277_v35  ;;  %v3368_v36 = vadd.f32 %v3367_v33, %v3349_v10  ;;  %v9757_v17 = vld [vmem:[#allocation8_spill] sm:$0xff] }
 0x1a2   :  { %v6283_v44 = vld [vmem:[%s9679_s1 + $0xccc] sm:$0xf]  ;;  %v5629_v40 = vor.u32 %v6251_v6, %v5626_v28  ;;  %3704 = vmatpush.bf16.msra.mxu0 %v4909_v11  ;;  %v5610_v49 = vld [vmem:[%s9679_s1 + $0xbb8] sm:$0xf0]  ;;  %v3332_v7 = vpop.f32.mrf.mxu0 }
 0x1a3   :  { %v5757_v9 = vor.u32 %v6283_v44, %v5754_v50  ;;  %v6219_v2 = vld [vmem:[%s9679_s1 + $0xacc] sm:$0xf]  ;;  %3991 = vst [vmem:[%s9684_s5 + $0x68] sm:$0xff] %v3975_v34  ;;  %v5818_v42 = vld [vmem:[%s9679_s1 + $0xd58] sm:$0xf0]  ;;  %3635 = vmatmul.bf16.gmra.mxu0 %v9755_v41 }
 0x1a4   :  { %3743 = vmatpush.bf16.msra.mxu2 %v5149_v56  ;;  %3794 = vmatpush.bf16.msrb.mxu1 %v5629_v40  ;;  %v6247_v29 = vld [vmem:[%s9679_s1 + $0xbac] sm:$0xf]  ;;  %v5501_v27 = vor.u32 %v6219_v2, %v5498_v59  ;;  %v5738_v54 = vld [vmem:[%s9679_s1 + $0xcb8] sm:$0xf0]  ;;  %v3386_v4 = vpop.f32.mrf.mxu3 }
 0x1a5   :  { %v6299_v30 = vld [vmem:[%s9679_s1 + $0xd4c] sm:$0xf]  ;;  %v5613_v5 = vor.u32 %v6247_v29, %v5610_v49  ;;  %3835 = vmatpush.bf16.msrb.mxu3 %v5837_v61  ;;  %v5482_v32 = vld [vmem:[%s9679_s1 + $0xab8] sm:$0xf0]  ;;  %v9481_v56 = vadd.f32 %v3386_v4, %v3368_v36 }
 0x1a6   :  { %3705 = vmatpush.bf16.msra.mxu0 %v4893_v48  ;;  %v6279_v23 = vld [vmem:[%s9679_s1 + $0xcac] sm:$0xf]  ;;  %v5821_v14 = vor.u32 %v6299_v30, %v5818_v42  ;;  %v5594_v11 = vld [vmem:[%s9679_s1 + $0xb98] sm:$0xf0]  ;;  %v3351_v1 = vpop.f32.mrf.mxu1 }
 0x1a7   :  { %v6215_v57 = vld [vmem:[%s9679_s1 + $0xaac] sm:$0xf]  ;;  %v3352_v25 = vadd.f32 %v3351_v1, %v3332_v7  ;;  %v5741_v55 = vor.u32 %v6279_v23, %v5738_v54  ;;  %v5722_v13 = vld [vmem:[%s9679_s1 + $0xc98] sm:$0xf0] }
 0x1a8   :  { %3812 = vmatpush.bf16.msrb.mxu2 %v5773_v21  ;;  %3795 = vmatpush.bf16.msrb.mxu1 %v5613_v5  ;;  %v6243_v3 = vld [vmem:[%s9679_s1 + $0xb8c] sm:$0xf]  ;;  %v5485_v12 = vor.u32 %v6215_v57, %v5482_v32  ;;  %v5466_v52 = vld [vmem:[%s9679_s1 + $0xa98] sm:$0xf0] }
 0x1a9   :  { %v5597_v63 = vor.u32 %v6243_v3, %v5594_v11  ;;  %3836 = vmatpush.bf16.msrb.mxu3 %v5821_v14  ;;  %v6275_v22 = vld [vmem:[%s9679_s1 + $0xc8c] sm:$0xf]  ;;  %v5578_v28 = vld [vmem:[%s9679_s1 + $0xb78] sm:$0xf0]  ;;  %3673 = vmatmul.bf16.gmra.mxu2 %v9757_v17 }
 0x1aa   :  { %3774 = vmatpush.bf16.msrb.mxu0 %v5517_v53  ;;  %v6211_v45 = vld [vmem:[%s9679_s1 + $0xa8c] sm:$0xf]  ;;  %v9758_v18 = vld [vmem:[#allocation9_spill] sm:$0xff]  ;;  %v5725_v44 = vor.u32 %v6275_v22, %v5722_v13  ;;  %v3370_v53 = vpop.f32.mrf.mxu2  ;;  %v3334_v49 = vpop.f32.mrf.mxu0 }
 0x1ab   :  { %v9756_v21 = vld [vmem:[#allocation3_spill] sm:$0xff]  ;;  %3692 = vmatmul.bf16.gmra.mxu3 %v9758_v18  ;;  %v5802_v0 = vld [vmem:[%s9679_s1 + $0xd38] sm:$0xf0]  ;;  %v5469_v10 = vor.u32 %v6211_v45, %v5466_v52  ;;  %v3371_v29 = vadd.f32 %v3370_v53, %v3352_v25  ;;  %v9761_v53 = vld [vmem:[#allocation12_spill] sm:$0xff] }
 0x1ac   :  { %3813 = vmatpush.bf16.msrb.mxu2 %v5757_v9  ;;  %3654 = vmatmul.bf16.gmra.mxu1 %v9756_v21  ;;  %v6239_v6 = vld [vmem:[%s9679_s1 + $0xb6c] sm:$0xf]  ;;  %v5706_v35 = vld [vmem:[%s9679_s1 + $0xc78] sm:$0xf0]  ;;  %v3389_v61 = vpop.f32.mrf.mxu3 }
 0x1ad   :  { %v6295_v8 = vld [vmem:[%s9679_s1 + $0xd2c] sm:$0xf]  ;;  %3796 = vmatpush.bf16.msrb.mxu1 %v5597_v63  ;;  %v5581_v50 = vor.u32 %v6239_v6, %v5578_v28  ;;  %v5450_v9 = vld [vmem:[%s9679_s1 + $0xa78] sm:$0xf0]  ;;  %v9529_v23 = vadd.f32 %v3389_v61, %v3371_v29 }
 0x1ae   :  { %3775 = vmatpush.bf16.msrb.mxu0 %v5501_v27  ;;  %v5805_v40 = vor.u32 %v6295_v8, %v5802_v0  ;;  %v6271_v48 = vld [vmem:[%s9679_s1 + $0xc6c] sm:$0xf]  ;;  %v5562_v59 = vld [vmem:[%s9679_s1 + $0xb58] sm:$0xf0]  ;;  %v3353_v30 = vpop.f32.mrf.mxu1 }
 0x1af   :  { %v6207_v34 = vld [vmem:[%s9679_s1 + $0xa6c] sm:$0xf]  ;;  %v3354_v5 = vadd.f32 %v3353_v30, %v3334_v49  ;;  %v5709_v42 = vor.u32 %v6271_v48, %v5706_v35  ;;  %v5690_v14 = vld [vmem:[%s9679_s1 + $0xc58] sm:$0xf0] }
 0x1b0   :  { %3814 = vmatpush.bf16.msrb.mxu2 %v5741_v55  ;;  %3837 = vmatpush.bf16.msrb.mxu3 %v5805_v40  ;;  %v6235_v2 = vld [vmem:[%s9679_s1 + $0xb4c] sm:$0xf]  ;;  %v5453_v54 = vor.u32 %v6207_v34, %v5450_v9  ;;  %v5434_v4 = vld [vmem:[%s9679_s1 + $0xa58] sm:$0xf0] }
 0x1b1   :  { %3797 = vmatpush.bf16.msrb.mxu1 %v5581_v50  ;;  %v5565_v27 = vor.u32 %v6235_v2, %v5562_v59  ;;  %v6267_v57 = vld [vmem:[%s9679_s1 + $0xc4c] sm:$0xf]  ;;  %v5546_v3 = vld [vmem:[%s9679_s1 + $0xb38] sm:$0xf0] }
 0x1b2   :  { %3776 = vmatpush.bf16.msrb.mxu0 %v5485_v12  ;;  %v6203_v33 = vld [vmem:[%s9679_s1 + $0xa4c] sm:$0xf]  ;;  %v5786_v36 = vld [vmem:[%s9679_s1 + $0xd18] sm:$0xf0]  ;;  %v5693_v7 = vor.u32 %v6267_v57, %v5690_v14  ;;  %v3372_v13 = vpop.f32.mrf.mxu2  ;;  %v3403_v28 = vpop.f32.mrf.mxu0  ;;  %v9763_v57 = vld [vmem:[#allocation10_spill] sm:$0xff] }
 0x1b3   :  { %v6231_v32 = vld [vmem:[%s9679_s1 + $0xb2c] sm:$0xf]  ;;  %v5437_v55 = vor.u32 %v6203_v33, %v5434_v4  ;;  %v5674_v12 = vld [vmem:[%s9679_s1 + $0xc38] sm:$0xf0]  ;;  %v3373_v6 = vadd.f32 %v3372_v13, %v3354_v5 }
 0x1b4   :  { %3815 = vmatpush.bf16.msrb.mxu2 %v5725_v44  ;;  %v6291_v11 = vld [vmem:[%s9679_s1 + $0xd0c] sm:$0xf]  ;;  %v5549_v1 = vor.u32 %v6231_v32, %v5546_v3  ;;  %v3391_v45 = vpop.f32.mrf.mxu3  ;;  %v5418_v41 = vld [vmem:[%s9679_s1 + $0xa38] sm:$0xf0] }
 0x1b5   :  { %3798 = vmatpush.bf16.msrb.mxu1 %v5565_v27  ;;  %v5789_v25 = vor.u32 %v6291_v11, %v5786_v36  ;;  %v6263_v63 = vld [vmem:[%s9679_s1 + $0xc2c] sm:$0xf]  ;;  %v5530_v52 = vld [vmem:[%s9679_s1 + $0xb18] sm:$0xf0]  ;;  %v9573_v0 = vadd.f32 %v3391_v45, %v3373_v6 }
 0x1b6   :  { %3777 = vmatpush.bf16.msrb.mxu0 %v5469_v10  ;;  %v6199_v22 = vld [vmem:[%s9679_s1 + $0xa2c] sm:$0xf]  ;;  %v3422_v17 = vpop.f32.mrf.mxu1  ;;  %v5677_v18 = vor.u32 %v6263_v63, %v5674_v12  ;;  %v5658_v40 = vld [vmem:[%s9679_s1 + $0xc18] sm:$0xf0]  ;;  %v9759_v10 = vld [vmem:[#allocation6_spill] sm:$0xff] }
 0x1b7   :  { %3838 = vmatpush.bf16.msrb.mxu3 %v5789_v25  ;;  %v6227_v21 = vld [vmem:[%s9679_s1 + $0xb0c] sm:$0xf]  ;;  %v5421_v44 = vor.u32 %v6199_v22, %v5418_v41  ;;  %3706 = vmatmul.bf16.vlgmr.msra.gmra.mxu0 %v9759_v10  ;;  %v5402_v34 = vld [vmem:[%s9679_s1 + $0xa18] sm:$0xf0]  ;;  %v9765_v25 = vld [vmem:[#allocation14_spill] sm:$0xff]  ;;  %v3404_v22 = vadd.f32 %v3403_v28, %v9440_v37 }
 0x1b8   :  { %3816 = vmatpush.bf16.msrb.mxu2 %v5709_v42  ;;  %v5533_v8 = vor.u32 %v6227_v21, %v5530_v52  ;;  %v6259_v50 = vld [vmem:[%s9679_s1 + $0xc0c] sm:$0xf]  ;;  %v9762_v61 = vld [vmem:[#allocation13_spill] sm:$0xff] }
 0x1b9   :  { %3799 = vmatpush.bf16.msrb.mxu1 %v5549_v1  ;;  %v9760_v48 = vld [vmem:[#allocation7_spill] sm:$0xff]  ;;  %3744 = vmatmul.bf16.vlgmr.msra.gmra.mxu2 %v9761_v53  ;;  %v5661_v9 = vor.u32 %v6259_v50, %v5658_v40  ;;  %v3423_v13 = vadd.f32 %v3422_v17, %v3404_v22  ;;  %v3936_v22 = vld [vmem:[%s9683_s4 + $0x30] sm:$0xff] }
 0x1ba   :  { %3778 = vmatpush.bf16.msrb.mxu0 %v5453_v54  ;;  %v6195_v35 = vld [vmem:[%s9679_s1 + $0xa0c] sm:$0xf]  ;;  %v3441_v59 = vpop.f32.mrf.mxu2  ;;  %v3405_v49 = vpop.f32.mrf.mxu0 }
 0x1bb   :  { %3763 = vmatmul.bf16.vlgmr.msra.gmra.mxu3 %v9762_v61  ;;  %v5405_v2 = vor.u32 %v6195_v35, %v5402_v34  ;;  %v9764_v14 = vld [vmem:[#allocation11_spill] sm:$0xff]  ;;  %v3442_v45 = vadd.f32 %v3441_v59, %v3423_v13 }
 0x1bc   :  { %3817 = vmatpush.bf16.msrb.mxu2 %v5693_v7  ;;  %3725 = vmatmul.bf16.vlgmr.msra.gmra.mxu1 %v9760_v48  ;;  %v3460_v29 = vpop.f32.mrf.mxu3 }
 0x1bd   :  { %3800 = vmatpush.bf16.msrb.mxu1 %v5533_v8  ;;  %v3461_v8 = vadd.f32 %v3460_v29, %v3442_v45 }
 0x1be   :  { %3779 = vmatpush.bf16.msrb.mxu0 %v5437_v55  ;;  %v3424_v30 = vpop.f32.mrf.mxu1  ;;  %v9766_v55 = vld [vmem:[#allocation15_spill] sm:$0xff] }
 0x1c0   :  { %3818 = vmatpush.bf16.msrb.mxu2 %v5677_v18  ;;  %v3406_v18 = vadd.f32 %v3405_v49, %v9481_v56 }
 0x1c2   :  { %3780 = vmatpush.bf16.msrb.mxu0 %v5421_v44  ;;  %v3443_v5 = vpop.f32.mrf.mxu2  ;;  %v3408_v27 = vpop.f32.mrf.mxu0 }
 0x1c3   :  { %v3409_v40 = vadd.f32 %v3408_v27, %v9529_v23  ;;  %v3932_v27 = vld [vmem:[%s9683_s4 + $0x10] sm:$0xff] }
 0x1c4   :  { %3819 = vmatpush.bf16.msrb.mxu2 %v5661_v9  ;;  %v3462_v42 = vpop.f32.mrf.mxu3 }
 0x1c6   :  { %3781 = vmatpush.bf16.msrb.mxu0 %v5405_v2  ;;  %v3427_v54 = vpop.f32.mrf.mxu1 }
 0x1c7   :  { %3711 = vmatmul.bf16.gmra.mxu0 %v9763_v57 }
 0x1c9   :  { %3749 = vmatmul.bf16.gmra.mxu2 %v9747_v20 }
 0x1ca   :  { %v3446_v33 = vpop.f32.mrf.mxu2  ;;  %v3410_v32 = vpop.f32.mrf.mxu0 }
 0x1cb   :  { %3768 = vmatmul.bf16.gmra.mxu3 %v9748_v58  ;;  %v3411_v9 = vadd.f32 %v3410_v32, %v9573_v0 }
 0x1cc   :  { %3730 = vmatmul.bf16.gmra.mxu1 %v9764_v14  ;;  %v3465_v4 = vpop.f32.mrf.mxu3 }
 0x1ce   :  { %v3429_v3 = vpop.f32.mrf.mxu1 }
 0x1d2   :  { %v3448_v11 = vpop.f32.mrf.mxu2  ;;  %v3479_v7 = vpop.f32.mrf.mxu0 }
 0x1d4   :  { %v9595_v36 = vpop.f32.mrf.mxu3 }
 0x1d6   :  { %v3498_v1 = vpop.f32.mrf.mxu1 }
 0x1d7   :  { %3782 = vmatmul.bf16.vlgmr.msrb.gmra.mxu0 %v9765_v25 }
 0x1d9   :  { %3820 = vmatmul.bf16.vlgmr.msrb.gmra.mxu2 %v9749_v51  ;;  %v3425_v51 = vadd.f32 %v3424_v30, %v3406_v18 }
 0x1da   :  { %v3517_v20 = vpop.f32.mrf.mxu2  ;;  %v3481_v63 = vpop.f32.mrf.mxu0 }
 0x1db   :  { %5844 = vmatmul.msk.bf16.vlgmr.msrb.gmra.mxu3 %vm2779_vm0, %v9750_v24  ;;  %v3480_v24 = vadd.f32 %v3479_v7, %v3461_v8  ;;  %v3444_v37 = vadd.f32 %v3443_v5, %v3425_v51  ;;  %v3430_v5 = vadd.f32 %v3429_v3, %v3411_v9 }
 0x1dc   :  { %3801 = vmatmul.bf16.vlgmr.msrb.gmra.mxu1 %v9766_v55  ;;  %v3536_v58 = vpop.f32.mrf.mxu3 }
 0x1dd   :  { %v3499_v56 = vadd.f32 %v3498_v1, %v3480_v24  ;;  %v3463_v10 = vadd.f32 %v3462_v42, %v3444_v37 }
 0x1de   :  { %v3500_v12 = vpop.f32.mrf.mxu1 }
 0x1df   :  { %v3518_v48 = vadd.f32 %v3517_v20, %v3499_v56  ;;  %v3482_v35 = vadd.f32 %v3481_v63, %v3463_v10 }
 0x1e1   :  { %v3537_v34 = vadd.f32 %v3536_v58, %v3518_v48  ;;  %v3501_v2 = vadd.f32 %v3500_v12, %v3482_v35 }
 0x1e2   :  { %v3519_v41 = vpop.f32.mrf.mxu2  ;;  %v3484_v52 = vpop.f32.mrf.mxu0 }
 0x1e3   :  { %v3520_v49 = vadd.f32 %v3519_v41, %v3501_v2 }
 0x1e4   :  { %v3538_v21 = vpop.f32.mrf.mxu3 }
 0x1e5   :  { %v3539_v57 = vadd.f32 %v3538_v21, %v3520_v49 }
 0x1e6   :  { %v3503_v6 = vpop.f32.mrf.mxu1 }
 0x1e7   :  { %3787 = vmatmul.bf16.gmra.mxu0 %v7284_v46  ;;  %v3428_v46 = vadd.f32 %v3427_v54, %v3409_v40  ;;  %v3449_v54 = vadd.f32 %v3448_v11, %v3430_v5 }
 0x1e9   :  { %3825 = vmatmul.bf16.gmra.mxu2 %v7532_v38  ;;  %v3468_v55 = vadd.f32 %v9595_v36, %v3449_v54 }
 0x1ea   :  { %v3522_v28 = vpop.f32.mrf.mxu2  ;;  %v3486_v44 = vpop.f32.mrf.mxu0 }
 0x1eb   :  { %5845 = vmatmul.msk.bf16.gmra.mxu3 %vm2779_vm0, %v7534_v39  ;;  %v3487_v12 = vadd.f32 %v3486_v44, %v3468_v55 }
 0x1ec   :  { %3806 = vmatmul.bf16.gmra.mxu1 %v7286_v47  ;;  %v3541_v17 = vpop.f32.mrf.mxu3  ;;  %v3447_v47 = vadd.f32 %v3446_v33, %v3428_v46 }
 0x1ee   :  { %v3505_v50 = vpop.f32.mrf.mxu1  ;;  %v3466_v29 = vadd.f32 %v3465_v4, %v3447_v47 }
 0x1ef   :  { %v3506_v18 = vadd.f32 %v3505_v50, %v3487_v12 }
 0x1f0   :  { %v3485_v23 = vadd.f32 %v3484_v52, %v3466_v29 }
 0x1f2   :  { %v3524_v38 = vpop.f32.mrf.mxu2  ;;  %v3555_v61 = vpop.f32.mrf.mxu0  ;;  %v3504_v1 = vadd.f32 %v3503_v6, %v3485_v23 }
 0x1f3   :  { %v3556_v59 = vadd.f32 %v3555_v61, %v3537_v34  ;;  %v3525_v24 = vadd.f32 %v3524_v38, %v3506_v18 }
 0x1f4   :  { %v3543_v53 = vpop.f32.mrf.mxu3  ;;  %v3523_v20 = vadd.f32 %v3522_v28, %v3504_v1 }
 0x1f5   :  { %v3544_v40 = vadd.f32 %v3543_v53, %v3525_v24  ;;  %v3944_v53 = vld [vmem:[%s9683_s4 + $0x70] sm:$0xff] }
 0x1f6   :  { %v3574_v39 = vpop.f32.mrf.mxu1  ;;  %v3542_v13 = vadd.f32 %v3541_v17, %v3523_v20  ;;  %v3940_v17 = vld [vmem:[%s9683_s4 + $0x50] sm:$0xff] }
 0x1f7   :  { %v3575_v30 = vadd.f32 %v3574_v39, %v3556_v59 }
 0x1f9   :  { %v3876_v42 = vmul.f32 %v8331_v43, %v3575_v30 }
 0x1fa   :  { %v3593_v33 = vpop.f32.mrf.mxu2  ;;  %v3557_v32 = vpop.f32.mrf.mxu0 }
 0x1fb   :  { %v3916_v14 = vadd.f32 %v8366_v19, %v3876_v42  ;;  %v3558_v3 = vadd.f32 %v3557_v32, %v3539_v57 }
 0x1fc   :  { %v3612_v7 = vpop.f32.mrf.mxu3 }
 0x1fd   :  { %v9616_v0 = vadd.f32 %v3612_v7, %v3593_v33  ;;  %v3948_v25 = vadd.f32 %v3932_v27, %v3916_v14 }
 0x1fe   :  { %v3576_v4 = vpop.f32.mrf.mxu1 }
 0x1ff   :  { %v3964_v58 = vmax.f32 %v3948_v25, 0.0  ;;  %v3577_v63 = vadd.f32 %v3576_v4, %v3558_v3 }
 0x201   :  { %3980 = vst [vmem:[%s9684_s5 + $0x10] sm:$0xff] %v3964_v58  ;;  %v3880_v11 = vmul.f32 %v8439_v60, %v3577_v63 }
 0x202   :  { %v3595_v41 = vpop.f32.mrf.mxu2  ;;  %v3560_v52 = vpop.f32.mrf.mxu0 }
 0x203   :  { %v3920_v45 = vadd.f32 %v8458_v62, %v3880_v11  ;;  %v3561_v51 = vadd.f32 %v3560_v52, %v3542_v13 }
 0x204   :  { %v3614_v21 = vpop.f32.mrf.mxu3 }
 0x205   :  { %v3615_v36 = vadd.f32 %v3614_v21, %v3595_v41  ;;  %v3952_v8 = vadd.f32 %v3936_v22, %v3920_v45 }
 0x206   :  { %v3579_v6 = vpop.f32.mrf.mxu1 }
 0x207   :  { %v3968_v37 = vmax.f32 %v3952_v8, 0.0  ;;  %v3580_v28 = vadd.f32 %v3579_v6, %v3561_v51 }
 0x209   :  { %3984 = vst [vmem:[%s9684_s5 + $0x30] sm:$0xff] %v3968_v37  ;;  %v3884_v44 = vmul.f32 %v8404_v31, %v3580_v28 }
 0x20a   :  { %v3598_v10 = vpop.f32.mrf.mxu2  ;;  %v3562_v46 = vpop.f32.mrf.mxu0 }
 0x20b   :  { %v3924_v56 = vadd.f32 %v8527_v16, %v3884_v44  ;;  %v3563_v34 = vadd.f32 %v3562_v46, %v3544_v40 }
 0x20c   :  { %v3617_v50 = vpop.f32.mrf.mxu3 }
 0x20d   :  { %v3618_v48 = vadd.f32 %v3617_v50, %v3598_v10  ;;  %v3956_v47 = vadd.f32 %v3940_v17, %v3924_v56 }
 0x20e   :  { %v3581_v35 = vpop.f32.mrf.mxu1 }
 0x20f   :  { %v3972_v38 = vmax.f32 %v3956_v47, 0.0  ;;  %v3582_v61 = vadd.f32 %v3581_v35, %v3563_v34 }
 0x211   :  { %3988 = vst [vmem:[%s9684_s5 + $0x50] sm:$0xff] %v3972_v38  ;;  %v3888_v39 = vmul.f32 %v9751_v15, %v3582_v61 }
 0x212   :  { %v3600_v2 = vpop.f32.mrf.mxu2  ;;  %v3631_v49 = vpop.f32.mrf.mxu0 }
 0x213   :  { %v3928_v9 = vadd.f32 %v9754_v26, %v3888_v39  ;;  %v3632_v45 = vadd.f32 %v3631_v49, %v9616_v0 }
 0x214   :  { %v3619_v59 = vpop.f32.mrf.mxu3 }
 0x215   :  { %v3620_v29 = vadd.f32 %v3619_v59, %v3600_v2  ;;  %v3960_v5 = vadd.f32 %v3944_v53, %v3928_v9 }
 0x216   :  { %v3650_v30 = vpop.f32.mrf.mxu1 }
 0x217   :  { %v3976_v23 = vmax.f32 %v3960_v5, 0.0  ;;  %v3651_v41 = vadd.f32 %v3650_v30, %v3632_v45 }
 0x219   :  { %3992 = vst [vmem:[%s9684_s5 + $0x70] sm:$0xff] %v3976_v23 }
 0x21a   :  { %v3633_v54 = vpop.f32.mrf.mxu0 }
 0x21b   :  { %v3634_v51 = vadd.f32 %v3633_v54, %v3615_v36 }
 0x21c   :  { %v3669_v42 = vpop.f32.mrf.mxu2  ;;  %v3688_v27 = vpop.f32.mrf.mxu3 }
 0x21d   :  { %v3670_v6 = vadd.f32 %v3669_v42, %v3651_v41 }
 0x21e   :  { %v3652_v57 = vpop.f32.mrf.mxu1 }
 0x21f   :  { %v3689_v24 = vadd.f32 %v3688_v27, %v3670_v6  ;;  %v3653_v37 = vadd.f32 %v3652_v57, %v3634_v51 }
 0x222   :  { %v3636_v7 = vpop.f32.mrf.mxu0 }
 0x223   :  { %v3637_v50 = vadd.f32 %v3636_v7, %v3618_v48 }
 0x224   :  { %v3671_v14 = vpop.f32.mrf.mxu2  ;;  %v3690_v33 = vpop.f32.mrf.mxu3 }
 0x225   :  { %v3672_v40 = vadd.f32 %v3671_v14, %v3653_v37 }
 0x227   :  { %v3691_v35 = vadd.f32 %v3690_v33, %v3672_v40 }
 0x229   :  { %v3655_v32 = vpop.f32.mrf.mxu1 }
 0x22a   :  { %v3638_v25 = vpop.f32.mrf.mxu0  ;;  %v3656_v0 = vadd.f32 %v3655_v32, %v3637_v50 }
 0x22b   :  { %v3639_v2 = vadd.f32 %v3638_v25, %v3620_v29 }
 0x22c   :  { %v3674_v4 = vpop.f32.mrf.mxu2 }
 0x22d   :  { %v3675_v39 = vadd.f32 %v3674_v4, %v3656_v0 }
 0x22e   :  { %v3693_v1 = vpop.f32.mrf.mxu3 }
 0x22f   :  { %v3694_v30 = vadd.f32 %v3693_v1, %v3675_v39  ;;  %v3933_v1 = vld [vmem:[%s9683_s4 + $0x18] sm:$0xff] }
 0x231   :  { %v3657_v3 = vpop.f32.mrf.mxu1 }
 0x232   :  { %v3658_v23 = vadd.f32 %v3657_v3, %v3639_v2 }
 0x234   :  { %v3676_v55 = vpop.f32.mrf.mxu2  ;;  %v3707_v58 = vpop.f32.mrf.mxu0 }
 0x235   :  { %v3708_v28 = vadd.f32 %v3707_v58, %v3689_v24  ;;  %v3677_v57 = vadd.f32 %v3676_v55, %v3658_v23 }
 0x236   :  { %v3695_v20 = vpop.f32.mrf.mxu3 }
 0x239   :  { %v3726_v63 = vpop.f32.mrf.mxu1 }
 0x23a   :  { %v3727_v46 = vadd.f32 %v3726_v63, %v3708_v28 }
 0x23c   :  { %v3745_v12 = vpop.f32.mrf.mxu2  ;;  %v3709_v22 = vpop.f32.mrf.mxu0 }
 0x23d   :  { %v3746_v47 = vadd.f32 %v3745_v12, %v3727_v46  ;;  %v3710_v34 = vadd.f32 %v3709_v22, %v3691_v35  ;;  %v3696_v12 = vadd.f32 %v3695_v20, %v3677_v57 }
 0x23e   :  { %v3764_v11 = vpop.f32.mrf.mxu3 }
 0x23f   :  { %v3765_v53 = vadd.f32 %v3764_v11, %v3746_v47 }
 0x241   :  { %v3728_v13 = vpop.f32.mrf.mxu1 }
 0x242   :  { %v3729_v59 = vadd.f32 %v3728_v13, %v3710_v34 }
 0x244   :  { %v3747_v21 = vpop.f32.mrf.mxu2  ;;  %v3712_v18 = vpop.f32.mrf.mxu0 }
 0x245   :  { %v3748_v5 = vadd.f32 %v3747_v21, %v3729_v59  ;;  %v3713_v42 = vadd.f32 %v3712_v18, %v3694_v30  ;;  %v3945_v59 = vld [vmem:[%s9683_s4 + $0x78] sm:$0xff] }
 0x246   :  { %v3766_v52 = vpop.f32.mrf.mxu3 }
 0x247   :  { %v3767_v14 = vadd.f32 %v3766_v52, %v3748_v5 }
 0x249   :  { %v3731_v8 = vpop.f32.mrf.mxu1 }
 0x24a   :  { %v3732_v58 = vadd.f32 %v3731_v8, %v3713_v42 }
 0x24c   :  { %v3750_v44 = vpop.f32.mrf.mxu2  ;;  %v3714_v56 = vpop.f32.mrf.mxu0 }
 0x24d   :  { %v3751_v11 = vadd.f32 %v3750_v44, %v3732_v58  ;;  %v3715_v25 = vadd.f32 %v3714_v56, %v3696_v12 }
 0x24e   :  { %v3769_v17 = vpop.f32.mrf.mxu3 }
 0x24f   :  { %v3770_v45 = vadd.f32 %v3769_v17, %v3751_v11 }
 0x251   :  { %v3733_v10 = vpop.f32.mrf.mxu1 }
 0x252   :  { %v3734_v6 = vadd.f32 %v3733_v10, %v3715_v25 }
 0x254   :  { %v3752_v38 = vpop.f32.mrf.mxu2  ;;  %v3783_v9 = vpop.f32.mrf.mxu0 }
 0x255   :  { %v3784_v49 = vadd.f32 %v3783_v9, %v3765_v53 }
 0x256   :  { %v3771_v61 = vpop.f32.mrf.mxu3 }
 0x259   :  { %v3802_v36 = vpop.f32.mrf.mxu1 }
 0x25a   :  { %v3803_v27 = vadd.f32 %v3802_v36, %v3784_v49 }
 0x25c   :  { %v3821_v48 = vpop.f32.mrf.mxu2  ;;  %v3785_v7 = vpop.f32.mrf.mxu0 }
 0x25d   :  { %v3822_v33 = vadd.f32 %v3821_v48, %v3803_v27  ;;  %v3786_v63 = vadd.f32 %v3785_v7, %v3767_v14 }
 0x25e   :  { %v3840_v54 = vpop.f32.mrf.mxu3 }
 0x25f   :  { %v3841_v4 = vadd.f32 %v3840_v54, %v3822_v33 }
 0x261   :  { %v3804_v32 = vpop.f32.mrf.mxu1  ;;  %v3877_v29 = vmul.f32 %v8331_v43, %v3841_v4  ;;  %v3753_v43 = vadd.f32 %v3752_v38, %v3734_v6 }
 0x262   :  { %v3805_v22 = vadd.f32 %v3804_v32, %v3786_v63 }
 0x263   :  { %v3917_v3 = vadd.f32 %v8366_v19, %v3877_v29  ;;  %v3937_v19 = vld [vmem:[%s9683_s4 + $0x38] sm:$0xff]  ;;  %v3772_v40 = vadd.f32 %v3771_v61, %v3753_v43 }
 0x264   :  { %v3823_v55 = vpop.f32.mrf.mxu2  ;;  %v3788_v52 = vpop.f32.mrf.mxu0 }
 0x265   :  { %v3949_v41 = vadd.f32 %v3933_v1, %v3917_v3  ;;  %v3824_v21 = vadd.f32 %v3823_v55, %v3805_v22  ;;  %v3789_v8 = vadd.f32 %v3788_v52, %v3770_v45 }
 0x266   :  { %v3842_v13 = vpop.f32.mrf.mxu3 }
 0x267   :  { %v3965_v18 = vmax.f32 %v3949_v41, 0.0  ;;  %v3843_v20 = vadd.f32 %v3842_v13, %v3824_v21 }
 0x269   :  { %v3807_v51 = vpop.f32.mrf.mxu1  ;;  %3981 = vst [vmem:[%s9684_s5 + $0x18] sm:$0xff] %v3965_v18  ;;  %v3881_v24 = vmul.f32 %v8439_v60, %v3843_v20 }
 0x26a   :  { %v3808_v28 = vadd.f32 %v3807_v51, %v3789_v8 }
 0x26b   :  { %v3921_v37 = vadd.f32 %v8458_v62, %v3881_v24  ;;  %v3941_v62 = vld [vmem:[%s9683_s4 + $0x58] sm:$0xff] }
 0x26c   :  { %v3826_v44 = vpop.f32.mrf.mxu2  ;;  %v3790_v50 = vpop.f32.mrf.mxu0 }
 0x26d   :  { %v3953_v56 = vadd.f32 %v3937_v19, %v3921_v37  ;;  %v3827_v10 = vadd.f32 %v3826_v44, %v3808_v28  ;;  %v3791_v47 = vadd.f32 %v3790_v50, %v3772_v40 }
 0x26e   :  { %v3845_v17 = vpop.f32.mrf.mxu3 }
 0x26f   :  { %v3969_v46 = vmax.f32 %v3953_v56, 0.0  ;;  %v3846_v35 = vadd.f32 %v3845_v17, %v3827_v10 }
 0x271   :  { %3985 = vst [vmem:[%s9684_s5 + $0x38] sm:$0xff] %v3969_v46  ;;  %v3885_v60 = vmul.f32 %v8404_v31, %v3846_v35  ;;  %v3809_v0 = vpop.f32.mrf.mxu1 }
 0x272   :  { %v3810_v38 = vadd.f32 %v3809_v0, %v3791_v47 }
 0x273   :  { %v3925_v34 = vadd.f32 %v8527_v16, %v3885_v60 }
 0x274   :  { %v3828_v61 = vpop.f32.mrf.mxu2 }
 0x275   :  { %v3957_v39 = vadd.f32 %v3941_v62, %v3925_v34  ;;  %v3829_v53 = vadd.f32 %v3828_v61, %v3810_v38 }
 0x276   :  { %v3847_v9 = vpop.f32.mrf.mxu3 }
 0x277   :  { %v3973_v36 = vmax.f32 %v3957_v39, 0.0  ;;  %v3848_v2 = vadd.f32 %v3847_v9, %v3829_v53 }
 0x279   :  { %3989 = vst [vmem:[%s9684_s5 + $0x58] sm:$0xff] %v3973_v36  ;;  %v3889_v31 = vmul.f32 %v9751_v15, %v3848_v2 }
 0x27b   :  { %v3929_v49 = vadd.f32 %v9754_v26, %v3889_v31 }
 0x27d   :  { %v3961_v16 = vadd.f32 %v3945_v59, %v3929_v49 }
 0x27f   :  { %v3977_v30 = vmax.f32 %v3961_v16, 0.0 }
 0x281   :  { %3993 = vst [vmem:[%s9684_s5 + $0x78] sm:$0xff] %v3977_v30 }

</bundles_post_ra>
